<compile_context>
chip_gen: v6e
topology: v6e:2x2x1
jax: 0.10.0
libtpu: 0.0.40
codegen_flags: <defaults>
</compile_context>

<pallas_src>
import math

import numpy as np
import jax
import jax.numpy as jnp
from jax.experimental import pallas as pl
from jax.experimental.pallas import tpu as pltpu

# ---------------- synthetic SAM hyper-parameters (scaled down) ----------------
IMG = 32                    # input resolution (real SAM: 1024)
PATCH = 8                   # patch size (real SAM: 16)
GRID = IMG // PATCH         # 4  -> image embedding is 4x4 (real SAM: 64x64)
N_TOK = GRID * GRID         # 16
ENC_DIM = 64                # ViT embed dim (real SAM: 768+)
ENC_HEADS = 2
ENC_MLP = 128
PDIM = 32                   # prompt / transformer dim (real SAM: 256)
DEC_HEADS = 2
DEC_MLP = 64
NUM_MASK_TOKENS = 4
UP1 = PDIM // 4             # 8
UP2 = PDIM // 8             # 4


# ----------------------- constant selection / packing matrices -----------------------
def _shift_mats():
    """S[t] @ n1 == 3x3-neighbourhood tap t of n1 on the GRIDxGRID grid (zero padded)."""
    m = np.zeros((9, N_TOK, N_TOK), np.float32)
    t = 0
    for di in (-1, 0, 1):
        for dj in (-1, 0, 1):
            for i in range(GRID):
                for j in range(GRID):
                    ii, jj = i + di, j + dj
                    if 0 <= ii < GRID and 0 <= jj < GRID:
                        m[t, i * GRID + j, ii * GRID + jj] = 1.0
            t += 1
    return jnp.asarray(m)


def _expand_mats():
    """E[t][hw*4 + t, hw] = 1 : scatters per-pixel ConvT(k=2,s=2) tap t into packed rows."""
    e = np.zeros((4, 4 * N_TOK, N_TOK), np.float32)
    for t in range(4):
        for hw in range(N_TOK):
            e[t, hw * 4 + t, hw] = 1.0
    return jnp.asarray(e)


def _hyper_consts():
    """Constants to build block-diag(hyper^T) with matmuls only (no in-kernel transpose)."""
    R = np.zeros((4 * UP2, UP2), np.float32)                    # (16, 4)
    C = np.zeros((NUM_MASK_TOKENS, 4 * NUM_MASK_TOKENS), np.float32)   # (4, 16)
    BD = np.zeros((4 * UP2, 4 * NUM_MASK_TOKENS), np.float32)   # (16, 16)
    for g in range(4):
        for c in range(UP2):
            R[g * UP2 + c, c] = 1.0
    for n in range(NUM_MASK_TOKENS):
        for g in range(4):
            C[n, g * NUM_MASK_TOKENS + n] = 1.0
    for g in range(4):
        BD[g * UP2:(g + 1) * UP2, g * NUM_MASK_TOKENS:(g + 1) * NUM_MASK_TOKENS] = 1.0
    oh = np.zeros((NUM_MASK_TOKENS, NUM_MASK_TOKENS, 1), np.float32)
    for n in range(NUM_MASK_TOKENS):
        oh[n, n, 0] = 1.0
    return jnp.asarray(R), jnp.asarray(C), jnp.asarray(BD), jnp.asarray(oh)


SHIFT_MATS = _shift_mats()
EXPAND_MATS = _expand_mats()
HYP_R, HYP_C, HYP_BD, ONEHOT = _hyper_consts()


# ------------------------------- in-kernel math helpers -------------------------------
def _mm(a, b):
    """MXU matmul: bf16 operands, f32 accumulation."""
    return jax.lax.dot_general(
        a.astype(jnp.bfloat16), b.astype(jnp.bfloat16),
        (((1,), (0,)), ((), ())), preferred_element_type=jnp.float32)


def _mm_t(a, b):
    """a @ b.T by contracting last dims of both operands (no explicit transpose)."""
    return jax.lax.dot_general(
        a.astype(jnp.bfloat16), b.astype(jnp.bfloat16),
        (((1,), (1,)), ((), ())), preferred_element_type=jnp.float32)


def _layernorm(x, g, b, eps):
    mu = jnp.mean(x, axis=-1, keepdims=True)
    var = jnp.mean(jnp.square(x - mu), axis=-1, keepdims=True)
    return (x - mu) * jax.lax.rsqrt(var + eps) * g + b


def _softmax(s):
    s = s - jnp.max(s, axis=-1, keepdims=True)
    e = jnp.exp(s)
    return e * pl.reciprocal(jnp.sum(e, axis=-1, keepdims=True), approx=True)


def _gelu(x):
    # TODO(synk): PyTorch nn.GELU default is exact erf; tanh approximation used for Mosaic.
    return jax.nn.gelu(x, approximate=True)


# ------------------------------------ fused kernels ------------------------------------
def encoder_kernel(patches_ref, pos_ref, pw_ref, pb_ref,
                   ln1g_ref, ln1b_ref,
                   wq_ref, wk_ref, wv_ref, bq_ref, bk_ref, bv_ref,
                   wo_ref, pjb_ref, ln2g_ref, ln2b_ref,
                   m1w_ref, m1b_ref, m2w_ref, m2b_ref,
                   nw1_ref, nl1g_ref, nl1b_ref, shift_ref, nw2_ref,
                   nl2g_ref, nl2b_ref, o_ref):
    # patch embed + absolute position embedding
    tok = _mm(patches_ref[0], pw_ref[...]) + pb_ref[...] + pos_ref[...]        # (16, 64)

    # ViT block: x = x + attn(ln1(x)); x = x + mlp(ln2(x))
    h = _layernorm(tok, ln1g_ref[...], ln1b_ref[...], 1e-6)
    hd = ENC_DIM // ENC_HEADS
    scale = 1.0 / math.sqrt(hd)
    attn = jnp.zeros((N_TOK, ENC_DIM), jnp.float32)
    for head in range(ENC_HEADS):                     # heads via pre-split weights: no reshapes
        q = _mm(h, wq_ref[head]) + bq_ref[head]
        k = _mm(h, wk_ref[head]) + bk_ref[head]
        v = _mm(h, wv_ref[head]) + bv_ref[head]
        p = _softmax(_mm_t(q, k) * scale)
        attn = attn + _mm(_mm(p, v), wo_ref[head])
    tok = tok + attn + pjb_ref[...]
    h = _layernorm(tok, ln2g_ref[...], ln2b_ref[...], 1e-6)
    h = _gelu(_mm(h, m1w_ref[...]) + m1b_ref[...])
    tok = tok + _mm(h, m2w_ref[...]) + m2b_ref[...]

    # neck: 1x1 conv -> LayerNorm2d -> 3x3 conv (9 shifted matmuls, zero-padded) -> LayerNorm2d
    n1 = _layernorm(_mm(tok, nw1_ref[...]), nl1g_ref[...], nl1b_ref[...], 1e-6)
    n2 = jnp.zeros((N_TOK, PDIM), jnp.float32)
    for t in range(9):
        n2 = n2 + _mm(_mm(shift_ref[t], n1), nw2_ref[t])
    o_ref[0] = _layernorm(n2, nl2g_ref[...], nl2b_ref[...], 1e-6)


def decoder_block_kernel(tok_ref, img_ref, nomask_ref, pos_ref,
                         wq_ref, wk_ref, wv_ref, bq_ref, bk_ref, bv_ref,
                         wo_ref, bo_ref, lng_ref, lnb_ref,
                         m1w_ref, m1b_ref, m2w_ref, m2b_ref,
                         q_out_ref, k_out_ref):
    tok = tok_ref[0]                                   # (Nt, PDIM) prompt+output tokens
    src = img_ref[0] + nomask_ref[...]                 # (16, PDIM) image embed + dense embed
    pos = pos_ref[...]                                 # (16, PDIM) dense positional encoding
    qpe = tok                                          # query PE == sparse prompt embeddings
    hd = PDIM // DEC_HEADS
    scale = 1.0 / math.sqrt(hd)

    def attn(m, xq, xk, xv):
        out = jnp.zeros((xq.shape[0], PDIM), jnp.float32)
        for head in range(DEC_HEADS):
            i = m * DEC_HEADS + head
            q = _mm(xq, wq_ref[i]) + bq_ref[i]
            k = _mm(xk, wk_ref[i]) + bk_ref[i]
            v = _mm(xv, wv_ref[i]) + bv_ref[i]
            p = _softmax(_mm_t(q, k) * scale)
            out = out + _mm(_mm(p, v), wo_ref[i])
        return out + bo_ref[m]

    def ln(x, i):
        return _layernorm(x, lng_ref[i], lnb_ref[i], 1e-5)

    # TwoWayAttentionBlock (skip_first_layer_pe=True) + final token-to-image attention
    queries = ln(attn(0, tok, tok, tok), 0)
    queries = ln(queries + attn(1, queries + qpe, src + pos, src), 1)
    mlp = _mm(jnp.maximum(_mm(queries, m1w_ref[...]) + m1b_ref[...], 0.0),
              m2w_ref[...]) + m2b_ref[...]
    queries = ln(queries + mlp, 2)
    src = ln(src + attn(2, src + pos, queries + qpe, queries), 3)
    queries = ln(queries + attn(3, queries + qpe, src + pos, src), 4)
    q_out_ref[0] = queries
    k_out_ref[0] = src


def decoder_tail_kernel(q_ref, k_ref,
                        w1t_ref, b1_ref, exp_ref, ulng_ref, ulnb_ref,
                        w2p_ref, b2p_ref,
                        hw1_ref, hb1_ref, hw2_ref, hb2_ref, hw3_ref, hb3_ref,
                        oh_ref, r_ref, c_ref, bd_ref,
                        iw1_ref, ib1_ref, iw2_ref, ib2_ref, iw3_ref, ib3_ref,
                        mask_ref, iou_ref):
    queries = q_ref[0]                                    # (Nt, PDIM)
    src = k_ref[0]                                        # (16, PDIM)
    iou_tok = queries[0:1, :]                             # (1, PDIM)
    mask_toks = queries[1:1 + NUM_MASK_TOKENS, :]         # (4, PDIM)

    # output upscaling, fully VMEM-resident.  Packed rows = (h, w, di, dj) = 64,
    # lanes = channels, so LayerNorm2d is a plain row-LN and ConvT(k=2,s=2) is one matmul.
    z1 = jnp.zeros((4 * N_TOK, UP1), jnp.float32)
    for t in range(4):
        z1 = z1 + _mm(exp_ref[t], _mm(src, w1t_ref[t]))
    z1 = _gelu(_layernorm(z1 + b1_ref[...], ulng_ref[...], ulnb_ref[...], 1e-6))
    up = _gelu(_mm(z1, w2p_ref[...]) + b2p_ref[...])      # (64, 16), lanes = (ei, ej, c2)

    # hypernetwork MLPs, batched inside the one kernel (was 12 separate pallas_calls)
    hyper = jnp.zeros((NUM_MASK_TOKENS, UP2), jnp.float32)
    for n in range(NUM_MASK_TOKENS):
        h = mask_toks[n:n + 1, :]
        h = jnp.maximum(_mm(h, hw1_ref[n]) + hb1_ref[n], 0.0)
        h = jnp.maximum(_mm(h, hw2_ref[n]) + hb2_ref[n], 0.0)
        h = _mm(h, hw3_ref[n]) + hb3_ref[n]               # (1, UP2)
        hyper = hyper + oh_ref[n] * h                     # one-hot outer product -> row n

    # masks = up @ block-diag(hyper^T); block-diag built with constant matmuls + mask
    tiled = _mm(_mm_t(r_ref[...], hyper), c_ref[...])     # (16, 16) == R @ hyper^T @ C
    mask_ref[0] = _mm(up, tiled * bd_ref[...])            # (64, 16), lanes = (ei, ej, token)

    # IoU head (Sam_model.forward discards it; computed for structural faithfulness)
    i = jnp.maximum(_mm(iou_tok, iw1_ref[...]) + ib1_ref[...], 0.0)
    i = jnp.maximum(_mm(i, iw2_ref[...]) + ib2_ref[...], 0.0)
    iou_ref[0] = _mm(i, iw3_ref[...]) + ib3_ref[...]


# --------------------------------- pallas_call plumbing ---------------------------------
def _bspec(shape, batched):
    nd = len(shape)
    if batched:
        return pl.BlockSpec((1,) + tuple(shape[1:]),
                            lambda b, _n=nd: (b,) + (0,) * (_n - 1))
    return pl.BlockSpec(tuple(shape), lambda b, _n=nd: (0,) * _n)


def fused_call(kernel, inputs, out_shapes, batch):
    """inputs: list of (array, is_batched).  Outputs are always batched over `batch`."""
    arrays = [a for a, _ in inputs]
    in_specs = [_bspec(a.shape, bat) for a, bat in inputs]
    out_shape = [jax.ShapeDtypeStruct(tuple(s), jnp.float32) for s in out_shapes]
    out_specs = [_bspec(tuple(s), True) for s in out_shapes]
    single = len(out_shapes) == 1
    call = pl.pallas_call(
        kernel,
        out_shape=out_shape[0] if single else out_shape,
        grid=(batch,),
        in_specs=in_specs,
        out_specs=out_specs[0] if single else out_specs,
        compiler_params=pltpu.CompilerParams(dimension_semantics=("parallel",)),
    )
    return call(*arrays)


# --------------------------- prompt encoder (plain XLA, tiny) ---------------------------
# The Fourier point PE is a (B,3,2)@(2,16) matmul + sin/cos: not worth a kernel launch.
def prompt_tokens(p, coords, labels):
    B, N, _ = coords.shape
    coords = jnp.concatenate([coords, jnp.zeros((B, 1, 2), jnp.float32)], axis=1)
    labels = jnp.concatenate([labels, -jnp.ones((B, 1), jnp.float32)], axis=1)
    c = 2.0 * ((coords + 0.5) / float(IMG)) - 1.0
    proj = 2.0 * jnp.pi * jnp.matmul(c, p["pe_gauss"])
    pe = jnp.concatenate([jnp.sin(proj), jnp.cos(proj)], axis=-1)        # (B, N+1, PDIM)
    lab = labels[..., None]
    pe = jnp.where(lab == -1, 0.0, pe)
    pe = pe + jnp.where(lab == -1, p["not_a_point"], 0.0)
    pe = pe + jnp.where(lab == 0, p["point_embed_neg"], 0.0)
    pe = pe + jnp.where(lab == 1, p["point_embed_pos"], 0.0)
    return pe


def get_dense_pe(p):
    xs = (jnp.arange(GRID, dtype=jnp.float32) + 0.5) / GRID
    gx, gy = jnp.meshgrid(xs, xs, indexing="xy")
    grid01 = jnp.stack([gx, gy], axis=-1).reshape(-1, 2)                 # (16, 2) as (x, y)
    proj = 2.0 * jnp.pi * jnp.matmul(2.0 * grid01 - 1.0, p["pe_gauss"])
    return jnp.concatenate([jnp.sin(proj), jnp.cos(proj)], axis=-1)      # (16, PDIM)


# -------------------------------------- full forward --------------------------------------
def sam_forward(p, x, point_coords, point_labels):
    """Mirrors Sam_model.forward: image_encoder -> prompt_encoder -> mask_decoder."""
    B = x.shape[0]

    # ---------- weight repacking (layout plumbing only; a few KB, traced once) ----------
    ehd = ENC_DIM // ENC_HEADS
    qw, qb = p["enc_qkv_w"], p["enc_qkv_b"]
    enc_wq = jnp.stack([qw[:, 0 * ENC_DIM + h * ehd:0 * ENC_DIM + (h + 1) * ehd] for h in range(ENC_HEADS)])
    enc_wk = jnp.stack([qw[:, 1 * ENC_DIM + h * ehd:1 * ENC_DIM + (h + 1) * ehd] for h in range(ENC_HEADS)])
    enc_wv = jnp.stack([qw[:, 2 * ENC_DIM + h * ehd:2 * ENC_DIM + (h + 1) * ehd] for h in range(ENC_HEADS)])
    enc_bq = jnp.stack([qb[0 * ENC_DIM + h * ehd:0 * ENC_DIM + (h + 1) * ehd].reshape(1, ehd) for h in range(ENC_HEADS)])
    enc_bk = jnp.stack([qb[1 * ENC_DIM + h * ehd:1 * ENC_DIM + (h + 1) * ehd].reshape(1, ehd) for h in range(ENC_HEADS)])
    enc_bv = jnp.stack([qb[2 * ENC_DIM + h * ehd:2 * ENC_DIM + (h + 1) * ehd].reshape(1, ehd) for h in range(ENC_HEADS)])
    enc_wo = jnp.stack([p["enc_proj_w"][h * ehd:(h + 1) * ehd, :] for h in range(ENC_HEADS)])

    mods = ("dec_self", "dec_t2i", "dec_i2t", "dec_final")
    dhd = PDIM // DEC_HEADS
    dec_wq = jnp.stack([p[m + "_wq"][:, h * dhd:(h + 1) * dhd] for m in mods for h in range(DEC_HEADS)])
    dec_wk = jnp.stack([p[m + "_wk"][:, h * dhd:(h + 1) * dhd] for m in mods for h in range(DEC_HEADS)])
    dec_wv = jnp.stack([p[m + "_wv"][:, h * dhd:(h + 1) * dhd] for m in mods for h in range(DEC_HEADS)])
    dec_bq = jnp.stack([p[m + "_bq"][h * dhd:(h + 1) * dhd].reshape(1, dhd) for m in mods for h in range(DEC_HEADS)])
    dec_bk = jnp.stack([p[m + "_bk"][h * dhd:(h + 1) * dhd].reshape(1, dhd) for m in mods for h in range(DEC_HEADS)])
    dec_bv = jnp.stack([p[m + "_bv"][h * dhd:(h + 1) * dhd].reshape(1, dhd) for m in mods for h in range(DEC_HEADS)])
    dec_wo = jnp.stack([p[m + "_wo"][h * dhd:(h + 1) * dhd, :] for m in mods for h in range(DEC_HEADS)])
    dec_bo = jnp.stack([p[m + "_bo"].reshape(1, PDIM) for m in mods])
    dec_lng = jnp.stack([p[f"dec_ln{n}_g"].reshape(1, PDIM) for n in ("1", "2", "3", "4", "f")])
    dec_lnb = jnp.stack([p[f"dec_ln{n}_b"].reshape(1, PDIM) for n in ("1", "2", "3", "4", "f")])

    up_w1t = jnp.stack([p["up1_w"][:, :, di, dj] for di in range(2) for dj in range(2)])   # (4, PDIM, UP1)
    up_w2p = p["up2_w"].transpose(0, 2, 3, 1).reshape(UP1, 4 * UP2)                        # (UP1, 16)
    up_b2p = jnp.tile(p["up2_b"].reshape(1, UP2), (1, 4))                                  # (1, 16)
    hyp_w1 = jnp.stack([p[f"hyper{i}_w1"] for i in range(NUM_MASK_TOKENS)])
    hyp_b1 = jnp.stack([p[f"hyper{i}_b1"].reshape(1, -1) for i in range(NUM_MASK_TOKENS)])
    hyp_w2 = jnp.stack([p[f"hyper{i}_w2"] for i in range(NUM_MASK_TOKENS)])
    hyp_b2 = jnp.stack([p[f"hyper{i}_b2"].reshape(1, -1) for i in range(NUM_MASK_TOKENS)])
    hyp_w3 = jnp.stack([p[f"hyper{i}_w3"] for i in range(NUM_MASK_TOKENS)])
    hyp_b3 = jnp.stack([p[f"hyper{i}_b3"].reshape(1, -1) for i in range(NUM_MASK_TOKENS)])

    # ---------- image encoder (one fused kernel, grid over batch) ----------
    patches = x.reshape(B, 3, GRID, PATCH, GRID, PATCH).transpose(0, 2, 4, 1, 3, 5)
    patches = patches.reshape(B, N_TOK, 3 * PATCH * PATCH)
    image_embed = fused_call(encoder_kernel, [
        (patches, True),
        (p["pos_embed"].reshape(N_TOK, ENC_DIM), False),
        (p["patch_w"], False), (p["patch_b"].reshape(1, -1), False),
        (p["enc_ln1_g"].reshape(1, -1), False), (p["enc_ln1_b"].reshape(1, -1), False),
        (enc_wq, False), (enc_wk, False), (enc_wv, False),
        (enc_bq, False), (enc_bk, False), (enc_bv, False),
        (enc_wo, False), (p["enc_proj_b"].reshape(1, -1), False),
        (p["enc_ln2_g"].reshape(1, -1), False), (p["enc_ln2_b"].reshape(1, -1), False),
        (p["enc_mlp_w1"], False), (p["enc_mlp_b1"].reshape(1, -1), False),
        (p["enc_mlp_w2"], False), (p["enc_mlp_b2"].reshape(1, -1), False),
        (p["neck_w1"], False),
        (p["neck_ln1_g"].reshape(1, -1), False), (p["neck_ln1_b"].reshape(1, -1), False),
        (SHIFT_MATS, False), (p["neck_w2"].reshape(9, PDIM, PDIM), False),
        (p["neck_ln2_g"].reshape(1, -1), False), (p["neck_ln2_b"].reshape(1, -1), False),
    ], [(B, N_TOK, PDIM)], B)

    # ---------- prompt encoder ----------
    sparse = prompt_tokens(p, point_coords, point_labels)           # (B, Np+1, PDIM)
    pos = get_dense_pe(p)                                           # (16, PDIM)
    fixed = jnp.concatenate([p["iou_token"], p["mask_tokens"]], axis=0)
    tokens = jnp.concatenate(
        [jnp.broadcast_to(fixed[None], (B,) + fixed.shape), sparse], axis=1)   # (B, Nt, PDIM)
    n_t = tokens.shape[1]

    # ---------- mask decoder: two-way transformer (one fused kernel) ----------
    queries, keys = fused_call(decoder_block_kernel, [
        (tokens, True), (image_embed, True),
        (p["no_mask_embed"].reshape(1, PDIM), False), (pos, False),
        (dec_wq, False), (dec_wk, False), (dec_wv, False),
        (dec_bq, False), (dec_bk, False), (dec_bv, False),
        (dec_wo, False), (dec_bo, False),
        (dec_lng, False), (dec_lnb, False),
        (p["dec_mlp_w1"], False), (p["dec_mlp_b1"].reshape(1, -1), False),
        (p["dec_mlp_w2"], False), (p["dec_mlp_b2"].reshape(1, -1), False),
    ], [(B, n_t, PDIM), (B, N_TOK, PDIM)], B)

    # ---------- mask decoder: upscaling + hypernets + mask matmul + IoU (one fused kernel) ----------
    masks_packed, _iou = fused_call(decoder_tail_kernel, [
        (queries, True), (keys, True),
        (up_w1t, False), (p["up1_b"].reshape(1, -1), False),
        (EXPAND_MATS, False),
        (p["up_ln_g"].reshape(1, -1), False), (p["up_ln_b"].reshape(1, -1), False),
        (up_w2p, False), (up_b2p, False),
        (hyp_w1, False), (hyp_b1, False), (hyp_w2, False), (hyp_b2, False),
        (hyp_w3, False), (hyp_b3, False),
        (ONEHOT, False), (HYP_R, False), (HYP_C, False), (HYP_BD, False),
        (p["iou_w1"], False), (p["iou_b1"].reshape(1, -1), False),
        (p["iou_w2"], False), (p["iou_b2"].reshape(1, -1), False),
        (p["iou_w3"], False), (p["iou_b3"].reshape(1, -1), False),
    ], [(B, 4 * N_TOK, 4 * NUM_MASK_TOKENS), (B, 1, NUM_MASK_TOKENS)], B)

    # unpack the packed masks to NCHW spatial layout (pure layout plumbing on the output)
    m = masks_packed.reshape(B, GRID, GRID, 2, 2, 2, 2, NUM_MASK_TOKENS)
    m = m.transpose(0, 7, 1, 3, 5, 2, 4, 6).reshape(B, NUM_MASK_TOKENS, 4 * GRID, 4 * GRID)
    return m[:, 0:1]                                                 # multimask_output=False


# ------------------------------------ parameter init ------------------------------------
def init_params(key):
    ks = iter(jax.random.split(key, 96))

    def w(shape, scale=0.02):
        return (scale * jax.random.normal(next(ks), shape)).astype(jnp.float32)

    z = lambda shape: jnp.zeros(shape, jnp.float32)
    o = lambda shape: jnp.ones(shape, jnp.float32)
    p = {}
    # image encoder
    p["patch_w"] = w((3 * PATCH * PATCH, ENC_DIM)); p["patch_b"] = z((ENC_DIM,))
    p["pos_embed"] = w((1, GRID, GRID, ENC_DIM))
    p["enc_ln1_g"] = o((ENC_DIM,)); p["enc_ln1_b"] = z((ENC_DIM,))
    p["enc_qkv_w"] = w((ENC_DIM, 3 * ENC_DIM)); p["enc_qkv_b"] = z((3 * ENC_DIM,))
    p["enc_proj_w"] = w((ENC_DIM, ENC_DIM)); p["enc_proj_b"] = z((ENC_DIM,))
    p["enc_ln2_g"] = o((ENC_DIM,)); p["enc_ln2_b"] = z((ENC_DIM,))
    p["enc_mlp_w1"] = w((ENC_DIM, ENC_MLP)); p["enc_mlp_b1"] = z((ENC_MLP,))
    p["enc_mlp_w2"] = w((ENC_MLP, ENC_DIM)); p["enc_mlp_b2"] = z((ENC_DIM,))
    p["neck_w1"] = w((ENC_DIM, PDIM))
    p["neck_ln1_g"] = o((PDIM,)); p["neck_ln1_b"] = z((PDIM,))
    p["neck_w2"] = w((9 * PDIM, PDIM))
    p["neck_ln2_g"] = o((PDIM,)); p["neck_ln2_b"] = z((PDIM,))
    # prompt encoder
    p["pe_gauss"] = jax.random.normal(next(ks), (2, PDIM // 2)).astype(jnp.float32)
    p["point_embed_neg"] = w((PDIM,)); p["point_embed_pos"] = w((PDIM,))
    p["not_a_point"] = w((PDIM,)); p["no_mask_embed"] = w((PDIM,))
    # mask decoder
    p["iou_token"] = w((1, PDIM)); p["mask_tokens"] = w((NUM_MASK_TOKENS, PDIM))

    def attn_w(prefix, inner=PDIM):
        p[prefix + "_wq"] = w((PDIM, inner)); p[prefix + "_bq"] = z((inner,))
        p[prefix + "_wk"] = w((PDIM, inner)); p[prefix + "_bk"] = z((inner,))
        p[prefix + "_wv"] = w((PDIM, inner)); p[prefix + "_bv"] = z((inner,))
        p[prefix + "_wo"] = w((inner, PDIM)); p[prefix + "_bo"] = z((PDIM,))

    attn_w("dec_self"); attn_w("dec_t2i"); attn_w("dec_i2t"); attn_w("dec_final")
    for name in ("1", "2", "3", "4", "f"):
        p[f"dec_ln{name}_g"] = o((PDIM,)); p[f"dec_ln{name}_b"] = z((PDIM,))
    p["dec_mlp_w1"] = w((PDIM, DEC_MLP)); p["dec_mlp_b1"] = z((DEC_MLP,))
    p["dec_mlp_w2"] = w((DEC_MLP, PDIM)); p["dec_mlp_b2"] = z((PDIM,))
    p["up1_w"] = w((PDIM, UP1, 2, 2)); p["up1_b"] = z((UP1,))
    p["up_ln_g"] = o((UP1,)); p["up_ln_b"] = z((UP1,))
    p["up2_w"] = w((UP1, UP2, 2, 2)); p["up2_b"] = z((UP2,))
    for i in range(NUM_MASK_TOKENS):
        p[f"hyper{i}_w1"] = w((PDIM, PDIM)); p[f"hyper{i}_b1"] = z((PDIM,))
        p[f"hyper{i}_w2"] = w((PDIM, PDIM)); p[f"hyper{i}_b2"] = z((PDIM,))
        p[f"hyper{i}_w3"] = w((PDIM, UP2)); p[f"hyper{i}_b3"] = z((UP2,))
    p["iou_w1"] = w((PDIM, PDIM)); p["iou_b1"] = z((PDIM,))
    p["iou_w2"] = w((PDIM, PDIM)); p["iou_b2"] = z((PDIM,))
    p["iou_w3"] = w((PDIM, NUM_MASK_TOKENS)); p["iou_b3"] = z((NUM_MASK_TOKENS,))
    return p


if __name__ == "__main__":
    key = jax.random.PRNGKey(0)
    k_param, k_x, k_pts = jax.random.split(key, 3)
    params = init_params(k_param)
    x = jax.random.normal(k_x, (1, 3, IMG, IMG), jnp.float32)                 # NCHW image
    point_coords = jax.random.uniform(k_pts, (1, 2, 2), jnp.float32, 0.0, float(IMG))
    point_labels = jnp.array([[1.0, 0.0]], jnp.float32)                       # 1=fg, 0=bg
    fwd = jax.jit(sam_forward)
    pred = fwd(params, x, point_coords, point_labels)
    jax.block_until_ready(pred)
    assert pred.shape == (1, 1, 4 * GRID, 4 * GRID), pred.shape
    print("KERNEL_OK")
</pallas_src>

<mosaic_0001>
module attributes {stable_mosaic.version = 11 : i64} {
  func.func @encoder_kernel(%arg0: i32, %arg1: memref<1x16x192xf32, #tpu.memory_space<vmem>>, %arg2: memref<16x64xf32, #tpu.memory_space<vmem>>, %arg3: memref<192x64xf32, #tpu.memory_space<vmem>>, %arg4: memref<1x64xf32, #tpu.memory_space<vmem>>, %arg5: memref<1x64xf32, #tpu.memory_space<vmem>>, %arg6: memref<1x64xf32, #tpu.memory_space<vmem>>, %arg7: memref<2x64x32xf32, #tpu.memory_space<vmem>>, %arg8: memref<2x64x32xf32, #tpu.memory_space<vmem>>, %arg9: memref<2x64x32xf32, #tpu.memory_space<vmem>>, %arg10: memref<2x1x32xf32, #tpu.memory_space<vmem>>, %arg11: memref<2x1x32xf32, #tpu.memory_space<vmem>>, %arg12: memref<2x1x32xf32, #tpu.memory_space<vmem>>, %arg13: memref<2x32x64xf32, #tpu.memory_space<vmem>>, %arg14: memref<1x64xf32, #tpu.memory_space<vmem>>, %arg15: memref<1x64xf32, #tpu.memory_space<vmem>>, %arg16: memref<1x64xf32, #tpu.memory_space<vmem>>, %arg17: memref<64x128xf32, #tpu.memory_space<vmem>>, %arg18: memref<1x128xf32, #tpu.memory_space<vmem>>, %arg19: memref<128x64xf32, #tpu.memory_space<vmem>>, %arg20: memref<1x64xf32, #tpu.memory_space<vmem>>, %arg21: memref<64x32xf32, #tpu.memory_space<vmem>>, %arg22: memref<1x32xf32, #tpu.memory_space<vmem>>, %arg23: memref<1x32xf32, #tpu.memory_space<vmem>>, %arg24: memref<9x16x16xf32, #tpu.memory_space<vmem>>, %arg25: memref<9x32x32xf32, #tpu.memory_space<vmem>>, %arg26: memref<1x32xf32, #tpu.memory_space<vmem>>, %arg27: memref<1x32xf32, #tpu.memory_space<vmem>>, %arg28: memref<1x16x32xf32, #tpu.memory_space<vmem>>) attributes {dimension_semantics = [#tpu.dimension_semantics<parallel>], iteration_bounds = array<i64: 1>, scalar_prefetch = 0 : i64, scratch_operands = 0 : i64, tpu.core_type = #tpu.core_type<tc>, window_params = [{transform_indices = @transform_0, window_bounds = array<i64: 1, 16, 192>}, {pipeline_mode = #tpu.pipeline_mode<synchronous>, transform_indices = @transform_1, window_bounds = array<i64: 16, 64>}, {pipeline_mode = #tpu.pipeline_mode<synchronous>, transform_indices = @transform_2, window_bounds = array<i64: 192, 64>}, {pipeline_mode = #tpu.pipeline_mode<synchronous>, transform_indices = @transform_3, window_bounds = array<i64: 1, 64>}, {pipeline_mode = #tpu.pipeline_mode<synchronous>, transform_indices = @transform_4, window_bounds = array<i64: 1, 64>}, {pipeline_mode = #tpu.pipeline_mode<synchronous>, transform_indices = @transform_5, window_bounds = array<i64: 1, 64>}, {pipeline_mode = #tpu.pipeline_mode<synchronous>, transform_indices = @transform_6, window_bounds = array<i64: 2, 64, 32>}, {pipeline_mode = #tpu.pipeline_mode<synchronous>, transform_indices = @transform_7, window_bounds = array<i64: 2, 64, 32>}, {pipeline_mode = #tpu.pipeline_mode<synchronous>, transform_indices = @transform_8, window_bounds = array<i64: 2, 64, 32>}, {pipeline_mode = #tpu.pipeline_mode<synchronous>, transform_indices = @transform_9, window_bounds = array<i64: 2, 1, 32>}, {pipeline_mode = #tpu.pipeline_mode<synchronous>, transform_indices = @transform_10, window_bounds = array<i64: 2, 1, 32>}, {pipeline_mode = #tpu.pipeline_mode<synchronous>, transform_indices = @transform_11, window_bounds = array<i64: 2, 1, 32>}, {pipeline_mode = #tpu.pipeline_mode<synchronous>, transform_indices = @transform_12, window_bounds = array<i64: 2, 32, 64>}, {pipeline_mode = #tpu.pipeline_mode<synchronous>, transform_indices = @transform_13, window_bounds = array<i64: 1, 64>}, {pipeline_mode = #tpu.pipeline_mode<synchronous>, transform_indices = @transform_14, window_bounds = array<i64: 1, 64>}, {pipeline_mode = #tpu.pipeline_mode<synchronous>, transform_indices = @transform_15, window_bounds = array<i64: 1, 64>}, {pipeline_mode = #tpu.pipeline_mode<synchronous>, transform_indices = @transform_16, window_bounds = array<i64: 64, 128>}, {pipeline_mode = #tpu.pipeline_mode<synchronous>, transform_indices = @transform_17, window_bounds = array<i64: 1, 128>}, {pipeline_mode = #tpu.pipeline_mode<synchronous>, transform_indices = @transform_18, window_bounds = array<i64: 128, 64>}, {pipeline_mode = #tpu.pipeline_mode<synchronous>, transform_indices = @transform_19, window_bounds = array<i64: 1, 64>}, {pipeline_mode = #tpu.pipeline_mode<synchronous>, transform_indices = @transform_20, window_bounds = array<i64: 64, 32>}, {pipeline_mode = #tpu.pipeline_mode<synchronous>, transform_indices = @transform_21, window_bounds = array<i64: 1, 32>}, {pipeline_mode = #tpu.pipeline_mode<synchronous>, transform_indices = @transform_22, window_bounds = array<i64: 1, 32>}, {pipeline_mode = #tpu.pipeline_mode<synchronous>, transform_indices = @transform_23, window_bounds = array<i64: 9, 16, 16>}, {pipeline_mode = #tpu.pipeline_mode<synchronous>, transform_indices = @transform_24, window_bounds = array<i64: 9, 32, 32>}, {pipeline_mode = #tpu.pipeline_mode<synchronous>, transform_indices = @transform_25, window_bounds = array<i64: 1, 32>}, {pipeline_mode = #tpu.pipeline_mode<synchronous>, transform_indices = @transform_26, window_bounds = array<i64: 1, 32>}, {transform_indices = @transform_27, window_bounds = array<i64: 1, 16, 32>}]} {
    %c0 = arith.constant 0 : index
    %c0_0 = arith.constant 0 : index
    %c0_1 = arith.constant 0 : index
    %0 = vector.load %arg1[%c0, %c0_0, %c0_1] : memref<1x16x192xf32, #tpu.memory_space<vmem>>, vector<1x16x192xf32>
    %1 = vector.shape_cast %0 : vector<1x16x192xf32> to vector<16x192xf32>
    %c0_2 = arith.constant 0 : index
    %c0_3 = arith.constant 0 : index
    %2 = vector.load %arg3[%c0_2, %c0_3] : memref<192x64xf32, #tpu.memory_space<vmem>>, vector<192x64xf32>
    %3 = arith.truncf %1 : vector<16x192xf32> to vector<16x192xbf16>
    %4 = arith.truncf %2 : vector<192x64xf32> to vector<192x64xbf16>
    %cst = arith.constant dense<0.000000e+00> : vector<16x64xf32>
    %5 = tpu.matmul %3, %4, %cst {dimension_numbers = #tpu.dot_dimension_numbers<[1], [0], [0], [1], [0, 0, 1, 1], [], []>} : vector<16x192xbf16>, vector<192x64xbf16>, vector<16x64xf32> -> vector<16x64xf32>
    %c0_4 = arith.constant 0 : index
    %c0_5 = arith.constant 0 : index
    %6 = vector.load %arg4[%c0_4, %c0_5] : memref<1x64xf32, #tpu.memory_space<vmem>>, vector<1x64xf32>
    %7 = vector.broadcast %6 : vector<1x64xf32> to vector<16x64xf32>
    %8 = arith.addf %5, %7 : vector<16x64xf32>
    %c0_6 = arith.constant 0 : index
    %c0_7 = arith.constant 0 : index
    %9 = vector.load %arg2[%c0_6, %c0_7] : memref<16x64xf32, #tpu.memory_space<vmem>>, vector<16x64xf32>
    %10 = arith.addf %8, %9 : vector<16x64xf32>
    %c0_8 = arith.constant 0 : index
    %c0_9 = arith.constant 0 : index
    %11 = vector.load %arg5[%c0_8, %c0_9] : memref<1x64xf32, #tpu.memory_space<vmem>>, vector<1x64xf32>
    %c0_10 = arith.constant 0 : index
    %c0_11 = arith.constant 0 : index
    %12 = vector.load %arg6[%c0_10, %c0_11] : memref<1x64xf32, #tpu.memory_space<vmem>>, vector<1x64xf32>
    %cst_12 = arith.constant dense<0.000000e+00> : vector<16xf32>
    %13 = vector.multi_reduction <add>, %10, %cst_12 [1] : vector<16x64xf32> to vector<16xf32>
    %14 = vector.shape_cast %13 : vector<16xf32> to vector<16x1xf32>
    %cst_13 = arith.constant 6.400000e+01 : f32
    %15 = vector.broadcast %cst_13 : f32 to vector<16x1xf32>
    %16 = arith.divf %14, %15 : vector<16x1xf32>
    %17 = vector.broadcast %16 : vector<16x1xf32> to vector<16x64xf32>
    %18 = arith.subf %10, %17 : vector<16x64xf32>
    %19 = arith.mulf %18, %18 : vector<16x64xf32>
    %cst_14 = arith.constant dense<0.000000e+00> : vector<16xf32>
    %20 = vector.multi_reduction <add>, %19, %cst_14 [1] : vector<16x64xf32> to vector<16xf32>
    %21 = vector.shape_cast %20 : vector<16xf32> to vector<16x1xf32>
    %cst_15 = arith.constant 6.400000e+01 : f32
    %22 = vector.broadcast %cst_15 : f32 to vector<16x1xf32>
    %23 = arith.divf %21, %22 : vector<16x1xf32>
    %24 = vector.broadcast %16 : vector<16x1xf32> to vector<16x64xf32>
    %25 = arith.subf %10, %24 : vector<16x64xf32>
    %cst_16 = arith.constant 9.99999997E-7 : f32
    %26 = vector.broadcast %cst_16 : f32 to vector<16x1xf32>
    %27 = arith.addf %23, %26 : vector<16x1xf32>
    %28 = math.rsqrt %27 : vector<16x1xf32>
    %29 = vector.broadcast %28 : vector<16x1xf32> to vector<16x64xf32>
    %30 = arith.mulf %25, %29 : vector<16x64xf32>
    %31 = vector.broadcast %11 : vector<1x64xf32> to vector<16x64xf32>
    %32 = arith.mulf %30, %31 : vector<16x64xf32>
    %33 = vector.broadcast %12 : vector<1x64xf32> to vector<16x64xf32>
    %34 = arith.addf %32, %33 : vector<16x64xf32>
    %cst_17 = arith.constant 0.000000e+00 : f32
    %35 = vector.broadcast %cst_17 : f32 to vector<16x64xf32>
    %c0_18 = arith.constant 0 : index
    %c0_19 = arith.constant 0 : index
    %c0_20 = arith.constant 0 : index
    %36 = vector.load %arg7[%c0_18, %c0_19, %c0_20] : memref<2x64x32xf32, #tpu.memory_space<vmem>>, vector<1x64x32xf32>
    %37 = vector.shape_cast %36 : vector<1x64x32xf32> to vector<64x32xf32>
    %38 = arith.truncf %34 : vector<16x64xf32> to vector<16x64xbf16>
    %39 = arith.truncf %37 : vector<64x32xf32> to vector<64x32xbf16>
    %cst_21 = arith.constant dense<0.000000e+00> : vector<16x32xf32>
    %40 = tpu.matmul %38, %39, %cst_21 {dimension_numbers = #tpu.dot_dimension_numbers<[1], [0], [0], [1], [0, 0, 1, 1], [], []>} : vector<16x64xbf16>, vector<64x32xbf16>, vector<16x32xf32> -> vector<16x32xf32>
    %c0_22 = arith.constant 0 : index
    %c0_23 = arith.constant 0 : index
    %c0_24 = arith.constant 0 : index
    %41 = vector.load %arg10[%c0_22, %c0_23, %c0_24] : memref<2x1x32xf32, #tpu.memory_space<vmem>>, vector<1x1x32xf32>
    %42 = vector.shape_cast %41 : vector<1x1x32xf32> to vector<1x32xf32>
    %43 = vector.broadcast %42 : vector<1x32xf32> to vector<16x32xf32>
    %44 = arith.addf %40, %43 : vector<16x32xf32>
    %c0_25 = arith.constant 0 : index
    %c0_26 = arith.constant 0 : index
    %c0_27 = arith.constant 0 : index
    %45 = vector.load %arg8[%c0_25, %c0_26, %c0_27] : memref<2x64x32xf32, #tpu.memory_space<vmem>>, vector<1x64x32xf32>
    %46 = vector.shape_cast %45 : vector<1x64x32xf32> to vector<64x32xf32>
    %47 = arith.truncf %34 : vector<16x64xf32> to vector<16x64xbf16>
    %48 = arith.truncf %46 : vector<64x32xf32> to vector<64x32xbf16>
    %cst_28 = arith.constant dense<0.000000e+00> : vector<16x32xf32>
    %49 = tpu.matmul %47, %48, %cst_28 {dimension_numbers = #tpu.dot_dimension_numbers<[1], [0], [0], [1], [0, 0, 1, 1], [], []>} : vector<16x64xbf16>, vector<64x32xbf16>, vector<16x32xf32> -> vector<16x32xf32>
    %c0_29 = arith.constant 0 : index
    %c0_30 = arith.constant 0 : index
    %c0_31 = arith.constant 0 : index
    %50 = vector.load %arg11[%c0_29, %c0_30, %c0_31] : memref<2x1x32xf32, #tpu.memory_space<vmem>>, vector<1x1x32xf32>
    %51 = vector.shape_cast %50 : vector<1x1x32xf32> to vector<1x32xf32>
    %52 = vector.broadcast %51 : vector<1x32xf32> to vector<16x32xf32>
    %53 = arith.addf %49, %52 : vector<16x32xf32>
    %c0_32 = arith.constant 0 : index
    %c0_33 = arith.constant 0 : index
    %c0_34 = arith.constant 0 : index
    %54 = vector.load %arg9[%c0_32, %c0_33, %c0_34] : memref<2x64x32xf32, #tpu.memory_space<vmem>>, vector<1x64x32xf32>
    %55 = vector.shape_cast %54 : vector<1x64x32xf32> to vector<64x32xf32>
    %56 = arith.truncf %34 : vector<16x64xf32> to vector<16x64xbf16>
    %57 = arith.truncf %55 : vector<64x32xf32> to vector<64x32xbf16>
    %cst_35 = arith.constant dense<0.000000e+00> : vector<16x32xf32>
    %58 = tpu.matmul %56, %57, %cst_35 {dimension_numbers = #tpu.dot_dimension_numbers<[1], [0], [0], [1], [0, 0, 1, 1], [], []>} : vector<16x64xbf16>, vector<64x32xbf16>, vector<16x32xf32> -> vector<16x32xf32>
    %c0_36 = arith.constant 0 : index
    %c0_37 = arith.constant 0 : index
    %c0_38 = arith.constant 0 : index
    %59 = vector.load %arg12[%c0_36, %c0_37, %c0_38] : memref<2x1x32xf32, #tpu.memory_space<vmem>>, vector<1x1x32xf32>
    %60 = vector.shape_cast %59 : vector<1x1x32xf32> to vector<1x32xf32>
    %61 = vector.broadcast %60 : vector<1x32xf32> to vector<16x32xf32>
    %62 = arith.addf %58, %61 : vector<16x32xf32>
    %63 = arith.truncf %44 : vector<16x32xf32> to vector<16x32xbf16>
    %64 = arith.truncf %53 : vector<16x32xf32> to vector<16x32xbf16>
    %cst_39 = arith.constant dense<0.000000e+00> : vector<16x16xf32>
    %65 = tpu.matmul %63, %64, %cst_39 {dimension_numbers = #tpu.dot_dimension_numbers<[1], [1], [0], [0], [0, 0, 1, 0], [], []>} : vector<16x32xbf16>, vector<16x32xbf16>, vector<16x16xf32> -> vector<16x16xf32>
    %cst_40 = arith.constant 0.176776692 : f32
    %66 = vector.broadcast %cst_40 : f32 to vector<16x16xf32>
    %67 = arith.mulf %65, %66 : vector<16x16xf32>
    %cst_41 = arith.constant dense<0xFF800000> : vector<16xf32>
    %68 = vector.multi_reduction <maximumf>, %67, %cst_41 [1] : vector<16x16xf32> to vector<16xf32>
    %69 = vector.shape_cast %68 : vector<16xf32> to vector<16x1xf32>
    %70 = vector.broadcast %69 : vector<16x1xf32> to vector<16x16xf32>
    %71 = arith.subf %67, %70 : vector<16x16xf32>
    %72 = math.exp %71 : vector<16x16xf32>
    %cst_42 = arith.constant dense<0.000000e+00> : vector<16xf32>
    %73 = vector.multi_reduction <add>, %72, %cst_42 [1] : vector<16x16xf32> to vector<16xf32>
    %74 = vector.shape_cast %73 : vector<16xf32> to vector<16x1xf32>
    %75 = tpu.reciprocal %74 {approx = true} : vector<16x1xf32> -> vector<16x1xf32>
    %76 = vector.broadcast %75 : vector<16x1xf32> to vector<16x16xf32>
    %77 = arith.mulf %72, %76 : vector<16x16xf32>
    %78 = arith.truncf %77 : vector<16x16xf32> to vector<16x16xbf16>
    %79 = arith.truncf %62 : vector<16x32xf32> to vector<16x32xbf16>
    %cst_43 = arith.constant dense<0.000000e+00> : vector<16x32xf32>
    %80 = tpu.matmul %78, %79, %cst_43 {dimension_numbers = #tpu.dot_dimension_numbers<[1], [0], [0], [1], [0, 0, 1, 1], [], []>} : vector<16x16xbf16>, vector<16x32xbf16>, vector<16x32xf32> -> vector<16x32xf32>
    %c0_44 = arith.constant 0 : index
    %c0_45 = arith.constant 0 : index
    %c0_46 = arith.constant 0 : index
    %81 = vector.load %arg13[%c0_44, %c0_45, %c0_46] : memref<2x32x64xf32, #tpu.memory_space<vmem>>, vector<1x32x64xf32>
    %82 = vector.shape_cast %81 : vector<1x32x64xf32> to vector<32x64xf32>
    %83 = arith.truncf %80 : vector<16x32xf32> to vector<16x32xbf16>
    %84 = arith.truncf %82 : vector<32x64xf32> to vector<32x64xbf16>
    %cst_47 = arith.constant dense<0.000000e+00> : vector<16x64xf32>
    %85 = tpu.matmul %83, %84, %cst_47 {dimension_numbers = #tpu.dot_dimension_numbers<[1], [0], [0], [1], [0, 0, 1, 1], [], []>} : vector<16x32xbf16>, vector<32x64xbf16>, vector<16x64xf32> -> vector<16x64xf32>
    %86 = arith.addf %35, %85 : vector<16x64xf32>
    %c1 = arith.constant 1 : index
    %c0_48 = arith.constant 0 : index
    %c0_49 = arith.constant 0 : index
    %87 = vector.load %arg7[%c1, %c0_48, %c0_49] : memref<2x64x32xf32, #tpu.memory_space<vmem>>, vector<1x64x32xf32>
    %88 = vector.shape_cast %87 : vector<1x64x32xf32> to vector<64x32xf32>
    %89 = arith.truncf %34 : vector<16x64xf32> to vector<16x64xbf16>
    %90 = arith.truncf %88 : vector<64x32xf32> to vector<64x32xbf16>
    %cst_50 = arith.constant dense<0.000000e+00> : vector<16x32xf32>
    %91 = tpu.matmul %89, %90, %cst_50 {dimension_numbers = #tpu.dot_dimension_numbers<[1], [0], [0], [1], [0, 0, 1, 1], [], []>} : vector<16x64xbf16>, vector<64x32xbf16>, vector<16x32xf32> -> vector<16x32xf32>
    %c1_51 = arith.constant 1 : index
    %c0_52 = arith.constant 0 : index
    %c0_53 = arith.constant 0 : index
    %92 = vector.load %arg10[%c1_51, %c0_52, %c0_53] : memref<2x1x32xf32, #tpu.memory_space<vmem>>, vector<1x1x32xf32>
    %93 = vector.shape_cast %92 : vector<1x1x32xf32> to vector<1x32xf32>
    %94 = vector.broadcast %93 : vector<1x32xf32> to vector<16x32xf32>
    %95 = arith.addf %91, %94 : vector<16x32xf32>
    %c1_54 = arith.constant 1 : index
    %c0_55 = arith.constant 0 : index
    %c0_56 = arith.constant 0 : index
    %96 = vector.load %arg8[%c1_54, %c0_55, %c0_56] : memref<2x64x32xf32, #tpu.memory_space<vmem>>, vector<1x64x32xf32>
    %97 = vector.shape_cast %96 : vector<1x64x32xf32> to vector<64x32xf32>
    %98 = arith.truncf %34 : vector<16x64xf32> to vector<16x64xbf16>
    %99 = arith.truncf %97 : vector<64x32xf32> to vector<64x32xbf16>
    %cst_57 = arith.constant dense<0.000000e+00> : vector<16x32xf32>
    %100 = tpu.matmul %98, %99, %cst_57 {dimension_numbers = #tpu.dot_dimension_numbers<[1], [0], [0], [1], [0, 0, 1, 1], [], []>} : vector<16x64xbf16>, vector<64x32xbf16>, vector<16x32xf32> -> vector<16x32xf32>
    %c1_58 = arith.constant 1 : index
    %c0_59 = arith.constant 0 : index
    %c0_60 = arith.constant 0 : index
    %101 = vector.load %arg11[%c1_58, %c0_59, %c0_60] : memref<2x1x32xf32, #tpu.memory_space<vmem>>, vector<1x1x32xf32>
    %102 = vector.shape_cast %101 : vector<1x1x32xf32> to vector<1x32xf32>
    %103 = vector.broadcast %102 : vector<1x32xf32> to vector<16x32xf32>
    %104 = arith.addf %100, %103 : vector<16x32xf32>
    %c1_61 = arith.constant 1 : index
    %c0_62 = arith.constant 0 : index
    %c0_63 = arith.constant 0 : index
    %105 = vector.load %arg9[%c1_61, %c0_62, %c0_63] : memref<2x64x32xf32, #tpu.memory_space<vmem>>, vector<1x64x32xf32>
    %106 = vector.shape_cast %105 : vector<1x64x32xf32> to vector<64x32xf32>
    %107 = arith.truncf %34 : vector<16x64xf32> to vector<16x64xbf16>
    %108 = arith.truncf %106 : vector<64x32xf32> to vector<64x32xbf16>
    %cst_64 = arith.constant dense<0.000000e+00> : vector<16x32xf32>
    %109 = tpu.matmul %107, %108, %cst_64 {dimension_numbers = #tpu.dot_dimension_numbers<[1], [0], [0], [1], [0, 0, 1, 1], [], []>} : vector<16x64xbf16>, vector<64x32xbf16>, vector<16x32xf32> -> vector<16x32xf32>
    %c1_65 = arith.constant 1 : index
    %c0_66 = arith.constant 0 : index
    %c0_67 = arith.constant 0 : index
    %110 = vector.load %arg12[%c1_65, %c0_66, %c0_67] : memref<2x1x32xf32, #tpu.memory_space<vmem>>, vector<1x1x32xf32>
    %111 = vector.shape_cast %110 : vector<1x1x32xf32> to vector<1x32xf32>
    %112 = vector.broadcast %111 : vector<1x32xf32> to vector<16x32xf32>
    %113 = arith.addf %109, %112 : vector<16x32xf32>
    %114 = arith.truncf %95 : vector<16x32xf32> to vector<16x32xbf16>
    %115 = arith.truncf %104 : vector<16x32xf32> to vector<16x32xbf16>
    %cst_68 = arith.constant dense<0.000000e+00> : vector<16x16xf32>
    %116 = tpu.matmul %114, %115, %cst_68 {dimension_numbers = #tpu.dot_dimension_numbers<[1], [1], [0], [0], [0, 0, 1, 0], [], []>} : vector<16x32xbf16>, vector<16x32xbf16>, vector<16x16xf32> -> vector<16x16xf32>
    %cst_69 = arith.constant 0.176776692 : f32
    %117 = vector.broadcast %cst_69 : f32 to vector<16x16xf32>
    %118 = arith.mulf %116, %117 : vector<16x16xf32>
    %cst_70 = arith.constant dense<0xFF800000> : vector<16xf32>
    %119 = vector.multi_reduction <maximumf>, %118, %cst_70 [1] : vector<16x16xf32> to vector<16xf32>
    %120 = vector.shape_cast %119 : vector<16xf32> to vector<16x1xf32>
    %121 = vector.broadcast %120 : vector<16x1xf32> to vector<16x16xf32>
    %122 = arith.subf %118, %121 : vector<16x16xf32>
    %123 = math.exp %122 : vector<16x16xf32>
    %cst_71 = arith.constant dense<0.000000e+00> : vector<16xf32>
    %124 = vector.multi_reduction <add>, %123, %cst_71 [1] : vector<16x16xf32> to vector<16xf32>
    %125 = vector.shape_cast %124 : vector<16xf32> to vector<16x1xf32>
    %126 = tpu.reciprocal %125 {approx = true} : vector<16x1xf32> -> vector<16x1xf32>
    %127 = vector.broadcast %126 : vector<16x1xf32> to vector<16x16xf32>
    %128 = arith.mulf %123, %127 : vector<16x16xf32>
    %129 = arith.truncf %128 : vector<16x16xf32> to vector<16x16xbf16>
    %130 = arith.truncf %113 : vector<16x32xf32> to vector<16x32xbf16>
    %cst_72 = arith.constant dense<0.000000e+00> : vector<16x32xf32>
    %131 = tpu.matmul %129, %130, %cst_72 {dimension_numbers = #tpu.dot_dimension_numbers<[1], [0], [0], [1], [0, 0, 1, 1], [], []>} : vector<16x16xbf16>, vector<16x32xbf16>, vector<16x32xf32> -> vector<16x32xf32>
    %c1_73 = arith.constant 1 : index
    %c0_74 = arith.constant 0 : index
    %c0_75 = arith.constant 0 : index
    %132 = vector.load %arg13[%c1_73, %c0_74, %c0_75] : memref<2x32x64xf32, #tpu.memory_space<vmem>>, vector<1x32x64xf32>
    %133 = vector.shape_cast %132 : vector<1x32x64xf32> to vector<32x64xf32>
    %134 = arith.truncf %131 : vector<16x32xf32> to vector<16x32xbf16>
    %135 = arith.truncf %133 : vector<32x64xf32> to vector<32x64xbf16>
    %cst_76 = arith.constant dense<0.000000e+00> : vector<16x64xf32>
    %136 = tpu.matmul %134, %135, %cst_76 {dimension_numbers = #tpu.dot_dimension_numbers<[1], [0], [0], [1], [0, 0, 1, 1], [], []>} : vector<16x32xbf16>, vector<32x64xbf16>, vector<16x64xf32> -> vector<16x64xf32>
    %137 = arith.addf %86, %136 : vector<16x64xf32>
    %138 = arith.addf %10, %137 : vector<16x64xf32>
    %c0_77 = arith.constant 0 : index
    %c0_78 = arith.constant 0 : index
    %139 = vector.load %arg14[%c0_77, %c0_78] : memref<1x64xf32, #tpu.memory_space<vmem>>, vector<1x64xf32>
    %140 = vector.broadcast %139 : vector<1x64xf32> to vector<16x64xf32>
    %141 = arith.addf %138, %140 : vector<16x64xf32>
    %c0_79 = arith.constant 0 : index
    %c0_80 = arith.constant 0 : index
    %142 = vector.load %arg15[%c0_79, %c0_80] : memref<1x64xf32, #tpu.memory_space<vmem>>, vector<1x64xf32>
    %c0_81 = arith.constant 0 : index
    %c0_82 = arith.constant 0 : index
    %143 = vector.load %arg16[%c0_81, %c0_82] : memref<1x64xf32, #tpu.memory_space<vmem>>, vector<1x64xf32>
    %cst_83 = arith.constant dense<0.000000e+00> : vector<16xf32>
    %144 = vector.multi_reduction <add>, %141, %cst_83 [1] : vector<16x64xf32> to vector<16xf32>
    %145 = vector.shape_cast %144 : vector<16xf32> to vector<16x1xf32>
    %cst_84 = arith.constant 6.400000e+01 : f32
    %146 = vector.broadcast %cst_84 : f32 to vector<16x1xf32>
    %147 = arith.divf %145, %146 : vector<16x1xf32>
    %148 = vector.broadcast %147 : vector<16x1xf32> to vector<16x64xf32>
    %149 = arith.subf %141, %148 : vector<16x64xf32>
    %150 = arith.mulf %149, %149 : vector<16x64xf32>
    %cst_85 = arith.constant dense<0.000000e+00> : vector<16xf32>
    %151 = vector.multi_reduction <add>, %150, %cst_85 [1] : vector<16x64xf32> to vector<16xf32>
    %152 = vector.shape_cast %151 : vector<16xf32> to vector<16x1xf32>
    %cst_86 = arith.constant 6.400000e+01 : f32
    %153 = vector.broadcast %cst_86 : f32 to vector<16x1xf32>
    %154 = arith.divf %152, %153 : vector<16x1xf32>
    %155 = vector.broadcast %147 : vector<16x1xf32> to vector<16x64xf32>
    %156 = arith.subf %141, %155 : vector<16x64xf32>
    %cst_87 = arith.constant 9.99999997E-7 : f32
    %157 = vector.broadcast %cst_87 : f32 to vector<16x1xf32>
    %158 = arith.addf %154, %157 : vector<16x1xf32>
    %159 = math.rsqrt %158 : vector<16x1xf32>
    %160 = vector.broadcast %159 : vector<16x1xf32> to vector<16x64xf32>
    %161 = arith.mulf %156, %160 : vector<16x64xf32>
    %162 = vector.broadcast %142 : vector<1x64xf32> to vector<16x64xf32>
    %163 = arith.mulf %161, %162 : vector<16x64xf32>
    %164 = vector.broadcast %143 : vector<1x64xf32> to vector<16x64xf32>
    %165 = arith.addf %163, %164 : vector<16x64xf32>
    %c0_88 = arith.constant 0 : index
    %c0_89 = arith.constant 0 : index
    %166 = vector.load %arg17[%c0_88, %c0_89] : memref<64x128xf32, #tpu.memory_space<vmem>>, vector<64x128xf32>
    %167 = arith.truncf %165 : vector<16x64xf32> to vector<16x64xbf16>
    %168 = arith.truncf %166 : vector<64x128xf32> to vector<64x128xbf16>
    %cst_90 = arith.constant dense<0.000000e+00> : vector<16x128xf32>
    %169 = tpu.matmul %167, %168, %cst_90 {dimension_numbers = #tpu.dot_dimension_numbers<[1], [0], [0], [1], [0, 0, 1, 1], [], []>} : vector<16x64xbf16>, vector<64x128xbf16>, vector<16x128xf32> -> vector<16x128xf32>
    %c0_91 = arith.constant 0 : index
    %c0_92 = arith.constant 0 : index
    %170 = vector.load %arg18[%c0_91, %c0_92] : memref<1x128xf32, #tpu.memory_space<vmem>>, vector<1x128xf32>
    %171 = vector.broadcast %170 : vector<1x128xf32> to vector<16x128xf32>
    %172 = arith.addf %169, %171 : vector<16x128xf32>
    %173 = arith.mulf %172, %172 : vector<16x128xf32>
    %174 = arith.mulf %172, %173 : vector<16x128xf32>
    %cst_93 = arith.constant 4.471500e-02 : f32
    %175 = vector.broadcast %cst_93 : f32 to vector<16x128xf32>
    %176 = arith.mulf %175, %174 : vector<16x128xf32>
    %177 = arith.addf %172, %176 : vector<16x128xf32>
    %cst_94 = arith.constant 0.797884583 : f32
    %178 = vector.broadcast %cst_94 : f32 to vector<16x128xf32>
    %179 = arith.mulf %178, %177 : vector<16x128xf32>
    %180 = math.tanh %179 : vector<16x128xf32>
    %cst_95 = arith.constant 1.000000e+00 : f32
    %181 = vector.broadcast %cst_95 : f32 to vector<16x128xf32>
    %182 = arith.addf %181, %180 : vector<16x128xf32>
    %cst_96 = arith.constant 5.000000e-01 : f32
    %183 = vector.broadcast %cst_96 : f32 to vector<16x128xf32>
    %184 = arith.mulf %183, %182 : vector<16x128xf32>
    %185 = arith.mulf %172, %184 : vector<16x128xf32>
    %c0_97 = arith.constant 0 : index
    %c0_98 = arith.constant 0 : index
    %186 = vector.load %arg19[%c0_97, %c0_98] : memref<128x64xf32, #tpu.memory_space<vmem>>, vector<128x64xf32>
    %187 = arith.truncf %185 : vector<16x128xf32> to vector<16x128xbf16>
    %188 = arith.truncf %186 : vector<128x64xf32> to vector<128x64xbf16>
    %cst_99 = arith.constant dense<0.000000e+00> : vector<16x64xf32>
    %189 = tpu.matmul %187, %188, %cst_99 {dimension_numbers = #tpu.dot_dimension_numbers<[1], [0], [0], [1], [0, 0, 1, 1], [], []>} : vector<16x128xbf16>, vector<128x64xbf16>, vector<16x64xf32> -> vector<16x64xf32>
    %190 = arith.addf %141, %189 : vector<16x64xf32>
    %c0_100 = arith.constant 0 : index
    %c0_101 = arith.constant 0 : index
    %191 = vector.load %arg20[%c0_100, %c0_101] : memref<1x64xf32, #tpu.memory_space<vmem>>, vector<1x64xf32>
    %192 = vector.broadcast %191 : vector<1x64xf32> to vector<16x64xf32>
    %193 = arith.addf %190, %192 : vector<16x64xf32>
    %c0_102 = arith.constant 0 : index
    %c0_103 = arith.constant 0 : index
    %194 = vector.load %arg21[%c0_102, %c0_103] : memref<64x32xf32, #tpu.memory_space<vmem>>, vector<64x32xf32>
    %195 = arith.truncf %193 : vector<16x64xf32> to vector<16x64xbf16>
    %196 = arith.truncf %194 : vector<64x32xf32> to vector<64x32xbf16>
    %cst_104 = arith.constant dense<0.000000e+00> : vector<16x32xf32>
    %197 = tpu.matmul %195, %196, %cst_104 {dimension_numbers = #tpu.dot_dimension_numbers<[1], [0], [0], [1], [0, 0, 1, 1], [], []>} : vector<16x64xbf16>, vector<64x32xbf16>, vector<16x32xf32> -> vector<16x32xf32>
    %c0_105 = arith.constant 0 : index
    %c0_106 = arith.constant 0 : index
    %198 = vector.load %arg22[%c0_105, %c0_106] : memref<1x32xf32, #tpu.memory_space<vmem>>, vector<1x32xf32>
    %c0_107 = arith.constant 0 : index
    %c0_108 = arith.constant 0 : index
    %199 = vector.load %arg23[%c0_107, %c0_108] : memref<1x32xf32, #tpu.memory_space<vmem>>, vector<1x32xf32>
    %cst_109 = arith.constant dense<0.000000e+00> : vector<16xf32>
    %200 = vector.multi_reduction <add>, %197, %cst_109 [1] : vector<16x32xf32> to vector<16xf32>
    %201 = vector.shape_cast %200 : vector<16xf32> to vector<16x1xf32>
    %cst_110 = arith.constant 3.200000e+01 : f32
    %202 = vector.broadcast %cst_110 : f32 to vector<16x1xf32>
    %203 = arith.divf %201, %202 : vector<16x1xf32>
    %204 = vector.broadcast %203 : vector<16x1xf32> to vector<16x32xf32>
    %205 = arith.subf %197, %204 : vector<16x32xf32>
    %206 = arith.mulf %205, %205 : vector<16x32xf32>
    %cst_111 = arith.constant dense<0.000000e+00> : vector<16xf32>
    %207 = vector.multi_reduction <add>, %206, %cst_111 [1] : vector<16x32xf32> to vector<16xf32>
    %208 = vector.shape_cast %207 : vector<16xf32> to vector<16x1xf32>
    %cst_112 = arith.constant 3.200000e+01 : f32
    %209 = vector.broadcast %cst_112 : f32 to vector<16x1xf32>
    %210 = arith.divf %208, %209 : vector<16x1xf32>
    %211 = vector.broadcast %203 : vector<16x1xf32> to vector<16x32xf32>
    %212 = arith.subf %197, %211 : vector<16x32xf32>
    %cst_113 = arith.constant 9.99999997E-7 : f32
    %213 = vector.broadcast %cst_113 : f32 to vector<16x1xf32>
    %214 = arith.addf %210, %213 : vector<16x1xf32>
    %215 = math.rsqrt %214 : vector<16x1xf32>
    %216 = vector.broadcast %215 : vector<16x1xf32> to vector<16x32xf32>
    %217 = arith.mulf %212, %216 : vector<16x32xf32>
    %218 = vector.broadcast %198 : vector<1x32xf32> to vector<16x32xf32>
    %219 = arith.mulf %217, %218 : vector<16x32xf32>
    %220 = vector.broadcast %199 : vector<1x32xf32> to vector<16x32xf32>
    %221 = arith.addf %219, %220 : vector<16x32xf32>
    %cst_114 = arith.constant 0.000000e+00 : f32
    %222 = vector.broadcast %cst_114 : f32 to vector<16x32xf32>
    %c0_115 = arith.constant 0 : index
    %c0_116 = arith.constant 0 : index
    %c0_117 = arith.constant 0 : index
    %223 = vector.load %arg24[%c0_115, %c0_116, %c0_117] : memref<9x16x16xf32, #tpu.memory_space<vmem>>, vector<1x16x16xf32>
    %224 = vector.shape_cast %223 : vector<1x16x16xf32> to vector<16x16xf32>
    %225 = arith.truncf %224 : vector<16x16xf32> to vector<16x16xbf16>
    %226 = arith.truncf %221 : vector<16x32xf32> to vector<16x32xbf16>
    %cst_118 = arith.constant dense<0.000000e+00> : vector<16x32xf32>
    %227 = tpu.matmul %225, %226, %cst_118 {dimension_numbers = #tpu.dot_dimension_numbers<[1], [0], [0], [1], [0, 0, 1, 1], [], []>} : vector<16x16xbf16>, vector<16x32xbf16>, vector<16x32xf32> -> vector<16x32xf32>
    %c0_119 = arith.constant 0 : index
    %c0_120 = arith.constant 0 : index
    %c0_121 = arith.constant 0 : index
    %228 = vector.load %arg25[%c0_119, %c0_120, %c0_121] : memref<9x32x32xf32, #tpu.memory_space<vmem>>, vector<1x32x32xf32>
    %229 = vector.shape_cast %228 : vector<1x32x32xf32> to vector<32x32xf32>
    %230 = arith.truncf %227 : vector<16x32xf32> to vector<16x32xbf16>
    %231 = arith.truncf %229 : vector<32x32xf32> to vector<32x32xbf16>
    %cst_122 = arith.constant dense<0.000000e+00> : vector<16x32xf32>
    %232 = tpu.matmul %230, %231, %cst_122 {dimension_numbers = #tpu.dot_dimension_numbers<[1], [0], [0], [1], [0, 0, 1, 1], [], []>} : vector<16x32xbf16>, vector<32x32xbf16>, vector<16x32xf32> -> vector<16x32xf32>
    %233 = arith.addf %222, %232 : vector<16x32xf32>
    %c1_123 = arith.constant 1 : index
    %c0_124 = arith.constant 0 : index
    %c0_125 = arith.constant 0 : index
    %234 = vector.load %arg24[%c1_123, %c0_124, %c0_125] : memref<9x16x16xf32, #tpu.memory_space<vmem>>, vector<1x16x16xf32>
    %235 = vector.shape_cast %234 : vector<1x16x16xf32> to vector<16x16xf32>
    %236 = arith.truncf %235 : vector<16x16xf32> to vector<16x16xbf16>
    %237 = arith.truncf %221 : vector<16x32xf32> to vector<16x32xbf16>
    %cst_126 = arith.constant dense<0.000000e+00> : vector<16x32xf32>
    %238 = tpu.matmul %236, %237, %cst_126 {dimension_numbers = #tpu.dot_dimension_numbers<[1], [0], [0], [1], [0, 0, 1, 1], [], []>} : vector<16x16xbf16>, vector<16x32xbf16>, vector<16x32xf32> -> vector<16x32xf32>
    %c1_127 = arith.constant 1 : index
    %c0_128 = arith.constant 0 : index
    %c0_129 = arith.constant 0 : index
    %239 = vector.load %arg25[%c1_127, %c0_128, %c0_129] : memref<9x32x32xf32, #tpu.memory_space<vmem>>, vector<1x32x32xf32>
    %240 = vector.shape_cast %239 : vector<1x32x32xf32> to vector<32x32xf32>
    %241 = arith.truncf %238 : vector<16x32xf32> to vector<16x32xbf16>
    %242 = arith.truncf %240 : vector<32x32xf32> to vector<32x32xbf16>
    %cst_130 = arith.constant dense<0.000000e+00> : vector<16x32xf32>
    %243 = tpu.matmul %241, %242, %cst_130 {dimension_numbers = #tpu.dot_dimension_numbers<[1], [0], [0], [1], [0, 0, 1, 1], [], []>} : vector<16x32xbf16>, vector<32x32xbf16>, vector<16x32xf32> -> vector<16x32xf32>
    %244 = arith.addf %233, %243 : vector<16x32xf32>
    %c2 = arith.constant 2 : index
    %c0_131 = arith.constant 0 : index
    %c0_132 = arith.constant 0 : index
    %245 = vector.load %arg24[%c2, %c0_131, %c0_132] : memref<9x16x16xf32, #tpu.memory_space<vmem>>, vector<1x16x16xf32>
    %246 = vector.shape_cast %245 : vector<1x16x16xf32> to vector<16x16xf32>
    %247 = arith.truncf %246 : vector<16x16xf32> to vector<16x16xbf16>
    %248 = arith.truncf %221 : vector<16x32xf32> to vector<16x32xbf16>
    %cst_133 = arith.constant dense<0.000000e+00> : vector<16x32xf32>
    %249 = tpu.matmul %247, %248, %cst_133 {dimension_numbers = #tpu.dot_dimension_numbers<[1], [0], [0], [1], [0, 0, 1, 1], [], []>} : vector<16x16xbf16>, vector<16x32xbf16>, vector<16x32xf32> -> vector<16x32xf32>
    %c2_134 = arith.constant 2 : index
    %c0_135 = arith.constant 0 : index
    %c0_136 = arith.constant 0 : index
    %250 = vector.load %arg25[%c2_134, %c0_135, %c0_136] : memref<9x32x32xf32, #tpu.memory_space<vmem>>, vector<1x32x32xf32>
    %251 = vector.shape_cast %250 : vector<1x32x32xf32> to vector<32x32xf32>
    %252 = arith.truncf %249 : vector<16x32xf32> to vector<16x32xbf16>
    %253 = arith.truncf %251 : vector<32x32xf32> to vector<32x32xbf16>
    %cst_137 = arith.constant dense<0.000000e+00> : vector<16x32xf32>
    %254 = tpu.matmul %252, %253, %cst_137 {dimension_numbers = #tpu.dot_dimension_numbers<[1], [0], [0], [1], [0, 0, 1, 1], [], []>} : vector<16x32xbf16>, vector<32x32xbf16>, vector<16x32xf32> -> vector<16x32xf32>
    %255 = arith.addf %244, %254 : vector<16x32xf32>
    %c3 = arith.constant 3 : index
    %c0_138 = arith.constant 0 : index
    %c0_139 = arith.constant 0 : index
    %256 = vector.load %arg24[%c3, %c0_138, %c0_139] : memref<9x16x16xf32, #tpu.memory_space<vmem>>, vector<1x16x16xf32>
    %257 = vector.shape_cast %256 : vector<1x16x16xf32> to vector<16x16xf32>
    %258 = arith.truncf %257 : vector<16x16xf32> to vector<16x16xbf16>
    %259 = arith.truncf %221 : vector<16x32xf32> to vector<16x32xbf16>
    %cst_140 = arith.constant dense<0.000000e+00> : vector<16x32xf32>
    %260 = tpu.matmul %258, %259, %cst_140 {dimension_numbers = #tpu.dot_dimension_numbers<[1], [0], [0], [1], [0, 0, 1, 1], [], []>} : vector<16x16xbf16>, vector<16x32xbf16>, vector<16x32xf32> -> vector<16x32xf32>
    %c3_141 = arith.constant 3 : index
    %c0_142 = arith.constant 0 : index
    %c0_143 = arith.constant 0 : index
    %261 = vector.load %arg25[%c3_141, %c0_142, %c0_143] : memref<9x32x32xf32, #tpu.memory_space<vmem>>, vector<1x32x32xf32>
    %262 = vector.shape_cast %261 : vector<1x32x32xf32> to vector<32x32xf32>
    %263 = arith.truncf %260 : vector<16x32xf32> to vector<16x32xbf16>
    %264 = arith.truncf %262 : vector<32x32xf32> to vector<32x32xbf16>
    %cst_144 = arith.constant dense<0.000000e+00> : vector<16x32xf32>
    %265 = tpu.matmul %263, %264, %cst_144 {dimension_numbers = #tpu.dot_dimension_numbers<[1], [0], [0], [1], [0, 0, 1, 1], [], []>} : vector<16x32xbf16>, vector<32x32xbf16>, vector<16x32xf32> -> vector<16x32xf32>
    %266 = arith.addf %255, %265 : vector<16x32xf32>
    %c4 = arith.constant 4 : index
    %c0_145 = arith.constant 0 : index
    %c0_146 = arith.constant 0 : index
    %267 = vector.load %arg24[%c4, %c0_145, %c0_146] : memref<9x16x16xf32, #tpu.memory_space<vmem>>, vector<1x16x16xf32>
    %268 = vector.shape_cast %267 : vector<1x16x16xf32> to vector<16x16xf32>
    %269 = arith.truncf %268 : vector<16x16xf32> to vector<16x16xbf16>
    %270 = arith.truncf %221 : vector<16x32xf32> to vector<16x32xbf16>
    %cst_147 = arith.constant dense<0.000000e+00> : vector<16x32xf32>
    %271 = tpu.matmul %269, %270, %cst_147 {dimension_numbers = #tpu.dot_dimension_numbers<[1], [0], [0], [1], [0, 0, 1, 1], [], []>} : vector<16x16xbf16>, vector<16x32xbf16>, vector<16x32xf32> -> vector<16x32xf32>
    %c4_148 = arith.constant 4 : index
    %c0_149 = arith.constant 0 : index
    %c0_150 = arith.constant 0 : index
    %272 = vector.load %arg25[%c4_148, %c0_149, %c0_150] : memref<9x32x32xf32, #tpu.memory_space<vmem>>, vector<1x32x32xf32>
    %273 = vector.shape_cast %272 : vector<1x32x32xf32> to vector<32x32xf32>
    %274 = arith.truncf %271 : vector<16x32xf32> to vector<16x32xbf16>
    %275 = arith.truncf %273 : vector<32x32xf32> to vector<32x32xbf16>
    %cst_151 = arith.constant dense<0.000000e+00> : vector<16x32xf32>
    %276 = tpu.matmul %274, %275, %cst_151 {dimension_numbers = #tpu.dot_dimension_numbers<[1], [0], [0], [1], [0, 0, 1, 1], [], []>} : vector<16x32xbf16>, vector<32x32xbf16>, vector<16x32xf32> -> vector<16x32xf32>
    %277 = arith.addf %266, %276 : vector<16x32xf32>
    %c5 = arith.constant 5 : index
    %c0_152 = arith.constant 0 : index
    %c0_153 = arith.constant 0 : index
    %278 = vector.load %arg24[%c5, %c0_152, %c0_153] : memref<9x16x16xf32, #tpu.memory_space<vmem>>, vector<1x16x16xf32>
    %279 = vector.shape_cast %278 : vector<1x16x16xf32> to vector<16x16xf32>
    %280 = arith.truncf %279 : vector<16x16xf32> to vector<16x16xbf16>
    %281 = arith.truncf %221 : vector<16x32xf32> to vector<16x32xbf16>
    %cst_154 = arith.constant dense<0.000000e+00> : vector<16x32xf32>
    %282 = tpu.matmul %280, %281, %cst_154 {dimension_numbers = #tpu.dot_dimension_numbers<[1], [0], [0], [1], [0, 0, 1, 1], [], []>} : vector<16x16xbf16>, vector<16x32xbf16>, vector<16x32xf32> -> vector<16x32xf32>
    %c5_155 = arith.constant 5 : index
    %c0_156 = arith.constant 0 : index
    %c0_157 = arith.constant 0 : index
    %283 = vector.load %arg25[%c5_155, %c0_156, %c0_157] : memref<9x32x32xf32, #tpu.memory_space<vmem>>, vector<1x32x32xf32>
    %284 = vector.shape_cast %283 : vector<1x32x32xf32> to vector<32x32xf32>
    %285 = arith.truncf %282 : vector<16x32xf32> to vector<16x32xbf16>
    %286 = arith.truncf %284 : vector<32x32xf32> to vector<32x32xbf16>
    %cst_158 = arith.constant dense<0.000000e+00> : vector<16x32xf32>
    %287 = tpu.matmul %285, %286, %cst_158 {dimension_numbers = #tpu.dot_dimension_numbers<[1], [0], [0], [1], [0, 0, 1, 1], [], []>} : vector<16x32xbf16>, vector<32x32xbf16>, vector<16x32xf32> -> vector<16x32xf32>
    %288 = arith.addf %277, %287 : vector<16x32xf32>
    %c6 = arith.constant 6 : index
    %c0_159 = arith.constant 0 : index
    %c0_160 = arith.constant 0 : index
    %289 = vector.load %arg24[%c6, %c0_159, %c0_160] : memref<9x16x16xf32, #tpu.memory_space<vmem>>, vector<1x16x16xf32>
    %290 = vector.shape_cast %289 : vector<1x16x16xf32> to vector<16x16xf32>
    %291 = arith.truncf %290 : vector<16x16xf32> to vector<16x16xbf16>
    %292 = arith.truncf %221 : vector<16x32xf32> to vector<16x32xbf16>
    %cst_161 = arith.constant dense<0.000000e+00> : vector<16x32xf32>
    %293 = tpu.matmul %291, %292, %cst_161 {dimension_numbers = #tpu.dot_dimension_numbers<[1], [0], [0], [1], [0, 0, 1, 1], [], []>} : vector<16x16xbf16>, vector<16x32xbf16>, vector<16x32xf32> -> vector<16x32xf32>
    %c6_162 = arith.constant 6 : index
    %c0_163 = arith.constant 0 : index
    %c0_164 = arith.constant 0 : index
    %294 = vector.load %arg25[%c6_162, %c0_163, %c0_164] : memref<9x32x32xf32, #tpu.memory_space<vmem>>, vector<1x32x32xf32>
    %295 = vector.shape_cast %294 : vector<1x32x32xf32> to vector<32x32xf32>
    %296 = arith.truncf %293 : vector<16x32xf32> to vector<16x32xbf16>
    %297 = arith.truncf %295 : vector<32x32xf32> to vector<32x32xbf16>
    %cst_165 = arith.constant dense<0.000000e+00> : vector<16x32xf32>
    %298 = tpu.matmul %296, %297, %cst_165 {dimension_numbers = #tpu.dot_dimension_numbers<[1], [0], [0], [1], [0, 0, 1, 1], [], []>} : vector<16x32xbf16>, vector<32x32xbf16>, vector<16x32xf32> -> vector<16x32xf32>
    %299 = arith.addf %288, %298 : vector<16x32xf32>
    %c7 = arith.constant 7 : index
    %c0_166 = arith.constant 0 : index
    %c0_167 = arith.constant 0 : index
    %300 = vector.load %arg24[%c7, %c0_166, %c0_167] : memref<9x16x16xf32, #tpu.memory_space<vmem>>, vector<1x16x16xf32>
    %301 = vector.shape_cast %300 : vector<1x16x16xf32> to vector<16x16xf32>
    %302 = arith.truncf %301 : vector<16x16xf32> to vector<16x16xbf16>
    %303 = arith.truncf %221 : vector<16x32xf32> to vector<16x32xbf16>
    %cst_168 = arith.constant dense<0.000000e+00> : vector<16x32xf32>
    %304 = tpu.matmul %302, %303, %cst_168 {dimension_numbers = #tpu.dot_dimension_numbers<[1], [0], [0], [1], [0, 0, 1, 1], [], []>} : vector<16x16xbf16>, vector<16x32xbf16>, vector<16x32xf32> -> vector<16x32xf32>
    %c7_169 = arith.constant 7 : index
    %c0_170 = arith.constant 0 : index
    %c0_171 = arith.constant 0 : index
    %305 = vector.load %arg25[%c7_169, %c0_170, %c0_171] : memref<9x32x32xf32, #tpu.memory_space<vmem>>, vector<1x32x32xf32>
    %306 = vector.shape_cast %305 : vector<1x32x32xf32> to vector<32x32xf32>
    %307 = arith.truncf %304 : vector<16x32xf32> to vector<16x32xbf16>
    %308 = arith.truncf %306 : vector<32x32xf32> to vector<32x32xbf16>
    %cst_172 = arith.constant dense<0.000000e+00> : vector<16x32xf32>
    %309 = tpu.matmul %307, %308, %cst_172 {dimension_numbers = #tpu.dot_dimension_numbers<[1], [0], [0], [1], [0, 0, 1, 1], [], []>} : vector<16x32xbf16>, vector<32x32xbf16>, vector<16x32xf32> -> vector<16x32xf32>
    %310 = arith.addf %299, %309 : vector<16x32xf32>
    %c8 = arith.constant 8 : index
    %c0_173 = arith.constant 0 : index
    %c0_174 = arith.constant 0 : index
    %311 = vector.load %arg24[%c8, %c0_173, %c0_174] : memref<9x16x16xf32, #tpu.memory_space<vmem>>, vector<1x16x16xf32>
    %312 = vector.shape_cast %311 : vector<1x16x16xf32> to vector<16x16xf32>
    %313 = arith.truncf %312 : vector<16x16xf32> to vector<16x16xbf16>
    %314 = arith.truncf %221 : vector<16x32xf32> to vector<16x32xbf16>
    %cst_175 = arith.constant dense<0.000000e+00> : vector<16x32xf32>
    %315 = tpu.matmul %313, %314, %cst_175 {dimension_numbers = #tpu.dot_dimension_numbers<[1], [0], [0], [1], [0, 0, 1, 1], [], []>} : vector<16x16xbf16>, vector<16x32xbf16>, vector<16x32xf32> -> vector<16x32xf32>
    %c8_176 = arith.constant 8 : index
    %c0_177 = arith.constant 0 : index
    %c0_178 = arith.constant 0 : index
    %316 = vector.load %arg25[%c8_176, %c0_177, %c0_178] : memref<9x32x32xf32, #tpu.memory_space<vmem>>, vector<1x32x32xf32>
    %317 = vector.shape_cast %316 : vector<1x32x32xf32> to vector<32x32xf32>
    %318 = arith.truncf %315 : vector<16x32xf32> to vector<16x32xbf16>
    %319 = arith.truncf %317 : vector<32x32xf32> to vector<32x32xbf16>
    %cst_179 = arith.constant dense<0.000000e+00> : vector<16x32xf32>
    %320 = tpu.matmul %318, %319, %cst_179 {dimension_numbers = #tpu.dot_dimension_numbers<[1], [0], [0], [1], [0, 0, 1, 1], [], []>} : vector<16x32xbf16>, vector<32x32xbf16>, vector<16x32xf32> -> vector<16x32xf32>
    %321 = arith.addf %310, %320 : vector<16x32xf32>
    %c0_180 = arith.constant 0 : index
    %c0_181 = arith.constant 0 : index
    %322 = vector.load %arg26[%c0_180, %c0_181] : memref<1x32xf32, #tpu.memory_space<vmem>>, vector<1x32xf32>
    %c0_182 = arith.constant 0 : index
    %c0_183 = arith.constant 0 : index
    %323 = vector.load %arg27[%c0_182, %c0_183] : memref<1x32xf32, #tpu.memory_space<vmem>>, vector<1x32xf32>
    %cst_184 = arith.constant dense<0.000000e+00> : vector<16xf32>
    %324 = vector.multi_reduction <add>, %321, %cst_184 [1] : vector<16x32xf32> to vector<16xf32>
    %325 = vector.shape_cast %324 : vector<16xf32> to vector<16x1xf32>
    %cst_185 = arith.constant 3.200000e+01 : f32
    %326 = vector.broadcast %cst_185 : f32 to vector<16x1xf32>
    %327 = arith.divf %325, %326 : vector<16x1xf32>
    %328 = vector.broadcast %327 : vector<16x1xf32> to vector<16x32xf32>
    %329 = arith.subf %321, %328 : vector<16x32xf32>
    %330 = arith.mulf %329, %329 : vector<16x32xf32>
    %cst_186 = arith.constant dense<0.000000e+00> : vector<16xf32>
    %331 = vector.multi_reduction <add>, %330, %cst_186 [1] : vector<16x32xf32> to vector<16xf32>
    %332 = vector.shape_cast %331 : vector<16xf32> to vector<16x1xf32>
    %cst_187 = arith.constant 3.200000e+01 : f32
    %333 = vector.broadcast %cst_187 : f32 to vector<16x1xf32>
    %334 = arith.divf %332, %333 : vector<16x1xf32>
    %335 = vector.broadcast %327 : vector<16x1xf32> to vector<16x32xf32>
    %336 = arith.subf %321, %335 : vector<16x32xf32>
    %cst_188 = arith.constant 9.99999997E-7 : f32
    %337 = vector.broadcast %cst_188 : f32 to vector<16x1xf32>
    %338 = arith.addf %334, %337 : vector<16x1xf32>
    %339 = math.rsqrt %338 : vector<16x1xf32>
    %340 = vector.broadcast %339 : vector<16x1xf32> to vector<16x32xf32>
    %341 = arith.mulf %336, %340 : vector<16x32xf32>
    %342 = vector.broadcast %322 : vector<1x32xf32> to vector<16x32xf32>
    %343 = arith.mulf %341, %342 : vector<16x32xf32>
    %344 = vector.broadcast %323 : vector<1x32xf32> to vector<16x32xf32>
    %345 = arith.addf %343, %344 : vector<16x32xf32>
    %c0_189 = arith.constant 0 : index
    %c0_190 = arith.constant 0 : index
    %c0_191 = arith.constant 0 : index
    %346 = vector.load %arg28[%c0_189, %c0_190, %c0_191] : memref<1x16x32xf32, #tpu.memory_space<vmem>>, vector<1x16x32xf32>
    %347 = vector.shape_cast %346 : vector<1x16x32xf32> to vector<16x32xf32>
    %348 = vector.shape_cast %345 : vector<16x32xf32> to vector<1x16x32xf32>
    tpu.vector_store %arg28[%c0_189, %c0_190, %c0_191], %348 {strides = array<i32>} : memref<1x16x32xf32, #tpu.memory_space<vmem>>, vector<1x16x32xf32>,
    return
  }
  func.func @transform_0(%arg0: i32) -> (i32, i32, i32) {
    %c0_i32 = arith.constant 0 : i32
    %c0_i32_0 = arith.constant 0 : i32
    %c0_i32_1 = arith.constant 0 : i32
    return %arg0, %c0_i32, %c0_i32_0 : i32, i32, i32
  }
  func.func @transform_1(%arg0: i32) -> (i32, i32) {
    %c0_i32 = arith.constant 0 : i32
    %c0_i32_0 = arith.constant 0 : i32
    %c0_i32_1 = arith.constant 0 : i32
    return %c0_i32, %c0_i32_0 : i32, i32
  }
  func.func @transform_2(%arg0: i32) -> (i32, i32) {
    %c0_i32 = arith.constant 0 : i32
    %c0_i32_0 = arith.constant 0 : i32
    %c0_i32_1 = arith.constant 0 : i32
    return %c0_i32, %c0_i32_0 : i32, i32
  }
  func.func @transform_3(%arg0: i32) -> (i32, i32) {
    %c0_i32 = arith.constant 0 : i32
    %c0_i32_0 = arith.constant 0 : i32
    %c0_i32_1 = arith.constant 0 : i32
    return %c0_i32, %c0_i32_0 : i32, i32
  }
  func.func @transform_4(%arg0: i32) -> (i32, i32) {
    %c0_i32 = arith.constant 0 : i32
    %c0_i32_0 = arith.constant 0 : i32
    %c0_i32_1 = arith.constant 0 : i32
    return %c0_i32, %c0_i32_0 : i32, i32
  }
  func.func @transform_5(%arg0: i32) -> (i32, i32) {
    %c0_i32 = arith.constant 0 : i32
    %c0_i32_0 = arith.constant 0 : i32
    %c0_i32_1 = arith.constant 0 : i32
    return %c0_i32, %c0_i32_0 : i32, i32
  }
  func.func @transform_6(%arg0: i32) -> (i32, i32, i32) {
    %c0_i32 = arith.constant 0 : i32
    %c0_i32_0 = arith.constant 0 : i32
    %c0_i32_1 = arith.constant 0 : i32
    %c0_i32_2 = arith.constant 0 : i32
    return %c0_i32, %c0_i32_0, %c0_i32_1 : i32, i32, i32
  }
  func.func @transform_7(%arg0: i32) -> (i32, i32, i32) {
    %c0_i32 = arith.constant 0 : i32
    %c0_i32_0 = arith.constant 0 : i32
    %c0_i32_1 = arith.constant 0 : i32
    %c0_i32_2 = arith.constant 0 : i32
    return %c0_i32, %c0_i32_0, %c0_i32_1 : i32, i32, i32
  }
  func.func @transform_8(%arg0: i32) -> (i32, i32, i32) {
    %c0_i32 = arith.constant 0 : i32
    %c0_i32_0 = arith.constant 0 : i32
    %c0_i32_1 = arith.constant 0 : i32
    %c0_i32_2 = arith.constant 0 : i32
    return %c0_i32, %c0_i32_0, %c0_i32_1 : i32, i32, i32
  }
  func.func @transform_9(%arg0: i32) -> (i32, i32, i32) {
    %c0_i32 = arith.constant 0 : i32
    %c0_i32_0 = arith.constant 0 : i32
    %c0_i32_1 = arith.constant 0 : i32
    %c0_i32_2 = arith.constant 0 : i32
    return %c0_i32, %c0_i32_0, %c0_i32_1 : i32, i32, i32
  }
  func.func @transform_10(%arg0: i32) -> (i32, i32, i32) {
    %c0_i32 = arith.constant 0 : i32
    %c0_i32_0 = arith.constant 0 : i32
    %c0_i32_1 = arith.constant 0 : i32
    %c0_i32_2 = arith.constant 0 : i32
    return %c0_i32, %c0_i32_0, %c0_i32_1 : i32, i32, i32
  }
  func.func @transform_11(%arg0: i32) -> (i32, i32, i32) {
    %c0_i32 = arith.constant 0 : i32
    %c0_i32_0 = arith.constant 0 : i32
    %c0_i32_1 = arith.constant 0 : i32
    %c0_i32_2 = arith.constant 0 : i32
    return %c0_i32, %c0_i32_0, %c0_i32_1 : i32, i32, i32
  }
  func.func @transform_12(%arg0: i32) -> (i32, i32, i32) {
    %c0_i32 = arith.constant 0 : i32
    %c0_i32_0 = arith.constant 0 : i32
    %c0_i32_1 = arith.constant 0 : i32
    %c0_i32_2 = arith.constant 0 : i32
    return %c0_i32, %c0_i32_0, %c0_i32_1 : i32, i32, i32
  }
  func.func @transform_13(%arg0: i32) -> (i32, i32) {
    %c0_i32 = arith.constant 0 : i32
    %c0_i32_0 = arith.constant 0 : i32
    %c0_i32_1 = arith.constant 0 : i32
    return %c0_i32, %c0_i32_0 : i32, i32
  }
  func.func @transform_14(%arg0: i32) -> (i32, i32) {
    %c0_i32 = arith.constant 0 : i32
    %c0_i32_0 = arith.constant 0 : i32
    %c0_i32_1 = arith.constant 0 : i32
    return %c0_i32, %c0_i32_0 : i32, i32
  }
  func.func @transform_15(%arg0: i32) -> (i32, i32) {
    %c0_i32 = arith.constant 0 : i32
    %c0_i32_0 = arith.constant 0 : i32
    %c0_i32_1 = arith.constant 0 : i32
    return %c0_i32, %c0_i32_0 : i32, i32
  }
  func.func @transform_16(%arg0: i32) -> (i32, i32) {
    %c0_i32 = arith.constant 0 : i32
    %c0_i32_0 = arith.constant 0 : i32
    %c0_i32_1 = arith.constant 0 : i32
    return %c0_i32, %c0_i32_0 : i32, i32
  }
  func.func @transform_17(%arg0: i32) -> (i32, i32) {
    %c0_i32 = arith.constant 0 : i32
    %c0_i32_0 = arith.constant 0 : i32
    %c0_i32_1 = arith.constant 0 : i32
    return %c0_i32, %c0_i32_0 : i32, i32
  }
  func.func @transform_18(%arg0: i32) -> (i32, i32) {
    %c0_i32 = arith.constant 0 : i32
    %c0_i32_0 = arith.constant 0 : i32
    %c0_i32_1 = arith.constant 0 : i32
    return %c0_i32, %c0_i32_0 : i32, i32
  }
  func.func @transform_19(%arg0: i32) -> (i32, i32) {
    %c0_i32 = arith.constant 0 : i32
    %c0_i32_0 = arith.constant 0 : i32
    %c0_i32_1 = arith.constant 0 : i32
    return %c0_i32, %c0_i32_0 : i32, i32
  }
  func.func @transform_20(%arg0: i32) -> (i32, i32) {
    %c0_i32 = arith.constant 0 : i32
    %c0_i32_0 = arith.constant 0 : i32
    %c0_i32_1 = arith.constant 0 : i32
    return %c0_i32, %c0_i32_0 : i32, i32
  }
  func.func @transform_21(%arg0: i32) -> (i32, i32) {
    %c0_i32 = arith.constant 0 : i32
    %c0_i32_0 = arith.constant 0 : i32
    %c0_i32_1 = arith.constant 0 : i32
    return %c0_i32, %c0_i32_0 : i32, i32
  }
  func.func @transform_22(%arg0: i32) -> (i32, i32) {
    %c0_i32 = arith.constant 0 : i32
    %c0_i32_0 = arith.constant 0 : i32
    %c0_i32_1 = arith.constant 0 : i32
    return %c0_i32, %c0_i32_0 : i32, i32
  }
  func.func @transform_23(%arg0: i32) -> (i32, i32, i32) {
    %c0_i32 = arith.constant 0 : i32
    %c0_i32_0 = arith.constant 0 : i32
    %c0_i32_1 = arith.constant 0 : i32
    %c0_i32_2 = arith.constant 0 : i32
    return %c0_i32, %c0_i32_0, %c0_i32_1 : i32, i32, i32
  }
  func.func @transform_24(%arg0: i32) -> (i32, i32, i32) {
    %c0_i32 = arith.constant 0 : i32
    %c0_i32_0 = arith.constant 0 : i32
    %c0_i32_1 = arith.constant 0 : i32
    %c0_i32_2 = arith.constant 0 : i32
    return %c0_i32, %c0_i32_0, %c0_i32_1 : i32, i32, i32
  }
  func.func @transform_25(%arg0: i32) -> (i32, i32) {
    %c0_i32 = arith.constant 0 : i32
    %c0_i32_0 = arith.constant 0 : i32
    %c0_i32_1 = arith.constant 0 : i32
    return %c0_i32, %c0_i32_0 : i32, i32
  }
  func.func @transform_26(%arg0: i32) -> (i32, i32) {
    %c0_i32 = arith.constant 0 : i32
    %c0_i32_0 = arith.constant 0 : i32
    %c0_i32_1 = arith.constant 0 : i32
    return %c0_i32, %c0_i32_0 : i32, i32
  }
  func.func @transform_27(%arg0: i32) -> (i32, i32, i32) {
    %c0_i32 = arith.constant 0 : i32
    %c0_i32_0 = arith.constant 0 : i32
    %c0_i32_1 = arith.constant 0 : i32
    return %arg0, %c0_i32, %c0_i32_0 : i32, i32, i32
  }
}

module attributes {stable_mosaic.version = 11 : i64} {
  func.func @decoder_tail_kernel(%arg0: i32, %arg1: memref<1x8x32xf32, #tpu.memory_space<vmem>>, %arg2: memref<1x16x32xf32, #tpu.memory_space<vmem>>, %arg3: memref<4x32x8xf32, #tpu.memory_space<vmem>>, %arg4: memref<1x8xf32, #tpu.memory_space<vmem>>, %arg5: memref<4x64x16xf32, #tpu.memory_space<vmem>>, %arg6: memref<1x8xf32, #tpu.memory_space<vmem>>, %arg7: memref<1x8xf32, #tpu.memory_space<vmem>>, %arg8: memref<8x16xf32, #tpu.memory_space<vmem>>, %arg9: memref<1x16xf32, #tpu.memory_space<vmem>>, %arg10: memref<4x32x32xf32, #tpu.memory_space<vmem>>, %arg11: memref<4x1x32xf32, #tpu.memory_space<vmem>>, %arg12: memref<4x32x32xf32, #tpu.memory_space<vmem>>, %arg13: memref<4x1x32xf32, #tpu.memory_space<vmem>>, %arg14: memref<4x32x4xf32, #tpu.memory_space<vmem>>, %arg15: memref<4x1x4xf32, #tpu.memory_space<vmem>>, %arg16: memref<4x4x1xf32, #tpu.memory_space<vmem>>, %arg17: memref<16x4xf32, #tpu.memory_space<vmem>>, %arg18: memref<4x16xf32, #tpu.memory_space<vmem>>, %arg19: memref<16x16xf32, #tpu.memory_space<vmem>>, %arg20: memref<32x32xf32, #tpu.memory_space<vmem>>, %arg21: memref<1x32xf32, #tpu.memory_space<vmem>>, %arg22: memref<32x32xf32, #tpu.memory_space<vmem>>, %arg23: memref<1x32xf32, #tpu.memory_space<vmem>>, %arg24: memref<32x4xf32, #tpu.memory_space<vmem>>, %arg25: memref<1x4xf32, #tpu.memory_space<vmem>>, %arg26: memref<1x64x16xf32, #tpu.memory_space<vmem>>, %arg27: memref<1x1x4xf32, #tpu.memory_space<vmem>>) attributes {dimension_semantics = [#tpu.dimension_semantics<parallel>], iteration_bounds = array<i64: 1>, scalar_prefetch = 0 : i64, scratch_operands = 0 : i64, tpu.core_type = #tpu.core_type<tc>, window_params = [{transform_indices = @transform_0, window_bounds = array<i64: 1, 8, 32>}, {transform_indices = @transform_1, window_bounds = array<i64: 1, 16, 32>}, {pipeline_mode = #tpu.pipeline_mode<synchronous>, transform_indices = @transform_2, window_bounds = array<i64: 4, 32, 8>}, {pipeline_mode = #tpu.pipeline_mode<synchronous>, transform_indices = @transform_3, window_bounds = array<i64: 1, 8>}, {pipeline_mode = #tpu.pipeline_mode<synchronous>, transform_indices = @transform_4, window_bounds = array<i64: 4, 64, 16>}, {pipeline_mode = #tpu.pipeline_mode<synchronous>, transform_indices = @transform_5, window_bounds = array<i64: 1, 8>}, {pipeline_mode = #tpu.pipeline_mode<synchronous>, transform_indices = @transform_6, window_bounds = array<i64: 1, 8>}, {pipeline_mode = #tpu.pipeline_mode<synchronous>, transform_indices = @transform_7, window_bounds = array<i64: 8, 16>}, {pipeline_mode = #tpu.pipeline_mode<synchronous>, transform_indices = @transform_8, window_bounds = array<i64: 1, 16>}, {pipeline_mode = #tpu.pipeline_mode<synchronous>, transform_indices = @transform_9, window_bounds = array<i64: 4, 32, 32>}, {pipeline_mode = #tpu.pipeline_mode<synchronous>, transform_indices = @transform_10, window_bounds = array<i64: 4, 1, 32>}, {pipeline_mode = #tpu.pipeline_mode<synchronous>, transform_indices = @transform_11, window_bounds = array<i64: 4, 32, 32>}, {pipeline_mode = #tpu.pipeline_mode<synchronous>, transform_indices = @transform_12, window_bounds = array<i64: 4, 1, 32>}, {pipeline_mode = #tpu.pipeline_mode<synchronous>, transform_indices = @transform_13, window_bounds = array<i64: 4, 32, 4>}, {pipeline_mode = #tpu.pipeline_mode<synchronous>, transform_indices = @transform_14, window_bounds = array<i64: 4, 1, 4>}, {pipeline_mode = #tpu.pipeline_mode<synchronous>, transform_indices = @transform_15, window_bounds = array<i64: 4, 4, 1>}, {pipeline_mode = #tpu.pipeline_mode<synchronous>, transform_indices = @transform_16, window_bounds = array<i64: 16, 4>}, {pipeline_mode = #tpu.pipeline_mode<synchronous>, transform_indices = @transform_17, window_bounds = array<i64: 4, 16>}, {pipeline_mode = #tpu.pipeline_mode<synchronous>, transform_indices = @transform_18, window_bounds = array<i64: 16, 16>}, {pipeline_mode = #tpu.pipeline_mode<synchronous>, transform_indices = @transform_19, window_bounds = array<i64: 32, 32>}, {pipeline_mode = #tpu.pipeline_mode<synchronous>, transform_indices = @transform_20, window_bounds = array<i64: 1, 32>}, {pipeline_mode = #tpu.pipeline_mode<synchronous>, transform_indices = @transform_21, window_bounds = array<i64: 32, 32>}, {pipeline_mode = #tpu.pipeline_mode<synchronous>, transform_indices = @transform_22, window_bounds = array<i64: 1, 32>}, {pipeline_mode = #tpu.pipeline_mode<synchronous>, transform_indices = @transform_23, window_bounds = array<i64: 32, 4>}, {pipeline_mode = #tpu.pipeline_mode<synchronous>, transform_indices = @transform_24, window_bounds = array<i64: 1, 4>}, {transform_indices = @transform_25, window_bounds = array<i64: 1, 64, 16>}, {transform_indices = @transform_26, window_bounds = array<i64: 1, 1, 4>}]} {
    %c0 = arith.constant 0 : index
    %c0_0 = arith.constant 0 : index
    %c0_1 = arith.constant 0 : index
    %0 = vector.load %arg1[%c0, %c0_0, %c0_1] : memref<1x8x32xf32, #tpu.memory_space<vmem>>, vector<1x8x32xf32>
    %1 = vector.shape_cast %0 : vector<1x8x32xf32> to vector<8x32xf32>
    %c0_2 = arith.constant 0 : index
    %c0_3 = arith.constant 0 : index
    %c0_4 = arith.constant 0 : index
    %2 = vector.load %arg2[%c0_2, %c0_3, %c0_4] : memref<1x16x32xf32, #tpu.memory_space<vmem>>, vector<1x16x32xf32>
    %3 = vector.shape_cast %2 : vector<1x16x32xf32> to vector<16x32xf32>
    %4 = vector.extract_strided_slice %1 {offsets = [0, 0], sizes = [1, 32], strides = [1, 1]} : vector<8x32xf32> to vector<1x32xf32>
    %5 = vector.extract_strided_slice %1 {offsets = [1, 0], sizes = [4, 32], strides = [1, 1]} : vector<8x32xf32> to vector<4x32xf32>
    %cst = arith.constant 0.000000e+00 : f32
    %6 = vector.broadcast %cst : f32 to vector<64x8xf32>
    %c0_5 = arith.constant 0 : index
    %c0_6 = arith.constant 0 : index
    %c0_7 = arith.constant 0 : index
    %7 = vector.load %arg5[%c0_5, %c0_6, %c0_7] : memref<4x64x16xf32, #tpu.memory_space<vmem>>, vector<1x64x16xf32>
    %8 = vector.shape_cast %7 : vector<1x64x16xf32> to vector<64x16xf32>
    %c0_8 = arith.constant 0 : index
    %c0_9 = arith.constant 0 : index
    %c0_10 = arith.constant 0 : index
    %9 = vector.load %arg3[%c0_8, %c0_9, %c0_10] : memref<4x32x8xf32, #tpu.memory_space<vmem>>, vector<1x32x8xf32>
    %10 = vector.shape_cast %9 : vector<1x32x8xf32> to vector<32x8xf32>
    %11 = arith.truncf %3 : vector<16x32xf32> to vector<16x32xbf16>
    %12 = arith.truncf %10 : vector<32x8xf32> to vector<32x8xbf16>
    %cst_11 = arith.constant dense<0.000000e+00> : vector<16x8xf32>
    %13 = tpu.matmul %11, %12, %cst_11 {dimension_numbers = #tpu.dot_dimension_numbers<[1], [0], [0], [1], [0, 0, 1, 1], [], []>} : vector<16x32xbf16>, vector<32x8xbf16>, vector<16x8xf32> -> vector<16x8xf32>
    %14 = arith.truncf %8 : vector<64x16xf32> to vector<64x16xbf16>
    %15 = arith.truncf %13 : vector<16x8xf32> to vector<16x8xbf16>
    %cst_12 = arith.constant dense<0.000000e+00> : vector<64x8xf32>
    %16 = tpu.matmul %14, %15, %cst_12 {dimension_numbers = #tpu.dot_dimension_numbers<[1], [0], [0], [1], [0, 0, 1, 1], [], []>} : vector<64x16xbf16>, vector<16x8xbf16>, vector<64x8xf32> -> vector<64x8xf32>
    %17 = arith.addf %6, %16 : vector<64x8xf32>
    %c1 = arith.constant 1 : index
    %c0_13 = arith.constant 0 : index
    %c0_14 = arith.constant 0 : index
    %18 = vector.load %arg5[%c1, %c0_13, %c0_14] : memref<4x64x16xf32, #tpu.memory_space<vmem>>, vector<1x64x16xf32>
    %19 = vector.shape_cast %18 : vector<1x64x16xf32> to vector<64x16xf32>
    %c1_15 = arith.constant 1 : index
    %c0_16 = arith.constant 0 : index
    %c0_17 = arith.constant 0 : index
    %20 = vector.load %arg3[%c1_15, %c0_16, %c0_17] : memref<4x32x8xf32, #tpu.memory_space<vmem>>, vector<1x32x8xf32>
    %21 = vector.shape_cast %20 : vector<1x32x8xf32> to vector<32x8xf32>
    %22 = arith.truncf %3 : vector<16x32xf32> to vector<16x32xbf16>
    %23 = arith.truncf %21 : vector<32x8xf32> to vector<32x8xbf16>
    %cst_18 = arith.constant dense<0.000000e+00> : vector<16x8xf32>
    %24 = tpu.matmul %22, %23, %cst_18 {dimension_numbers = #tpu.dot_dimension_numbers<[1], [0], [0], [1], [0, 0, 1, 1], [], []>} : vector<16x32xbf16>, vector<32x8xbf16>, vector<16x8xf32> -> vector<16x8xf32>
    %25 = arith.truncf %19 : vector<64x16xf32> to vector<64x16xbf16>
    %26 = arith.truncf %24 : vector<16x8xf32> to vector<16x8xbf16>
    %cst_19 = arith.constant dense<0.000000e+00> : vector<64x8xf32>
    %27 = tpu.matmul %25, %26, %cst_19 {dimension_numbers = #tpu.dot_dimension_numbers<[1], [0], [0], [1], [0, 0, 1, 1], [], []>} : vector<64x16xbf16>, vector<16x8xbf16>, vector<64x8xf32> -> vector<64x8xf32>
    %28 = arith.addf %17, %27 : vector<64x8xf32>
    %c2 = arith.constant 2 : index
    %c0_20 = arith.constant 0 : index
    %c0_21 = arith.constant 0 : index
    %29 = vector.load %arg5[%c2, %c0_20, %c0_21] : memref<4x64x16xf32, #tpu.memory_space<vmem>>, vector<1x64x16xf32>
    %30 = vector.shape_cast %29 : vector<1x64x16xf32> to vector<64x16xf32>
    %c2_22 = arith.constant 2 : index
    %c0_23 = arith.constant 0 : index
    %c0_24 = arith.constant 0 : index
    %31 = vector.load %arg3[%c2_22, %c0_23, %c0_24] : memref<4x32x8xf32, #tpu.memory_space<vmem>>, vector<1x32x8xf32>
    %32 = vector.shape_cast %31 : vector<1x32x8xf32> to vector<32x8xf32>
    %33 = arith.truncf %3 : vector<16x32xf32> to vector<16x32xbf16>
    %34 = arith.truncf %32 : vector<32x8xf32> to vector<32x8xbf16>
    %cst_25 = arith.constant dense<0.000000e+00> : vector<16x8xf32>
    %35 = tpu.matmul %33, %34, %cst_25 {dimension_numbers = #tpu.dot_dimension_numbers<[1], [0], [0], [1], [0, 0, 1, 1], [], []>} : vector<16x32xbf16>, vector<32x8xbf16>, vector<16x8xf32> -> vector<16x8xf32>
    %36 = arith.truncf %30 : vector<64x16xf32> to vector<64x16xbf16>
    %37 = arith.truncf %35 : vector<16x8xf32> to vector<16x8xbf16>
    %cst_26 = arith.constant dense<0.000000e+00> : vector<64x8xf32>
    %38 = tpu.matmul %36, %37, %cst_26 {dimension_numbers = #tpu.dot_dimension_numbers<[1], [0], [0], [1], [0, 0, 1, 1], [], []>} : vector<64x16xbf16>, vector<16x8xbf16>, vector<64x8xf32> -> vector<64x8xf32>
    %39 = arith.addf %28, %38 : vector<64x8xf32>
    %c3 = arith.constant 3 : index
    %c0_27 = arith.constant 0 : index
    %c0_28 = arith.constant 0 : index
    %40 = vector.load %arg5[%c3, %c0_27, %c0_28] : memref<4x64x16xf32, #tpu.memory_space<vmem>>, vector<1x64x16xf32>
    %41 = vector.shape_cast %40 : vector<1x64x16xf32> to vector<64x16xf32>
    %c3_29 = arith.constant 3 : index
    %c0_30 = arith.constant 0 : index
    %c0_31 = arith.constant 0 : index
    %42 = vector.load %arg3[%c3_29, %c0_30, %c0_31] : memref<4x32x8xf32, #tpu.memory_space<vmem>>, vector<1x32x8xf32>
    %43 = vector.shape_cast %42 : vector<1x32x8xf32> to vector<32x8xf32>
    %44 = arith.truncf %3 : vector<16x32xf32> to vector<16x32xbf16>
    %45 = arith.truncf %43 : vector<32x8xf32> to vector<32x8xbf16>
    %cst_32 = arith.constant dense<0.000000e+00> : vector<16x8xf32>
    %46 = tpu.matmul %44, %45, %cst_32 {dimension_numbers = #tpu.dot_dimension_numbers<[1], [0], [0], [1], [0, 0, 1, 1], [], []>} : vector<16x32xbf16>, vector<32x8xbf16>, vector<16x8xf32> -> vector<16x8xf32>
    %47 = arith.truncf %41 : vector<64x16xf32> to vector<64x16xbf16>
    %48 = arith.truncf %46 : vector<16x8xf32> to vector<16x8xbf16>
    %cst_33 = arith.constant dense<0.000000e+00> : vector<64x8xf32>
    %49 = tpu.matmul %47, %48, %cst_33 {dimension_numbers = #tpu.dot_dimension_numbers<[1], [0], [0], [1], [0, 0, 1, 1], [], []>} : vector<64x16xbf16>, vector<16x8xbf16>, vector<64x8xf32> -> vector<64x8xf32>
    %50 = arith.addf %39, %49 : vector<64x8xf32>
    %c0_34 = arith.constant 0 : index
    %c0_35 = arith.constant 0 : index
    %51 = vector.load %arg4[%c0_34, %c0_35] : memref<1x8xf32, #tpu.memory_space<vmem>>, vector<1x8xf32>
    %52 = vector.broadcast %51 : vector<1x8xf32> to vector<64x8xf32>
    %53 = arith.addf %50, %52 : vector<64x8xf32>
    %c0_36 = arith.constant 0 : index
    %c0_37 = arith.constant 0 : index
    %54 = vector.load %arg6[%c0_36, %c0_37] : memref<1x8xf32, #tpu.memory_space<vmem>>, vector<1x8xf32>
    %c0_38 = arith.constant 0 : index
    %c0_39 = arith.constant 0 : index
    %55 = vector.load %arg7[%c0_38, %c0_39] : memref<1x8xf32, #tpu.memory_space<vmem>>, vector<1x8xf32>
    %cst_40 = arith.constant dense<0.000000e+00> : vector<64xf32>
    %56 = vector.multi_reduction <add>, %53, %cst_40 [1] : vector<64x8xf32> to vector<64xf32>
    %57 = vector.shape_cast %56 : vector<64xf32> to vector<64x1xf32>
    %cst_41 = arith.constant 8.000000e+00 : f32
    %58 = vector.broadcast %cst_41 : f32 to vector<64x1xf32>
    %59 = arith.divf %57, %58 : vector<64x1xf32>
    %60 = vector.broadcast %59 : vector<64x1xf32> to vector<64x8xf32>
    %61 = arith.subf %53, %60 : vector<64x8xf32>
    %62 = arith.mulf %61, %61 : vector<64x8xf32>
    %cst_42 = arith.constant dense<0.000000e+00> : vector<64xf32>
    %63 = vector.multi_reduction <add>, %62, %cst_42 [1] : vector<64x8xf32> to vector<64xf32>
    %64 = vector.shape_cast %63 : vector<64xf32> to vector<64x1xf32>
    %cst_43 = arith.constant 8.000000e+00 : f32
    %65 = vector.broadcast %cst_43 : f32 to vector<64x1xf32>
    %66 = arith.divf %64, %65 : vector<64x1xf32>
    %67 = vector.broadcast %59 : vector<64x1xf32> to vector<64x8xf32>
    %68 = arith.subf %53, %67 : vector<64x8xf32>
    %cst_44 = arith.constant 9.99999997E-7 : f32
    %69 = vector.broadcast %cst_44 : f32 to vector<64x1xf32>
    %70 = arith.addf %66, %69 : vector<64x1xf32>
    %71 = math.rsqrt %70 : vector<64x1xf32>
    %72 = vector.broadcast %71 : vector<64x1xf32> to vector<64x8xf32>
    %73 = arith.mulf %68, %72 : vector<64x8xf32>
    %74 = vector.broadcast %54 : vector<1x8xf32> to vector<64x8xf32>
    %75 = arith.mulf %73, %74 : vector<64x8xf32>
    %76 = vector.broadcast %55 : vector<1x8xf32> to vector<64x8xf32>
    %77 = arith.addf %75, %76 : vector<64x8xf32>
    %78 = arith.mulf %77, %77 : vector<64x8xf32>
    %79 = arith.mulf %77, %78 : vector<64x8xf32>
    %cst_45 = arith.constant 4.471500e-02 : f32
    %80 = vector.broadcast %cst_45 : f32 to vector<64x8xf32>
    %81 = arith.mulf %80, %79 : vector<64x8xf32>
    %82 = arith.addf %77, %81 : vector<64x8xf32>
    %cst_46 = arith.constant 0.797884583 : f32
    %83 = vector.broadcast %cst_46 : f32 to vector<64x8xf32>
    %84 = arith.mulf %83, %82 : vector<64x8xf32>
    %85 = math.tanh %84 : vector<64x8xf32>
    %cst_47 = arith.constant 1.000000e+00 : f32
    %86 = vector.broadcast %cst_47 : f32 to vector<64x8xf32>
    %87 = arith.addf %86, %85 : vector<64x8xf32>
    %cst_48 = arith.constant 5.000000e-01 : f32
    %88 = vector.broadcast %cst_48 : f32 to vector<64x8xf32>
    %89 = arith.mulf %88, %87 : vector<64x8xf32>
    %90 = arith.mulf %77, %89 : vector<64x8xf32>
    %c0_49 = arith.constant 0 : index
    %c0_50 = arith.constant 0 : index
    %91 = vector.load %arg8[%c0_49, %c0_50] : memref<8x16xf32, #tpu.memory_space<vmem>>, vector<8x16xf32>
    %92 = arith.truncf %90 : vector<64x8xf32> to vector<64x8xbf16>
    %93 = arith.truncf %91 : vector<8x16xf32> to vector<8x16xbf16>
    %cst_51 = arith.constant dense<0.000000e+00> : vector<64x16xf32>
    %94 = tpu.matmul %92, %93, %cst_51 {dimension_numbers = #tpu.dot_dimension_numbers<[1], [0], [0], [1], [0, 0, 1, 1], [], []>} : vector<64x8xbf16>, vector<8x16xbf16>, vector<64x16xf32> -> vector<64x16xf32>
    %c0_52 = arith.constant 0 : index
    %c0_53 = arith.constant 0 : index
    %95 = vector.load %arg9[%c0_52, %c0_53] : memref<1x16xf32, #tpu.memory_space<vmem>>, vector<1x16xf32>
    %96 = vector.broadcast %95 : vector<1x16xf32> to vector<64x16xf32>
    %97 = arith.addf %94, %96 : vector<64x16xf32>
    %98 = arith.mulf %97, %97 : vector<64x16xf32>
    %99 = arith.mulf %97, %98 : vector<64x16xf32>
    %cst_54 = arith.constant 4.471500e-02 : f32
    %100 = vector.broadcast %cst_54 : f32 to vector<64x16xf32>
    %101 = arith.mulf %100, %99 : vector<64x16xf32>
    %102 = arith.addf %97, %101 : vector<64x16xf32>
    %cst_55 = arith.constant 0.797884583 : f32
    %103 = vector.broadcast %cst_55 : f32 to vector<64x16xf32>
    %104 = arith.mulf %103, %102 : vector<64x16xf32>
    %105 = math.tanh %104 : vector<64x16xf32>
    %cst_56 = arith.constant 1.000000e+00 : f32
    %106 = vector.broadcast %cst_56 : f32 to vector<64x16xf32>
    %107 = arith.addf %106, %105 : vector<64x16xf32>
    %cst_57 = arith.constant 5.000000e-01 : f32
    %108 = vector.broadcast %cst_57 : f32 to vector<64x16xf32>
    %109 = arith.mulf %108, %107 : vector<64x16xf32>
    %110 = arith.mulf %97, %109 : vector<64x16xf32>
    %cst_58 = arith.constant 0.000000e+00 : f32
    %111 = vector.broadcast %cst_58 : f32 to vector<4x4xf32>
    %112 = vector.extract_strided_slice %5 {offsets = [0, 0], sizes = [1, 32], strides = [1, 1]} : vector<4x32xf32> to vector<1x32xf32>
    %c0_59 = arith.constant 0 : index
    %c0_60 = arith.constant 0 : index
    %c0_61 = arith.constant 0 : index
    %113 = vector.load %arg10[%c0_59, %c0_60, %c0_61] : memref<4x32x32xf32, #tpu.memory_space<vmem>>, vector<1x32x32xf32>
    %114 = vector.shape_cast %113 : vector<1x32x32xf32> to vector<32x32xf32>
    %115 = arith.truncf %112 : vector<1x32xf32> to vector<1x32xbf16>
    %116 = arith.truncf %114 : vector<32x32xf32> to vector<32x32xbf16>
    %cst_62 = arith.constant dense<0.000000e+00> : vector<1x32xf32>
    %117 = tpu.matmul %115, %116, %cst_62 {dimension_numbers = #tpu.dot_dimension_numbers<[1], [0], [0], [1], [0, 0, 1, 1], [], []>} : vector<1x32xbf16>, vector<32x32xbf16>, vector<1x32xf32> -> vector<1x32xf32>
    %c0_63 = arith.constant 0 : index
    %c0_64 = arith.constant 0 : index
    %c0_65 = arith.constant 0 : index
    %118 = vector.load %arg11[%c0_63, %c0_64, %c0_65] : memref<4x1x32xf32, #tpu.memory_space<vmem>>, vector<1x1x32xf32>
    %119 = vector.shape_cast %118 : vector<1x1x32xf32> to vector<1x32xf32>
    %120 = arith.addf %117, %119 : vector<1x32xf32>
    %cst_66 = arith.constant 0.000000e+00 : f32
    %121 = vector.broadcast %cst_66 : f32 to vector<1x32xf32>
    %122 = arith.maximumf %120, %121 : vector<1x32xf32>
    %c0_67 = arith.constant 0 : index
    %c0_68 = arith.constant 0 : index
    %c0_69 = arith.constant 0 : index
    %123 = vector.load %arg12[%c0_67, %c0_68, %c0_69] : memref<4x32x32xf32, #tpu.memory_space<vmem>>, vector<1x32x32xf32>
    %124 = vector.shape_cast %123 : vector<1x32x32xf32> to vector<32x32xf32>
    %125 = arith.truncf %122 : vector<1x32xf32> to vector<1x32xbf16>
    %126 = arith.truncf %124 : vector<32x32xf32> to vector<32x32xbf16>
    %cst_70 = arith.constant dense<0.000000e+00> : vector<1x32xf32>
    %127 = tpu.matmul %125, %126, %cst_70 {dimension_numbers = #tpu.dot_dimension_numbers<[1], [0], [0], [1], [0, 0, 1, 1], [], []>} : vector<1x32xbf16>, vector<32x32xbf16>, vector<1x32xf32> -> vector<1x32xf32>
    %c0_71 = arith.constant 0 : index
    %c0_72 = arith.constant 0 : index
    %c0_73 = arith.constant 0 : index
    %128 = vector.load %arg13[%c0_71, %c0_72, %c0_73] : memref<4x1x32xf32, #tpu.memory_space<vmem>>, vector<1x1x32xf32>
    %129 = vector.shape_cast %128 : vector<1x1x32xf32> to vector<1x32xf32>
    %130 = arith.addf %127, %129 : vector<1x32xf32>
    %cst_74 = arith.constant 0.000000e+00 : f32
    %131 = vector.broadcast %cst_74 : f32 to vector<1x32xf32>
    %132 = arith.maximumf %130, %131 : vector<1x32xf32>
    %c0_75 = arith.constant 0 : index
    %c0_76 = arith.constant 0 : index
    %c0_77 = arith.constant 0 : index
    %133 = vector.load %arg14[%c0_75, %c0_76, %c0_77] : memref<4x32x4xf32, #tpu.memory_space<vmem>>, vector<1x32x4xf32>
    %134 = vector.shape_cast %133 : vector<1x32x4xf32> to vector<32x4xf32>
    %135 = arith.truncf %132 : vector<1x32xf32> to vector<1x32xbf16>
    %136 = arith.truncf %134 : vector<32x4xf32> to vector<32x4xbf16>
    %cst_78 = arith.constant dense<0.000000e+00> : vector<1x4xf32>
    %137 = tpu.matmul %135, %136, %cst_78 {dimension_numbers = #tpu.dot_dimension_numbers<[1], [0], [0], [1], [0, 0, 1, 1], [], []>} : vector<1x32xbf16>, vector<32x4xbf16>, vector<1x4xf32> -> vector<1x4xf32>
    %c0_79 = arith.constant 0 : index
    %c0_80 = arith.constant 0 : index
    %c0_81 = arith.constant 0 : index
    %138 = vector.load %arg15[%c0_79, %c0_80, %c0_81] : memref<4x1x4xf32, #tpu.memory_space<vmem>>, vector<1x1x4xf32>
    %139 = vector.shape_cast %138 : vector<1x1x4xf32> to vector<1x4xf32>
    %140 = arith.addf %137, %139 : vector<1x4xf32>
    %c0_82 = arith.constant 0 : index
    %c0_83 = arith.constant 0 : index
    %c0_84 = arith.constant 0 : index
    %141 = vector.load %arg16[%c0_82, %c0_83, %c0_84] : memref<4x4x1xf32, #tpu.memory_space<vmem>>, vector<1x4x1xf32>
    %142 = vector.shape_cast %141 : vector<1x4x1xf32> to vector<4x1xf32>
    %143 = vector.broadcast %142 : vector<4x1xf32> to vector<4x4xf32>
    %144 = vector.broadcast %140 : vector<1x4xf32> to vector<4x4xf32>
    %145 = arith.mulf %143, %144 : vector<4x4xf32>
    %146 = arith.addf %111, %145 : vector<4x4xf32>
    %147 = vector.extract_strided_slice %5 {offsets = [1, 0], sizes = [1, 32], strides = [1, 1]} : vector<4x32xf32> to vector<1x32xf32>
    %c1_85 = arith.constant 1 : index
    %c0_86 = arith.constant 0 : index
    %c0_87 = arith.constant 0 : index
    %148 = vector.load %arg10[%c1_85, %c0_86, %c0_87] : memref<4x32x32xf32, #tpu.memory_space<vmem>>, vector<1x32x32xf32>
    %149 = vector.shape_cast %148 : vector<1x32x32xf32> to vector<32x32xf32>
    %150 = arith.truncf %147 : vector<1x32xf32> to vector<1x32xbf16>
    %151 = arith.truncf %149 : vector<32x32xf32> to vector<32x32xbf16>
    %cst_88 = arith.constant dense<0.000000e+00> : vector<1x32xf32>
    %152 = tpu.matmul %150, %151, %cst_88 {dimension_numbers = #tpu.dot_dimension_numbers<[1], [0], [0], [1], [0, 0, 1, 1], [], []>} : vector<1x32xbf16>, vector<32x32xbf16>, vector<1x32xf32> -> vector<1x32xf32>
    %c1_89 = arith.constant 1 : index
    %c0_90 = arith.constant 0 : index
    %c0_91 = arith.constant 0 : index
    %153 = vector.load %arg11[%c1_89, %c0_90, %c0_91] : memref<4x1x32xf32, #tpu.memory_space<vmem>>, vector<1x1x32xf32>
    %154 = vector.shape_cast %153 : vector<1x1x32xf32> to vector<1x32xf32>
    %155 = arith.addf %152, %154 : vector<1x32xf32>
    %cst_92 = arith.constant 0.000000e+00 : f32
    %156 = vector.broadcast %cst_92 : f32 to vector<1x32xf32>
    %157 = arith.maximumf %155, %156 : vector<1x32xf32>
    %c1_93 = arith.constant 1 : index
    %c0_94 = arith.constant 0 : index
    %c0_95 = arith.constant 0 : index
    %158 = vector.load %arg12[%c1_93, %c0_94, %c0_95] : memref<4x32x32xf32, #tpu.memory_space<vmem>>, vector<1x32x32xf32>
    %159 = vector.shape_cast %158 : vector<1x32x32xf32> to vector<32x32xf32>
    %160 = arith.truncf %157 : vector<1x32xf32> to vector<1x32xbf16>
    %161 = arith.truncf %159 : vector<32x32xf32> to vector<32x32xbf16>
    %cst_96 = arith.constant dense<0.000000e+00> : vector<1x32xf32>
    %162 = tpu.matmul %160, %161, %cst_96 {dimension_numbers = #tpu.dot_dimension_numbers<[1], [0], [0], [1], [0, 0, 1, 1], [], []>} : vector<1x32xbf16>, vector<32x32xbf16>, vector<1x32xf32> -> vector<1x32xf32>
    %c1_97 = arith.constant 1 : index
    %c0_98 = arith.constant 0 : index
    %c0_99 = arith.constant 0 : index
    %163 = vector.load %arg13[%c1_97, %c0_98, %c0_99] : memref<4x1x32xf32, #tpu.memory_space<vmem>>, vector<1x1x32xf32>
    %164 = vector.shape_cast %163 : vector<1x1x32xf32> to vector<1x32xf32>
    %165 = arith.addf %162, %164 : vector<1x32xf32>
    %cst_100 = arith.constant 0.000000e+00 : f32
    %166 = vector.broadcast %cst_100 : f32 to vector<1x32xf32>
    %167 = arith.maximumf %165, %166 : vector<1x32xf32>
    %c1_101 = arith.constant 1 : index
    %c0_102 = arith.constant 0 : index
    %c0_103 = arith.constant 0 : index
    %168 = vector.load %arg14[%c1_101, %c0_102, %c0_103] : memref<4x32x4xf32, #tpu.memory_space<vmem>>, vector<1x32x4xf32>
    %169 = vector.shape_cast %168 : vector<1x32x4xf32> to vector<32x4xf32>
    %170 = arith.truncf %167 : vector<1x32xf32> to vector<1x32xbf16>
    %171 = arith.truncf %169 : vector<32x4xf32> to vector<32x4xbf16>
    %cst_104 = arith.constant dense<0.000000e+00> : vector<1x4xf32>
    %172 = tpu.matmul %170, %171, %cst_104 {dimension_numbers = #tpu.dot_dimension_numbers<[1], [0], [0], [1], [0, 0, 1, 1], [], []>} : vector<1x32xbf16>, vector<32x4xbf16>, vector<1x4xf32> -> vector<1x4xf32>
    %c1_105 = arith.constant 1 : index
    %c0_106 = arith.constant 0 : index
    %c0_107 = arith.constant 0 : index
    %173 = vector.load %arg15[%c1_105, %c0_106, %c0_107] : memref<4x1x4xf32, #tpu.memory_space<vmem>>, vector<1x1x4xf32>
    %174 = vector.shape_cast %173 : vector<1x1x4xf32> to vector<1x4xf32>
    %175 = arith.addf %172, %174 : vector<1x4xf32>
    %c1_108 = arith.constant 1 : index
    %c0_109 = arith.constant 0 : index
    %c0_110 = arith.constant 0 : index
    %176 = vector.load %arg16[%c1_108, %c0_109, %c0_110] : memref<4x4x1xf32, #tpu.memory_space<vmem>>, vector<1x4x1xf32>
    %177 = vector.shape_cast %176 : vector<1x4x1xf32> to vector<4x1xf32>
    %178 = vector.broadcast %177 : vector<4x1xf32> to vector<4x4xf32>
    %179 = vector.broadcast %175 : vector<1x4xf32> to vector<4x4xf32>
    %180 = arith.mulf %178, %179 : vector<4x4xf32>
    %181 = arith.addf %146, %180 : vector<4x4xf32>
    %182 = vector.extract_strided_slice %5 {offsets = [2, 0], sizes = [1, 32], strides = [1, 1]} : vector<4x32xf32> to vector<1x32xf32>
    %c2_111 = arith.constant 2 : index
    %c0_112 = arith.constant 0 : index
    %c0_113 = arith.constant 0 : index
    %183 = vector.load %arg10[%c2_111, %c0_112, %c0_113] : memref<4x32x32xf32, #tpu.memory_space<vmem>>, vector<1x32x32xf32>
    %184 = vector.shape_cast %183 : vector<1x32x32xf32> to vector<32x32xf32>
    %185 = arith.truncf %182 : vector<1x32xf32> to vector<1x32xbf16>
    %186 = arith.truncf %184 : vector<32x32xf32> to vector<32x32xbf16>
    %cst_114 = arith.constant dense<0.000000e+00> : vector<1x32xf32>
    %187 = tpu.matmul %185, %186, %cst_114 {dimension_numbers = #tpu.dot_dimension_numbers<[1], [0], [0], [1], [0, 0, 1, 1], [], []>} : vector<1x32xbf16>, vector<32x32xbf16>, vector<1x32xf32> -> vector<1x32xf32>
    %c2_115 = arith.constant 2 : index
    %c0_116 = arith.constant 0 : index
    %c0_117 = arith.constant 0 : index
    %188 = vector.load %arg11[%c2_115, %c0_116, %c0_117] : memref<4x1x32xf32, #tpu.memory_space<vmem>>, vector<1x1x32xf32>
    %189 = vector.shape_cast %188 : vector<1x1x32xf32> to vector<1x32xf32>
    %190 = arith.addf %187, %189 : vector<1x32xf32>
    %cst_118 = arith.constant 0.000000e+00 : f32
    %191 = vector.broadcast %cst_118 : f32 to vector<1x32xf32>
    %192 = arith.maximumf %190, %191 : vector<1x32xf32>
    %c2_119 = arith.constant 2 : index
    %c0_120 = arith.constant 0 : index
    %c0_121 = arith.constant 0 : index
    %193 = vector.load %arg12[%c2_119, %c0_120, %c0_121] : memref<4x32x32xf32, #tpu.memory_space<vmem>>, vector<1x32x32xf32>
    %194 = vector.shape_cast %193 : vector<1x32x32xf32> to vector<32x32xf32>
    %195 = arith.truncf %192 : vector<1x32xf32> to vector<1x32xbf16>
    %196 = arith.truncf %194 : vector<32x32xf32> to vector<32x32xbf16>
    %cst_122 = arith.constant dense<0.000000e+00> : vector<1x32xf32>
    %197 = tpu.matmul %195, %196, %cst_122 {dimension_numbers = #tpu.dot_dimension_numbers<[1], [0], [0], [1], [0, 0, 1, 1], [], []>} : vector<1x32xbf16>, vector<32x32xbf16>, vector<1x32xf32> -> vector<1x32xf32>
    %c2_123 = arith.constant 2 : index
    %c0_124 = arith.constant 0 : index
    %c0_125 = arith.constant 0 : index
    %198 = vector.load %arg13[%c2_123, %c0_124, %c0_125] : memref<4x1x32xf32, #tpu.memory_space<vmem>>, vector<1x1x32xf32>
    %199 = vector.shape_cast %198 : vector<1x1x32xf32> to vector<1x32xf32>
    %200 = arith.addf %197, %199 : vector<1x32xf32>
    %cst_126 = arith.constant 0.000000e+00 : f32
    %201 = vector.broadcast %cst_126 : f32 to vector<1x32xf32>
    %202 = arith.maximumf %200, %201 : vector<1x32xf32>
    %c2_127 = arith.constant 2 : index
    %c0_128 = arith.constant 0 : index
    %c0_129 = arith.constant 0 : index
    %203 = vector.load %arg14[%c2_127, %c0_128, %c0_129] : memref<4x32x4xf32, #tpu.memory_space<vmem>>, vector<1x32x4xf32>
    %204 = vector.shape_cast %203 : vector<1x32x4xf32> to vector<32x4xf32>
    %205 = arith.truncf %202 : vector<1x32xf32> to vector<1x32xbf16>
    %206 = arith.truncf %204 : vector<32x4xf32> to vector<32x4xbf16>
    %cst_130 = arith.constant dense<0.000000e+00> : vector<1x4xf32>
    %207 = tpu.matmul %205, %206, %cst_130 {dimension_numbers = #tpu.dot_dimension_numbers<[1], [0], [0], [1], [0, 0, 1, 1], [], []>} : vector<1x32xbf16>, vector<32x4xbf16>, vector<1x4xf32> -> vector<1x4xf32>
    %c2_131 = arith.constant 2 : index
    %c0_132 = arith.constant 0 : index
    %c0_133 = arith.constant 0 : index
    %208 = vector.load %arg15[%c2_131, %c0_132, %c0_133] : memref<4x1x4xf32, #tpu.memory_space<vmem>>, vector<1x1x4xf32>
    %209 = vector.shape_cast %208 : vector<1x1x4xf32> to vector<1x4xf32>
    %210 = arith.addf %207, %209 : vector<1x4xf32>
    %c2_134 = arith.constant 2 : index
    %c0_135 = arith.constant 0 : index
    %c0_136 = arith.constant 0 : index
    %211 = vector.load %arg16[%c2_134, %c0_135, %c0_136] : memref<4x4x1xf32, #tpu.memory_space<vmem>>, vector<1x4x1xf32>
    %212 = vector.shape_cast %211 : vector<1x4x1xf32> to vector<4x1xf32>
    %213 = vector.broadcast %212 : vector<4x1xf32> to vector<4x4xf32>
    %214 = vector.broadcast %210 : vector<1x4xf32> to vector<4x4xf32>
    %215 = arith.mulf %213, %214 : vector<4x4xf32>
    %216 = arith.addf %181, %215 : vector<4x4xf32>
    %217 = vector.extract_strided_slice %5 {offsets = [3, 0], sizes = [1, 32], strides = [1, 1]} : vector<4x32xf32> to vector<1x32xf32>
    %c3_137 = arith.constant 3 : index
    %c0_138 = arith.constant 0 : index
    %c0_139 = arith.constant 0 : index
    %218 = vector.load %arg10[%c3_137, %c0_138, %c0_139] : memref<4x32x32xf32, #tpu.memory_space<vmem>>, vector<1x32x32xf32>
    %219 = vector.shape_cast %218 : vector<1x32x32xf32> to vector<32x32xf32>
    %220 = arith.truncf %217 : vector<1x32xf32> to vector<1x32xbf16>
    %221 = arith.truncf %219 : vector<32x32xf32> to vector<32x32xbf16>
    %cst_140 = arith.constant dense<0.000000e+00> : vector<1x32xf32>
    %222 = tpu.matmul %220, %221, %cst_140 {dimension_numbers = #tpu.dot_dimension_numbers<[1], [0], [0], [1], [0, 0, 1, 1], [], []>} : vector<1x32xbf16>, vector<32x32xbf16>, vector<1x32xf32> -> vector<1x32xf32>
    %c3_141 = arith.constant 3 : index
    %c0_142 = arith.constant 0 : index
    %c0_143 = arith.constant 0 : index
    %223 = vector.load %arg11[%c3_141, %c0_142, %c0_143] : memref<4x1x32xf32, #tpu.memory_space<vmem>>, vector<1x1x32xf32>
    %224 = vector.shape_cast %223 : vector<1x1x32xf32> to vector<1x32xf32>
    %225 = arith.addf %222, %224 : vector<1x32xf32>
    %cst_144 = arith.constant 0.000000e+00 : f32
    %226 = vector.broadcast %cst_144 : f32 to vector<1x32xf32>
    %227 = arith.maximumf %225, %226 : vector<1x32xf32>
    %c3_145 = arith.constant 3 : index
    %c0_146 = arith.constant 0 : index
    %c0_147 = arith.constant 0 : index
    %228 = vector.load %arg12[%c3_145, %c0_146, %c0_147] : memref<4x32x32xf32, #tpu.memory_space<vmem>>, vector<1x32x32xf32>
    %229 = vector.shape_cast %228 : vector<1x32x32xf32> to vector<32x32xf32>
    %230 = arith.truncf %227 : vector<1x32xf32> to vector<1x32xbf16>
    %231 = arith.truncf %229 : vector<32x32xf32> to vector<32x32xbf16>
    %cst_148 = arith.constant dense<0.000000e+00> : vector<1x32xf32>
    %232 = tpu.matmul %230, %231, %cst_148 {dimension_numbers = #tpu.dot_dimension_numbers<[1], [0], [0], [1], [0, 0, 1, 1], [], []>} : vector<1x32xbf16>, vector<32x32xbf16>, vector<1x32xf32> -> vector<1x32xf32>
    %c3_149 = arith.constant 3 : index
    %c0_150 = arith.constant 0 : index
    %c0_151 = arith.constant 0 : index
    %233 = vector.load %arg13[%c3_149, %c0_150, %c0_151] : memref<4x1x32xf32, #tpu.memory_space<vmem>>, vector<1x1x32xf32>
    %234 = vector.shape_cast %233 : vector<1x1x32xf32> to vector<1x32xf32>
    %235 = arith.addf %232, %234 : vector<1x32xf32>
    %cst_152 = arith.constant 0.000000e+00 : f32
    %236 = vector.broadcast %cst_152 : f32 to vector<1x32xf32>
    %237 = arith.maximumf %235, %236 : vector<1x32xf32>
    %c3_153 = arith.constant 3 : index
    %c0_154 = arith.constant 0 : index
    %c0_155 = arith.constant 0 : index
    %238 = vector.load %arg14[%c3_153, %c0_154, %c0_155] : memref<4x32x4xf32, #tpu.memory_space<vmem>>, vector<1x32x4xf32>
    %239 = vector.shape_cast %238 : vector<1x32x4xf32> to vector<32x4xf32>
    %240 = arith.truncf %237 : vector<1x32xf32> to vector<1x32xbf16>
    %241 = arith.truncf %239 : vector<32x4xf32> to vector<32x4xbf16>
    %cst_156 = arith.constant dense<0.000000e+00> : vector<1x4xf32>
    %242 = tpu.matmul %240, %241, %cst_156 {dimension_numbers = #tpu.dot_dimension_numbers<[1], [0], [0], [1], [0, 0, 1, 1], [], []>} : vector<1x32xbf16>, vector<32x4xbf16>, vector<1x4xf32> -> vector<1x4xf32>
    %c3_157 = arith.constant 3 : index
    %c0_158 = arith.constant 0 : index
    %c0_159 = arith.constant 0 : index
    %243 = vector.load %arg15[%c3_157, %c0_158, %c0_159] : memref<4x1x4xf32, #tpu.memory_space<vmem>>, vector<1x1x4xf32>
    %244 = vector.shape_cast %243 : vector<1x1x4xf32> to vector<1x4xf32>
    %245 = arith.addf %242, %244 : vector<1x4xf32>
    %c3_160 = arith.constant 3 : index
    %c0_161 = arith.constant 0 : index
    %c0_162 = arith.constant 0 : index
    %246 = vector.load %arg16[%c3_160, %c0_161, %c0_162] : memref<4x4x1xf32, #tpu.memory_space<vmem>>, vector<1x4x1xf32>
    %247 = vector.shape_cast %246 : vector<1x4x1xf32> to vector<4x1xf32>
    %248 = vector.broadcast %247 : vector<4x1xf32> to vector<4x4xf32>
    %249 = vector.broadcast %245 : vector<1x4xf32> to vector<4x4xf32>
    %250 = arith.mulf %248, %249 : vector<4x4xf32>
    %251 = arith.addf %216, %250 : vector<4x4xf32>
    %c0_163 = arith.constant 0 : index
    %c0_164 = arith.constant 0 : index
    %252 = vector.load %arg17[%c0_163, %c0_164] : memref<16x4xf32, #tpu.memory_space<vmem>>, vector<16x4xf32>
    %253 = arith.truncf %252 : vector<16x4xf32> to vector<16x4xbf16>
    %254 = arith.truncf %251 : vector<4x4xf32> to vector<4x4xbf16>
    %cst_165 = arith.constant dense<0.000000e+00> : vector<16x4xf32>
    %255 = tpu.matmul %253, %254, %cst_165 {dimension_numbers = #tpu.dot_dimension_numbers<[1], [1], [0], [0], [0, 0, 1, 0], [], []>} : vector<16x4xbf16>, vector<4x4xbf16>, vector<16x4xf32> -> vector<16x4xf32>
    %c0_166 = arith.constant 0 : index
    %c0_167 = arith.constant 0 : index
    %256 = vector.load %arg18[%c0_166, %c0_167] : memref<4x16xf32, #tpu.memory_space<vmem>>, vector<4x16xf32>
    %257 = arith.truncf %255 : vector<16x4xf32> to vector<16x4xbf16>
    %258 = arith.truncf %256 : vector<4x16xf32> to vector<4x16xbf16>
    %cst_168 = arith.constant dense<0.000000e+00> : vector<16x16xf32>
    %259 = tpu.matmul %257, %258, %cst_168 {dimension_numbers = #tpu.dot_dimension_numbers<[1], [0], [0], [1], [0, 0, 1, 1], [], []>} : vector<16x4xbf16>, vector<4x16xbf16>, vector<16x16xf32> -> vector<16x16xf32>
    %c0_169 = arith.constant 0 : index
    %c0_170 = arith.constant 0 : index
    %260 = vector.load %arg19[%c0_169, %c0_170] : memref<16x16xf32, #tpu.memory_space<vmem>>, vector<16x16xf32>
    %261 = arith.mulf %259, %260 : vector<16x16xf32>
    %262 = arith.truncf %110 : vector<64x16xf32> to vector<64x16xbf16>
    %263 = arith.truncf %261 : vector<16x16xf32> to vector<16x16xbf16>
    %cst_171 = arith.constant dense<0.000000e+00> : vector<64x16xf32>
    %264 = tpu.matmul %262, %263, %cst_171 {dimension_numbers = #tpu.dot_dimension_numbers<[1], [0], [0], [1], [0, 0, 1, 1], [], []>} : vector<64x16xbf16>, vector<16x16xbf16>, vector<64x16xf32> -> vector<64x16xf32>
    %c0_172 = arith.constant 0 : index
    %c0_173 = arith.constant 0 : index
    %c0_174 = arith.constant 0 : index
    %265 = vector.load %arg26[%c0_172, %c0_173, %c0_174] : memref<1x64x16xf32, #tpu.memory_space<vmem>>, vector<1x64x16xf32>
    %266 = vector.shape_cast %265 : vector<1x64x16xf32> to vector<64x16xf32>
    %267 = vector.shape_cast %264 : vector<64x16xf32> to vector<1x64x16xf32>
    tpu.vector_store %arg26[%c0_172, %c0_173, %c0_174], %267 {strides = array<i32>} : memref<1x64x16xf32, #tpu.memory_space<vmem>>, vector<1x64x16xf32>,
    %c0_175 = arith.constant 0 : index
    %c0_176 = arith.constant 0 : index
    %268 = vector.load %arg20[%c0_175, %c0_176] : memref<32x32xf32, #tpu.memory_space<vmem>>, vector<32x32xf32>
    %269 = arith.truncf %4 : vector<1x32xf32> to vector<1x32xbf16>
    %270 = arith.truncf %268 : vector<32x32xf32> to vector<32x32xbf16>
    %cst_177 = arith.constant dense<0.000000e+00> : vector<1x32xf32>
    %271 = tpu.matmul %269, %270, %cst_177 {dimension_numbers = #tpu.dot_dimension_numbers<[1], [0], [0], [1], [0, 0, 1, 1], [], []>} : vector<1x32xbf16>, vector<32x32xbf16>, vector<1x32xf32> -> vector<1x32xf32>
    %c0_178 = arith.constant 0 : index
    %c0_179 = arith.constant 0 : index
    %272 = vector.load %arg21[%c0_178, %c0_179] : memref<1x32xf32, #tpu.memory_space<vmem>>, vector<1x32xf32>
    %273 = arith.addf %271, %272 : vector<1x32xf32>
    %cst_180 = arith.constant 0.000000e+00 : f32
    %274 = vector.broadcast %cst_180 : f32 to vector<1x32xf32>
    %275 = arith.maximumf %273, %274 : vector<1x32xf32>
    %c0_181 = arith.constant 0 : index
    %c0_182 = arith.constant 0 : index
    %276 = vector.load %arg22[%c0_181, %c0_182] : memref<32x32xf32, #tpu.memory_space<vmem>>, vector<32x32xf32>
    %277 = arith.truncf %275 : vector<1x32xf32> to vector<1x32xbf16>
    %278 = arith.truncf %276 : vector<32x32xf32> to vector<32x32xbf16>
    %cst_183 = arith.constant dense<0.000000e+00> : vector<1x32xf32>
    %279 = tpu.matmul %277, %278, %cst_183 {dimension_numbers = #tpu.dot_dimension_numbers<[1], [0], [0], [1], [0, 0, 1, 1], [], []>} : vector<1x32xbf16>, vector<32x32xbf16>, vector<1x32xf32> -> vector<1x32xf32>
    %c0_184 = arith.constant 0 : index
    %c0_185 = arith.constant 0 : index
    %280 = vector.load %arg23[%c0_184, %c0_185] : memref<1x32xf32, #tpu.memory_space<vmem>>, vector<1x32xf32>
    %281 = arith.addf %279, %280 : vector<1x32xf32>
    %cst_186 = arith.constant 0.000000e+00 : f32
    %282 = vector.broadcast %cst_186 : f32 to vector<1x32xf32>
    %283 = arith.maximumf %281, %282 : vector<1x32xf32>
    %c0_187 = arith.constant 0 : index
    %c0_188 = arith.constant 0 : index
    %284 = vector.load %arg24[%c0_187, %c0_188] : memref<32x4xf32, #tpu.memory_space<vmem>>, vector<32x4xf32>
    %285 = arith.truncf %283 : vector<1x32xf32> to vector<1x32xbf16>
    %286 = arith.truncf %284 : vector<32x4xf32> to vector<32x4xbf16>
    %cst_189 = arith.constant dense<0.000000e+00> : vector<1x4xf32>
    %287 = tpu.matmul %285, %286, %cst_189 {dimension_numbers = #tpu.dot_dimension_numbers<[1], [0], [0], [1], [0, 0, 1, 1], [], []>} : vector<1x32xbf16>, vector<32x4xbf16>, vector<1x4xf32> -> vector<1x4xf32>
    %c0_190 = arith.constant 0 : index
    %c0_191 = arith.constant 0 : index
    %288 = vector.load %arg25[%c0_190, %c0_191] : memref<1x4xf32, #tpu.memory_space<vmem>>, vector<1x4xf32>
    %289 = arith.addf %287, %288 : vector<1x4xf32>
    %c0_192 = arith.constant 0 : index
    %c0_193 = arith.constant 0 : index
    %c0_194 = arith.constant 0 : index
    %290 = vector.load %arg27[%c0_192, %c0_193, %c0_194] : memref<1x1x4xf32, #tpu.memory_space<vmem>>, vector<1x1x4xf32>
    %291 = vector.shape_cast %290 : vector<1x1x4xf32> to vector<1x4xf32>
    %292 = vector.shape_cast %289 : vector<1x4xf32> to vector<1x1x4xf32>
    tpu.vector_store %arg27[%c0_192, %c0_193, %c0_194], %292 {strides = array<i32>} : memref<1x1x4xf32, #tpu.memory_space<vmem>>, vector<1x1x4xf32>,
    return
  }
  func.func @transform_0(%arg0: i32) -> (i32, i32, i32) {
    %c0_i32 = arith.constant 0 : i32
    %c0_i32_0 = arith.constant 0 : i32
    %c0_i32_1 = arith.constant 0 : i32
    return %arg0, %c0_i32, %c0_i32_0 : i32, i32, i32
  }
  func.func @transform_1(%arg0: i32) -> (i32, i32, i32) {
    %c0_i32 = arith.constant 0 : i32
    %c0_i32_0 = arith.constant 0 : i32
    %c0_i32_1 = arith.constant 0 : i32
    return %arg0, %c0_i32, %c0_i32_0 : i32, i32, i32
  }
  func.func @transform_2(%arg0: i32) -> (i32, i32, i32) {
    %c0_i32 = arith.constant 0 : i32
    %c0_i32_0 = arith.constant 0 : i32
    %c0_i32_1 = arith.constant 0 : i32
    %c0_i32_2 = arith.constant 0 : i32
    return %c0_i32, %c0_i32_0, %c0_i32_1 : i32, i32, i32
  }
  func.func @transform_3(%arg0: i32) -> (i32, i32) {
    %c0_i32 = arith.constant 0 : i32
    %c0_i32_0 = arith.constant 0 : i32
    %c0_i32_1 = arith.constant 0 : i32
    return %c0_i32, %c0_i32_0 : i32, i32
  }
  func.func @transform_4(%arg0: i32) -> (i32, i32, i32) {
    %c0_i32 = arith.constant 0 : i32
    %c0_i32_0 = arith.constant 0 : i32
    %c0_i32_1 = arith.constant 0 : i32
    %c0_i32_2 = arith.constant 0 : i32
    return %c0_i32, %c0_i32_0, %c0_i32_1 : i32, i32, i32
  }
  func.func @transform_5(%arg0: i32) -> (i32, i32) {
    %c0_i32 = arith.constant 0 : i32
    %c0_i32_0 = arith.constant 0 : i32
    %c0_i32_1 = arith.constant 0 : i32
    return %c0_i32, %c0_i32_0 : i32, i32
  }
  func.func @transform_6(%arg0: i32) -> (i32, i32) {
    %c0_i32 = arith.constant 0 : i32
    %c0_i32_0 = arith.constant 0 : i32
    %c0_i32_1 = arith.constant 0 : i32
    return %c0_i32, %c0_i32_0 : i32, i32
  }
  func.func @transform_7(%arg0: i32) -> (i32, i32) {
    %c0_i32 = arith.constant 0 : i32
    %c0_i32_0 = arith.constant 0 : i32
    %c0_i32_1 = arith.constant 0 : i32
    return %c0_i32, %c0_i32_0 : i32, i32
  }
  func.func @transform_8(%arg0: i32) -> (i32, i32) {
    %c0_i32 = arith.constant 0 : i32
    %c0_i32_0 = arith.constant 0 : i32
    %c0_i32_1 = arith.constant 0 : i32
    return %c0_i32, %c0_i32_0 : i32, i32
  }
  func.func @transform_9(%arg0: i32) -> (i32, i32, i32) {
    %c0_i32 = arith.constant 0 : i32
    %c0_i32_0 = arith.constant 0 : i32
    %c0_i32_1 = arith.constant 0 : i32
    %c0_i32_2 = arith.constant 0 : i32
    return %c0_i32, %c0_i32_0, %c0_i32_1 : i32, i32, i32
  }
  func.func @transform_10(%arg0: i32) -> (i32, i32, i32) {
    %c0_i32 = arith.constant 0 : i32
    %c0_i32_0 = arith.constant 0 : i32
    %c0_i32_1 = arith.constant 0 : i32
    %c0_i32_2 = arith.constant 0 : i32
    return %c0_i32, %c0_i32_0, %c0_i32_1 : i32, i32, i32
  }
  func.func @transform_11(%arg0: i32) -> (i32, i32, i32) {
    %c0_i32 = arith.constant 0 : i32
    %c0_i32_0 = arith.constant 0 : i32
    %c0_i32_1 = arith.constant 0 : i32
    %c0_i32_2 = arith.constant 0 : i32
    return %c0_i32, %c0_i32_0, %c0_i32_1 : i32, i32, i32
  }
  func.func @transform_12(%arg0: i32) -> (i32, i32, i32) {
    %c0_i32 = arith.constant 0 : i32
    %c0_i32_0 = arith.constant 0 : i32
    %c0_i32_1 = arith.constant 0 : i32
    %c0_i32_2 = arith.constant 0 : i32
    return %c0_i32, %c0_i32_0, %c0_i32_1 : i32, i32, i32
  }
  func.func @transform_13(%arg0: i32) -> (i32, i32, i32) {
    %c0_i32 = arith.constant 0 : i32
    %c0_i32_0 = arith.constant 0 : i32
    %c0_i32_1 = arith.constant 0 : i32
    %c0_i32_2 = arith.constant 0 : i32
    return %c0_i32, %c0_i32_0, %c0_i32_1 : i32, i32, i32
  }
  func.func @transform_14(%arg0: i32) -> (i32, i32, i32) {
    %c0_i32 = arith.constant 0 : i32
    %c0_i32_0 = arith.constant 0 : i32
    %c0_i32_1 = arith.constant 0 : i32
    %c0_i32_2 = arith.constant 0 : i32
    return %c0_i32, %c0_i32_0, %c0_i32_1 : i32, i32, i32
  }
  func.func @transform_15(%arg0: i32) -> (i32, i32, i32) {
    %c0_i32 = arith.constant 0 : i32
    %c0_i32_0 = arith.constant 0 : i32
    %c0_i32_1 = arith.constant 0 : i32
    %c0_i32_2 = arith.constant 0 : i32
    return %c0_i32, %c0_i32_0, %c0_i32_1 : i32, i32, i32
  }
  func.func @transform_16(%arg0: i32) -> (i32, i32) {
    %c0_i32 = arith.constant 0 : i32
    %c0_i32_0 = arith.constant 0 : i32
    %c0_i32_1 = arith.constant 0 : i32
    return %c0_i32, %c0_i32_0 : i32, i32
  }
  func.func @transform_17(%arg0: i32) -> (i32, i32) {
    %c0_i32 = arith.constant 0 : i32
    %c0_i32_0 = arith.constant 0 : i32
    %c0_i32_1 = arith.constant 0 : i32
    return %c0_i32, %c0_i32_0 : i32, i32
  }
  func.func @transform_18(%arg0: i32) -> (i32, i32) {
    %c0_i32 = arith.constant 0 : i32
    %c0_i32_0 = arith.constant 0 : i32
    %c0_i32_1 = arith.constant 0 : i32
    return %c0_i32, %c0_i32_0 : i32, i32
  }
  func.func @transform_19(%arg0: i32) -> (i32, i32) {
    %c0_i32 = arith.constant 0 : i32
    %c0_i32_0 = arith.constant 0 : i32
    %c0_i32_1 = arith.constant 0 : i32
    return %c0_i32, %c0_i32_0 : i32, i32
  }
  func.func @transform_20(%arg0: i32) -> (i32, i32) {
    %c0_i32 = arith.constant 0 : i32
    %c0_i32_0 = arith.constant 0 : i32
    %c0_i32_1 = arith.constant 0 : i32
    return %c0_i32, %c0_i32_0 : i32, i32
  }
  func.func @transform_21(%arg0: i32) -> (i32, i32) {
    %c0_i32 = arith.constant 0 : i32
    %c0_i32_0 = arith.constant 0 : i32
    %c0_i32_1 = arith.constant 0 : i32
    return %c0_i32, %c0_i32_0 : i32, i32
  }
  func.func @transform_22(%arg0: i32) -> (i32, i32) {
    %c0_i32 = arith.constant 0 : i32
    %c0_i32_0 = arith.constant 0 : i32
    %c0_i32_1 = arith.constant 0 : i32
    return %c0_i32, %c0_i32_0 : i32, i32
  }
  func.func @transform_23(%arg0: i32) -> (i32, i32) {
    %c0_i32 = arith.constant 0 : i32
    %c0_i32_0 = arith.constant 0 : i32
    %c0_i32_1 = arith.constant 0 : i32
    return %c0_i32, %c0_i32_0 : i32, i32
  }
  func.func @transform_24(%arg0: i32) -> (i32, i32) {
    %c0_i32 = arith.constant 0 : i32
    %c0_i32_0 = arith.constant 0 : i32
    %c0_i32_1 = arith.constant 0 : i32
    return %c0_i32, %c0_i32_0 : i32, i32
  }
  func.func @transform_25(%arg0: i32) -> (i32, i32, i32) {
    %c0_i32 = arith.constant 0 : i32
    %c0_i32_0 = arith.constant 0 : i32
    %c0_i32_1 = arith.constant 0 : i32
    return %arg0, %c0_i32, %c0_i32_0 : i32, i32, i32
  }
  func.func @transform_26(%arg0: i32) -> (i32, i32, i32) {
    %c0_i32 = arith.constant 0 : i32
    %c0_i32_0 = arith.constant 0 : i32
    %c0_i32_1 = arith.constant 0 : i32
    return %arg0, %c0_i32, %c0_i32_0 : i32, i32, i32
  }
}

module attributes {stable_mosaic.version = 11 : i64} {
  func.func @decoder_block_kernel(%arg0: i32, %arg1: memref<1x8x32xf32, #tpu.memory_space<vmem>>, %arg2: memref<1x16x32xf32, #tpu.memory_space<vmem>>, %arg3: memref<1x32xf32, #tpu.memory_space<vmem>>, %arg4: memref<16x32xf32, #tpu.memory_space<vmem>>, %arg5: memref<8x32x16xf32, #tpu.memory_space<vmem>>, %arg6: memref<8x32x16xf32, #tpu.memory_space<vmem>>, %arg7: memref<8x32x16xf32, #tpu.memory_space<vmem>>, %arg8: memref<8x1x16xf32, #tpu.memory_space<vmem>>, %arg9: memref<8x1x16xf32, #tpu.memory_space<vmem>>, %arg10: memref<8x1x16xf32, #tpu.memory_space<vmem>>, %arg11: memref<8x16x32xf32, #tpu.memory_space<vmem>>, %arg12: memref<4x1x32xf32, #tpu.memory_space<vmem>>, %arg13: memref<5x1x32xf32, #tpu.memory_space<vmem>>, %arg14: memref<5x1x32xf32, #tpu.memory_space<vmem>>, %arg15: memref<32x64xf32, #tpu.memory_space<vmem>>, %arg16: memref<1x64xf32, #tpu.memory_space<vmem>>, %arg17: memref<64x32xf32, #tpu.memory_space<vmem>>, %arg18: memref<1x32xf32, #tpu.memory_space<vmem>>, %arg19: memref<1x8x32xf32, #tpu.memory_space<vmem>>, %arg20: memref<1x16x32xf32, #tpu.memory_space<vmem>>) attributes {dimension_semantics = [#tpu.dimension_semantics<parallel>], iteration_bounds = array<i64: 1>, scalar_prefetch = 0 : i64, scratch_operands = 0 : i64, tpu.core_type = #tpu.core_type<tc>, window_params = [{transform_indices = @transform_0, window_bounds = array<i64: 1, 8, 32>}, {transform_indices = @transform_1, window_bounds = array<i64: 1, 16, 32>}, {pipeline_mode = #tpu.pipeline_mode<synchronous>, transform_indices = @transform_2, window_bounds = array<i64: 1, 32>}, {pipeline_mode = #tpu.pipeline_mode<synchronous>, transform_indices = @transform_3, window_bounds = array<i64: 16, 32>}, {pipeline_mode = #tpu.pipeline_mode<synchronous>, transform_indices = @transform_4, window_bounds = array<i64: 8, 32, 16>}, {pipeline_mode = #tpu.pipeline_mode<synchronous>, transform_indices = @transform_5, window_bounds = array<i64: 8, 32, 16>}, {pipeline_mode = #tpu.pipeline_mode<synchronous>, transform_indices = @transform_6, window_bounds = array<i64: 8, 32, 16>}, {pipeline_mode = #tpu.pipeline_mode<synchronous>, transform_indices = @transform_7, window_bounds = array<i64: 8, 1, 16>}, {pipeline_mode = #tpu.pipeline_mode<synchronous>, transform_indices = @transform_8, window_bounds = array<i64: 8, 1, 16>}, {pipeline_mode = #tpu.pipeline_mode<synchronous>, transform_indices = @transform_9, window_bounds = array<i64: 8, 1, 16>}, {pipeline_mode = #tpu.pipeline_mode<synchronous>, transform_indices = @transform_10, window_bounds = array<i64: 8, 16, 32>}, {pipeline_mode = #tpu.pipeline_mode<synchronous>, transform_indices = @transform_11, window_bounds = array<i64: 4, 1, 32>}, {pipeline_mode = #tpu.pipeline_mode<synchronous>, transform_indices = @transform_12, window_bounds = array<i64: 5, 1, 32>}, {pipeline_mode = #tpu.pipeline_mode<synchronous>, transform_indices = @transform_13, window_bounds = array<i64: 5, 1, 32>}, {pipeline_mode = #tpu.pipeline_mode<synchronous>, transform_indices = @transform_14, window_bounds = array<i64: 32, 64>}, {pipeline_mode = #tpu.pipeline_mode<synchronous>, transform_indices = @transform_15, window_bounds = array<i64: 1, 64>}, {pipeline_mode = #tpu.pipeline_mode<synchronous>, transform_indices = @transform_16, window_bounds = array<i64: 64, 32>}, {pipeline_mode = #tpu.pipeline_mode<synchronous>, transform_indices = @transform_17, window_bounds = array<i64: 1, 32>}, {transform_indices = @transform_18, window_bounds = array<i64: 1, 8, 32>}, {transform_indices = @transform_19, window_bounds = array<i64: 1, 16, 32>}]} {
    %c0 = arith.constant 0 : index
    %c0_0 = arith.constant 0 : index
    %c0_1 = arith.constant 0 : index
    %0 = vector.load %arg1[%c0, %c0_0, %c0_1] : memref<1x8x32xf32, #tpu.memory_space<vmem>>, vector<1x8x32xf32>
    %1 = vector.shape_cast %0 : vector<1x8x32xf32> to vector<8x32xf32>
    %c0_2 = arith.constant 0 : index
    %c0_3 = arith.constant 0 : index
    %c0_4 = arith.constant 0 : index
    %2 = vector.load %arg2[%c0_2, %c0_3, %c0_4] : memref<1x16x32xf32, #tpu.memory_space<vmem>>, vector<1x16x32xf32>
    %3 = vector.shape_cast %2 : vector<1x16x32xf32> to vector<16x32xf32>
    %c0_5 = arith.constant 0 : index
    %c0_6 = arith.constant 0 : index
    %4 = vector.load %arg3[%c0_5, %c0_6] : memref<1x32xf32, #tpu.memory_space<vmem>>, vector<1x32xf32>
    %5 = vector.broadcast %4 : vector<1x32xf32> to vector<16x32xf32>
    %6 = arith.addf %3, %5 : vector<16x32xf32>
    %c0_7 = arith.constant 0 : index
    %c0_8 = arith.constant 0 : index
    %7 = vector.load %arg4[%c0_7, %c0_8] : memref<16x32xf32, #tpu.memory_space<vmem>>, vector<16x32xf32>
    %cst = arith.constant 0.000000e+00 : f32
    %8 = vector.broadcast %cst : f32 to vector<8x32xf32>
    %c0_9 = arith.constant 0 : index
    %c0_10 = arith.constant 0 : index
    %c0_11 = arith.constant 0 : index
    %9 = vector.load %arg5[%c0_9, %c0_10, %c0_11] : memref<8x32x16xf32, #tpu.memory_space<vmem>>, vector<1x32x16xf32>
    %10 = vector.shape_cast %9 : vector<1x32x16xf32> to vector<32x16xf32>
    %11 = arith.truncf %1 : vector<8x32xf32> to vector<8x32xbf16>
    %12 = arith.truncf %10 : vector<32x16xf32> to vector<32x16xbf16>
    %cst_12 = arith.constant dense<0.000000e+00> : vector<8x16xf32>
    %13 = tpu.matmul %11, %12, %cst_12 {dimension_numbers = #tpu.dot_dimension_numbers<[1], [0], [0], [1], [0, 0, 1, 1], [], []>} : vector<8x32xbf16>, vector<32x16xbf16>, vector<8x16xf32> -> vector<8x16xf32>
    %c0_13 = arith.constant 0 : index
    %c0_14 = arith.constant 0 : index
    %c0_15 = arith.constant 0 : index
    %14 = vector.load %arg8[%c0_13, %c0_14, %c0_15] : memref<8x1x16xf32, #tpu.memory_space<vmem>>, vector<1x1x16xf32>
    %15 = vector.shape_cast %14 : vector<1x1x16xf32> to vector<1x16xf32>
    %16 = vector.broadcast %15 : vector<1x16xf32> to vector<8x16xf32>
    %17 = arith.addf %13, %16 : vector<8x16xf32>
    %c0_16 = arith.constant 0 : index
    %c0_17 = arith.constant 0 : index
    %c0_18 = arith.constant 0 : index
    %18 = vector.load %arg6[%c0_16, %c0_17, %c0_18] : memref<8x32x16xf32, #tpu.memory_space<vmem>>, vector<1x32x16xf32>
    %19 = vector.shape_cast %18 : vector<1x32x16xf32> to vector<32x16xf32>
    %20 = arith.truncf %1 : vector<8x32xf32> to vector<8x32xbf16>
    %21 = arith.truncf %19 : vector<32x16xf32> to vector<32x16xbf16>
    %cst_19 = arith.constant dense<0.000000e+00> : vector<8x16xf32>
    %22 = tpu.matmul %20, %21, %cst_19 {dimension_numbers = #tpu.dot_dimension_numbers<[1], [0], [0], [1], [0, 0, 1, 1], [], []>} : vector<8x32xbf16>, vector<32x16xbf16>, vector<8x16xf32> -> vector<8x16xf32>
    %c0_20 = arith.constant 0 : index
    %c0_21 = arith.constant 0 : index
    %c0_22 = arith.constant 0 : index
    %23 = vector.load %arg9[%c0_20, %c0_21, %c0_22] : memref<8x1x16xf32, #tpu.memory_space<vmem>>, vector<1x1x16xf32>
    %24 = vector.shape_cast %23 : vector<1x1x16xf32> to vector<1x16xf32>
    %25 = vector.broadcast %24 : vector<1x16xf32> to vector<8x16xf32>
    %26 = arith.addf %22, %25 : vector<8x16xf32>
    %c0_23 = arith.constant 0 : index
    %c0_24 = arith.constant 0 : index
    %c0_25 = arith.constant 0 : index
    %27 = vector.load %arg7[%c0_23, %c0_24, %c0_25] : memref<8x32x16xf32, #tpu.memory_space<vmem>>, vector<1x32x16xf32>
    %28 = vector.shape_cast %27 : vector<1x32x16xf32> to vector<32x16xf32>
    %29 = arith.truncf %1 : vector<8x32xf32> to vector<8x32xbf16>
    %30 = arith.truncf %28 : vector<32x16xf32> to vector<32x16xbf16>
    %cst_26 = arith.constant dense<0.000000e+00> : vector<8x16xf32>
    %31 = tpu.matmul %29, %30, %cst_26 {dimension_numbers = #tpu.dot_dimension_numbers<[1], [0], [0], [1], [0, 0, 1, 1], [], []>} : vector<8x32xbf16>, vector<32x16xbf16>, vector<8x16xf32> -> vector<8x16xf32>
    %c0_27 = arith.constant 0 : index
    %c0_28 = arith.constant 0 : index
    %c0_29 = arith.constant 0 : index
    %32 = vector.load %arg10[%c0_27, %c0_28, %c0_29] : memref<8x1x16xf32, #tpu.memory_space<vmem>>, vector<1x1x16xf32>
    %33 = vector.shape_cast %32 : vector<1x1x16xf32> to vector<1x16xf32>
    %34 = vector.broadcast %33 : vector<1x16xf32> to vector<8x16xf32>
    %35 = arith.addf %31, %34 : vector<8x16xf32>
    %36 = arith.truncf %17 : vector<8x16xf32> to vector<8x16xbf16>
    %37 = arith.truncf %26 : vector<8x16xf32> to vector<8x16xbf16>
    %cst_30 = arith.constant dense<0.000000e+00> : vector<8x8xf32>
    %38 = tpu.matmul %36, %37, %cst_30 {dimension_numbers = #tpu.dot_dimension_numbers<[1], [1], [0], [0], [0, 0, 1, 0], [], []>} : vector<8x16xbf16>, vector<8x16xbf16>, vector<8x8xf32> -> vector<8x8xf32>
    %cst_31 = arith.constant 2.500000e-01 : f32
    %39 = vector.broadcast %cst_31 : f32 to vector<8x8xf32>
    %40 = arith.mulf %38, %39 : vector<8x8xf32>
    %cst_32 = arith.constant dense<0xFF800000> : vector<8xf32>
    %41 = vector.multi_reduction <maximumf>, %40, %cst_32 [1] : vector<8x8xf32> to vector<8xf32>
    %42 = vector.shape_cast %41 : vector<8xf32> to vector<8x1xf32>
    %43 = vector.broadcast %42 : vector<8x1xf32> to vector<8x8xf32>
    %44 = arith.subf %40, %43 : vector<8x8xf32>
    %45 = math.exp %44 : vector<8x8xf32>
    %cst_33 = arith.constant dense<0.000000e+00> : vector<8xf32>
    %46 = vector.multi_reduction <add>, %45, %cst_33 [1] : vector<8x8xf32> to vector<8xf32>
    %47 = vector.shape_cast %46 : vector<8xf32> to vector<8x1xf32>
    %48 = tpu.reciprocal %47 {approx = true} : vector<8x1xf32> -> vector<8x1xf32>
    %49 = vector.broadcast %48 : vector<8x1xf32> to vector<8x8xf32>
    %50 = arith.mulf %45, %49 : vector<8x8xf32>
    %51 = arith.truncf %50 : vector<8x8xf32> to vector<8x8xbf16>
    %52 = arith.truncf %35 : vector<8x16xf32> to vector<8x16xbf16>
    %cst_34 = arith.constant dense<0.000000e+00> : vector<8x16xf32>
    %53 = tpu.matmul %51, %52, %cst_34 {dimension_numbers = #tpu.dot_dimension_numbers<[1], [0], [0], [1], [0, 0, 1, 1], [], []>} : vector<8x8xbf16>, vector<8x16xbf16>, vector<8x16xf32> -> vector<8x16xf32>
    %c0_35 = arith.constant 0 : index
    %c0_36 = arith.constant 0 : index
    %c0_37 = arith.constant 0 : index
    %54 = vector.load %arg11[%c0_35, %c0_36, %c0_37] : memref<8x16x32xf32, #tpu.memory_space<vmem>>, vector<1x16x32xf32>
    %55 = vector.shape_cast %54 : vector<1x16x32xf32> to vector<16x32xf32>
    %56 = arith.truncf %53 : vector<8x16xf32> to vector<8x16xbf16>
    %57 = arith.truncf %55 : vector<16x32xf32> to vector<16x32xbf16>
    %cst_38 = arith.constant dense<0.000000e+00> : vector<8x32xf32>
    %58 = tpu.matmul %56, %57, %cst_38 {dimension_numbers = #tpu.dot_dimension_numbers<[1], [0], [0], [1], [0, 0, 1, 1], [], []>} : vector<8x16xbf16>, vector<16x32xbf16>, vector<8x32xf32> -> vector<8x32xf32>
    %59 = arith.addf %8, %58 : vector<8x32xf32>
    %c1 = arith.constant 1 : index
    %c0_39 = arith.constant 0 : index
    %c0_40 = arith.constant 0 : index
    %60 = vector.load %arg5[%c1, %c0_39, %c0_40] : memref<8x32x16xf32, #tpu.memory_space<vmem>>, vector<1x32x16xf32>
    %61 = vector.shape_cast %60 : vector<1x32x16xf32> to vector<32x16xf32>
    %62 = arith.truncf %1 : vector<8x32xf32> to vector<8x32xbf16>
    %63 = arith.truncf %61 : vector<32x16xf32> to vector<32x16xbf16>
    %cst_41 = arith.constant dense<0.000000e+00> : vector<8x16xf32>
    %64 = tpu.matmul %62, %63, %cst_41 {dimension_numbers = #tpu.dot_dimension_numbers<[1], [0], [0], [1], [0, 0, 1, 1], [], []>} : vector<8x32xbf16>, vector<32x16xbf16>, vector<8x16xf32> -> vector<8x16xf32>
    %c1_42 = arith.constant 1 : index
    %c0_43 = arith.constant 0 : index
    %c0_44 = arith.constant 0 : index
    %65 = vector.load %arg8[%c1_42, %c0_43, %c0_44] : memref<8x1x16xf32, #tpu.memory_space<vmem>>, vector<1x1x16xf32>
    %66 = vector.shape_cast %65 : vector<1x1x16xf32> to vector<1x16xf32>
    %67 = vector.broadcast %66 : vector<1x16xf32> to vector<8x16xf32>
    %68 = arith.addf %64, %67 : vector<8x16xf32>
    %c1_45 = arith.constant 1 : index
    %c0_46 = arith.constant 0 : index
    %c0_47 = arith.constant 0 : index
    %69 = vector.load %arg6[%c1_45, %c0_46, %c0_47] : memref<8x32x16xf32, #tpu.memory_space<vmem>>, vector<1x32x16xf32>
    %70 = vector.shape_cast %69 : vector<1x32x16xf32> to vector<32x16xf32>
    %71 = arith.truncf %1 : vector<8x32xf32> to vector<8x32xbf16>
    %72 = arith.truncf %70 : vector<32x16xf32> to vector<32x16xbf16>
    %cst_48 = arith.constant dense<0.000000e+00> : vector<8x16xf32>
    %73 = tpu.matmul %71, %72, %cst_48 {dimension_numbers = #tpu.dot_dimension_numbers<[1], [0], [0], [1], [0, 0, 1, 1], [], []>} : vector<8x32xbf16>, vector<32x16xbf16>, vector<8x16xf32> -> vector<8x16xf32>
    %c1_49 = arith.constant 1 : index
    %c0_50 = arith.constant 0 : index
    %c0_51 = arith.constant 0 : index
    %74 = vector.load %arg9[%c1_49, %c0_50, %c0_51] : memref<8x1x16xf32, #tpu.memory_space<vmem>>, vector<1x1x16xf32>
    %75 = vector.shape_cast %74 : vector<1x1x16xf32> to vector<1x16xf32>
    %76 = vector.broadcast %75 : vector<1x16xf32> to vector<8x16xf32>
    %77 = arith.addf %73, %76 : vector<8x16xf32>
    %c1_52 = arith.constant 1 : index
    %c0_53 = arith.constant 0 : index
    %c0_54 = arith.constant 0 : index
    %78 = vector.load %arg7[%c1_52, %c0_53, %c0_54] : memref<8x32x16xf32, #tpu.memory_space<vmem>>, vector<1x32x16xf32>
    %79 = vector.shape_cast %78 : vector<1x32x16xf32> to vector<32x16xf32>
    %80 = arith.truncf %1 : vector<8x32xf32> to vector<8x32xbf16>
    %81 = arith.truncf %79 : vector<32x16xf32> to vector<32x16xbf16>
    %cst_55 = arith.constant dense<0.000000e+00> : vector<8x16xf32>
    %82 = tpu.matmul %80, %81, %cst_55 {dimension_numbers = #tpu.dot_dimension_numbers<[1], [0], [0], [1], [0, 0, 1, 1], [], []>} : vector<8x32xbf16>, vector<32x16xbf16>, vector<8x16xf32> -> vector<8x16xf32>
    %c1_56 = arith.constant 1 : index
    %c0_57 = arith.constant 0 : index
    %c0_58 = arith.constant 0 : index
    %83 = vector.load %arg10[%c1_56, %c0_57, %c0_58] : memref<8x1x16xf32, #tpu.memory_space<vmem>>, vector<1x1x16xf32>
    %84 = vector.shape_cast %83 : vector<1x1x16xf32> to vector<1x16xf32>
    %85 = vector.broadcast %84 : vector<1x16xf32> to vector<8x16xf32>
    %86 = arith.addf %82, %85 : vector<8x16xf32>
    %87 = arith.truncf %68 : vector<8x16xf32> to vector<8x16xbf16>
    %88 = arith.truncf %77 : vector<8x16xf32> to vector<8x16xbf16>
    %cst_59 = arith.constant dense<0.000000e+00> : vector<8x8xf32>
    %89 = tpu.matmul %87, %88, %cst_59 {dimension_numbers = #tpu.dot_dimension_numbers<[1], [1], [0], [0], [0, 0, 1, 0], [], []>} : vector<8x16xbf16>, vector<8x16xbf16>, vector<8x8xf32> -> vector<8x8xf32>
    %cst_60 = arith.constant 2.500000e-01 : f32
    %90 = vector.broadcast %cst_60 : f32 to vector<8x8xf32>
    %91 = arith.mulf %89, %90 : vector<8x8xf32>
    %cst_61 = arith.constant dense<0xFF800000> : vector<8xf32>
    %92 = vector.multi_reduction <maximumf>, %91, %cst_61 [1] : vector<8x8xf32> to vector<8xf32>
    %93 = vector.shape_cast %92 : vector<8xf32> to vector<8x1xf32>
    %94 = vector.broadcast %93 : vector<8x1xf32> to vector<8x8xf32>
    %95 = arith.subf %91, %94 : vector<8x8xf32>
    %96 = math.exp %95 : vector<8x8xf32>
    %cst_62 = arith.constant dense<0.000000e+00> : vector<8xf32>
    %97 = vector.multi_reduction <add>, %96, %cst_62 [1] : vector<8x8xf32> to vector<8xf32>
    %98 = vector.shape_cast %97 : vector<8xf32> to vector<8x1xf32>
    %99 = tpu.reciprocal %98 {approx = true} : vector<8x1xf32> -> vector<8x1xf32>
    %100 = vector.broadcast %99 : vector<8x1xf32> to vector<8x8xf32>
    %101 = arith.mulf %96, %100 : vector<8x8xf32>
    %102 = arith.truncf %101 : vector<8x8xf32> to vector<8x8xbf16>
    %103 = arith.truncf %86 : vector<8x16xf32> to vector<8x16xbf16>
    %cst_63 = arith.constant dense<0.000000e+00> : vector<8x16xf32>
    %104 = tpu.matmul %102, %103, %cst_63 {dimension_numbers = #tpu.dot_dimension_numbers<[1], [0], [0], [1], [0, 0, 1, 1], [], []>} : vector<8x8xbf16>, vector<8x16xbf16>, vector<8x16xf32> -> vector<8x16xf32>
    %c1_64 = arith.constant 1 : index
    %c0_65 = arith.constant 0 : index
    %c0_66 = arith.constant 0 : index
    %105 = vector.load %arg11[%c1_64, %c0_65, %c0_66] : memref<8x16x32xf32, #tpu.memory_space<vmem>>, vector<1x16x32xf32>
    %106 = vector.shape_cast %105 : vector<1x16x32xf32> to vector<16x32xf32>
    %107 = arith.truncf %104 : vector<8x16xf32> to vector<8x16xbf16>
    %108 = arith.truncf %106 : vector<16x32xf32> to vector<16x32xbf16>
    %cst_67 = arith.constant dense<0.000000e+00> : vector<8x32xf32>
    %109 = tpu.matmul %107, %108, %cst_67 {dimension_numbers = #tpu.dot_dimension_numbers<[1], [0], [0], [1], [0, 0, 1, 1], [], []>} : vector<8x16xbf16>, vector<16x32xbf16>, vector<8x32xf32> -> vector<8x32xf32>
    %110 = arith.addf %59, %109 : vector<8x32xf32>
    %c0_68 = arith.constant 0 : index
    %c0_69 = arith.constant 0 : index
    %c0_70 = arith.constant 0 : index
    %111 = vector.load %arg12[%c0_68, %c0_69, %c0_70] : memref<4x1x32xf32, #tpu.memory_space<vmem>>, vector<1x1x32xf32>
    %112 = vector.shape_cast %111 : vector<1x1x32xf32> to vector<1x32xf32>
    %113 = vector.broadcast %112 : vector<1x32xf32> to vector<8x32xf32>
    %114 = arith.addf %110, %113 : vector<8x32xf32>
    %c0_71 = arith.constant 0 : index
    %c0_72 = arith.constant 0 : index
    %c0_73 = arith.constant 0 : index
    %115 = vector.load %arg13[%c0_71, %c0_72, %c0_73] : memref<5x1x32xf32, #tpu.memory_space<vmem>>, vector<1x1x32xf32>
    %116 = vector.shape_cast %115 : vector<1x1x32xf32> to vector<1x32xf32>
    %c0_74 = arith.constant 0 : index
    %c0_75 = arith.constant 0 : index
    %c0_76 = arith.constant 0 : index
    %117 = vector.load %arg14[%c0_74, %c0_75, %c0_76] : memref<5x1x32xf32, #tpu.memory_space<vmem>>, vector<1x1x32xf32>
    %118 = vector.shape_cast %117 : vector<1x1x32xf32> to vector<1x32xf32>
    %cst_77 = arith.constant dense<0.000000e+00> : vector<8xf32>
    %119 = vector.multi_reduction <add>, %114, %cst_77 [1] : vector<8x32xf32> to vector<8xf32>
    %120 = vector.shape_cast %119 : vector<8xf32> to vector<8x1xf32>
    %cst_78 = arith.constant 3.200000e+01 : f32
    %121 = vector.broadcast %cst_78 : f32 to vector<8x1xf32>
    %122 = arith.divf %120, %121 : vector<8x1xf32>
    %123 = vector.broadcast %122 : vector<8x1xf32> to vector<8x32xf32>
    %124 = arith.subf %114, %123 : vector<8x32xf32>
    %125 = arith.mulf %124, %124 : vector<8x32xf32>
    %cst_79 = arith.constant dense<0.000000e+00> : vector<8xf32>
    %126 = vector.multi_reduction <add>, %125, %cst_79 [1] : vector<8x32xf32> to vector<8xf32>
    %127 = vector.shape_cast %126 : vector<8xf32> to vector<8x1xf32>
    %cst_80 = arith.constant 3.200000e+01 : f32
    %128 = vector.broadcast %cst_80 : f32 to vector<8x1xf32>
    %129 = arith.divf %127, %128 : vector<8x1xf32>
    %130 = vector.broadcast %122 : vector<8x1xf32> to vector<8x32xf32>
    %131 = arith.subf %114, %130 : vector<8x32xf32>
    %cst_81 = arith.constant 9.99999974E-6 : f32
    %132 = vector.broadcast %cst_81 : f32 to vector<8x1xf32>
    %133 = arith.addf %129, %132 : vector<8x1xf32>
    %134 = math.rsqrt %133 : vector<8x1xf32>
    %135 = vector.broadcast %134 : vector<8x1xf32> to vector<8x32xf32>
    %136 = arith.mulf %131, %135 : vector<8x32xf32>
    %137 = vector.broadcast %116 : vector<1x32xf32> to vector<8x32xf32>
    %138 = arith.mulf %136, %137 : vector<8x32xf32>
    %139 = vector.broadcast %118 : vector<1x32xf32> to vector<8x32xf32>
    %140 = arith.addf %138, %139 : vector<8x32xf32>
    %141 = arith.addf %140, %1 : vector<8x32xf32>
    %142 = arith.addf %6, %7 : vector<16x32xf32>
    %cst_82 = arith.constant 0.000000e+00 : f32
    %143 = vector.broadcast %cst_82 : f32 to vector<8x32xf32>
    %c2 = arith.constant 2 : index
    %c0_83 = arith.constant 0 : index
    %c0_84 = arith.constant 0 : index
    %144 = vector.load %arg5[%c2, %c0_83, %c0_84] : memref<8x32x16xf32, #tpu.memory_space<vmem>>, vector<1x32x16xf32>
    %145 = vector.shape_cast %144 : vector<1x32x16xf32> to vector<32x16xf32>
    %146 = arith.truncf %141 : vector<8x32xf32> to vector<8x32xbf16>
    %147 = arith.truncf %145 : vector<32x16xf32> to vector<32x16xbf16>
    %cst_85 = arith.constant dense<0.000000e+00> : vector<8x16xf32>
    %148 = tpu.matmul %146, %147, %cst_85 {dimension_numbers = #tpu.dot_dimension_numbers<[1], [0], [0], [1], [0, 0, 1, 1], [], []>} : vector<8x32xbf16>, vector<32x16xbf16>, vector<8x16xf32> -> vector<8x16xf32>
    %c2_86 = arith.constant 2 : index
    %c0_87 = arith.constant 0 : index
    %c0_88 = arith.constant 0 : index
    %149 = vector.load %arg8[%c2_86, %c0_87, %c0_88] : memref<8x1x16xf32, #tpu.memory_space<vmem>>, vector<1x1x16xf32>
    %150 = vector.shape_cast %149 : vector<1x1x16xf32> to vector<1x16xf32>
    %151 = vector.broadcast %150 : vector<1x16xf32> to vector<8x16xf32>
    %152 = arith.addf %148, %151 : vector<8x16xf32>
    %c2_89 = arith.constant 2 : index
    %c0_90 = arith.constant 0 : index
    %c0_91 = arith.constant 0 : index
    %153 = vector.load %arg6[%c2_89, %c0_90, %c0_91] : memref<8x32x16xf32, #tpu.memory_space<vmem>>, vector<1x32x16xf32>
    %154 = vector.shape_cast %153 : vector<1x32x16xf32> to vector<32x16xf32>
    %155 = arith.truncf %142 : vector<16x32xf32> to vector<16x32xbf16>
    %156 = arith.truncf %154 : vector<32x16xf32> to vector<32x16xbf16>
    %cst_92 = arith.constant dense<0.000000e+00> : vector<16x16xf32>
    %157 = tpu.matmul %155, %156, %cst_92 {dimension_numbers = #tpu.dot_dimension_numbers<[1], [0], [0], [1], [0, 0, 1, 1], [], []>} : vector<16x32xbf16>, vector<32x16xbf16>, vector<16x16xf32> -> vector<16x16xf32>
    %c2_93 = arith.constant 2 : index
    %c0_94 = arith.constant 0 : index
    %c0_95 = arith.constant 0 : index
    %158 = vector.load %arg9[%c2_93, %c0_94, %c0_95] : memref<8x1x16xf32, #tpu.memory_space<vmem>>, vector<1x1x16xf32>
    %159 = vector.shape_cast %158 : vector<1x1x16xf32> to vector<1x16xf32>
    %160 = vector.broadcast %159 : vector<1x16xf32> to vector<16x16xf32>
    %161 = arith.addf %157, %160 : vector<16x16xf32>
    %c2_96 = arith.constant 2 : index
    %c0_97 = arith.constant 0 : index
    %c0_98 = arith.constant 0 : index
    %162 = vector.load %arg7[%c2_96, %c0_97, %c0_98] : memref<8x32x16xf32, #tpu.memory_space<vmem>>, vector<1x32x16xf32>
    %163 = vector.shape_cast %162 : vector<1x32x16xf32> to vector<32x16xf32>
    %164 = arith.truncf %6 : vector<16x32xf32> to vector<16x32xbf16>
    %165 = arith.truncf %163 : vector<32x16xf32> to vector<32x16xbf16>
    %cst_99 = arith.constant dense<0.000000e+00> : vector<16x16xf32>
    %166 = tpu.matmul %164, %165, %cst_99 {dimension_numbers = #tpu.dot_dimension_numbers<[1], [0], [0], [1], [0, 0, 1, 1], [], []>} : vector<16x32xbf16>, vector<32x16xbf16>, vector<16x16xf32> -> vector<16x16xf32>
    %c2_100 = arith.constant 2 : index
    %c0_101 = arith.constant 0 : index
    %c0_102 = arith.constant 0 : index
    %167 = vector.load %arg10[%c2_100, %c0_101, %c0_102] : memref<8x1x16xf32, #tpu.memory_space<vmem>>, vector<1x1x16xf32>
    %168 = vector.shape_cast %167 : vector<1x1x16xf32> to vector<1x16xf32>
    %169 = vector.broadcast %168 : vector<1x16xf32> to vector<16x16xf32>
    %170 = arith.addf %166, %169 : vector<16x16xf32>
    %171 = arith.truncf %152 : vector<8x16xf32> to vector<8x16xbf16>
    %172 = arith.truncf %161 : vector<16x16xf32> to vector<16x16xbf16>
    %cst_103 = arith.constant dense<0.000000e+00> : vector<8x16xf32>
    %173 = tpu.matmul %171, %172, %cst_103 {dimension_numbers = #tpu.dot_dimension_numbers<[1], [1], [0], [0], [0, 0, 1, 0], [], []>} : vector<8x16xbf16>, vector<16x16xbf16>, vector<8x16xf32> -> vector<8x16xf32>
    %cst_104 = arith.constant 2.500000e-01 : f32
    %174 = vector.broadcast %cst_104 : f32 to vector<8x16xf32>
    %175 = arith.mulf %173, %174 : vector<8x16xf32>
    %cst_105 = arith.constant dense<0xFF800000> : vector<8xf32>
    %176 = vector.multi_reduction <maximumf>, %175, %cst_105 [1] : vector<8x16xf32> to vector<8xf32>
    %177 = vector.shape_cast %176 : vector<8xf32> to vector<8x1xf32>
    %178 = vector.broadcast %177 : vector<8x1xf32> to vector<8x16xf32>
    %179 = arith.subf %175, %178 : vector<8x16xf32>
    %180 = math.exp %179 : vector<8x16xf32>
    %cst_106 = arith.constant dense<0.000000e+00> : vector<8xf32>
    %181 = vector.multi_reduction <add>, %180, %cst_106 [1] : vector<8x16xf32> to vector<8xf32>
    %182 = vector.shape_cast %181 : vector<8xf32> to vector<8x1xf32>
    %183 = tpu.reciprocal %182 {approx = true} : vector<8x1xf32> -> vector<8x1xf32>
    %184 = vector.broadcast %183 : vector<8x1xf32> to vector<8x16xf32>
    %185 = arith.mulf %180, %184 : vector<8x16xf32>
    %186 = arith.truncf %185 : vector<8x16xf32> to vector<8x16xbf16>
    %187 = arith.truncf %170 : vector<16x16xf32> to vector<16x16xbf16>
    %cst_107 = arith.constant dense<0.000000e+00> : vector<8x16xf32>
    %188 = tpu.matmul %186, %187, %cst_107 {dimension_numbers = #tpu.dot_dimension_numbers<[1], [0], [0], [1], [0, 0, 1, 1], [], []>} : vector<8x16xbf16>, vector<16x16xbf16>, vector<8x16xf32> -> vector<8x16xf32>
    %c2_108 = arith.constant 2 : index
    %c0_109 = arith.constant 0 : index
    %c0_110 = arith.constant 0 : index
    %189 = vector.load %arg11[%c2_108, %c0_109, %c0_110] : memref<8x16x32xf32, #tpu.memory_space<vmem>>, vector<1x16x32xf32>
    %190 = vector.shape_cast %189 : vector<1x16x32xf32> to vector<16x32xf32>
    %191 = arith.truncf %188 : vector<8x16xf32> to vector<8x16xbf16>
    %192 = arith.truncf %190 : vector<16x32xf32> to vector<16x32xbf16>
    %cst_111 = arith.constant dense<0.000000e+00> : vector<8x32xf32>
    %193 = tpu.matmul %191, %192, %cst_111 {dimension_numbers = #tpu.dot_dimension_numbers<[1], [0], [0], [1], [0, 0, 1, 1], [], []>} : vector<8x16xbf16>, vector<16x32xbf16>, vector<8x32xf32> -> vector<8x32xf32>
    %194 = arith.addf %143, %193 : vector<8x32xf32>
    %c3 = arith.constant 3 : index
    %c0_112 = arith.constant 0 : index
    %c0_113 = arith.constant 0 : index
    %195 = vector.load %arg5[%c3, %c0_112, %c0_113] : memref<8x32x16xf32, #tpu.memory_space<vmem>>, vector<1x32x16xf32>
    %196 = vector.shape_cast %195 : vector<1x32x16xf32> to vector<32x16xf32>
    %197 = arith.truncf %141 : vector<8x32xf32> to vector<8x32xbf16>
    %198 = arith.truncf %196 : vector<32x16xf32> to vector<32x16xbf16>
    %cst_114 = arith.constant dense<0.000000e+00> : vector<8x16xf32>
    %199 = tpu.matmul %197, %198, %cst_114 {dimension_numbers = #tpu.dot_dimension_numbers<[1], [0], [0], [1], [0, 0, 1, 1], [], []>} : vector<8x32xbf16>, vector<32x16xbf16>, vector<8x16xf32> -> vector<8x16xf32>
    %c3_115 = arith.constant 3 : index
    %c0_116 = arith.constant 0 : index
    %c0_117 = arith.constant 0 : index
    %200 = vector.load %arg8[%c3_115, %c0_116, %c0_117] : memref<8x1x16xf32, #tpu.memory_space<vmem>>, vector<1x1x16xf32>
    %201 = vector.shape_cast %200 : vector<1x1x16xf32> to vector<1x16xf32>
    %202 = vector.broadcast %201 : vector<1x16xf32> to vector<8x16xf32>
    %203 = arith.addf %199, %202 : vector<8x16xf32>
    %c3_118 = arith.constant 3 : index
    %c0_119 = arith.constant 0 : index
    %c0_120 = arith.constant 0 : index
    %204 = vector.load %arg6[%c3_118, %c0_119, %c0_120] : memref<8x32x16xf32, #tpu.memory_space<vmem>>, vector<1x32x16xf32>
    %205 = vector.shape_cast %204 : vector<1x32x16xf32> to vector<32x16xf32>
    %206 = arith.truncf %142 : vector<16x32xf32> to vector<16x32xbf16>
    %207 = arith.truncf %205 : vector<32x16xf32> to vector<32x16xbf16>
    %cst_121 = arith.constant dense<0.000000e+00> : vector<16x16xf32>
    %208 = tpu.matmul %206, %207, %cst_121 {dimension_numbers = #tpu.dot_dimension_numbers<[1], [0], [0], [1], [0, 0, 1, 1], [], []>} : vector<16x32xbf16>, vector<32x16xbf16>, vector<16x16xf32> -> vector<16x16xf32>
    %c3_122 = arith.constant 3 : index
    %c0_123 = arith.constant 0 : index
    %c0_124 = arith.constant 0 : index
    %209 = vector.load %arg9[%c3_122, %c0_123, %c0_124] : memref<8x1x16xf32, #tpu.memory_space<vmem>>, vector<1x1x16xf32>
    %210 = vector.shape_cast %209 : vector<1x1x16xf32> to vector<1x16xf32>
    %211 = vector.broadcast %210 : vector<1x16xf32> to vector<16x16xf32>
    %212 = arith.addf %208, %211 : vector<16x16xf32>
    %c3_125 = arith.constant 3 : index
    %c0_126 = arith.constant 0 : index
    %c0_127 = arith.constant 0 : index
    %213 = vector.load %arg7[%c3_125, %c0_126, %c0_127] : memref<8x32x16xf32, #tpu.memory_space<vmem>>, vector<1x32x16xf32>
    %214 = vector.shape_cast %213 : vector<1x32x16xf32> to vector<32x16xf32>
    %215 = arith.truncf %6 : vector<16x32xf32> to vector<16x32xbf16>
    %216 = arith.truncf %214 : vector<32x16xf32> to vector<32x16xbf16>
    %cst_128 = arith.constant dense<0.000000e+00> : vector<16x16xf32>
    %217 = tpu.matmul %215, %216, %cst_128 {dimension_numbers = #tpu.dot_dimension_numbers<[1], [0], [0], [1], [0, 0, 1, 1], [], []>} : vector<16x32xbf16>, vector<32x16xbf16>, vector<16x16xf32> -> vector<16x16xf32>
    %c3_129 = arith.constant 3 : index
    %c0_130 = arith.constant 0 : index
    %c0_131 = arith.constant 0 : index
    %218 = vector.load %arg10[%c3_129, %c0_130, %c0_131] : memref<8x1x16xf32, #tpu.memory_space<vmem>>, vector<1x1x16xf32>
    %219 = vector.shape_cast %218 : vector<1x1x16xf32> to vector<1x16xf32>
    %220 = vector.broadcast %219 : vector<1x16xf32> to vector<16x16xf32>
    %221 = arith.addf %217, %220 : vector<16x16xf32>
    %222 = arith.truncf %203 : vector<8x16xf32> to vector<8x16xbf16>
    %223 = arith.truncf %212 : vector<16x16xf32> to vector<16x16xbf16>
    %cst_132 = arith.constant dense<0.000000e+00> : vector<8x16xf32>
    %224 = tpu.matmul %222, %223, %cst_132 {dimension_numbers = #tpu.dot_dimension_numbers<[1], [1], [0], [0], [0, 0, 1, 0], [], []>} : vector<8x16xbf16>, vector<16x16xbf16>, vector<8x16xf32> -> vector<8x16xf32>
    %cst_133 = arith.constant 2.500000e-01 : f32
    %225 = vector.broadcast %cst_133 : f32 to vector<8x16xf32>
    %226 = arith.mulf %224, %225 : vector<8x16xf32>
    %cst_134 = arith.constant dense<0xFF800000> : vector<8xf32>
    %227 = vector.multi_reduction <maximumf>, %226, %cst_134 [1] : vector<8x16xf32> to vector<8xf32>
    %228 = vector.shape_cast %227 : vector<8xf32> to vector<8x1xf32>
    %229 = vector.broadcast %228 : vector<8x1xf32> to vector<8x16xf32>
    %230 = arith.subf %226, %229 : vector<8x16xf32>
    %231 = math.exp %230 : vector<8x16xf32>
    %cst_135 = arith.constant dense<0.000000e+00> : vector<8xf32>
    %232 = vector.multi_reduction <add>, %231, %cst_135 [1] : vector<8x16xf32> to vector<8xf32>
    %233 = vector.shape_cast %232 : vector<8xf32> to vector<8x1xf32>
    %234 = tpu.reciprocal %233 {approx = true} : vector<8x1xf32> -> vector<8x1xf32>
    %235 = vector.broadcast %234 : vector<8x1xf32> to vector<8x16xf32>
    %236 = arith.mulf %231, %235 : vector<8x16xf32>
    %237 = arith.truncf %236 : vector<8x16xf32> to vector<8x16xbf16>
    %238 = arith.truncf %221 : vector<16x16xf32> to vector<16x16xbf16>
    %cst_136 = arith.constant dense<0.000000e+00> : vector<8x16xf32>
    %239 = tpu.matmul %237, %238, %cst_136 {dimension_numbers = #tpu.dot_dimension_numbers<[1], [0], [0], [1], [0, 0, 1, 1], [], []>} : vector<8x16xbf16>, vector<16x16xbf16>, vector<8x16xf32> -> vector<8x16xf32>
    %c3_137 = arith.constant 3 : index
    %c0_138 = arith.constant 0 : index
    %c0_139 = arith.constant 0 : index
    %240 = vector.load %arg11[%c3_137, %c0_138, %c0_139] : memref<8x16x32xf32, #tpu.memory_space<vmem>>, vector<1x16x32xf32>
    %241 = vector.shape_cast %240 : vector<1x16x32xf32> to vector<16x32xf32>
    %242 = arith.truncf %239 : vector<8x16xf32> to vector<8x16xbf16>
    %243 = arith.truncf %241 : vector<16x32xf32> to vector<16x32xbf16>
    %cst_140 = arith.constant dense<0.000000e+00> : vector<8x32xf32>
    %244 = tpu.matmul %242, %243, %cst_140 {dimension_numbers = #tpu.dot_dimension_numbers<[1], [0], [0], [1], [0, 0, 1, 1], [], []>} : vector<8x16xbf16>, vector<16x32xbf16>, vector<8x32xf32> -> vector<8x32xf32>
    %245 = arith.addf %194, %244 : vector<8x32xf32>
    %c1_141 = arith.constant 1 : index
    %c0_142 = arith.constant 0 : index
    %c0_143 = arith.constant 0 : index
    %246 = vector.load %arg12[%c1_141, %c0_142, %c0_143] : memref<4x1x32xf32, #tpu.memory_space<vmem>>, vector<1x1x32xf32>
    %247 = vector.shape_cast %246 : vector<1x1x32xf32> to vector<1x32xf32>
    %248 = vector.broadcast %247 : vector<1x32xf32> to vector<8x32xf32>
    %249 = arith.addf %245, %248 : vector<8x32xf32>
    %250 = arith.addf %140, %249 : vector<8x32xf32>
    %c1_144 = arith.constant 1 : index
    %c0_145 = arith.constant 0 : index
    %c0_146 = arith.constant 0 : index
    %251 = vector.load %arg13[%c1_144, %c0_145, %c0_146] : memref<5x1x32xf32, #tpu.memory_space<vmem>>, vector<1x1x32xf32>
    %252 = vector.shape_cast %251 : vector<1x1x32xf32> to vector<1x32xf32>
    %c1_147 = arith.constant 1 : index
    %c0_148 = arith.constant 0 : index
    %c0_149 = arith.constant 0 : index
    %253 = vector.load %arg14[%c1_147, %c0_148, %c0_149] : memref<5x1x32xf32, #tpu.memory_space<vmem>>, vector<1x1x32xf32>
    %254 = vector.shape_cast %253 : vector<1x1x32xf32> to vector<1x32xf32>
    %cst_150 = arith.constant dense<0.000000e+00> : vector<8xf32>
    %255 = vector.multi_reduction <add>, %250, %cst_150 [1] : vector<8x32xf32> to vector<8xf32>
    %256 = vector.shape_cast %255 : vector<8xf32> to vector<8x1xf32>
    %cst_151 = arith.constant 3.200000e+01 : f32
    %257 = vector.broadcast %cst_151 : f32 to vector<8x1xf32>
    %258 = arith.divf %256, %257 : vector<8x1xf32>
    %259 = vector.broadcast %258 : vector<8x1xf32> to vector<8x32xf32>
    %260 = arith.subf %250, %259 : vector<8x32xf32>
    %261 = arith.mulf %260, %260 : vector<8x32xf32>
    %cst_152 = arith.constant dense<0.000000e+00> : vector<8xf32>
    %262 = vector.multi_reduction <add>, %261, %cst_152 [1] : vector<8x32xf32> to vector<8xf32>
    %263 = vector.shape_cast %262 : vector<8xf32> to vector<8x1xf32>
    %cst_153 = arith.constant 3.200000e+01 : f32
    %264 = vector.broadcast %cst_153 : f32 to vector<8x1xf32>
    %265 = arith.divf %263, %264 : vector<8x1xf32>
    %266 = vector.broadcast %258 : vector<8x1xf32> to vector<8x32xf32>
    %267 = arith.subf %250, %266 : vector<8x32xf32>
    %cst_154 = arith.constant 9.99999974E-6 : f32
    %268 = vector.broadcast %cst_154 : f32 to vector<8x1xf32>
    %269 = arith.addf %265, %268 : vector<8x1xf32>
    %270 = math.rsqrt %269 : vector<8x1xf32>
    %271 = vector.broadcast %270 : vector<8x1xf32> to vector<8x32xf32>
    %272 = arith.mulf %267, %271 : vector<8x32xf32>
    %273 = vector.broadcast %252 : vector<1x32xf32> to vector<8x32xf32>
    %274 = arith.mulf %272, %273 : vector<8x32xf32>
    %275 = vector.broadcast %254 : vector<1x32xf32> to vector<8x32xf32>
    %276 = arith.addf %274, %275 : vector<8x32xf32>
    %c0_155 = arith.constant 0 : index
    %c0_156 = arith.constant 0 : index
    %277 = vector.load %arg15[%c0_155, %c0_156] : memref<32x64xf32, #tpu.memory_space<vmem>>, vector<32x64xf32>
    %278 = arith.truncf %276 : vector<8x32xf32> to vector<8x32xbf16>
    %279 = arith.truncf %277 : vector<32x64xf32> to vector<32x64xbf16>
    %cst_157 = arith.constant dense<0.000000e+00> : vector<8x64xf32>
    %280 = tpu.matmul %278, %279, %cst_157 {dimension_numbers = #tpu.dot_dimension_numbers<[1], [0], [0], [1], [0, 0, 1, 1], [], []>} : vector<8x32xbf16>, vector<32x64xbf16>, vector<8x64xf32> -> vector<8x64xf32>
    %c0_158 = arith.constant 0 : index
    %c0_159 = arith.constant 0 : index
    %281 = vector.load %arg16[%c0_158, %c0_159] : memref<1x64xf32, #tpu.memory_space<vmem>>, vector<1x64xf32>
    %282 = vector.broadcast %281 : vector<1x64xf32> to vector<8x64xf32>
    %283 = arith.addf %280, %282 : vector<8x64xf32>
    %cst_160 = arith.constant 0.000000e+00 : f32
    %284 = vector.broadcast %cst_160 : f32 to vector<8x64xf32>
    %285 = arith.maximumf %283, %284 : vector<8x64xf32>
    %c0_161 = arith.constant 0 : index
    %c0_162 = arith.constant 0 : index
    %286 = vector.load %arg17[%c0_161, %c0_162] : memref<64x32xf32, #tpu.memory_space<vmem>>, vector<64x32xf32>
    %287 = arith.truncf %285 : vector<8x64xf32> to vector<8x64xbf16>
    %288 = arith.truncf %286 : vector<64x32xf32> to vector<64x32xbf16>
    %cst_163 = arith.constant dense<0.000000e+00> : vector<8x32xf32>
    %289 = tpu.matmul %287, %288, %cst_163 {dimension_numbers = #tpu.dot_dimension_numbers<[1], [0], [0], [1], [0, 0, 1, 1], [], []>} : vector<8x64xbf16>, vector<64x32xbf16>, vector<8x32xf32> -> vector<8x32xf32>
    %c0_164 = arith.constant 0 : index
    %c0_165 = arith.constant 0 : index
    %290 = vector.load %arg18[%c0_164, %c0_165] : memref<1x32xf32, #tpu.memory_space<vmem>>, vector<1x32xf32>
    %291 = vector.broadcast %290 : vector<1x32xf32> to vector<8x32xf32>
    %292 = arith.addf %289, %291 : vector<8x32xf32>
    %293 = arith.addf %276, %292 : vector<8x32xf32>
    %c2_166 = arith.constant 2 : index
    %c0_167 = arith.constant 0 : index
    %c0_168 = arith.constant 0 : index
    %294 = vector.load %arg13[%c2_166, %c0_167, %c0_168] : memref<5x1x32xf32, #tpu.memory_space<vmem>>, vector<1x1x32xf32>
    %295 = vector.shape_cast %294 : vector<1x1x32xf32> to vector<1x32xf32>
    %c2_169 = arith.constant 2 : index
    %c0_170 = arith.constant 0 : index
    %c0_171 = arith.constant 0 : index
    %296 = vector.load %arg14[%c2_169, %c0_170, %c0_171] : memref<5x1x32xf32, #tpu.memory_space<vmem>>, vector<1x1x32xf32>
    %297 = vector.shape_cast %296 : vector<1x1x32xf32> to vector<1x32xf32>
    %cst_172 = arith.constant dense<0.000000e+00> : vector<8xf32>
    %298 = vector.multi_reduction <add>, %293, %cst_172 [1] : vector<8x32xf32> to vector<8xf32>
    %299 = vector.shape_cast %298 : vector<8xf32> to vector<8x1xf32>
    %cst_173 = arith.constant 3.200000e+01 : f32
    %300 = vector.broadcast %cst_173 : f32 to vector<8x1xf32>
    %301 = arith.divf %299, %300 : vector<8x1xf32>
    %302 = vector.broadcast %301 : vector<8x1xf32> to vector<8x32xf32>
    %303 = arith.subf %293, %302 : vector<8x32xf32>
    %304 = arith.mulf %303, %303 : vector<8x32xf32>
    %cst_174 = arith.constant dense<0.000000e+00> : vector<8xf32>
    %305 = vector.multi_reduction <add>, %304, %cst_174 [1] : vector<8x32xf32> to vector<8xf32>
    %306 = vector.shape_cast %305 : vector<8xf32> to vector<8x1xf32>
    %cst_175 = arith.constant 3.200000e+01 : f32
    %307 = vector.broadcast %cst_175 : f32 to vector<8x1xf32>
    %308 = arith.divf %306, %307 : vector<8x1xf32>
    %309 = vector.broadcast %301 : vector<8x1xf32> to vector<8x32xf32>
    %310 = arith.subf %293, %309 : vector<8x32xf32>
    %cst_176 = arith.constant 9.99999974E-6 : f32
    %311 = vector.broadcast %cst_176 : f32 to vector<8x1xf32>
    %312 = arith.addf %308, %311 : vector<8x1xf32>
    %313 = math.rsqrt %312 : vector<8x1xf32>
    %314 = vector.broadcast %313 : vector<8x1xf32> to vector<8x32xf32>
    %315 = arith.mulf %310, %314 : vector<8x32xf32>
    %316 = vector.broadcast %295 : vector<1x32xf32> to vector<8x32xf32>
    %317 = arith.mulf %315, %316 : vector<8x32xf32>
    %318 = vector.broadcast %297 : vector<1x32xf32> to vector<8x32xf32>
    %319 = arith.addf %317, %318 : vector<8x32xf32>
    %320 = arith.addf %6, %7 : vector<16x32xf32>
    %321 = arith.addf %319, %1 : vector<8x32xf32>
    %cst_177 = arith.constant 0.000000e+00 : f32
    %322 = vector.broadcast %cst_177 : f32 to vector<16x32xf32>
    %c4 = arith.constant 4 : index
    %c0_178 = arith.constant 0 : index
    %c0_179 = arith.constant 0 : index
    %323 = vector.load %arg5[%c4, %c0_178, %c0_179] : memref<8x32x16xf32, #tpu.memory_space<vmem>>, vector<1x32x16xf32>
    %324 = vector.shape_cast %323 : vector<1x32x16xf32> to vector<32x16xf32>
    %325 = arith.truncf %320 : vector<16x32xf32> to vector<16x32xbf16>
    %326 = arith.truncf %324 : vector<32x16xf32> to vector<32x16xbf16>
    %cst_180 = arith.constant dense<0.000000e+00> : vector<16x16xf32>
    %327 = tpu.matmul %325, %326, %cst_180 {dimension_numbers = #tpu.dot_dimension_numbers<[1], [0], [0], [1], [0, 0, 1, 1], [], []>} : vector<16x32xbf16>, vector<32x16xbf16>, vector<16x16xf32> -> vector<16x16xf32>
    %c4_181 = arith.constant 4 : index
    %c0_182 = arith.constant 0 : index
    %c0_183 = arith.constant 0 : index
    %328 = vector.load %arg8[%c4_181, %c0_182, %c0_183] : memref<8x1x16xf32, #tpu.memory_space<vmem>>, vector<1x1x16xf32>
    %329 = vector.shape_cast %328 : vector<1x1x16xf32> to vector<1x16xf32>
    %330 = vector.broadcast %329 : vector<1x16xf32> to vector<16x16xf32>
    %331 = arith.addf %327, %330 : vector<16x16xf32>
    %c4_184 = arith.constant 4 : index
    %c0_185 = arith.constant 0 : index
    %c0_186 = arith.constant 0 : index
    %332 = vector.load %arg6[%c4_184, %c0_185, %c0_186] : memref<8x32x16xf32, #tpu.memory_space<vmem>>, vector<1x32x16xf32>
    %333 = vector.shape_cast %332 : vector<1x32x16xf32> to vector<32x16xf32>
    %334 = arith.truncf %321 : vector<8x32xf32> to vector<8x32xbf16>
    %335 = arith.truncf %333 : vector<32x16xf32> to vector<32x16xbf16>
    %cst_187 = arith.constant dense<0.000000e+00> : vector<8x16xf32>
    %336 = tpu.matmul %334, %335, %cst_187 {dimension_numbers = #tpu.dot_dimension_numbers<[1], [0], [0], [1], [0, 0, 1, 1], [], []>} : vector<8x32xbf16>, vector<32x16xbf16>, vector<8x16xf32> -> vector<8x16xf32>
    %c4_188 = arith.constant 4 : index
    %c0_189 = arith.constant 0 : index
    %c0_190 = arith.constant 0 : index
    %337 = vector.load %arg9[%c4_188, %c0_189, %c0_190] : memref<8x1x16xf32, #tpu.memory_space<vmem>>, vector<1x1x16xf32>
    %338 = vector.shape_cast %337 : vector<1x1x16xf32> to vector<1x16xf32>
    %339 = vector.broadcast %338 : vector<1x16xf32> to vector<8x16xf32>
    %340 = arith.addf %336, %339 : vector<8x16xf32>
    %c4_191 = arith.constant 4 : index
    %c0_192 = arith.constant 0 : index
    %c0_193 = arith.constant 0 : index
    %341 = vector.load %arg7[%c4_191, %c0_192, %c0_193] : memref<8x32x16xf32, #tpu.memory_space<vmem>>, vector<1x32x16xf32>
    %342 = vector.shape_cast %341 : vector<1x32x16xf32> to vector<32x16xf32>
    %343 = arith.truncf %319 : vector<8x32xf32> to vector<8x32xbf16>
    %344 = arith.truncf %342 : vector<32x16xf32> to vector<32x16xbf16>
    %cst_194 = arith.constant dense<0.000000e+00> : vector<8x16xf32>
    %345 = tpu.matmul %343, %344, %cst_194 {dimension_numbers = #tpu.dot_dimension_numbers<[1], [0], [0], [1], [0, 0, 1, 1], [], []>} : vector<8x32xbf16>, vector<32x16xbf16>, vector<8x16xf32> -> vector<8x16xf32>
    %c4_195 = arith.constant 4 : index
    %c0_196 = arith.constant 0 : index
    %c0_197 = arith.constant 0 : index
    %346 = vector.load %arg10[%c4_195, %c0_196, %c0_197] : memref<8x1x16xf32, #tpu.memory_space<vmem>>, vector<1x1x16xf32>
    %347 = vector.shape_cast %346 : vector<1x1x16xf32> to vector<1x16xf32>
    %348 = vector.broadcast %347 : vector<1x16xf32> to vector<8x16xf32>
    %349 = arith.addf %345, %348 : vector<8x16xf32>
    %350 = arith.truncf %331 : vector<16x16xf32> to vector<16x16xbf16>
    %351 = arith.truncf %340 : vector<8x16xf32> to vector<8x16xbf16>
    %cst_198 = arith.constant dense<0.000000e+00> : vector<16x8xf32>
    %352 = tpu.matmul %350, %351, %cst_198 {dimension_numbers = #tpu.dot_dimension_numbers<[1], [1], [0], [0], [0, 0, 1, 0], [], []>} : vector<16x16xbf16>, vector<8x16xbf16>, vector<16x8xf32> -> vector<16x8xf32>
    %cst_199 = arith.constant 2.500000e-01 : f32
    %353 = vector.broadcast %cst_199 : f32 to vector<16x8xf32>
    %354 = arith.mulf %352, %353 : vector<16x8xf32>
    %cst_200 = arith.constant dense<0xFF800000> : vector<16xf32>
    %355 = vector.multi_reduction <maximumf>, %354, %cst_200 [1] : vector<16x8xf32> to vector<16xf32>
    %356 = vector.shape_cast %355 : vector<16xf32> to vector<16x1xf32>
    %357 = vector.broadcast %356 : vector<16x1xf32> to vector<16x8xf32>
    %358 = arith.subf %354, %357 : vector<16x8xf32>
    %359 = math.exp %358 : vector<16x8xf32>
    %cst_201 = arith.constant dense<0.000000e+00> : vector<16xf32>
    %360 = vector.multi_reduction <add>, %359, %cst_201 [1] : vector<16x8xf32> to vector<16xf32>
    %361 = vector.shape_cast %360 : vector<16xf32> to vector<16x1xf32>
    %362 = tpu.reciprocal %361 {approx = true} : vector<16x1xf32> -> vector<16x1xf32>
    %363 = vector.broadcast %362 : vector<16x1xf32> to vector<16x8xf32>
    %364 = arith.mulf %359, %363 : vector<16x8xf32>
    %365 = arith.truncf %364 : vector<16x8xf32> to vector<16x8xbf16>
    %366 = arith.truncf %349 : vector<8x16xf32> to vector<8x16xbf16>
    %cst_202 = arith.constant dense<0.000000e+00> : vector<16x16xf32>
    %367 = tpu.matmul %365, %366, %cst_202 {dimension_numbers = #tpu.dot_dimension_numbers<[1], [0], [0], [1], [0, 0, 1, 1], [], []>} : vector<16x8xbf16>, vector<8x16xbf16>, vector<16x16xf32> -> vector<16x16xf32>
    %c4_203 = arith.constant 4 : index
    %c0_204 = arith.constant 0 : index
    %c0_205 = arith.constant 0 : index
    %368 = vector.load %arg11[%c4_203, %c0_204, %c0_205] : memref<8x16x32xf32, #tpu.memory_space<vmem>>, vector<1x16x32xf32>
    %369 = vector.shape_cast %368 : vector<1x16x32xf32> to vector<16x32xf32>
    %370 = arith.truncf %367 : vector<16x16xf32> to vector<16x16xbf16>
    %371 = arith.truncf %369 : vector<16x32xf32> to vector<16x32xbf16>
    %cst_206 = arith.constant dense<0.000000e+00> : vector<16x32xf32>
    %372 = tpu.matmul %370, %371, %cst_206 {dimension_numbers = #tpu.dot_dimension_numbers<[1], [0], [0], [1], [0, 0, 1, 1], [], []>} : vector<16x16xbf16>, vector<16x32xbf16>, vector<16x32xf32> -> vector<16x32xf32>
    %373 = arith.addf %322, %372 : vector<16x32xf32>
    %c5 = arith.constant 5 : index
    %c0_207 = arith.constant 0 : index
    %c0_208 = arith.constant 0 : index
    %374 = vector.load %arg5[%c5, %c0_207, %c0_208] : memref<8x32x16xf32, #tpu.memory_space<vmem>>, vector<1x32x16xf32>
    %375 = vector.shape_cast %374 : vector<1x32x16xf32> to vector<32x16xf32>
    %376 = arith.truncf %320 : vector<16x32xf32> to vector<16x32xbf16>
    %377 = arith.truncf %375 : vector<32x16xf32> to vector<32x16xbf16>
    %cst_209 = arith.constant dense<0.000000e+00> : vector<16x16xf32>
    %378 = tpu.matmul %376, %377, %cst_209 {dimension_numbers = #tpu.dot_dimension_numbers<[1], [0], [0], [1], [0, 0, 1, 1], [], []>} : vector<16x32xbf16>, vector<32x16xbf16>, vector<16x16xf32> -> vector<16x16xf32>
    %c5_210 = arith.constant 5 : index
    %c0_211 = arith.constant 0 : index
    %c0_212 = arith.constant 0 : index
    %379 = vector.load %arg8[%c5_210, %c0_211, %c0_212] : memref<8x1x16xf32, #tpu.memory_space<vmem>>, vector<1x1x16xf32>
    %380 = vector.shape_cast %379 : vector<1x1x16xf32> to vector<1x16xf32>
    %381 = vector.broadcast %380 : vector<1x16xf32> to vector<16x16xf32>
    %382 = arith.addf %378, %381 : vector<16x16xf32>
    %c5_213 = arith.constant 5 : index
    %c0_214 = arith.constant 0 : index
    %c0_215 = arith.constant 0 : index
    %383 = vector.load %arg6[%c5_213, %c0_214, %c0_215] : memref<8x32x16xf32, #tpu.memory_space<vmem>>, vector<1x32x16xf32>
    %384 = vector.shape_cast %383 : vector<1x32x16xf32> to vector<32x16xf32>
    %385 = arith.truncf %321 : vector<8x32xf32> to vector<8x32xbf16>
    %386 = arith.truncf %384 : vector<32x16xf32> to vector<32x16xbf16>
    %cst_216 = arith.constant dense<0.000000e+00> : vector<8x16xf32>
    %387 = tpu.matmul %385, %386, %cst_216 {dimension_numbers = #tpu.dot_dimension_numbers<[1], [0], [0], [1], [0, 0, 1, 1], [], []>} : vector<8x32xbf16>, vector<32x16xbf16>, vector<8x16xf32> -> vector<8x16xf32>
    %c5_217 = arith.constant 5 : index
    %c0_218 = arith.constant 0 : index
    %c0_219 = arith.constant 0 : index
    %388 = vector.load %arg9[%c5_217, %c0_218, %c0_219] : memref<8x1x16xf32, #tpu.memory_space<vmem>>, vector<1x1x16xf32>
    %389 = vector.shape_cast %388 : vector<1x1x16xf32> to vector<1x16xf32>
    %390 = vector.broadcast %389 : vector<1x16xf32> to vector<8x16xf32>
    %391 = arith.addf %387, %390 : vector<8x16xf32>
    %c5_220 = arith.constant 5 : index
    %c0_221 = arith.constant 0 : index
    %c0_222 = arith.constant 0 : index
    %392 = vector.load %arg7[%c5_220, %c0_221, %c0_222] : memref<8x32x16xf32, #tpu.memory_space<vmem>>, vector<1x32x16xf32>
    %393 = vector.shape_cast %392 : vector<1x32x16xf32> to vector<32x16xf32>
    %394 = arith.truncf %319 : vector<8x32xf32> to vector<8x32xbf16>
    %395 = arith.truncf %393 : vector<32x16xf32> to vector<32x16xbf16>
    %cst_223 = arith.constant dense<0.000000e+00> : vector<8x16xf32>
    %396 = tpu.matmul %394, %395, %cst_223 {dimension_numbers = #tpu.dot_dimension_numbers<[1], [0], [0], [1], [0, 0, 1, 1], [], []>} : vector<8x32xbf16>, vector<32x16xbf16>, vector<8x16xf32> -> vector<8x16xf32>
    %c5_224 = arith.constant 5 : index
    %c0_225 = arith.constant 0 : index
    %c0_226 = arith.constant 0 : index
    %397 = vector.load %arg10[%c5_224, %c0_225, %c0_226] : memref<8x1x16xf32, #tpu.memory_space<vmem>>, vector<1x1x16xf32>
    %398 = vector.shape_cast %397 : vector<1x1x16xf32> to vector<1x16xf32>
    %399 = vector.broadcast %398 : vector<1x16xf32> to vector<8x16xf32>
    %400 = arith.addf %396, %399 : vector<8x16xf32>
    %401 = arith.truncf %382 : vector<16x16xf32> to vector<16x16xbf16>
    %402 = arith.truncf %391 : vector<8x16xf32> to vector<8x16xbf16>
    %cst_227 = arith.constant dense<0.000000e+00> : vector<16x8xf32>
    %403 = tpu.matmul %401, %402, %cst_227 {dimension_numbers = #tpu.dot_dimension_numbers<[1], [1], [0], [0], [0, 0, 1, 0], [], []>} : vector<16x16xbf16>, vector<8x16xbf16>, vector<16x8xf32> -> vector<16x8xf32>
    %cst_228 = arith.constant 2.500000e-01 : f32
    %404 = vector.broadcast %cst_228 : f32 to vector<16x8xf32>
    %405 = arith.mulf %403, %404 : vector<16x8xf32>
    %cst_229 = arith.constant dense<0xFF800000> : vector<16xf32>
    %406 = vector.multi_reduction <maximumf>, %405, %cst_229 [1] : vector<16x8xf32> to vector<16xf32>
    %407 = vector.shape_cast %406 : vector<16xf32> to vector<16x1xf32>
    %408 = vector.broadcast %407 : vector<16x1xf32> to vector<16x8xf32>
    %409 = arith.subf %405, %408 : vector<16x8xf32>
    %410 = math.exp %409 : vector<16x8xf32>
    %cst_230 = arith.constant dense<0.000000e+00> : vector<16xf32>
    %411 = vector.multi_reduction <add>, %410, %cst_230 [1] : vector<16x8xf32> to vector<16xf32>
    %412 = vector.shape_cast %411 : vector<16xf32> to vector<16x1xf32>
    %413 = tpu.reciprocal %412 {approx = true} : vector<16x1xf32> -> vector<16x1xf32>
    %414 = vector.broadcast %413 : vector<16x1xf32> to vector<16x8xf32>
    %415 = arith.mulf %410, %414 : vector<16x8xf32>
    %416 = arith.truncf %415 : vector<16x8xf32> to vector<16x8xbf16>
    %417 = arith.truncf %400 : vector<8x16xf32> to vector<8x16xbf16>
    %cst_231 = arith.constant dense<0.000000e+00> : vector<16x16xf32>
    %418 = tpu.matmul %416, %417, %cst_231 {dimension_numbers = #tpu.dot_dimension_numbers<[1], [0], [0], [1], [0, 0, 1, 1], [], []>} : vector<16x8xbf16>, vector<8x16xbf16>, vector<16x16xf32> -> vector<16x16xf32>
    %c5_232 = arith.constant 5 : index
    %c0_233 = arith.constant 0 : index
    %c0_234 = arith.constant 0 : index
    %419 = vector.load %arg11[%c5_232, %c0_233, %c0_234] : memref<8x16x32xf32, #tpu.memory_space<vmem>>, vector<1x16x32xf32>
    %420 = vector.shape_cast %419 : vector<1x16x32xf32> to vector<16x32xf32>
    %421 = arith.truncf %418 : vector<16x16xf32> to vector<16x16xbf16>
    %422 = arith.truncf %420 : vector<16x32xf32> to vector<16x32xbf16>
    %cst_235 = arith.constant dense<0.000000e+00> : vector<16x32xf32>
    %423 = tpu.matmul %421, %422, %cst_235 {dimension_numbers = #tpu.dot_dimension_numbers<[1], [0], [0], [1], [0, 0, 1, 1], [], []>} : vector<16x16xbf16>, vector<16x32xbf16>, vector<16x32xf32> -> vector<16x32xf32>
    %424 = arith.addf %373, %423 : vector<16x32xf32>
    %c2_236 = arith.constant 2 : index
    %c0_237 = arith.constant 0 : index
    %c0_238 = arith.constant 0 : index
    %425 = vector.load %arg12[%c2_236, %c0_237, %c0_238] : memref<4x1x32xf32, #tpu.memory_space<vmem>>, vector<1x1x32xf32>
    %426 = vector.shape_cast %425 : vector<1x1x32xf32> to vector<1x32xf32>
    %427 = vector.broadcast %426 : vector<1x32xf32> to vector<16x32xf32>
    %428 = arith.addf %424, %427 : vector<16x32xf32>
    %429 = arith.addf %6, %428 : vector<16x32xf32>
    %c3_239 = arith.constant 3 : index
    %c0_240 = arith.constant 0 : index
    %c0_241 = arith.constant 0 : index
    %430 = vector.load %arg13[%c3_239, %c0_240, %c0_241] : memref<5x1x32xf32, #tpu.memory_space<vmem>>, vector<1x1x32xf32>
    %431 = vector.shape_cast %430 : vector<1x1x32xf32> to vector<1x32xf32>
    %c3_242 = arith.constant 3 : index
    %c0_243 = arith.constant 0 : index
    %c0_244 = arith.constant 0 : index
    %432 = vector.load %arg14[%c3_242, %c0_243, %c0_244] : memref<5x1x32xf32, #tpu.memory_space<vmem>>, vector<1x1x32xf32>
    %433 = vector.shape_cast %432 : vector<1x1x32xf32> to vector<1x32xf32>
    %cst_245 = arith.constant dense<0.000000e+00> : vector<16xf32>
    %434 = vector.multi_reduction <add>, %429, %cst_245 [1] : vector<16x32xf32> to vector<16xf32>
    %435 = vector.shape_cast %434 : vector<16xf32> to vector<16x1xf32>
    %cst_246 = arith.constant 3.200000e+01 : f32
    %436 = vector.broadcast %cst_246 : f32 to vector<16x1xf32>
    %437 = arith.divf %435, %436 : vector<16x1xf32>
    %438 = vector.broadcast %437 : vector<16x1xf32> to vector<16x32xf32>
    %439 = arith.subf %429, %438 : vector<16x32xf32>
    %440 = arith.mulf %439, %439 : vector<16x32xf32>
    %cst_247 = arith.constant dense<0.000000e+00> : vector<16xf32>
    %441 = vector.multi_reduction <add>, %440, %cst_247 [1] : vector<16x32xf32> to vector<16xf32>
    %442 = vector.shape_cast %441 : vector<16xf32> to vector<16x1xf32>
    %cst_248 = arith.constant 3.200000e+01 : f32
    %443 = vector.broadcast %cst_248 : f32 to vector<16x1xf32>
    %444 = arith.divf %442, %443 : vector<16x1xf32>
    %445 = vector.broadcast %437 : vector<16x1xf32> to vector<16x32xf32>
    %446 = arith.subf %429, %445 : vector<16x32xf32>
    %cst_249 = arith.constant 9.99999974E-6 : f32
    %447 = vector.broadcast %cst_249 : f32 to vector<16x1xf32>
    %448 = arith.addf %444, %447 : vector<16x1xf32>
    %449 = math.rsqrt %448 : vector<16x1xf32>
    %450 = vector.broadcast %449 : vector<16x1xf32> to vector<16x32xf32>
    %451 = arith.mulf %446, %450 : vector<16x32xf32>
    %452 = vector.broadcast %431 : vector<1x32xf32> to vector<16x32xf32>
    %453 = arith.mulf %451, %452 : vector<16x32xf32>
    %454 = vector.broadcast %433 : vector<1x32xf32> to vector<16x32xf32>
    %455 = arith.addf %453, %454 : vector<16x32xf32>
    %456 = arith.addf %319, %1 : vector<8x32xf32>
    %457 = arith.addf %455, %7 : vector<16x32xf32>
    %cst_250 = arith.constant 0.000000e+00 : f32
    %458 = vector.broadcast %cst_250 : f32 to vector<8x32xf32>
    %c6 = arith.constant 6 : index
    %c0_251 = arith.constant 0 : index
    %c0_252 = arith.constant 0 : index
    %459 = vector.load %arg5[%c6, %c0_251, %c0_252] : memref<8x32x16xf32, #tpu.memory_space<vmem>>, vector<1x32x16xf32>
    %460 = vector.shape_cast %459 : vector<1x32x16xf32> to vector<32x16xf32>
    %461 = arith.truncf %456 : vector<8x32xf32> to vector<8x32xbf16>
    %462 = arith.truncf %460 : vector<32x16xf32> to vector<32x16xbf16>
    %cst_253 = arith.constant dense<0.000000e+00> : vector<8x16xf32>
    %463 = tpu.matmul %461, %462, %cst_253 {dimension_numbers = #tpu.dot_dimension_numbers<[1], [0], [0], [1], [0, 0, 1, 1], [], []>} : vector<8x32xbf16>, vector<32x16xbf16>, vector<8x16xf32> -> vector<8x16xf32>
    %c6_254 = arith.constant 6 : index
    %c0_255 = arith.constant 0 : index
    %c0_256 = arith.constant 0 : index
    %464 = vector.load %arg8[%c6_254, %c0_255, %c0_256] : memref<8x1x16xf32, #tpu.memory_space<vmem>>, vector<1x1x16xf32>
    %465 = vector.shape_cast %464 : vector<1x1x16xf32> to vector<1x16xf32>
    %466 = vector.broadcast %465 : vector<1x16xf32> to vector<8x16xf32>
    %467 = arith.addf %463, %466 : vector<8x16xf32>
    %c6_257 = arith.constant 6 : index
    %c0_258 = arith.constant 0 : index
    %c0_259 = arith.constant 0 : index
    %468 = vector.load %arg6[%c6_257, %c0_258, %c0_259] : memref<8x32x16xf32, #tpu.memory_space<vmem>>, vector<1x32x16xf32>
    %469 = vector.shape_cast %468 : vector<1x32x16xf32> to vector<32x16xf32>
    %470 = arith.truncf %457 : vector<16x32xf32> to vector<16x32xbf16>
    %471 = arith.truncf %469 : vector<32x16xf32> to vector<32x16xbf16>
    %cst_260 = arith.constant dense<0.000000e+00> : vector<16x16xf32>
    %472 = tpu.matmul %470, %471, %cst_260 {dimension_numbers = #tpu.dot_dimension_numbers<[1], [0], [0], [1], [0, 0, 1, 1], [], []>} : vector<16x32xbf16>, vector<32x16xbf16>, vector<16x16xf32> -> vector<16x16xf32>
    %c6_261 = arith.constant 6 : index
    %c0_262 = arith.constant 0 : index
    %c0_263 = arith.constant 0 : index
    %473 = vector.load %arg9[%c6_261, %c0_262, %c0_263] : memref<8x1x16xf32, #tpu.memory_space<vmem>>, vector<1x1x16xf32>
    %474 = vector.shape_cast %473 : vector<1x1x16xf32> to vector<1x16xf32>
    %475 = vector.broadcast %474 : vector<1x16xf32> to vector<16x16xf32>
    %476 = arith.addf %472, %475 : vector<16x16xf32>
    %c6_264 = arith.constant 6 : index
    %c0_265 = arith.constant 0 : index
    %c0_266 = arith.constant 0 : index
    %477 = vector.load %arg7[%c6_264, %c0_265, %c0_266] : memref<8x32x16xf32, #tpu.memory_space<vmem>>, vector<1x32x16xf32>
    %478 = vector.shape_cast %477 : vector<1x32x16xf32> to vector<32x16xf32>
    %479 = arith.truncf %455 : vector<16x32xf32> to vector<16x32xbf16>
    %480 = arith.truncf %478 : vector<32x16xf32> to vector<32x16xbf16>
    %cst_267 = arith.constant dense<0.000000e+00> : vector<16x16xf32>
    %481 = tpu.matmul %479, %480, %cst_267 {dimension_numbers = #tpu.dot_dimension_numbers<[1], [0], [0], [1], [0, 0, 1, 1], [], []>} : vector<16x32xbf16>, vector<32x16xbf16>, vector<16x16xf32> -> vector<16x16xf32>
    %c6_268 = arith.constant 6 : index
    %c0_269 = arith.constant 0 : index
    %c0_270 = arith.constant 0 : index
    %482 = vector.load %arg10[%c6_268, %c0_269, %c0_270] : memref<8x1x16xf32, #tpu.memory_space<vmem>>, vector<1x1x16xf32>
    %483 = vector.shape_cast %482 : vector<1x1x16xf32> to vector<1x16xf32>
    %484 = vector.broadcast %483 : vector<1x16xf32> to vector<16x16xf32>
    %485 = arith.addf %481, %484 : vector<16x16xf32>
    %486 = arith.truncf %467 : vector<8x16xf32> to vector<8x16xbf16>
    %487 = arith.truncf %476 : vector<16x16xf32> to vector<16x16xbf16>
    %cst_271 = arith.constant dense<0.000000e+00> : vector<8x16xf32>
    %488 = tpu.matmul %486, %487, %cst_271 {dimension_numbers = #tpu.dot_dimension_numbers<[1], [1], [0], [0], [0, 0, 1, 0], [], []>} : vector<8x16xbf16>, vector<16x16xbf16>, vector<8x16xf32> -> vector<8x16xf32>
    %cst_272 = arith.constant 2.500000e-01 : f32
    %489 = vector.broadcast %cst_272 : f32 to vector<8x16xf32>
    %490 = arith.mulf %488, %489 : vector<8x16xf32>
    %cst_273 = arith.constant dense<0xFF800000> : vector<8xf32>
    %491 = vector.multi_reduction <maximumf>, %490, %cst_273 [1] : vector<8x16xf32> to vector<8xf32>
    %492 = vector.shape_cast %491 : vector<8xf32> to vector<8x1xf32>
    %493 = vector.broadcast %492 : vector<8x1xf32> to vector<8x16xf32>
    %494 = arith.subf %490, %493 : vector<8x16xf32>
    %495 = math.exp %494 : vector<8x16xf32>
    %cst_274 = arith.constant dense<0.000000e+00> : vector<8xf32>
    %496 = vector.multi_reduction <add>, %495, %cst_274 [1] : vector<8x16xf32> to vector<8xf32>
    %497 = vector.shape_cast %496 : vector<8xf32> to vector<8x1xf32>
    %498 = tpu.reciprocal %497 {approx = true} : vector<8x1xf32> -> vector<8x1xf32>
    %499 = vector.broadcast %498 : vector<8x1xf32> to vector<8x16xf32>
    %500 = arith.mulf %495, %499 : vector<8x16xf32>
    %501 = arith.truncf %500 : vector<8x16xf32> to vector<8x16xbf16>
    %502 = arith.truncf %485 : vector<16x16xf32> to vector<16x16xbf16>
    %cst_275 = arith.constant dense<0.000000e+00> : vector<8x16xf32>
    %503 = tpu.matmul %501, %502, %cst_275 {dimension_numbers = #tpu.dot_dimension_numbers<[1], [0], [0], [1], [0, 0, 1, 1], [], []>} : vector<8x16xbf16>, vector<16x16xbf16>, vector<8x16xf32> -> vector<8x16xf32>
    %c6_276 = arith.constant 6 : index
    %c0_277 = arith.constant 0 : index
    %c0_278 = arith.constant 0 : index
    %504 = vector.load %arg11[%c6_276, %c0_277, %c0_278] : memref<8x16x32xf32, #tpu.memory_space<vmem>>, vector<1x16x32xf32>
    %505 = vector.shape_cast %504 : vector<1x16x32xf32> to vector<16x32xf32>
    %506 = arith.truncf %503 : vector<8x16xf32> to vector<8x16xbf16>
    %507 = arith.truncf %505 : vector<16x32xf32> to vector<16x32xbf16>
    %cst_279 = arith.constant dense<0.000000e+00> : vector<8x32xf32>
    %508 = tpu.matmul %506, %507, %cst_279 {dimension_numbers = #tpu.dot_dimension_numbers<[1], [0], [0], [1], [0, 0, 1, 1], [], []>} : vector<8x16xbf16>, vector<16x32xbf16>, vector<8x32xf32> -> vector<8x32xf32>
    %509 = arith.addf %458, %508 : vector<8x32xf32>
    %c7 = arith.constant 7 : index
    %c0_280 = arith.constant 0 : index
    %c0_281 = arith.constant 0 : index
    %510 = vector.load %arg5[%c7, %c0_280, %c0_281] : memref<8x32x16xf32, #tpu.memory_space<vmem>>, vector<1x32x16xf32>
    %511 = vector.shape_cast %510 : vector<1x32x16xf32> to vector<32x16xf32>
    %512 = arith.truncf %456 : vector<8x32xf32> to vector<8x32xbf16>
    %513 = arith.truncf %511 : vector<32x16xf32> to vector<32x16xbf16>
    %cst_282 = arith.constant dense<0.000000e+00> : vector<8x16xf32>
    %514 = tpu.matmul %512, %513, %cst_282 {dimension_numbers = #tpu.dot_dimension_numbers<[1], [0], [0], [1], [0, 0, 1, 1], [], []>} : vector<8x32xbf16>, vector<32x16xbf16>, vector<8x16xf32> -> vector<8x16xf32>
    %c7_283 = arith.constant 7 : index
    %c0_284 = arith.constant 0 : index
    %c0_285 = arith.constant 0 : index
    %515 = vector.load %arg8[%c7_283, %c0_284, %c0_285] : memref<8x1x16xf32, #tpu.memory_space<vmem>>, vector<1x1x16xf32>
    %516 = vector.shape_cast %515 : vector<1x1x16xf32> to vector<1x16xf32>
    %517 = vector.broadcast %516 : vector<1x16xf32> to vector<8x16xf32>
    %518 = arith.addf %514, %517 : vector<8x16xf32>
    %c7_286 = arith.constant 7 : index
    %c0_287 = arith.constant 0 : index
    %c0_288 = arith.constant 0 : index
    %519 = vector.load %arg6[%c7_286, %c0_287, %c0_288] : memref<8x32x16xf32, #tpu.memory_space<vmem>>, vector<1x32x16xf32>
    %520 = vector.shape_cast %519 : vector<1x32x16xf32> to vector<32x16xf32>
    %521 = arith.truncf %457 : vector<16x32xf32> to vector<16x32xbf16>
    %522 = arith.truncf %520 : vector<32x16xf32> to vector<32x16xbf16>
    %cst_289 = arith.constant dense<0.000000e+00> : vector<16x16xf32>
    %523 = tpu.matmul %521, %522, %cst_289 {dimension_numbers = #tpu.dot_dimension_numbers<[1], [0], [0], [1], [0, 0, 1, 1], [], []>} : vector<16x32xbf16>, vector<32x16xbf16>, vector<16x16xf32> -> vector<16x16xf32>
    %c7_290 = arith.constant 7 : index
    %c0_291 = arith.constant 0 : index
    %c0_292 = arith.constant 0 : index
    %524 = vector.load %arg9[%c7_290, %c0_291, %c0_292] : memref<8x1x16xf32, #tpu.memory_space<vmem>>, vector<1x1x16xf32>
    %525 = vector.shape_cast %524 : vector<1x1x16xf32> to vector<1x16xf32>
    %526 = vector.broadcast %525 : vector<1x16xf32> to vector<16x16xf32>
    %527 = arith.addf %523, %526 : vector<16x16xf32>
    %c7_293 = arith.constant 7 : index
    %c0_294 = arith.constant 0 : index
    %c0_295 = arith.constant 0 : index
    %528 = vector.load %arg7[%c7_293, %c0_294, %c0_295] : memref<8x32x16xf32, #tpu.memory_space<vmem>>, vector<1x32x16xf32>
    %529 = vector.shape_cast %528 : vector<1x32x16xf32> to vector<32x16xf32>
    %530 = arith.truncf %455 : vector<16x32xf32> to vector<16x32xbf16>
    %531 = arith.truncf %529 : vector<32x16xf32> to vector<32x16xbf16>
    %cst_296 = arith.constant dense<0.000000e+00> : vector<16x16xf32>
    %532 = tpu.matmul %530, %531, %cst_296 {dimension_numbers = #tpu.dot_dimension_numbers<[1], [0], [0], [1], [0, 0, 1, 1], [], []>} : vector<16x32xbf16>, vector<32x16xbf16>, vector<16x16xf32> -> vector<16x16xf32>
    %c7_297 = arith.constant 7 : index
    %c0_298 = arith.constant 0 : index
    %c0_299 = arith.constant 0 : index
    %533 = vector.load %arg10[%c7_297, %c0_298, %c0_299] : memref<8x1x16xf32, #tpu.memory_space<vmem>>, vector<1x1x16xf32>
    %534 = vector.shape_cast %533 : vector<1x1x16xf32> to vector<1x16xf32>
    %535 = vector.broadcast %534 : vector<1x16xf32> to vector<16x16xf32>
    %536 = arith.addf %532, %535 : vector<16x16xf32>
    %537 = arith.truncf %518 : vector<8x16xf32> to vector<8x16xbf16>
    %538 = arith.truncf %527 : vector<16x16xf32> to vector<16x16xbf16>
    %cst_300 = arith.constant dense<0.000000e+00> : vector<8x16xf32>
    %539 = tpu.matmul %537, %538, %cst_300 {dimension_numbers = #tpu.dot_dimension_numbers<[1], [1], [0], [0], [0, 0, 1, 0], [], []>} : vector<8x16xbf16>, vector<16x16xbf16>, vector<8x16xf32> -> vector<8x16xf32>
    %cst_301 = arith.constant 2.500000e-01 : f32
    %540 = vector.broadcast %cst_301 : f32 to vector<8x16xf32>
    %541 = arith.mulf %539, %540 : vector<8x16xf32>
    %cst_302 = arith.constant dense<0xFF800000> : vector<8xf32>
    %542 = vector.multi_reduction <maximumf>, %541, %cst_302 [1] : vector<8x16xf32> to vector<8xf32>
    %543 = vector.shape_cast %542 : vector<8xf32> to vector<8x1xf32>
    %544 = vector.broadcast %543 : vector<8x1xf32> to vector<8x16xf32>
    %545 = arith.subf %541, %544 : vector<8x16xf32>
    %546 = math.exp %545 : vector<8x16xf32>
    %cst_303 = arith.constant dense<0.000000e+00> : vector<8xf32>
    %547 = vector.multi_reduction <add>, %546, %cst_303 [1] : vector<8x16xf32> to vector<8xf32>
    %548 = vector.shape_cast %547 : vector<8xf32> to vector<8x1xf32>
    %549 = tpu.reciprocal %548 {approx = true} : vector<8x1xf32> -> vector<8x1xf32>
    %550 = vector.broadcast %549 : vector<8x1xf32> to vector<8x16xf32>
    %551 = arith.mulf %546, %550 : vector<8x16xf32>
    %552 = arith.truncf %551 : vector<8x16xf32> to vector<8x16xbf16>
    %553 = arith.truncf %536 : vector<16x16xf32> to vector<16x16xbf16>
    %cst_304 = arith.constant dense<0.000000e+00> : vector<8x16xf32>
    %554 = tpu.matmul %552, %553, %cst_304 {dimension_numbers = #tpu.dot_dimension_numbers<[1], [0], [0], [1], [0, 0, 1, 1], [], []>} : vector<8x16xbf16>, vector<16x16xbf16>, vector<8x16xf32> -> vector<8x16xf32>
    %c7_305 = arith.constant 7 : index
    %c0_306 = arith.constant 0 : index
    %c0_307 = arith.constant 0 : index
    %555 = vector.load %arg11[%c7_305, %c0_306, %c0_307] : memref<8x16x32xf32, #tpu.memory_space<vmem>>, vector<1x16x32xf32>
    %556 = vector.shape_cast %555 : vector<1x16x32xf32> to vector<16x32xf32>
    %557 = arith.truncf %554 : vector<8x16xf32> to vector<8x16xbf16>
    %558 = arith.truncf %556 : vector<16x32xf32> to vector<16x32xbf16>
    %cst_308 = arith.constant dense<0.000000e+00> : vector<8x32xf32>
    %559 = tpu.matmul %557, %558, %cst_308 {dimension_numbers = #tpu.dot_dimension_numbers<[1], [0], [0], [1], [0, 0, 1, 1], [], []>} : vector<8x16xbf16>, vector<16x32xbf16>, vector<8x32xf32> -> vector<8x32xf32>
    %560 = arith.addf %509, %559 : vector<8x32xf32>
    %c3_309 = arith.constant 3 : index
    %c0_310 = arith.constant 0 : index
    %c0_311 = arith.constant 0 : index
    %561 = vector.load %arg12[%c3_309, %c0_310, %c0_311] : memref<4x1x32xf32, #tpu.memory_space<vmem>>, vector<1x1x32xf32>
    %562 = vector.shape_cast %561 : vector<1x1x32xf32> to vector<1x32xf32>
    %563 = vector.broadcast %562 : vector<1x32xf32> to vector<8x32xf32>
    %564 = arith.addf %560, %563 : vector<8x32xf32>
    %565 = arith.addf %319, %564 : vector<8x32xf32>
    %c4_312 = arith.constant 4 : index
    %c0_313 = arith.constant 0 : index
    %c0_314 = arith.constant 0 : index
    %566 = vector.load %arg13[%c4_312, %c0_313, %c0_314] : memref<5x1x32xf32, #tpu.memory_space<vmem>>, vector<1x1x32xf32>
    %567 = vector.shape_cast %566 : vector<1x1x32xf32> to vector<1x32xf32>
    %c4_315 = arith.constant 4 : index
    %c0_316 = arith.constant 0 : index
    %c0_317 = arith.constant 0 : index
    %568 = vector.load %arg14[%c4_315, %c0_316, %c0_317] : memref<5x1x32xf32, #tpu.memory_space<vmem>>, vector<1x1x32xf32>
    %569 = vector.shape_cast %568 : vector<1x1x32xf32> to vector<1x32xf32>
    %cst_318 = arith.constant dense<0.000000e+00> : vector<8xf32>
    %570 = vector.multi_reduction <add>, %565, %cst_318 [1] : vector<8x32xf32> to vector<8xf32>
    %571 = vector.shape_cast %570 : vector<8xf32> to vector<8x1xf32>
    %cst_319 = arith.constant 3.200000e+01 : f32
    %572 = vector.broadcast %cst_319 : f32 to vector<8x1xf32>
    %573 = arith.divf %571, %572 : vector<8x1xf32>
    %574 = vector.broadcast %573 : vector<8x1xf32> to vector<8x32xf32>
    %575 = arith.subf %565, %574 : vector<8x32xf32>
    %576 = arith.mulf %575, %575 : vector<8x32xf32>
    %cst_320 = arith.constant dense<0.000000e+00> : vector<8xf32>
    %577 = vector.multi_reduction <add>, %576, %cst_320 [1] : vector<8x32xf32> to vector<8xf32>
    %578 = vector.shape_cast %577 : vector<8xf32> to vector<8x1xf32>
    %cst_321 = arith.constant 3.200000e+01 : f32
    %579 = vector.broadcast %cst_321 : f32 to vector<8x1xf32>
    %580 = arith.divf %578, %579 : vector<8x1xf32>
    %581 = vector.broadcast %573 : vector<8x1xf32> to vector<8x32xf32>
    %582 = arith.subf %565, %581 : vector<8x32xf32>
    %cst_322 = arith.constant 9.99999974E-6 : f32
    %583 = vector.broadcast %cst_322 : f32 to vector<8x1xf32>
    %584 = arith.addf %580, %583 : vector<8x1xf32>
    %585 = math.rsqrt %584 : vector<8x1xf32>
    %586 = vector.broadcast %585 : vector<8x1xf32> to vector<8x32xf32>
    %587 = arith.mulf %582, %586 : vector<8x32xf32>
    %588 = vector.broadcast %567 : vector<1x32xf32> to vector<8x32xf32>
    %589 = arith.mulf %587, %588 : vector<8x32xf32>
    %590 = vector.broadcast %569 : vector<1x32xf32> to vector<8x32xf32>
    %591 = arith.addf %589, %590 : vector<8x32xf32>
    %c0_323 = arith.constant 0 : index
    %c0_324 = arith.constant 0 : index
    %c0_325 = arith.constant 0 : index
    %592 = vector.load %arg19[%c0_323, %c0_324, %c0_325] : memref<1x8x32xf32, #tpu.memory_space<vmem>>, vector<1x8x32xf32>
    %593 = vector.shape_cast %592 : vector<1x8x32xf32> to vector<8x32xf32>
    %594 = vector.shape_cast %591 : vector<8x32xf32> to vector<1x8x32xf32>
    tpu.vector_store %arg19[%c0_323, %c0_324, %c0_325], %594 {strides = array<i32>} : memref<1x8x32xf32, #tpu.memory_space<vmem>>, vector<1x8x32xf32>,
    %c0_326 = arith.constant 0 : index
    %c0_327 = arith.constant 0 : index
    %c0_328 = arith.constant 0 : index
    %595 = vector.load %arg20[%c0_326, %c0_327, %c0_328] : memref<1x16x32xf32, #tpu.memory_space<vmem>>, vector<1x16x32xf32>
    %596 = vector.shape_cast %595 : vector<1x16x32xf32> to vector<16x32xf32>
    %597 = vector.shape_cast %455 : vector<16x32xf32> to vector<1x16x32xf32>
    tpu.vector_store %arg20[%c0_326, %c0_327, %c0_328], %597 {strides = array<i32>} : memref<1x16x32xf32, #tpu.memory_space<vmem>>, vector<1x16x32xf32>,
    return
  }
  func.func @transform_0(%arg0: i32) -> (i32, i32, i32) {
    %c0_i32 = arith.constant 0 : i32
    %c0_i32_0 = arith.constant 0 : i32
    %c0_i32_1 = arith.constant 0 : i32
    return %arg0, %c0_i32, %c0_i32_0 : i32, i32, i32
  }
  func.func @transform_1(%arg0: i32) -> (i32, i32, i32) {
    %c0_i32 = arith.constant 0 : i32
    %c0_i32_0 = arith.constant 0 : i32
    %c0_i32_1 = arith.constant 0 : i32
    return %arg0, %c0_i32, %c0_i32_0 : i32, i32, i32
  }
  func.func @transform_2(%arg0: i32) -> (i32, i32) {
    %c0_i32 = arith.constant 0 : i32
    %c0_i32_0 = arith.constant 0 : i32
    %c0_i32_1 = arith.constant 0 : i32
    return %c0_i32, %c0_i32_0 : i32, i32
  }
  func.func @transform_3(%arg0: i32) -> (i32, i32) {
    %c0_i32 = arith.constant 0 : i32
    %c0_i32_0 = arith.constant 0 : i32
    %c0_i32_1 = arith.constant 0 : i32
    return %c0_i32, %c0_i32_0 : i32, i32
  }
  func.func @transform_4(%arg0: i32) -> (i32, i32, i32) {
    %c0_i32 = arith.constant 0 : i32
    %c0_i32_0 = arith.constant 0 : i32
    %c0_i32_1 = arith.constant 0 : i32
    %c0_i32_2 = arith.constant 0 : i32
    return %c0_i32, %c0_i32_0, %c0_i32_1 : i32, i32, i32
  }
  func.func @transform_5(%arg0: i32) -> (i32, i32, i32) {
    %c0_i32 = arith.constant 0 : i32
    %c0_i32_0 = arith.constant 0 : i32
    %c0_i32_1 = arith.constant 0 : i32
    %c0_i32_2 = arith.constant 0 : i32
    return %c0_i32, %c0_i32_0, %c0_i32_1 : i32, i32, i32
  }
  func.func @transform_6(%arg0: i32) -> (i32, i32, i32) {
    %c0_i32 = arith.constant 0 : i32
    %c0_i32_0 = arith.constant 0 : i32
    %c0_i32_1 = arith.constant 0 : i32
    %c0_i32_2 = arith.constant 0 : i32
    return %c0_i32, %c0_i32_0, %c0_i32_1 : i32, i32, i32
  }
  func.func @transform_7(%arg0: i32) -> (i32, i32, i32) {
    %c0_i32 = arith.constant 0 : i32
    %c0_i32_0 = arith.constant 0 : i32
    %c0_i32_1 = arith.constant 0 : i32
    %c0_i32_2 = arith.constant 0 : i32
    return %c0_i32, %c0_i32_0, %c0_i32_1 : i32, i32, i32
  }
  func.func @transform_8(%arg0: i32) -> (i32, i32, i32) {
    %c0_i32 = arith.constant 0 : i32
    %c0_i32_0 = arith.constant 0 : i32
    %c0_i32_1 = arith.constant 0 : i32
    %c0_i32_2 = arith.constant 0 : i32
    return %c0_i32, %c0_i32_0, %c0_i32_1 : i32, i32, i32
  }
  func.func @transform_9(%arg0: i32) -> (i32, i32, i32) {
    %c0_i32 = arith.constant 0 : i32
    %c0_i32_0 = arith.constant 0 : i32
    %c0_i32_1 = arith.constant 0 : i32
    %c0_i32_2 = arith.constant 0 : i32
    return %c0_i32, %c0_i32_0, %c0_i32_1 : i32, i32, i32
  }
  func.func @transform_10(%arg0: i32) -> (i32, i32, i32) {
    %c0_i32 = arith.constant 0 : i32
    %c0_i32_0 = arith.constant 0 : i32
    %c0_i32_1 = arith.constant 0 : i32
    %c0_i32_2 = arith.constant 0 : i32
    return %c0_i32, %c0_i32_0, %c0_i32_1 : i32, i32, i32
  }
  func.func @transform_11(%arg0: i32) -> (i32, i32, i32) {
    %c0_i32 = arith.constant 0 : i32
    %c0_i32_0 = arith.constant 0 : i32
    %c0_i32_1 = arith.constant 0 : i32
    %c0_i32_2 = arith.constant 0 : i32
    return %c0_i32, %c0_i32_0, %c0_i32_1 : i32, i32, i32
  }
  func.func @transform_12(%arg0: i32) -> (i32, i32, i32) {
    %c0_i32 = arith.constant 0 : i32
    %c0_i32_0 = arith.constant 0 : i32
    %c0_i32_1 = arith.constant 0 : i32
    %c0_i32_2 = arith.constant 0 : i32
    return %c0_i32, %c0_i32_0, %c0_i32_1 : i32, i32, i32
  }
  func.func @transform_13(%arg0: i32) -> (i32, i32, i32) {
    %c0_i32 = arith.constant 0 : i32
    %c0_i32_0 = arith.constant 0 : i32
    %c0_i32_1 = arith.constant 0 : i32
    %c0_i32_2 = arith.constant 0 : i32
    return %c0_i32, %c0_i32_0, %c0_i32_1 : i32, i32, i32
  }
  func.func @transform_14(%arg0: i32) -> (i32, i32) {
    %c0_i32 = arith.constant 0 : i32
    %c0_i32_0 = arith.constant 0 : i32
    %c0_i32_1 = arith.constant 0 : i32
    return %c0_i32, %c0_i32_0 : i32, i32
  }
  func.func @transform_15(%arg0: i32) -> (i32, i32) {
    %c0_i32 = arith.constant 0 : i32
    %c0_i32_0 = arith.constant 0 : i32
    %c0_i32_1 = arith.constant 0 : i32
    return %c0_i32, %c0_i32_0 : i32, i32
  }
  func.func @transform_16(%arg0: i32) -> (i32, i32) {
    %c0_i32 = arith.constant 0 : i32
    %c0_i32_0 = arith.constant 0 : i32
    %c0_i32_1 = arith.constant 0 : i32
    return %c0_i32, %c0_i32_0 : i32, i32
  }
  func.func @transform_17(%arg0: i32) -> (i32, i32) {
    %c0_i32 = arith.constant 0 : i32
    %c0_i32_0 = arith.constant 0 : i32
    %c0_i32_1 = arith.constant 0 : i32
    return %c0_i32, %c0_i32_0 : i32, i32
  }
  func.func @transform_18(%arg0: i32) -> (i32, i32, i32) {
    %c0_i32 = arith.constant 0 : i32
    %c0_i32_0 = arith.constant 0 : i32
    %c0_i32_1 = arith.constant 0 : i32
    return %arg0, %c0_i32, %c0_i32_0 : i32, i32, i32
  }
  func.func @transform_19(%arg0: i32) -> (i32, i32, i32) {
    %c0_i32 = arith.constant 0 : i32
    %c0_i32_0 = arith.constant 0 : i32
    %c0_i32_1 = arith.constant 0 : i32
    return %arg0, %c0_i32, %c0_i32_0 : i32, i32, i32
  }
}

</mosaic_0001>

<bundles_post_ra>
// kernel: sam_forward.3
= control target key start
LH: loop header
LB: loop body
LE: loop exit
PB: predicated region body
PF: predicated region fallthrough
CT: control target
= control target key end

     0   :  { %v2781_v0 = vmov 0   ;;  %vm136_vm0 = vcmask 523264   ;;  %vm2783_vm1 = vmmov 0   ;;  %vm416_vm2 = vcmask 261120   ;;  %s3786_s2 = inlined_call_operand.vmem [shape: f32[192,64], index: 2, kind: input, shape index: {}]   ;;  %s3787_s0 = inlined_call_operand.vmem [shape: f32[1,16,192], index: 0, kind: input, shape index: {}]   ;;  %s3788_s3 = inlined_call_operand.vmem [shape: f32[1,64], index: 3, kind: input, shape index: {}]   ;;  %s3789_s1 = inlined_call_operand.vmem [shape: f32[16,64], index: 1, kind: input, shape index: {}]   ;;  %s3790_s6 = inlined_call_operand.vmem [shape: f32[2,64,32], index: 6, kind: input, shape index: {}]   ;;  %s3791_s4 = inlined_call_operand.vmem [shape: f32[1,64], index: 4, kind: input, shape index: {}]   ;;  %s3792_s5 = inlined_call_operand.vmem [shape: f32[1,64], index: 5, kind: input, shape index: {}]   ;;  %s3793_s7 = inlined_call_operand.vmem [shape: f32[2,64,32], index: 7, kind: input, shape index: {}]   ;;  %s3794_s8 = inlined_call_operand.vmem [shape: f32[2,64,32], index: 8, kind: input, shape index: {}]   ;;  %s3795_s10 = inlined_call_operand.vmem [shape: f32[2,1,32], index: 10, kind: input, shape index: {}]   ;;  %s3796_s9 = inlined_call_operand.vmem [shape: f32[2,1,32], index: 9, kind: input, shape index: {}]   ;;  %s3797_s11 = inlined_call_operand.vmem [shape: f32[2,1,32], index: 11, kind: input, shape index: {}]   ;;  %s3798_s12 = inlined_call_operand.vmem [shape: f32[2,32,64], index: 12, kind: input, shape index: {}]   ;;  %s3799_s13 = inlined_call_operand.vmem [shape: f32[1,64], index: 13, kind: input, shape index: {}]   ;;  %s3800_s16 = inlined_call_operand.vmem [shape: f32[64,128], index: 16, kind: input, shape index: {}]   ;;  %s3801_s14 = inlined_call_operand.vmem [shape: f32[1,64], index: 14, kind: input, shape index: {}]   ;;  %s3802_s15 = inlined_call_operand.vmem [shape: f32[1,64], index: 15, kind: input, shape index: {}]   ;;  %s3803_s18 = inlined_call_operand.vmem [shape: f32[128,64], index: 18, kind: input, shape index: {}]   ;;  %s3804_s20 = inlined_call_operand.vmem [shape: f32[64,32], index: 20, kind: input, shape index: {}]   ;;  %s3805_s17 = inlined_call_operand.vmem [shape: f32[1,128], index: 17, kind: input, shape index: {}]   ;;  %s3806_s19 = inlined_call_operand.vmem [shape: f32[1,64], index: 19, kind: input, shape index: {}]   ;;  %s3807_s21 = inlined_call_operand.vmem [shape: f32[1,32], index: 21, kind: input, shape index: {}]   ;;  %s3808_s22 = inlined_call_operand.vmem [shape: f32[1,32], index: 22, kind: input, shape index: {}]   ;;  %s3809_s23 = inlined_call_operand.vmem [shape: f32[9,16,16], index: 23, kind: input, shape index: {}]   ;;  %s3810_s24 = inlined_call_operand.vmem [shape: f32[9,32,32], index: 24, kind: input, shape index: {}]   ;;  %s3811_s25 = inlined_call_operand.vmem [shape: f32[1,32], index: 25, kind: input, shape index: {}]   ;;  %s3812_s26 = inlined_call_operand.vmem [shape: f32[1,32], index: 26, kind: input, shape index: {}]   ;;  %s3813_s27 = inlined_call_operand.vmem [shape: f32[1,16,32], index: 27, kind: output, shape index: {}]  }
   0x1   :  { %3823 = sst [smem:[#allocation2_spill]] %s3786_s2  ;;  %140 = vmatprep.subr.bf16.mxu0 %v2781_v0  ;;  %vm466_vm3 = vcmask 130048  }
   0x2   :  { %3824 = sst [smem:[#allocation3_spill]] %s3787_s0 }
   0x3   :  { %3825 = sst [smem:[#allocation4_spill]] %s3788_s3 }
   0x4   :  { %3826 = sst [smem:[#allocation5_spill]] %s3789_s1 }
   0x5   :  { %3827 = sst [smem:[#allocation6_spill]] %s3790_s6 }
   0x6   :  { %3828 = sst [smem:[#allocation7_spill]] %s3791_s4 }
   0x7   :  { %3829 = sst [smem:[#allocation8_spill]] %s3792_s5 }
   0x8   :  { %3830 = sst [smem:[#allocation9_spill]] %s3793_s7 }
   0x9   :  { %3831 = sst [smem:[#allocation10_spill]] %s3794_s8 }
   0xa   :  { %3832 = sst [smem:[#allocation11_spill]] %s3795_s10 }
   0xb   :  { %3833 = sst [smem:[#allocation12_spill]] %s3796_s9 }
   0xc   :  { %3834 = sst [smem:[#allocation13_spill]] %s3797_s11 }
   0xd   :  { %s3835_s8 = sld [smem:[#allocation2_spill]] }
   0xe   :  { %s3836_s4 = sld [smem:[#allocation3_spill]] }
   0xf   :  { %s3837_s0 = sld [smem:[#allocation4_spill]] }
  0x10   :  { %s3838_s29 = sld [smem:[#allocation5_spill]] }
  0x11   :  { %s3839_s2 = sld [smem:[#allocation6_spill]] }
  0x12   :  { %s3840_s6 = sld [smem:[#allocation7_spill]] }
  0x13   :  { %v105_v1 = vld [vmem:[%s3835_s8 + $0x70] sm:$0xff]  ;;  %v106_v2 = vld [vmem:[%s3835_s8 + $0x78] sm:$0xff]  ;;  %v103_v3 = vld [vmem:[%s3835_s8 + $0x60] sm:$0xff]  ;;  %s3841_s28 = sld [smem:[#allocation8_spill]] }
  0x14   :  { %v124_v4 = vpack.c.bf16 %v106_v2, %v105_v1  ;;  %v104_v5 = vld [vmem:[%s3835_s8 + $0x68] sm:$0xff]  ;;  %v101_v7 = vld [vmem:[%s3835_s8 + $0x50] sm:$0xff]  ;;  %v102_v8 = vld [vmem:[%s3835_s8 + $0x58] sm:$0xff]  ;;  %s3842_s9 = sld [smem:[#allocation9_spill]] }
  0x15   :  { %v123_v6 = vpack.c.bf16 %v104_v5, %v103_v3  ;;  %v122_v9 = vpack.c.bf16 %v102_v8, %v101_v7  ;;  %v99_v10 = vld [vmem:[%s3835_s8 + $0x40] sm:$0xff]  ;;  %v100_v11 = vld [vmem:[%s3835_s8 + $0x48] sm:$0xff]  ;;  %v90_v13 = vld [vmem:[%s3836_s4 + $0x18] sm:$0xff]  ;;  %v2782_v5 = vmov 0.0   ;;  %s3843_s5 = sld [smem:[#allocation10_spill]] }
  0x16   :  { %141 = vmatpush1.bf16.msra.mxu0 %v124_v4  ;;  %v88_v12 = vld [vmem:[%s3836_s4 + $0x8] sm:$0xff]  ;;  %v121_v15 = vpack.c.bf16 %v100_v11, %v99_v10  ;;  %v97_v16 = vld [vmem:[%s3835_s8 + $0x30] sm:$0xff]  ;;  %v98_v17 = vld [vmem:[%s3835_s8 + $0x38] sm:$0xff]  ;;  %2460 = vmatprep.subr.bf16.mxu1 %v2782_v5  ;;  %s3844_s30 = sld [smem:[#allocation11_spill]] }
  0x17   :  { %142 = vmatprep.subr.bf16.mxu0 %v2781_v0  ;;  %v116_v14 = vpack.c.bf16 %v90_v13, %v88_v12  ;;  %v120_v18 = vpack.c.bf16 %v98_v17, %v97_v16  ;;  %v95_v19 = vld [vmem:[%s3835_s8 + $0x20] sm:$0xff]  ;;  %v96_v20 = vld [vmem:[%s3835_s8 + $0x28] sm:$0xff]  ;;  %v93_v22 = vld [vmem:[%s3835_s8 + $0x10] sm:$0xff]  ;;  %2468 = vmatprep.mubr.msk.bf16.mxu1 %vm2783_vm1, %v2782_v5 }
  0x18   :  { %v119_v21 = vpack.c.bf16 %v96_v20, %v95_v19  ;;  %v94_v23 = vld [vmem:[%s3835_s8 + $0x18] sm:$0xff]  ;;  %v91_v25 = vld [vmem:[%s3835_s8] sm:$0xff]  ;;  %v92_v26 = vld [vmem:[%s3835_s8 + $0x8] sm:$0xff] }
  0x19   :  { %2223 = vmatprep.mubr.msk.bf16.mxu0 %vm136_vm0, %v116_v14  ;;  %v118_v24 = vpack.c.bf16 %v94_v23, %v93_v22  ;;  %v117_v27 = vpack.c.bf16 %v92_v26, %v91_v25  ;;  %v113_v28 = vld [vmem:[%s3835_s8 + $0xb0] sm:$0xff]  ;;  %v114_v29 = vld [vmem:[%s3835_s8 + $0xb8] sm:$0xff]  ;;  %v111_v31 = vld [vmem:[%s3835_s8 + $0xa0] sm:$0xff] }
  0x1a   :  { %143 = vmatpush1.bf16.msra.mxu0 %v123_v6  ;;  %v128_v30 = vpack.c.bf16 %v114_v29, %v113_v28  ;;  %v112_v32 = vld [vmem:[%s3835_s8 + $0xa8] sm:$0xff]  ;;  %v109_v34 = vld [vmem:[%s3835_s8 + $0x90] sm:$0xff]  ;;  %v110_v35 = vld [vmem:[%s3835_s8 + $0x98] sm:$0xff] }
  0x1b   :  { %144 = vmatprep.subr.bf16.mxu0 %v2781_v0  ;;  %v127_v33 = vpack.c.bf16 %v112_v32, %v111_v31  ;;  %v126_v36 = vpack.c.bf16 %v110_v35, %v109_v34  ;;  %v107_v37 = vld [vmem:[%s3835_s8 + $0x80] sm:$0xff]  ;;  %v108_v38 = vld [vmem:[%s3835_s8 + $0x88] sm:$0xff]  ;;  %v89_v41 = vld [vmem:[%s3836_s4 + $0x10] sm:$0xff]  ;;  %s3846_s8 = sld [smem:[#allocation13_spill]] }
  0x1c   :  { %v125_v39 = vpack.c.bf16 %v108_v38, %v107_v37  ;;  %v87_v40 = vld [vmem:[%s3836_s4] sm:$0xff]  ;;  %v182_v50 = vld [vmem:[%s3838_s29 + $0x8] sm:$0xff]  ;;  %v236_v2 = vld [vmem:[%s3839_s2 + $0x30] sm:$0xff] }
  0x1d   :  { %v115_v42 = vpack.c.bf16 %v89_v41, %v87_v40  ;;  %v2222_v43 = vld [vmem:[%s3837_s0] ss:$0 sm:$0xff]  ;;  %v237_v3 = vld [vmem:[%s3839_s2 + $0x38] sm:$0xff]  ;;  %v235_v7 = vld [vmem:[%s3839_s2 + $0x28] sm:$0xff]  ;;  %s3845_s0 = sld [smem:[#allocation12_spill]] }
  0x1e   :  { %145 = vmatpush1.bf16.msra.mxu0 %v122_v9  ;;  %v181_v45 = vld [vmem:[%s3838_s29] sm:$0xff]  ;;  %v242_v4 = vpack.c.bf16 %v237_v3, %v236_v2  ;;  %v232_v9 = vld [vmem:[%s3839_s2 + $0x10] sm:$0xff]  ;;  %v233_v10 = vld [vmem:[%s3839_s2 + $0x18] sm:$0xff] }
  0x1f   :  { %146 = vmatprep.subr.bf16.mxu0 %v2781_v0  ;;  %v234_v6 = vld [vmem:[%s3839_s2 + $0x20] sm:$0xff]  ;;  %v240_v11 = vpack.c.bf16 %v233_v10, %v232_v9  ;;  %v231_v13 = vld [vmem:[%s3839_s2 + $0x8] sm:$0xff]  ;;  %v300_v29 = vld [vmem:[%s3842_s9 + $0x30] sm:$0xff] }
  0x20   :  { %2461 = vmatpush3.bf16.msra.mxu1 %v242_v4  ;;  %v241_v8 = vpack.c.bf16 %v235_v7, %v234_v6  ;;  %v230_v12 = vld [vmem:[%s3839_s2] sm:$0xff]  ;;  %v296_v38 = vld [vmem:[%s3842_s9 + $0x10] sm:$0xff] }
  0x21   :  { %2462 = vmatprep.subr.bf16.mxu1 %v2782_v5  ;;  %v239_v14 = vpack.c.bf16 %v231_v13, %v230_v12  ;;  %v2224_v23 = vld [vmem:[%s3840_s6] ss:$0 sm:$0xff]  ;;  %v2240_v10 = vld [vmem:[%s3839_s2 + $0x70] sm:$0xff] }
  0x22   :  { %147 = vmatpush1.bf16.msra.mxu0 %v121_v15  ;;  %v298_v35 = vld [vmem:[%s3842_s9 + $0x20] sm:$0xff] }
  0x23   :  { %148 = vmatprep.subr.bf16.mxu0 %v2781_v0  ;;  %v294_v41 = vld [vmem:[%s3842_s9] sm:$0xff] }
  0x24   :  { %2463 = vmatpush3.bf16.msra.mxu1 %v241_v8  ;;  %v2226_v8 = vld [vmem:[%s3845_s0] ss:$0 sm:$0xff] }
  0x25   :  { %2464 = vmatprep.subr.bf16.mxu1 %v2782_v5 }
  0x26   :  { %149 = vmatpush1.bf16.msra.mxu0 %v120_v18 }
  0x27   :  { %150 = vmatprep.subr.bf16.mxu0 %v2781_v0 }
  0x28   :  { %2465 = vmatpush3.bf16.msra.mxu1 %v240_v11  ;;  %v2241_v11 = vld [vmem:[%s3839_s2 + $0x78] sm:$0xff] }
  0x29   :  { %2466 = vmatprep.subr.bf16.mxu1 %v2782_v5  ;;  %v554_v13 = vpack.c.bf16 %v2241_v11, %v2240_v10 }
  0x2a   :  { %151 = vmatpush1.bf16.msra.mxu0 %v119_v21 }
  0x2b   :  { %152 = vmatprep.subr.bf16.mxu0 %v2781_v0 }
  0x2c   :  { %2467 = vmatpush3.bf16.msra.mxu1 %v239_v14 }
  0x2d   :  { %2472 = vmatprep.subr.bf16.mxu1 %v2782_v5 }
  0x2e   :  { %153 = vmatpush1.bf16.msra.mxu0 %v118_v24 }
  0x2f   :  { %154 = vmatprep.subr.bf16.mxu0 %v2781_v0 }
  0x32   :  { %155 = vmatpush1.bf16.msra.mxu0 %v117_v27  ;;  %v2225_v27 = vld [vmem:[%s3841_s28] ss:$0 sm:$0xff] }
  0x33   :  { %164 = vmatprep.subr.bf16.mxu0 %v2781_v0 }
  0x36   :  { %165 = vmatpush2.bf16.msra.mxu0 %v128_v30  ;;  %v301_v30 = vld [vmem:[%s3842_s9 + $0x38] sm:$0xff] }
  0x37   :  { %166 = vmatprep.subr.bf16.mxu0 %v2781_v0 }
  0x3a   :  { %167 = vmatpush2.bf16.msra.mxu0 %v127_v33  ;;  %v305_v33 = vpack.c.bf16 %v301_v30, %v300_v29  ;;  %v2234_v29 = vld [vmem:[%s3839_s2 + $0x40] sm:$0xff]  ;;  %v2235_v30 = vld [vmem:[%s3839_s2 + $0x48] sm:$0xff] }
  0x3b   :  { %168 = vmatprep.subr.bf16.mxu0 %v2781_v0 }
  0x3e   :  { %169 = vmatpush2.bf16.msra.mxu0 %v126_v36  ;;  %v299_v36 = vld [vmem:[%s3842_s9 + $0x28] sm:$0xff] }
  0x3f   :  { %170 = vmatprep.subr.bf16.mxu0 %v2781_v0  ;;  %v304_v37 = vpack.c.bf16 %v299_v36, %v298_v35  ;;  %v2260_v36 = vld [vmem:[%s3843_s5 + $0x60] sm:$0xff] }
  0x42   :  { %171 = vmatpush2.bf16.msra.mxu0 %v125_v39  ;;  %v297_v39 = vld [vmem:[%s3842_s9 + $0x18] sm:$0xff] }
  0x43   :  { %2496 = vmatprep.subr.bf16.mxu0 %v2782_v5  ;;  %v303_v40 = vpack.c.bf16 %v297_v39, %v296_v38  ;;  %v2258_v39 = vld [vmem:[%s3843_s5 + $0x50] sm:$0xff] }
  0x45   :  { %173 = vmatmul.mubr.bf16.vlgmr.msra.gmra.mxu0 %v115_v42  ;;  %v295_v42 = vld [vmem:[%s3842_s9 + $0x8] sm:$0xff] }
  0x46   :  { %2498 = vmatprep.mubr.msk.bf16.mxu0 %vm2783_vm1, %v2782_v5 }
 0x105   :  { %v174_v44 = vpop.f32.mrf.mxu0 }
 0x106   :  { %v175_v46 = vadd.f32 %v2222_v43, %v174_v44  ;;  %v360_v44 = vld [vmem:[%s3843_s5 + $0x30] sm:$0xff] }
 0x107   :  { %v176_v47 = vpop.f32.mrf.mxu0 }
 0x108   :  { %v3027_v48 = vadd.f32 %v181_v45, %v175_v46  ;;  %v361_v45 = vld [vmem:[%s3843_s5 + $0x38] sm:$0xff]  ;;  %v358_v47 = vld [vmem:[%s3843_s5 + $0x20] sm:$0xff] }
 0x109   :  { %v177_v49 = vpop.f32.mrf.mxu0  ;;  %v365_v46 = vpack.c.bf16 %v361_v45, %v360_v44 }
 0x10a   :  { %v178_v51 = vadd.f32 %v2222_v43, %v177_v49  ;;  %v187_v52 = vsel %vm136_vm0, %v3027_v48, 0.0  ;;  %v302_v43 = vpack.c.bf16 %v295_v42, %v294_v41  ;;  %v359_v49 = vld [vmem:[%s3843_s5 + $0x28] sm:$0xff]  ;;  %v2256_v42 = vld [vmem:[%s3843_s5 + $0x40] sm:$0xff] }
 0x10b   :  { %v179_v53 = vpop.f32.mrf.mxu0  ;;  %188 = vadd.xlane.f32.xlu0 %v187_v52  ;;  %v357_v52 = vld [vmem:[%s3843_s5 + $0x18] sm:$0xff] }
 0x10c   :  { %v3034_v54 = vadd.f32 %v182_v50, %v178_v51  ;;  %v364_v50 = vpack.c.bf16 %v359_v49, %v358_v47  ;;  %v356_v51 = vld [vmem:[%s3843_s5 + $0x10] sm:$0xff] }
 0x10d   :  { %v363_v53 = vpack.c.bf16 %v357_v52, %v356_v51 }
 0x10e   :  { %v190_v55 = vsel %vm136_vm0, %v3034_v54, 0.0 }
 0x10f   :  { %191 = vadd.xlane.f32.xlu0 %v190_v55  ;;  %v354_v55 = vld [vmem:[%s3843_s5] sm:$0xff] }
 0x194   :  { %v189_v56 = vpop.xlane.xlu0 %188 }
 0x195   :  { %v194_v57 = vmul.f32 0.015625, %v189_v56  ;;  %v355_v56 = vld [vmem:[%s3843_s5 + $0x8] sm:$0xff] }
 0x197   :  { %v196_v58 = vsub.f32 %v3027_v48, %v194_v57  ;;  %v362_v57 = vpack.c.bf16 %v355_v56, %v354_v55  ;;  %v2243_v56 = vld [vmem:[%s3845_s0 + $0x1] ss:$0 sm:$0xff] }
 0x198   :  { %v192_v59 = vpop.xlane.xlu0 %191 }
 0x199   :  { %v195_v60 = vmul.f32 0.015625, %v192_v59  ;;  %v198_v61 = vmul.f32 %v196_v58, %v196_v58 }
 0x19b   :  { %v197_v62 = vsub.f32 %v3034_v54, %v195_v60  ;;  %v200_v63 = vsel %vm136_vm0, %v198_v61, 0.0 }
 0x19c   :  { %201 = vadd.xlane.f32.xlu1 %v200_v63  ;;  %v2228_v63 = vld [vmem:[%s3844_s30] ss:$0 sm:$0xff] }
 0x19d   :  { %v199_v0 = vmul.f32 %v197_v62, %v197_v62 }
 0x19f   :  { %v203_v1 = vsel %vm136_vm0, %v199_v0, 0.0 }
 0x1a0   :  { %204 = vadd.xlane.f32.xlu1 %v203_v1 }
 0x225   :  { %v202_v15 = vpop.xlane.xlu1 %201 }
 0x226   :  { %v206_v16 = vmul.f32 0.015625, %v202_v15  ;;  %v2238_v15 = vld [vmem:[%s3839_s2 + $0x60] sm:$0xff] }
 0x228   :  { %v208_v17 = vadd.f32 1e-06, %v206_v16  ;;  %v2239_v16 = vld [vmem:[%s3839_s2 + $0x68] sm:$0xff] }
 0x229   :  { %v205_v18 = vpop.xlane.xlu1 %204 }
 0x22a   :  { %2745 = vrsqrt.f32 %v208_v17  ;;  %v207_v19 = vmul.f32 0.015625, %v205_v18  ;;  %v2230_v18 = vld [vmem:[%s3846_s8] ss:$0 sm:$0xff] }
 0x22c   :  { %v209_v20 = vadd.f32 1e-06, %v207_v19 }
 0x22e   :  { %2747 = vrsqrt.f32 %v209_v20  ;;  %v553_v20 = vpack.c.bf16 %v2239_v16, %v2238_v15 }
 0x237   :  { %v2746_v21 = vpop.eup %2745 }
 0x238   :  { %v212_v22 = vmul.f32 %v2746_v21, %v196_v58  ;;  %v2236_v21 = vld [vmem:[%s3839_s2 + $0x50] sm:$0xff] }
 0x23a   :  { %v220_v25 = vmul.f32 %v2224_v23, %v212_v22  ;;  %v2237_v22 = vld [vmem:[%s3839_s2 + $0x58] sm:$0xff] }
 0x23b   :  { %v2748_v24 = vpop.eup %2747 }
 0x23c   :  { %v213_v26 = vmul.f32 %v2748_v24, %v197_v62  ;;  %v228_v31 = vadd.f32 %v2225_v27, %v220_v25 }
 0x23e   :  { %v221_v28 = vmul.f32 %v2224_v23, %v213_v26 }
 0x240   :  { %v229_v32 = vadd.f32 %v2225_v27, %v221_v28  ;;  %v552_v27 = vpack.c.bf16 %v2237_v22, %v2236_v21  ;;  %v2251_v21 = vld [vmem:[%s3842_s9 + $0x70] sm:$0xff]  ;;  %v2252_v22 = vld [vmem:[%s3842_s9 + $0x78] sm:$0xff] }
 0x242   :  { %v3088_v34 = vpack.c.bf16 %v229_v32, %v228_v31  ;;  %v551_v31 = vpack.c.bf16 %v2235_v30, %v2234_v29  ;;  %v2262_v32 = vld [vmem:[%s3843_s5 + $0x70] sm:$0xff]  ;;  %v2250_v29 = vld [vmem:[%s3842_s9 + $0x68] sm:$0xff] }
 0x244   :  { %2469 = vmatmul.mubr.msk.bf16.vlgmr.msra.gmra.mxu1 %vm136_vm0, %v3088_v34 }
 0x245   :  { %2473 = vmatpush3.bf16.msra.mxu1 %v305_v33  ;;  %2480 = vmatprep.mubr.msk.bf16.mxu1 %vm2783_vm1, %v2782_v5  ;;  %v2263_v33 = vld [vmem:[%s3843_s5 + $0x78] sm:$0xff] }
 0x246   :  { %2474 = vmatprep.subr.bf16.mxu1 %v2782_v5  ;;  %v678_v35 = vpack.c.bf16 %v2263_v33, %v2262_v32  ;;  %v2248_v32 = vld [vmem:[%s3842_s9 + $0x58] sm:$0xff] }
 0x249   :  { %2475 = vmatpush3.bf16.msra.mxu1 %v304_v37  ;;  %v2261_v37 = vld [vmem:[%s3843_s5 + $0x68] sm:$0xff] }
 0x24a   :  { %2476 = vmatprep.subr.bf16.mxu1 %v2782_v5  ;;  %v677_v38 = vpack.c.bf16 %v2261_v37, %v2260_v36  ;;  %v2246_v36 = vld [vmem:[%s3842_s9 + $0x48] sm:$0xff] }
 0x24d   :  { %2477 = vmatpush3.bf16.msra.mxu1 %v303_v40  ;;  %v2259_v40 = vld [vmem:[%s3843_s5 + $0x58] sm:$0xff] }
 0x24e   :  { %2478 = vmatprep.subr.bf16.mxu1 %v2782_v5  ;;  %v676_v41 = vpack.c.bf16 %v2259_v40, %v2258_v39 }
 0x251   :  { %2479 = vmatpush3.bf16.msra.mxu1 %v302_v43  ;;  %v2257_v43 = vld [vmem:[%s3843_s5 + $0x48] sm:$0xff] }
 0x252   :  { %2484 = vmatprep.subr.bf16.mxu1 %v2782_v5  ;;  %v675_v44 = vpack.c.bf16 %v2257_v43, %v2256_v42 }
 0x254   :  { %2481 = vmatmul.mubr.msk.bf16.vlgmr.msra.gmra.mxu1 %vm136_vm0, %v3088_v34 }
 0x255   :  { %2485 = vmatpush3.bf16.msra.mxu1 %v365_v46  ;;  %2492 = vmatprep.mubr.msk.bf16.mxu1 %vm2783_vm1, %v2782_v5 }
 0x256   :  { %2486 = vmatprep.subr.bf16.mxu1 %v2782_v5 }
 0x259   :  { %2487 = vmatpush3.bf16.msra.mxu1 %v364_v50 }
 0x25a   :  { %2488 = vmatprep.subr.bf16.mxu1 %v2782_v5 }
 0x25d   :  { %2489 = vmatpush3.bf16.msra.mxu1 %v363_v53 }
 0x25e   :  { %2490 = vmatprep.subr.bf16.mxu1 %v2782_v5 }
 0x261   :  { %2491 = vmatpush3.bf16.msra.mxu1 %v362_v57 }
 0x262   :  { %2502 = vmatprep.subr.bf16.mxu1 %v2782_v5 }
 0x264   :  { %2493 = vmatmul.mubr.msk.bf16.vlgmr.msra.gmra.mxu1 %vm136_vm0, %v3088_v34 }
 0x265   :  { %2504 = vmatprep.mubr.msk.bf16.mxu1 %vm2783_vm1, %v2782_v5 }
 0x304   :  { %v287_v58 = vpop.f32.mrf.mxu1 }
 0x305   :  { %v288_v12 = vadd.f32 %v2226_v8, %v287_v58 }
 0x306   :  { %v2470_v59 = vpop.f32.mrf.mxu1 }
 0x308   :  { %v290_v60 = vpop.f32.mrf.mxu1 }
 0x309   :  { %v291_v9 = vadd.f32 %v2226_v8, %v290_v60 }
 0x30a   :  { %v2471_v61 = vpop.f32.mrf.mxu1 }
 0x30b   :  { %v414_v14 = vpack.c.bf16 %v291_v9, %v288_v12 }
 0x314   :  { %v347_v62 = vpop.f32.mrf.mxu1 }
 0x315   :  { %v348_v2 = vadd.f32 %v2228_v63, %v347_v62 }
 0x316   :  { %v2482_v0 = vpop.f32.mrf.mxu1 }
 0x317   :  { %v2265_v0 = vld [vmem:[%s3846_s8 + $0x1] ss:$0 sm:$0xff] }
 0x318   :  { %v350_v1 = vpop.f32.mrf.mxu1 }
 0x319   :  { %v351_v3 = vadd.f32 %v2228_v63, %v350_v1 }
 0x31a   :  { %v2483_v4 = vpop.f32.mrf.mxu1 }
 0x31b   :  { %v415_v6 = vpack.c.bf16 %v351_v3, %v348_v2 }
 0x31d   :  { %v421_v7 = vsel %vm416_vm2, %v415_v6, 0 }
 0x31e   :  { %2497 = vmatpush3.bf16.xpose.msra.mxu0 %v421_v7 }
 0x31f   :  { %2508 = vmatprep.subr.bf16.mxu0 %v2782_v5 }
 0x324   :  { %v407_v17 = vpop.f32.mrf.mxu1 }
 0x325   :  { %2499 = vmatmul.mubr.msk.bf16.vlgmr.msra.gmra.mxu0 %vm416_vm2, %v414_v14  ;;  %v408_v24 = vadd.f32 %v2230_v18, %v407_v17 }
 0x326   :  { %v2494_v19 = vpop.f32.mrf.mxu1  ;;  %2509 = vmatpush3.bf16.msra.mxu0 %v554_v13  ;;  %2516 = vmatprep.mubr.msk.bf16.mxu0 %vm2783_vm1, %v2782_v5 }
 0x327   :  { %2510 = vmatprep.subr.bf16.mxu0 %v2782_v5 }
 0x328   :  { %v410_v23 = vpop.f32.mrf.mxu1 }
 0x329   :  { %v411_v25 = vadd.f32 %v2230_v18, %v410_v23 }
 0x32a   :  { %v2495_v26 = vpop.f32.mrf.mxu1  ;;  %2511 = vmatpush3.bf16.msra.mxu0 %v553_v20 }
 0x32b   :  { %v490_v28 = vpack.c.bf16 %v411_v25, %v408_v24  ;;  %2512 = vmatprep.subr.bf16.mxu0 %v2782_v5  ;;  %v616_v26 = vpack.c.bf16 %v2252_v22, %v2251_v21  ;;  %v2271_v21 = vld [vmem:[%s3798_s12 + $0x30] sm:$0xff]  ;;  %v2272_v22 = vld [vmem:[%s3798_s12 + $0x38] sm:$0xff] }
 0x32d   :  { %2503 = vmatpush3.bf16.msra.mxu1 %v490_v28  ;;  %v2249_v28 = vld [vmem:[%s3842_s9 + $0x60] sm:$0xff] }
 0x32e   :  { %2513 = vmatpush3.bf16.msra.mxu0 %v552_v27  ;;  %2520 = vmatprep.subr.bf16.mxu1 %v2782_v5  ;;  %v615_v30 = vpack.c.bf16 %v2250_v29, %v2249_v28 }
 0x32f   :  { %2514 = vmatprep.subr.bf16.mxu0 %v2782_v5 }
 0x332   :  { %2515 = vmatpush3.bf16.msra.mxu0 %v551_v31  ;;  %v2247_v31 = vld [vmem:[%s3842_s9 + $0x50] sm:$0xff] }
 0x333   :  { %2532 = vmatprep.subr.bf16.mxu0 %v2782_v5  ;;  %v614_v33 = vpack.c.bf16 %v2248_v32, %v2247_v31 }
 0x335   :  { %2517 = vmatmul.mubr.msk.bf16.vlgmr.msra.gmra.mxu0 %vm136_vm0, %v3088_v34 }
 0x336   :  { %2533 = vmatpush3.bf16.msra.mxu0 %v678_v35  ;;  %2540 = vmatprep.mubr.msk.bf16.mxu0 %vm2783_vm1, %v2782_v5  ;;  %v2245_v35 = vld [vmem:[%s3842_s9 + $0x40] sm:$0xff] }
 0x337   :  { %2534 = vmatprep.subr.bf16.mxu0 %v2782_v5  ;;  %v613_v37 = vpack.c.bf16 %v2246_v36, %v2245_v35 }
 0x33a   :  { %2535 = vmatpush3.bf16.msra.mxu0 %v677_v38 }
 0x33b   :  { %2536 = vmatprep.subr.bf16.mxu0 %v2782_v5 }
 0x33e   :  { %2537 = vmatpush3.bf16.msra.mxu0 %v676_v41 }
 0x33f   :  { %2538 = vmatprep.subr.bf16.mxu0 %v2782_v5 }
 0x342   :  { %2539 = vmatpush3.bf16.msra.mxu0 %v675_v44  ;;  %v2254_v44 = vld [vmem:[%s3844_s30 + $0x1] ss:$0 sm:$0xff] }
 0x343   :  { %2556 = vmatprep.subr.bf16.mxu0 %v2782_v5 }
 0x345   :  { %2541 = vmatmul.mubr.msk.bf16.vlgmr.msra.gmra.mxu0 %vm136_vm0, %v3088_v34 }
 0x346   :  { %2560 = vmatprep.mubr.msk.bf16.mxu0 %vm2783_vm1, %v2782_v5 }
 0x3e5   :  { %v457_v45 = vpop.f32.mrf.mxu0 }
 0x3e6   :  { %v464_v46 = vmul.f32 0.17677669, %v457_v45 }
 0x3e7   :  { %v2500_v47 = vpop.f32.mrf.mxu0 }
 0x3e8   :  { %v467_v49 = vsel %vm466_vm3, %v464_v46, -inf }
 0x3e9   :  { %468 = vmax.xlane.f32.xlu0 %v467_v49  ;;  %v460_v50 = vpop.f32.mrf.mxu0 }
 0x3ea   :  { %v465_v51 = vmul.f32 0.17677669, %v460_v50 }
 0x3eb   :  { %v2501_v52 = vpop.f32.mrf.mxu0 }
 0x3ec   :  { %v470_v53 = vsel %vm466_vm3, %v465_v51, -inf }
 0x3ed   :  { %471 = vmax.xlane.f32.xlu1 %v470_v53 }
 0x3f5   :  { %v597_v55 = vpop.f32.mrf.mxu0 }
 0x3f6   :  { %v3236_v59 = vadd.f32 %v2243_v56, %v597_v55 }
 0x3f7   :  { %v2518_v57 = vpop.f32.mrf.mxu0 }
 0x3f9   :  { %v600_v58 = vpop.f32.mrf.mxu0 }
 0x3fa   :  { %v3238_v60 = vadd.f32 %v2243_v56, %v600_v58 }
 0x3fb   :  { %v2519_v61 = vpop.f32.mrf.mxu0 }
 0x3fc   :  { %v728_v62 = vpack.c.bf16 %v3238_v60, %v3236_v59 }
 0x405   :  { %v721_v63 = vpop.f32.mrf.mxu0 }
 0x406   :  { %v3245_v3 = vadd.f32 %v2265_v0, %v721_v63 }
 0x407   :  { %v2542_v1 = vpop.f32.mrf.mxu0 }
 0x409   :  { %v724_v2 = vpop.f32.mrf.mxu0 }
 0x40a   :  { %v3247_v4 = vadd.f32 %v2265_v0, %v724_v2 }
 0x40b   :  { %v2543_v6 = vpop.f32.mrf.mxu0 }
 0x40c   :  { %v802_v7 = vpack.c.bf16 %v3247_v4, %v3245_v3 }
 0x472   :  { %v469_v8 = vpop.xlane.xlu0 %468 }
 0x473   :  { %v473_v9 = vsub.f32 %v464_v46, %v469_v8 }
 0x475   :  { %v475_v10 = vmul.f32 1.442695, %v473_v9 }
 0x476   :  { %v472_v11 = vpop.xlane.xlu1 %471 }
 0x477   :  { %2749 = vpow2.f32 %v475_v10  ;;  %v474_v12 = vsub.f32 %v465_v51, %v472_v11  ;;  %v537_v11 = vld [vmem:[%s3798_s12 + $0x10] sm:$0xff] }
 0x479   :  { %v477_v13 = vmul.f32 1.442695, %v474_v12  ;;  %v538_v12 = vld [vmem:[%s3798_s12 + $0x18] sm:$0xff] }
 0x47b   :  { %2751 = vpow2.f32 %v477_v13 }
 0x484   :  { %v2750_v14 = vpop.eup %2749 }
 0x485   :  { %v479_v15 = vsel %vm466_vm3, %v2750_v14, 0.0 }
 0x486   :  { %480 = vadd.xlane.f32.xlu0 %v479_v15 }
 0x488   :  { %v2752_v16 = vpop.eup %2751 }
 0x489   :  { %v482_v17 = vsel %vm466_vm3, %v2752_v16, 0.0 }
 0x48a   :  { %483 = vadd.xlane.f32.xlu1 %v482_v17 }
 0x50f   :  { %v481_v18 = vpop.xlane.xlu0 %480 }
 0x510   :  { %2753 = vrcp.f32 %v481_v18  ;;  %v535_v18 = vld [vmem:[%s3798_s12] sm:$0xff] }
 0x513   :  { %v484_v19 = vpop.xlane.xlu1 %483 }
 0x514   :  { %2755 = vrcp.f32 %v484_v19  ;;  %v536_v19 = vld [vmem:[%s3798_s12 + $0x8] sm:$0xff] }
 0x51d   :  { %v2754_v20 = vpop.eup %2753 }
 0x51e   :  { %v487_v24 = vmul.f32 %v2754_v20, %v2750_v14  ;;  %v540_v20 = vpack.c.bf16 %v536_v19, %v535_v18 }
 0x521   :  { %v2756_v23 = vpop.eup %2755 }
 0x522   :  { %v488_v25 = vmul.f32 %v2756_v23, %v2752_v16  ;;  %v541_v16 = vpack.c.bf16 %v538_v12, %v537_v11  ;;  %v854_v23 = vpack.c.bf16 %v2272_v22, %v2271_v21 }
 0x524   :  { %v489_v27 = vpack.c.bf16 %v488_v25, %v487_v24  ;;  %2557 = vmatpush3.bf16.msra.mxu0 %v854_v23  ;;  %v2269_v24 = vld [vmem:[%s3798_s12 + $0x20] sm:$0xff]  ;;  %v2270_v25 = vld [vmem:[%s3798_s12 + $0x28] sm:$0xff] }
 0x525   :  { %2558 = vmatprep.subr.bf16.mxu0 %v2782_v5 }
 0x526   :  { %2505 = vmatmul.mubr.msk.bf16.vlgmr.msra.gmra.mxu1 %vm466_vm3, %v489_v27 }
 0x527   :  { %2521 = vmatpush3.bf16.msra.mxu1 %v616_v26  ;;  %2528 = vmatprep.mubr.msk.bf16.mxu1 %vm2783_vm1, %v2782_v5  ;;  %v853_v26 = vpack.c.bf16 %v2270_v25, %v2269_v24  ;;  %v1094_v25 = vld [vmem:[%s3803_s18 + $0x70] sm:$0xff] }
 0x528   :  { %2522 = vmatprep.subr.bf16.mxu1 %v2782_v5 }
 0x529   :  { %2559 = vmatpush3.bf16.msra.mxu0 %v853_v26  ;;  %v1095_v26 = vld [vmem:[%s3803_s18 + $0x78] sm:$0xff] }
 0x52a   :  { %2572 = vmatprep.subr.bf16.mxu0 %v2782_v5 }
 0x52b   :  { %2523 = vmatpush3.bf16.msra.mxu1 %v615_v30 }
 0x52c   :  { %2524 = vmatprep.subr.bf16.mxu1 %v2782_v5 }
 0x52f   :  { %2525 = vmatpush3.bf16.msra.mxu1 %v614_v33 }
 0x530   :  { %2526 = vmatprep.subr.bf16.mxu1 %v2782_v5 }
 0x533   :  { %2527 = vmatpush3.bf16.msra.mxu1 %v613_v37 }
 0x534   :  { %2544 = vmatprep.subr.bf16.mxu1 %v2782_v5 }
 0x536   :  { %2529 = vmatmul.mubr.msk.bf16.vlgmr.msra.gmra.mxu1 %vm136_vm0, %v3088_v34 }
 0x537   :  { %2546 = vmatprep.mubr.msk.bf16.mxu1 %vm2783_vm1, %v2782_v5 }
 0x5e6   :  { %v3288_v38 = vpop.f32.mrf.mxu1 }
 0x5e8   :  { %v2506_v39 = vpop.f32.mrf.mxu1 }
 0x5e9   :  { %v2275_v39 = vld [vmem:[%s3799_s13] ss:$0 sm:$0xff] }
 0x5ea   :  { %v3290_v40 = vpop.f32.mrf.mxu1 }
 0x5eb   :  { %v539_v41 = vpack.c.bf16 %v3290_v40, %v3288_v38 }
 0x5ec   :  { %v2507_v42 = vpop.f32.mrf.mxu1 }
 0x5f6   :  { %v659_v43 = vpop.f32.mrf.mxu1 }
 0x5f7   :  { %v660_v34 = vadd.f32 %v2254_v44, %v659_v43 }
 0x5f8   :  { %v2530_v45 = vpop.f32.mrf.mxu1 }
 0x5fa   :  { %v662_v46 = vpop.f32.mrf.mxu1 }
 0x5fb   :  { %v663_v47 = vadd.f32 %v2254_v44, %v662_v46 }
 0x5fc   :  { %v2531_v49 = vpop.f32.mrf.mxu1 }
 0x5fd   :  { %v729_v50 = vpack.c.bf16 %v663_v47, %v660_v34 }
 0x5ff   :  { %v734_v51 = vsel %vm416_vm2, %v729_v50, 0 }
 0x600   :  { %2545 = vmatpush3.bf16.xpose.msra.mxu1 %v734_v51 }
 0x601   :  { %2550 = vmatprep.subr.bf16.mxu1 %v2782_v5 }
 0x607   :  { %2547 = vmatmul.mubr.msk.bf16.vlgmr.msra.gmra.mxu1 %vm416_vm2, %v728_v62 }
 0x608   :  { %2551 = vmatpush3.bf16.msra.mxu1 %v802_v7  ;;  %2552 = vmatprep.mubr.msk.bf16.mxu1 %vm2783_vm1, %v2782_v5 }
 0x609   :  { %2564 = vmatprep.subr.bf16.mxu1 %v2782_v5 }
 0x6c7   :  { %v770_v52 = vpop.f32.mrf.mxu1 }
 0x6c8   :  { %v777_v53 = vmul.f32 0.17677669, %v770_v52 }
 0x6c9   :  { %v2548_v55 = vpop.f32.mrf.mxu1 }
 0x6ca   :  { %v779_v56 = vsel %vm466_vm3, %v777_v53, -inf }
 0x6cb   :  { %780 = vmax.xlane.f32.xlu0 %v779_v56  ;;  %v773_v57 = vpop.f32.mrf.mxu1 }
 0x6cc   :  { %v778_v58 = vmul.f32 0.17677669, %v773_v57 }
 0x6cd   :  { %v2549_v59 = vpop.f32.mrf.mxu1 }
 0x6ce   :  { %v782_v60 = vsel %vm466_vm3, %v778_v58, -inf  ;;  %v1004_v59 = vld [vmem:[%s3800_s16 + $0x30] sm:$0xff] }
 0x6cf   :  { %783 = vmax.xlane.f32.xlu1 %v782_v60  ;;  %v1005_v60 = vld [vmem:[%s3800_s16 + $0x38] sm:$0xff] }
 0x754   :  { %v781_v61 = vpop.xlane.xlu0 %780 }
 0x755   :  { %v785_v62 = vsub.f32 %v777_v53, %v781_v61  ;;  %v1010_v61 = vpack.c.bf16 %v1005_v60, %v1004_v59 }
 0x757   :  { %v787_v63 = vmul.f32 1.442695, %v785_v62  ;;  %v1002_v62 = vld [vmem:[%s3800_s16 + $0x20] sm:$0xff] }
 0x758   :  { %v784_v0 = vpop.xlane.xlu1 %783 }
 0x759   :  { %2757 = vpow2.f32 %v787_v63  ;;  %v786_v1 = vsub.f32 %v778_v58, %v784_v0  ;;  %v1003_v63 = vld [vmem:[%s3800_s16 + $0x28] sm:$0xff] }
 0x75a   :  { %v1009_v0 = vpack.c.bf16 %v1003_v63, %v1002_v62 }
 0x75b   :  { %v789_v2 = vmul.f32 1.442695, %v786_v1  ;;  %v1000_v1 = vld [vmem:[%s3800_s16 + $0x10] sm:$0xff] }
 0x75d   :  { %2759 = vpow2.f32 %v789_v2  ;;  %v1001_v2 = vld [vmem:[%s3800_s16 + $0x18] sm:$0xff] }
 0x766   :  { %v2758_v3 = vpop.eup %2757 }
 0x767   :  { %v791_v4 = vsel %vm466_vm3, %v2758_v3, 0.0 }
 0x768   :  { %792 = vadd.xlane.f32.xlu0 %v791_v4  ;;  %v998_v4 = vld [vmem:[%s3800_s16] sm:$0xff] }
 0x76a   :  { %v2760_v6 = vpop.eup %2759 }
 0x76b   :  { %v794_v7 = vsel %vm466_vm3, %v2760_v6, 0.0 }
 0x76c   :  { %795 = vadd.xlane.f32.xlu1 %v794_v7 }
 0x7f1   :  { %v793_v8 = vpop.xlane.xlu0 %792 }
 0x7f2   :  { %2761 = vrcp.f32 %v793_v8 }
 0x7f5   :  { %v796_v9 = vpop.xlane.xlu1 %795 }
 0x7f6   :  { %2763 = vrcp.f32 %v796_v9 }
 0x7ff   :  { %v2762_v10 = vpop.eup %2761 }
 0x800   :  { %v799_v14 = vmul.f32 %v2762_v10, %v2758_v3  ;;  %v1008_v3 = vpack.c.bf16 %v1001_v2, %v1000_v1 }
 0x803   :  { %v2764_v13 = vpop.eup %2763 }
 0x804   :  { %v800_v15 = vmul.f32 %v2764_v13, %v2760_v6  ;;  %v999_v6 = vld [vmem:[%s3800_s16 + $0x8] sm:$0xff] }
 0x805   :  { %v1007_v7 = vpack.c.bf16 %v999_v6, %v998_v4 }
 0x806   :  { %v801_v17 = vpack.c.bf16 %v800_v15, %v799_v14 }
 0x808   :  { %2553 = vmatmul.mubr.msk.bf16.vlgmr.msra.gmra.mxu1 %vm466_vm3, %v801_v17 }
 0x809   :  { %2565 = vmatpush3.bf16.msra.mxu1 %v541_v16  ;;  %2568 = vmatprep.mubr.msk.bf16.mxu1 %vm2783_vm1, %v2782_v5  ;;  %v2276_v16 = vld [vmem:[%s3801_s14] ss:$0 sm:$0xff] }
 0x80a   :  { %2566 = vmatprep.subr.bf16.mxu1 %v2782_v5 }
 0x80d   :  { %2567 = vmatpush3.bf16.msra.mxu1 %v540_v20  ;;  %v2277_v20 = vld [vmem:[%s3802_s15] ss:$0 sm:$0xff] }
 0x80e   :  { %2584 = vmatprep.subr.bf16.mxu1 %v2782_v5 }
 0x810   :  { %2569 = vmatmul.mubr.msk.bf16.vlgmr.msra.gmra.mxu1 %vm416_vm2, %v539_v41 }
 0x811   :  { %2600 = vmatprep.mubr.msk.bf16.mxu1 %vm2783_vm1, %v2782_v5 }
 0x8c8   :  { %v840_v27 = vpop.f32.mrf.mxu1 }
 0x8ca   :  { %v2554_v28 = vpop.f32.mrf.mxu1 }
 0x8cb   :  { %v1092_v28 = vld [vmem:[%s3803_s18 + $0x60] sm:$0xff] }
 0x8cc   :  { %v843_v29 = vpop.f32.mrf.mxu1 }
 0x8cd   :  { %v852_v30 = vpack.c.bf16 %v843_v29, %v840_v27  ;;  %v1104_v27 = vpack.c.bf16 %v1095_v26, %v1094_v25  ;;  %v1093_v29 = vld [vmem:[%s3803_s18 + $0x68] sm:$0xff] }
 0x8ce   :  { %v2555_v31 = vpop.f32.mrf.mxu1 }
 0x8cf   :  { %2561 = vmatmul.mubr.msk.bf16.vlgmr.msra.gmra.mxu0 %vm416_vm2, %v852_v30  ;;  %2585 = vmatpush3.bf16.msra.mxu1 %v1104_v27  ;;  %v1103_v30 = vpack.c.bf16 %v1093_v29, %v1092_v28  ;;  %v1090_v31 = vld [vmem:[%s3803_s18 + $0x50] sm:$0xff]  ;;  %v2280_v29 = vld [vmem:[%s3806_s19] ss:$0 sm:$0xff] }
 0x8d0   :  { %v936_v32 = vpop.f32.mrf.mxu1  ;;  %2580 = vmatprep.mubr.msk.bf16.mxu0 %vm2783_vm1, %v2782_v5  ;;  %2573 = vmatpush3.bf16.msra.mxu0 %v1010_v61 }
 0x8d1   :  { %2574 = vmatprep.subr.bf16.mxu0 %v2782_v5  ;;  %2586 = vmatprep.subr.bf16.mxu1 %v2782_v5 }
 0x8d2   :  { %v2570_v33 = vpop.f32.mrf.mxu1 }
 0x8d3   :  { %2587 = vmatpush3.bf16.msra.mxu1 %v1103_v30 }
 0x8d4   :  { %v939_v35 = vpop.f32.mrf.mxu1  ;;  %2575 = vmatpush3.bf16.msra.mxu0 %v1009_v0  ;;  %2588 = vmatprep.subr.bf16.mxu1 %v2782_v5 }
 0x8d5   :  { %2576 = vmatprep.subr.bf16.mxu0 %v2782_v5 }
 0x8d6   :  { %v2571_v36 = vpop.f32.mrf.mxu1 }
 0x8d7   :  { %v1089_v36 = vld [vmem:[%s3803_s18 + $0x48] sm:$0xff] }
 0x8d8   :  { %2577 = vmatpush3.bf16.msra.mxu0 %v1008_v3 }
 0x8d9   :  { %2578 = vmatprep.subr.bf16.mxu0 %v2782_v5 }
 0x8dc   :  { %2579 = vmatpush3.bf16.msra.mxu0 %v1007_v7 }
 0x8dd   :  { %2604 = vmatprep.subr.bf16.mxu0 %v2782_v5 }
 0x98f   :  { %v892_v37 = vpop.f32.mrf.mxu0 }
 0x990   :  { %v937_v38 = vadd.f32 %v936_v32, %v892_v37  ;;  %v1091_v32 = vld [vmem:[%s3803_s18 + $0x58] sm:$0xff] }
 0x991   :  { %v2562_v40 = vpop.f32.mrf.mxu0  ;;  %v1102_v33 = vpack.c.bf16 %v1091_v32, %v1090_v31 }
 0x992   :  { %v943_v41 = vadd.f32 %v937_v38, %v3027_v48  ;;  %v1086_v38 = vld [vmem:[%s3803_s18 + $0x30] sm:$0xff] }
 0x993   :  { %v895_v42 = vpop.f32.mrf.mxu0  ;;  %2589 = vmatpush3.bf16.msra.mxu1 %v1102_v33 }
 0x994   :  { %v3357_v43 = vadd.f32 %v2275_v39, %v943_v41  ;;  %v940_v44 = vadd.f32 %v939_v35, %v895_v42  ;;  %2590 = vmatprep.subr.bf16.mxu1 %v2782_v5  ;;  %v1088_v35 = vld [vmem:[%s3803_s18 + $0x40] sm:$0xff]  ;;  %v1085_v42 = vld [vmem:[%s3803_s18 + $0x28] sm:$0xff] }
 0x995   :  { %v2563_v45 = vpop.f32.mrf.mxu0  ;;  %v1101_v37 = vpack.c.bf16 %v1089_v36, %v1088_v35  ;;  %v1084_v41 = vld [vmem:[%s3803_s18 + $0x20] sm:$0xff] }
 0x996   :  { %v944_v46 = vadd.f32 %v940_v44, %v3034_v54  ;;  %v956_v34 = vsel %vm136_vm0, %v3357_v43, 0.0  ;;  %v1099_v44 = vpack.c.bf16 %v1085_v42, %v1084_v41  ;;  %v1082_v45 = vld [vmem:[%s3803_s18 + $0x10] sm:$0xff] }
 0x997   :  { %957 = vadd.xlane.f32.xlu0 %v956_v34  ;;  %2591 = vmatpush3.bf16.msra.mxu1 %v1101_v37 }
 0x998   :  { %v3362_v47 = vadd.f32 %v2275_v39, %v944_v46  ;;  %2592 = vmatprep.subr.bf16.mxu1 %v2782_v5  ;;  %v1087_v39 = vld [vmem:[%s3803_s18 + $0x38] sm:$0xff] }
 0x999   :  { %v1100_v40 = vpack.c.bf16 %v1087_v39, %v1086_v38  ;;  %v1083_v46 = vld [vmem:[%s3803_s18 + $0x18] sm:$0xff] }
 0x99a   :  { %v959_v49 = vsel %vm136_vm0, %v3362_v47, 0.0  ;;  %v1098_v34 = vpack.c.bf16 %v1083_v46, %v1082_v45 }
 0x99b   :  { %960 = vadd.xlane.f32.xlu1 %v959_v49  ;;  %2593 = vmatpush3.bf16.msra.mxu1 %v1100_v40  ;;  %v1080_v49 = vld [vmem:[%s3803_s18] sm:$0xff] }
 0x99c   :  { %2594 = vmatprep.subr.bf16.mxu1 %v2782_v5 }
 0x99f   :  { %2595 = vmatpush3.bf16.msra.mxu1 %v1099_v44 }
 0x9a0   :  { %2596 = vmatprep.subr.bf16.mxu1 %v2782_v5 }
 0x9a3   :  { %2597 = vmatpush3.bf16.msra.mxu1 %v1098_v34 }
 0x9a4   :  { %2598 = vmatprep.subr.bf16.mxu1 %v2782_v5 }
 0xa20   :  { %v958_v50 = vpop.xlane.xlu0 %957 }
 0xa21   :  { %v962_v51 = vmul.f32 0.015625, %v958_v50  ;;  %v1081_v50 = vld [vmem:[%s3803_s18 + $0x8] sm:$0xff] }
 0xa23   :  { %v964_v48 = vsub.f32 %v3357_v43, %v962_v51  ;;  %v1097_v51 = vpack.c.bf16 %v1081_v50, %v1080_v49 }
 0xa24   :  { %v961_v52 = vpop.xlane.xlu1 %960 }
 0xa25   :  { %v963_v53 = vmul.f32 0.015625, %v961_v52  ;;  %v966_v55 = vmul.f32 %v964_v48, %v964_v48  ;;  %2599 = vmatpush3.bf16.msra.mxu1 %v1097_v51  ;;  %v1164_v52 = vld [vmem:[%s3804_s20 + $0x38] sm:$0xff] }
 0xa26   :  { %2622 = vmatprep.subr.bf16.mxu1 %v2782_v5 }
 0xa27   :  { %v965_v56 = vsub.f32 %v3362_v47, %v963_v53  ;;  %v968_v54 = vsel %vm136_vm0, %v966_v55, 0.0  ;;  %v2278_v55 = vld [vmem:[%s3805_s17] ss:$0 sm:$0xff] }
 0xa28   :  { %969 = vadd.xlane.f32.xlu0 %v968_v54 }
 0xa29   :  { %v967_v57 = vmul.f32 %v965_v56, %v965_v56 }
 0xa2b   :  { %v971_v58 = vsel %vm136_vm0, %v967_v57, 0.0 }
 0xa2c   :  { %972 = vadd.xlane.f32.xlu1 %v971_v58 }
 0xab1   :  { %v970_v8 = vpop.xlane.xlu0 %969 }
 0xab2   :  { %v974_v9 = vmul.f32 0.015625, %v970_v8 }
 0xab4   :  { %v976_v10 = vadd.f32 1e-06, %v974_v9 }
 0xab5   :  { %v973_v11 = vpop.xlane.xlu1 %972 }
 0xab6   :  { %2765 = vrsqrt.f32 %v976_v10  ;;  %v975_v12 = vmul.f32 0.015625, %v973_v11 }
 0xab8   :  { %v977_v13 = vadd.f32 1e-06, %v975_v12 }
 0xaba   :  { %2767 = vrsqrt.f32 %v977_v13 }
 0xac3   :  { %v2766_v14 = vpop.eup %2765 }
 0xac4   :  { %v980_v15 = vmul.f32 %v2766_v14, %v964_v48  ;;  %v1163_v48 = vld [vmem:[%s3804_s20 + $0x30] sm:$0xff] }
 0xac5   :  { %v1169_v53 = vpack.c.bf16 %v1164_v52, %v1163_v48 }
 0xac6   :  { %v988_v19 = vmul.f32 %v2276_v16, %v980_v15 }
 0xac7   :  { %v2768_v17 = vpop.eup %2767 }
 0xac8   :  { %v981_v18 = vmul.f32 %v2768_v17, %v965_v56  ;;  %v996_v22 = vadd.f32 %v2277_v20, %v988_v19  ;;  %v1161_v17 = vld [vmem:[%s3804_s20 + $0x20] sm:$0xff] }
 0xaca   :  { %v989_v21 = vmul.f32 %v2276_v16, %v981_v18  ;;  %v1162_v18 = vld [vmem:[%s3804_s20 + $0x28] sm:$0xff] }
 0xacb   :  { %v1168_v19 = vpack.c.bf16 %v1162_v18, %v1161_v17  ;;  %v2288_v18 = vld [vmem:[%s3810_s24 + $0x20] sm:$0xff] }
 0xacc   :  { %v997_v23 = vadd.f32 %v2277_v20, %v989_v21  ;;  %v1159_v20 = vld [vmem:[%s3804_s20 + $0x10] sm:$0xff]  ;;  %v1160_v21 = vld [vmem:[%s3804_s20 + $0x18] sm:$0xff] }
 0xace   :  { %v1006_v24 = vpack.c.bf16 %v997_v23, %v996_v22  ;;  %v1167_v22 = vpack.c.bf16 %v1160_v21, %v1159_v20  ;;  %v1157_v23 = vld [vmem:[%s3804_s20] sm:$0xff] }
 0xacf   :  { %v1307_v21 = vld [vmem:[%s3810_s24] sm:$0xff] }
 0xad0   :  { %2581 = vmatmul.mubr.msk.bf16.vlgmr.msra.gmra.mxu0 %vm136_vm0, %v1006_v24  ;;  %v1158_v24 = vld [vmem:[%s3804_s20 + $0x8] sm:$0xff] }
 0xad1   :  { %2612 = vmatprep.mubr.msk.bf16.mxu0 %vm2783_vm1, %v2782_v5  ;;  %2605 = vmatpush3.bf16.msra.mxu0 %v1169_v53  ;;  %v1166_v25 = vpack.c.bf16 %v1158_v24, %v1157_v23 }
 0xad2   :  { %2606 = vmatprep.subr.bf16.mxu0 %v2782_v5 }
 0xad5   :  { %2607 = vmatpush3.bf16.msra.mxu0 %v1168_v19  ;;  %v2289_v19 = vld [vmem:[%s3810_s24 + $0x28] sm:$0xff] }
 0xad6   :  { %2608 = vmatprep.subr.bf16.mxu0 %v2782_v5  ;;  %v1368_v20 = vpack.c.bf16 %v2289_v19, %v2288_v18 }
 0xad9   :  { %2609 = vmatpush3.bf16.msra.mxu0 %v1167_v22  ;;  %v1308_v22 = vld [vmem:[%s3810_s24 + $0x8] sm:$0xff] }
 0xada   :  { %2610 = vmatprep.subr.bf16.mxu0 %v2782_v5  ;;  %v1312_v23 = vpack.c.bf16 %v1308_v22, %v1307_v21  ;;  %v2316_v21 = vld [vmem:[%s3810_s24 + $0x98] sm:$0xff] }
 0xadd   :  { %2611 = vmatpush3.bf16.msra.mxu0 %v1166_v25 }
 0xade   :  { %2616 = vmatprep.subr.bf16.mxu0 %v2782_v5 }
 0xb90   :  { %v1055_v56 = vpop.f32.mrf.mxu0 }
 0xb91   :  { %v1056_v54 = vadd.f32 %v2278_v55, %v1055_v56 }
 0xb92   :  { %v2582_v57 = vpop.f32.mrf.mxu0 }
 0xb93   :  { %v1062_v58 = vmul.f32 %v1056_v54, %v1056_v54 }
 0xb94   :  { %v1058_v59 = vpop.f32.mrf.mxu0 }
 0xb95   :  { %v1064_v60 = vmul.f32 %v1062_v58, %v1056_v54  ;;  %v1059_v61 = vadd.f32 %v2278_v55, %v1058_v59 }
 0xb96   :  { %v2583_v62 = vpop.f32.mrf.mxu0 }
 0xb97   :  { %v1066_v63 = vmul.f32 0.044715, %v1064_v60  ;;  %v1063_v0 = vmul.f32 %v1059_v61, %v1059_v61  ;;  %v2282_v60 = vld [vmem:[%s3807_s21] ss:$0 sm:$0xff] }
 0xb99   :  { %v1068_v1 = vadd.f32 %v1066_v63, %v1056_v54  ;;  %v1065_v2 = vmul.f32 %v1063_v0, %v1059_v61  ;;  %v2283_v0 = vld [vmem:[%s3808_s22] ss:$0 sm:$0xff] }
 0xb9b   :  { %v1070_v3 = vmul.f32 0.7978846, %v1068_v1  ;;  %v1067_v4 = vmul.f32 0.044715, %v1065_v2  ;;  %v1259_v2 = vld [vmem:[%s3809_s23] sm:$0xff] }
 0xb9d   :  { %2769 = vtanh.f32 %v1070_v3  ;;  %v1069_v6 = vadd.f32 %v1067_v4, %v1059_v61 }
 0xb9f   :  { %v1071_v7 = vmul.f32 0.7978846, %v1069_v6  ;;  %v1260_v6 = vld [vmem:[%s3809_s23 + $0x8] sm:$0xff] }
 0xba1   :  { %2771 = vtanh.f32 %v1071_v7  ;;  %v2285_v7 = vld [vmem:[%s3809_s23 + $0x10] sm:$0xff] }
 0xbaa   :  { %v2770_v8 = vpop.eup %2769 }
 0xbab   :  { %v1074_v9 = vadd.f32 1.0, %v2770_v8  ;;  %v2286_v8 = vld [vmem:[%s3809_s23 + $0x18] sm:$0xff] }
 0xbad   :  { %v1076_v11 = vmul.f32 0.5, %v1074_v9  ;;  %v2290_v9 = vld [vmem:[%s3810_s24 + $0x30] sm:$0xff] }
 0xbae   :  { %v2772_v10 = vpop.eup %2771 }
 0xbaf   :  { %v1075_v12 = vadd.f32 1.0, %v2772_v10  ;;  %v1078_v14 = vmul.f32 %v1076_v11, %v1056_v54  ;;  %v2291_v10 = vld [vmem:[%s3810_s24 + $0x38] sm:$0xff] }
 0xbb1   :  { %v1077_v13 = vmul.f32 0.5, %v1075_v12  ;;  %v1261_v12 = vpack.c.bf16 %v1260_v6, %v1259_v2 }
 0xbb3   :  { %v1079_v15 = vmul.f32 %v1077_v13, %v1059_v61  ;;  %v1317_v13 = vpack.c.bf16 %v2286_v8, %v2285_v7 }
 0xbb5   :  { %v1096_v16 = vpack.c.bf16 %v1079_v15, %v1078_v14  ;;  %v1369_v14 = vpack.c.bf16 %v2291_v10, %v2290_v9  ;;  %v1309_v15 = vld [vmem:[%s3810_s24 + $0x10] sm:$0xff]  ;;  %v2308_v10 = vld [vmem:[%s3810_s24 + $0x78] sm:$0xff] }
 0xbb6   :  { %v2307_v9 = vld [vmem:[%s3810_s24 + $0x70] sm:$0xff] }
 0xbb7   :  { %2601 = vmatmul.mubr.bf16.vlgmr.msra.gmra.mxu1 %v1096_v16  ;;  %v1310_v16 = vld [vmem:[%s3810_s24 + $0x18] sm:$0xff] }
 0xbb8   :  { %2624 = vmatprep.mubr.msk.bf16.mxu1 %vm2783_vm1, %v2782_v5  ;;  %v1313_v17 = vpack.c.bf16 %v1310_v16, %v1309_v15  ;;  %v2305_v15 = vld [vmem:[%s3810_s24 + $0x60] sm:$0xff]  ;;  %v2306_v16 = vld [vmem:[%s3810_s24 + $0x68] sm:$0xff] }
 0xbb9   :  { %v1614_v19 = vpack.c.bf16 %v2306_v16, %v2305_v15 }
 0xc77   :  { %v1139_v26 = vpop.f32.mrf.mxu1 }
 0xc78   :  { %v1146_v28 = vadd.f32 %v1139_v26, %v3357_v43 }
 0xc79   :  { %v2602_v27 = vpop.f32.mrf.mxu1 }
 0xc7a   :  { %v1155_v33 = vadd.f32 %v2280_v29, %v1146_v28 }
 0xc7b   :  { %v1142_v30 = vpop.f32.mrf.mxu1 }
 0xc7c   :  { %v1147_v31 = vadd.f32 %v1142_v30, %v3362_v47 }
 0xc7d   :  { %v2603_v32 = vpop.f32.mrf.mxu1 }
 0xc7e   :  { %v1156_v35 = vadd.f32 %v2280_v29, %v1147_v31 }
 0xc80   :  { %v1165_v36 = vpack.c.bf16 %v1156_v35, %v1155_v33  ;;  %v2294_v35 = vld [vmem:[%s3809_s23 + $0x20] sm:$0xff] }
 0xc82   :  { %2613 = vmatmul.mubr.msk.bf16.vlgmr.msra.gmra.mxu0 %vm136_vm0, %v1165_v36  ;;  %v2295_v36 = vld [vmem:[%s3809_s23 + $0x28] sm:$0xff] }
 0xc83   :  { %2618 = vmatprep.mubr.msk.bf16.mxu0 %vm2783_vm1, %v2782_v5 }
 0xd42   :  { %v1207_v37 = vpop.f32.mrf.mxu0 }
 0xd43   :  { %v1216_v38 = vsel %vm416_vm2, %v1207_v37, 0.0 }
 0xd44   :  { %1217 = vadd.xlane.f32.xlu0 %v1216_v38  ;;  %v2614_v43 = vpop.f32.mrf.mxu0  ;;  %v2302_v38 = vld [vmem:[%s3809_s23 + $0x30] sm:$0xff] }
 0xd45   :  { %v2303_v43 = vld [vmem:[%s3809_s23 + $0x38] sm:$0xff] }
 0xd46   :  { %v1210_v39 = vpop.f32.mrf.mxu0 }
 0xd47   :  { %v1219_v40 = vsel %vm416_vm2, %v1210_v39, 0.0 }
 0xd48   :  { %1220 = vadd.xlane.f32.xlu1 %v1219_v40  ;;  %v2615_v41 = vpop.f32.mrf.mxu0  ;;  %v2310_v40 = vld [vmem:[%s3809_s23 + $0x40] sm:$0xff] }
 0xd49   :  { %v2311_v41 = vld [vmem:[%s3809_s23 + $0x48] sm:$0xff] }
 0xdcd   :  { %v1218_v47 = vpop.xlane.xlu0 %1217 }
 0xdce   :  { %v1223_v42 = vmul.f32 0.03125, %v1218_v47  ;;  %v1665_v47 = vpack.c.bf16 %v2311_v41, %v2310_v40 }
 0xdd0   :  { %v1225_v44 = vsub.f32 %v1207_v37, %v1223_v42  ;;  %v1461_v37 = vpack.c.bf16 %v2295_v36, %v2294_v35  ;;  %v2318_v42 = vld [vmem:[%s3809_s23 + $0x50] sm:$0xff] }
 0xdd1   :  { %v1221_v45 = vpop.xlane.xlu1 %1220 }
 0xdd2   :  { %v1224_v46 = vmul.f32 0.03125, %v1221_v45  ;;  %v1227_v34 = vmul.f32 %v1225_v44, %v1225_v44 }
 0xdd4   :  { %v1226_v49 = vsub.f32 %v1210_v39, %v1224_v46  ;;  %v1229_v50 = vsel %vm416_vm2, %v1227_v34, 0.0  ;;  %v1563_v39 = vpack.c.bf16 %v2303_v43, %v2302_v38  ;;  %v2326_v46 = vld [vmem:[%s3809_s23 + $0x60] sm:$0xff]  ;;  %v2327_v34 = vld [vmem:[%s3809_s23 + $0x68] sm:$0xff] }
 0xdd5   :  { %1230 = vadd.xlane.f32.xlu0 %v1229_v50  ;;  %v2334_v50 = vld [vmem:[%s3809_s23 + $0x70] sm:$0xff]  ;;  %v2321_v38 = vld [vmem:[%s3810_s24 + $0xa0] sm:$0xff]  ;;  %v2322_v43 = vld [vmem:[%s3810_s24 + $0xa8] sm:$0xff] }
 0xdd6   :  { %v1228_v51 = vmul.f32 %v1226_v49, %v1226_v49  ;;  %v1818_v41 = vpack.c.bf16 %v2322_v43, %v2321_v38 }
 0xdd8   :  { %v1232_v48 = vsel %vm416_vm2, %v1228_v51, 0.0  ;;  %v2335_v51 = vld [vmem:[%s3809_s23 + $0x78] sm:$0xff] }
 0xdd9   :  { %1233 = vadd.xlane.f32.xlu1 %v1232_v48  ;;  %v1971_v48 = vpack.c.bf16 %v2335_v51, %v2334_v50  ;;  %v2330_v50 = vld [vmem:[%s3810_s24 + $0xc8] sm:$0xff] }
 0xe5e   :  { %v1231_v52 = vpop.xlane.xlu0 %1230 }
 0xe5f   :  { %v1235_v53 = vmul.f32 0.03125, %v1231_v52  ;;  %v2342_v52 = vld [vmem:[%s3809_s23 + $0x80] sm:$0xff] }
 0xe61   :  { %v1237_v55 = vadd.f32 1e-06, %v1235_v53  ;;  %v2343_v53 = vld [vmem:[%s3809_s23 + $0x88] sm:$0xff] }
 0xe62   :  { %v1234_v56 = vpop.xlane.xlu1 %1233 }
 0xe63   :  { %2773 = vrsqrt.f32 %v1237_v55  ;;  %v1236_v54 = vmul.f32 0.03125, %v1234_v56  ;;  %v2073_v55 = vpack.c.bf16 %v2343_v53, %v2342_v52  ;;  %v2299_v56 = vld [vmem:[%s3810_s24 + $0x50] sm:$0xff] }
 0xe64   :  { %v2339_v53 = vld [vmem:[%s3810_s24 + $0xf0] sm:$0xff] }
 0xe65   :  { %v1238_v57 = vadd.f32 1e-06, %v1236_v54  ;;  %v2300_v54 = vld [vmem:[%s3810_s24 + $0x58] sm:$0xff] }
 0xe67   :  { %2775 = vrsqrt.f32 %v1238_v57  ;;  %v1513_v57 = vpack.c.bf16 %v2300_v54, %v2299_v56 }
 0xe70   :  { %v2774_v58 = vpop.eup %2773 }
 0xe71   :  { %v1241_v59 = vmul.f32 %v2774_v58, %v1225_v44  ;;  %v2319_v44 = vld [vmem:[%s3809_s23 + $0x58] sm:$0xff]  ;;  %v2297_v58 = vld [vmem:[%s3810_s24 + $0x40] sm:$0xff] }
 0xe72   :  { %v1767_v45 = vpack.c.bf16 %v2319_v44, %v2318_v42  ;;  %v2332_v42 = vld [vmem:[%s3810_s24 + $0xd8] sm:$0xff] }
 0xe73   :  { %v1249_v62 = vmul.f32 %v2282_v60, %v1241_v59  ;;  %v2298_v59 = vld [vmem:[%s3810_s24 + $0x48] sm:$0xff] }
 0xe74   :  { %v2776_v61 = vpop.eup %2775 }
 0xe75   :  { %v1242_v63 = vmul.f32 %v2776_v61, %v1226_v49  ;;  %v1257_v3 = vadd.f32 %v2283_v0, %v1249_v62  ;;  %v1869_v49 = vpack.c.bf16 %v2327_v34, %v2326_v46 }
 0xe77   :  { %v1250_v1 = vmul.f32 %v2282_v60, %v1242_v63  ;;  %v1512_v60 = vpack.c.bf16 %v2298_v59, %v2297_v58  ;;  %v2337_v59 = vld [vmem:[%s3810_s24 + $0xe0] sm:$0xff] }
 0xe79   :  { %v1258_v4 = vadd.f32 %v2283_v0, %v1250_v1 }
 0xe7b   :  { %v3532_v11 = vpack.c.bf16 %v1258_v4, %v1257_v3 }
 0xe7d   :  { %2617 = vmatpush3.bf16.msra.mxu0 %v3532_v11  ;;  %2623 = vmatpush3.bf16.msra.mxu1 %v3532_v11 }
 0xe7e   :  { %2628 = vmatprep.subr.bf16.mxu0 %v2782_v5  ;;  %2636 = vmatprep.subr.bf16.mxu1 %v2782_v5 }
 0xe80   :  { %2619 = vmatmul.mubr.msk.bf16.vlgmr.msra.gmra.mxu0 %vm466_vm3, %v1261_v12  ;;  %2625 = vmatmul.mubr.msk.bf16.vlgmr.msra.gmra.mxu1 %vm466_vm3, %v1317_v13  ;;  %v1615_v13 = vpack.c.bf16 %v2308_v10, %v2307_v9  ;;  %v2345_v9 = vld [vmem:[%s3810_s24 + $0x100] sm:$0xff]  ;;  %v2346_v10 = vld [vmem:[%s3810_s24 + $0x108] sm:$0xff] }
 0xe81   :  { %2629 = vmatpush3.bf16.msra.mxu0 %v1369_v14  ;;  %2632 = vmatprep.mubr.msk.bf16.mxu0 %vm2783_vm1, %v2782_v5 }
 0xe82   :  { %2630 = vmatprep.subr.bf16.mxu0 %v2782_v5  ;;  %2640 = vmatprep.mubr.msk.bf16.mxu1 %vm2783_vm1, %v2782_v5 }
 0xe83   :  { %2637 = vmatpush3.bf16.msra.mxu1 %v1313_v17 }
 0xe84   :  { %2638 = vmatprep.subr.bf16.mxu1 %v2782_v5 }
 0xe85   :  { %2631 = vmatpush3.bf16.msra.mxu0 %v1368_v20  ;;  %v2315_v20 = vld [vmem:[%s3810_s24 + $0x90] sm:$0xff] }
 0xe86   :  { %2644 = vmatprep.subr.bf16.mxu0 %v2782_v5 }
 0xe87   :  { %2639 = vmatpush3.bf16.msra.mxu1 %v1312_v23 }
 0xe88   :  { %2650 = vmatprep.subr.bf16.mxu1 %v2782_v5 }
 0xf40   :  { %v1300_v24 = vpop.f32.mrf.mxu0  ;;  %v1355_v25 = vpop.f32.mrf.mxu1 }
 0xf42   :  { %v2620_v26 = vpop.f32.mrf.mxu0  ;;  %v2626_v27 = vpop.f32.mrf.mxu1 }
 0xf43   :  { %v2313_v26 = vld [vmem:[%s3810_s24 + $0x80] sm:$0xff]  ;;  %v2314_v27 = vld [vmem:[%s3810_s24 + $0x88] sm:$0xff] }
 0xf44   :  { %v1303_v28 = vpop.f32.mrf.mxu0  ;;  %v1358_v29 = vpop.f32.mrf.mxu1 }
 0xf45   :  { %v1311_v30 = vpack.c.bf16 %v1303_v28, %v1300_v24  ;;  %v1367_v31 = vpack.c.bf16 %v1358_v29, %v1355_v25  ;;  %v1717_v24 = vpack.c.bf16 %v2316_v21, %v2315_v20 }
 0xf46   :  { %v2627_v32 = vpop.f32.mrf.mxu1  ;;  %v2621_v33 = vpop.f32.mrf.mxu0 }
 0xf47   :  { %2633 = vmatmul.mubr.msk.bf16.vlgmr.msra.gmra.mxu0 %vm416_vm2, %v1367_v31  ;;  %2641 = vmatmul.mubr.msk.bf16.vlgmr.msra.gmra.mxu1 %vm416_vm2, %v1311_v30  ;;  %v1716_v30 = vpack.c.bf16 %v2314_v27, %v2313_v26  ;;  %v2323_v31 = vld [vmem:[%s3810_s24 + $0xb0] sm:$0xff]  ;;  %v2324_v32 = vld [vmem:[%s3810_s24 + $0xb8] sm:$0xff] }
 0xf48   :  { %2645 = vmatpush3.bf16.msra.mxu0 %v3532_v11  ;;  %2646 = vmatprep.mubr.msk.bf16.mxu0 %vm2783_vm1, %v2782_v5  ;;  %v1819_v36 = vpack.c.bf16 %v2324_v32, %v2323_v31 }
 0xf49   :  { %2658 = vmatprep.subr.bf16.mxu0 %v2782_v5  ;;  %2654 = vmatprep.mubr.msk.bf16.mxu1 %vm2783_vm1, %v2782_v5 }
 0xf4a   :  { %2651 = vmatpush3.bf16.msra.mxu1 %v1513_v57 }
 0xf4b   :  { %2652 = vmatprep.subr.bf16.mxu1 %v2782_v5 }
 0xf4e   :  { %2653 = vmatpush3.bf16.msra.mxu1 %v1512_v60  ;;  %v2338_v60 = vld [vmem:[%s3810_s24 + $0xe8] sm:$0xff] }
 0xf4f   :  { %2647 = vmatmul.mubr.msk.bf16.vlgmr.msra.gmra.mxu0 %vm466_vm3, %v1461_v37  ;;  %2664 = vmatprep.subr.bf16.mxu1 %v2782_v5 }
 0xf50   :  { %2659 = vmatpush3.bf16.msra.mxu0 %v3532_v11  ;;  %2660 = vmatprep.mubr.msk.bf16.mxu0 %vm2783_vm1, %v2782_v5 }
 0xf51   :  { %2672 = vmatprep.subr.bf16.mxu0 %v2782_v5 }
 0xf57   :  { %2661 = vmatmul.mubr.msk.bf16.vlgmr.msra.gmra.mxu0 %vm466_vm3, %v1563_v39 }
 0xf58   :  { %2673 = vmatpush3.bf16.msra.mxu0 %v3532_v11  ;;  %2674 = vmatprep.mubr.msk.bf16.mxu0 %vm2783_vm1, %v2782_v5 }
 0xf59   :  { %2686 = vmatprep.subr.bf16.mxu0 %v2782_v5 }
 0xf5f   :  { %2675 = vmatmul.mubr.msk.bf16.vlgmr.msra.gmra.mxu0 %vm466_vm3, %v1665_v47  ;;  %v2331_v47 = vld [vmem:[%s3810_s24 + $0xd0] sm:$0xff] }
 0xf60   :  { %2687 = vmatpush3.bf16.msra.mxu0 %v3532_v11  ;;  %2688 = vmatprep.mubr.msk.bf16.mxu0 %vm2783_vm1, %v2782_v5  ;;  %v1921_v46 = vpack.c.bf16 %v2332_v42, %v2331_v47 }
 0xf61   :  { %2700 = vmatprep.subr.bf16.mxu0 %v2782_v5 }
 0xf67   :  { %2689 = vmatmul.mubr.msk.bf16.vlgmr.msra.gmra.mxu0 %vm466_vm3, %v1767_v45 }
 0xf68   :  { %2701 = vmatpush3.bf16.msra.mxu0 %v3532_v11  ;;  %2702 = vmatprep.mubr.msk.bf16.mxu0 %vm2783_vm1, %v2782_v5 }
 0xf69   :  { %2714 = vmatprep.subr.bf16.mxu0 %v2782_v5 }
 0xf6f   :  { %2703 = vmatmul.mubr.msk.bf16.vlgmr.msra.gmra.mxu0 %vm466_vm3, %v1869_v49  ;;  %v2329_v49 = vld [vmem:[%s3810_s24 + $0xc0] sm:$0xff] }
 0xf70   :  { %2715 = vmatpush3.bf16.msra.mxu0 %v3532_v11  ;;  %2716 = vmatprep.mubr.msk.bf16.mxu0 %vm2783_vm1, %v2782_v5  ;;  %v1920_v52 = vpack.c.bf16 %v2330_v50, %v2329_v49 }
 0xf71   :  { %2728 = vmatprep.subr.bf16.mxu0 %v2782_v5 }
 0xf77   :  { %2717 = vmatmul.mubr.msk.bf16.vlgmr.msra.gmra.mxu0 %vm466_vm3, %v1971_v48 }
 0xf78   :  { %2729 = vmatpush3.bf16.msra.mxu0 %v3532_v11  ;;  %2730 = vmatprep.mubr.msk.bf16.mxu0 %vm2783_vm1, %v2782_v5 }
 0xf7f   :  { %2731 = vmatmul.mubr.msk.bf16.vlgmr.msra.gmra.mxu0 %vm466_vm3, %v2073_v55  ;;  %v2340_v55 = vld [vmem:[%s3810_s24 + $0xf8] sm:$0xff] }
 0xf80   :  { %v2023_v57 = vpack.c.bf16 %v2340_v55, %v2339_v53 }
0x1007   :  { %v1407_v61 = vpop.f32.mrf.mxu0  ;;  %v1451_v62 = vpop.f32.mrf.mxu1 }
0x1008   :  { %v3660_v63 = vadd.f32 %v1451_v62, %v1407_v61 }
0x1009   :  { %v2634_v0 = vpop.f32.mrf.mxu0  ;;  %v2642_v1 = vpop.f32.mrf.mxu1 }
0x100a   :  { %v2022_v0 = vpack.c.bf16 %v2338_v60, %v2337_v59  ;;  %v2347_v1 = vld [vmem:[%s3810_s24 + $0x110] sm:$0xff] }
0x100b   :  { %v1410_v2 = vpop.f32.mrf.mxu0  ;;  %v1454_v3 = vpop.f32.mrf.mxu1 }
0x100c   :  { %v3662_v4 = vadd.f32 %v1454_v3, %v1410_v2  ;;  %v2348_v2 = vld [vmem:[%s3810_s24 + $0x118] sm:$0xff] }
0x100d   :  { %v2635_v6 = vpop.f32.mrf.mxu0  ;;  %v2643_v7 = vpop.f32.mrf.mxu1 }
0x100e   :  { %v2125_v7 = vpack.c.bf16 %v2348_v2, %v2347_v1 }
0x100f   :  { %v1499_v8 = vpop.f32.mrf.mxu0 }
0x1011   :  { %v2648_v11 = vpop.f32.mrf.mxu0 }
0x1013   :  { %v1502_v12 = vpop.f32.mrf.mxu0 }
0x1014   :  { %v1511_v14 = vpack.c.bf16 %v1502_v12, %v1499_v8 }
0x1015   :  { %v2649_v17 = vpop.f32.mrf.mxu0 }
0x1016   :  { %2655 = vmatmul.mubr.msk.bf16.vlgmr.msra.gmra.mxu1 %vm416_vm2, %v1511_v14 }
0x1017   :  { %v1601_v18 = vpop.f32.mrf.mxu0  ;;  %2665 = vmatpush3.bf16.msra.mxu1 %v1615_v13  ;;  %2668 = vmatprep.mubr.msk.bf16.mxu1 %vm2783_vm1, %v2782_v5  ;;  %v2124_v13 = vpack.c.bf16 %v2346_v10, %v2345_v9 }
0x1018   :  { %2666 = vmatprep.subr.bf16.mxu1 %v2782_v5 }
0x1019   :  { %v2662_v22 = vpop.f32.mrf.mxu0 }
0x101b   :  { %v1604_v23 = vpop.f32.mrf.mxu0  ;;  %2667 = vmatpush3.bf16.msra.mxu1 %v1614_v19 }
0x101c   :  { %v1613_v25 = vpack.c.bf16 %v1604_v23, %v1601_v18  ;;  %2678 = vmatprep.subr.bf16.mxu1 %v2782_v5 }
0x101d   :  { %v2663_v28 = vpop.f32.mrf.mxu0 }
0x101e   :  { %2669 = vmatmul.mubr.msk.bf16.vlgmr.msra.gmra.mxu1 %vm416_vm2, %v1613_v25 }
0x101f   :  { %v1703_v29 = vpop.f32.mrf.mxu0  ;;  %2679 = vmatpush3.bf16.msra.mxu1 %v1717_v24  ;;  %2682 = vmatprep.mubr.msk.bf16.mxu1 %vm2783_vm1, %v2782_v5 }
0x1020   :  { %2680 = vmatprep.subr.bf16.mxu1 %v2782_v5 }
0x1021   :  { %v2676_v33 = vpop.f32.mrf.mxu0 }
0x1023   :  { %v1706_v35 = vpop.f32.mrf.mxu0  ;;  %2681 = vmatpush3.bf16.msra.mxu1 %v1716_v30 }
0x1024   :  { %v1715_v37 = vpack.c.bf16 %v1706_v35, %v1703_v29  ;;  %2692 = vmatprep.subr.bf16.mxu1 %v2782_v5 }
0x1025   :  { %v2677_v39 = vpop.f32.mrf.mxu0 }
0x1026   :  { %2683 = vmatmul.mubr.msk.bf16.vlgmr.msra.gmra.mxu1 %vm416_vm2, %v1715_v37 }
0x1027   :  { %v1805_v40 = vpop.f32.mrf.mxu0  ;;  %2693 = vmatpush3.bf16.msra.mxu1 %v1819_v36  ;;  %2696 = vmatprep.mubr.msk.bf16.mxu1 %vm2783_vm1, %v2782_v5 }
0x1028   :  { %2694 = vmatprep.subr.bf16.mxu1 %v2782_v5 }
0x1029   :  { %v2690_v44 = vpop.f32.mrf.mxu0 }
0x102b   :  { %v1808_v45 = vpop.f32.mrf.mxu0  ;;  %2695 = vmatpush3.bf16.msra.mxu1 %v1818_v41 }
0x102c   :  { %v1817_v34 = vpack.c.bf16 %v1808_v45, %v1805_v40  ;;  %2706 = vmatprep.subr.bf16.mxu1 %v2782_v5 }
0x102d   :  { %v2691_v51 = vpop.f32.mrf.mxu0 }
0x102e   :  { %2697 = vmatmul.mubr.msk.bf16.vlgmr.msra.gmra.mxu1 %vm416_vm2, %v1817_v34 }
0x102f   :  { %v1907_v48 = vpop.f32.mrf.mxu0  ;;  %2707 = vmatpush3.bf16.msra.mxu1 %v1921_v46  ;;  %2710 = vmatprep.mubr.msk.bf16.mxu1 %vm2783_vm1, %v2782_v5 }
0x1030   :  { %2708 = vmatprep.subr.bf16.mxu1 %v2782_v5 }
0x1031   :  { %v2704_v56 = vpop.f32.mrf.mxu0 }
0x1033   :  { %v1910_v54 = vpop.f32.mrf.mxu0  ;;  %2709 = vmatpush3.bf16.msra.mxu1 %v1920_v52 }
0x1034   :  { %v1919_v58 = vpack.c.bf16 %v1910_v54, %v1907_v48  ;;  %2720 = vmatprep.subr.bf16.mxu1 %v2782_v5 }
0x1035   :  { %v2705_v61 = vpop.f32.mrf.mxu0 }
0x1036   :  { %2711 = vmatmul.mubr.msk.bf16.vlgmr.msra.gmra.mxu1 %vm416_vm2, %v1919_v58 }
0x1037   :  { %v2009_v62 = vpop.f32.mrf.mxu0  ;;  %2721 = vmatpush3.bf16.msra.mxu1 %v2023_v57  ;;  %2724 = vmatprep.mubr.msk.bf16.mxu1 %vm2783_vm1, %v2782_v5 }
0x1038   :  { %2722 = vmatprep.subr.bf16.mxu1 %v2782_v5 }
0x1039   :  { %v2718_v3 = vpop.f32.mrf.mxu0 }
0x103b   :  { %v2012_v6 = vpop.f32.mrf.mxu0  ;;  %2723 = vmatpush3.bf16.msra.mxu1 %v2022_v0 }
0x103c   :  { %v2021_v8 = vpack.c.bf16 %v2012_v6, %v2009_v62  ;;  %2734 = vmatprep.subr.bf16.mxu1 %v2782_v5 }
0x103d   :  { %v2719_v11 = vpop.f32.mrf.mxu0 }
0x103e   :  { %2725 = vmatmul.mubr.msk.bf16.vlgmr.msra.gmra.mxu1 %vm416_vm2, %v2021_v8 }
0x103f   :  { %v2111_v12 = vpop.f32.mrf.mxu0  ;;  %2735 = vmatpush3.bf16.msra.mxu1 %v2125_v7  ;;  %2738 = vmatprep.mubr.msk.bf16.mxu1 %vm2783_vm1, %v2782_v5 }
0x1040   :  { %2736 = vmatprep.subr.bf16.mxu1 %v2782_v5 }
0x1041   :  { %v2732_v14 = vpop.f32.mrf.mxu0 }
0x1043   :  { %v2114_v15 = vpop.f32.mrf.mxu0  ;;  %2737 = vmatpush3.bf16.msra.mxu1 %v2124_v13 }
0x1044   :  { %v2123_v16 = vpack.c.bf16 %v2114_v15, %v2111_v12  ;;  %v2350_v15 = vld [vmem:[%s3811_s25] ss:$0 sm:$0xff] }
0x1045   :  { %v2733_v17 = vpop.f32.mrf.mxu0 }
0x1046   :  { %2739 = vmatmul.mubr.msk.bf16.vlgmr.msra.gmra.mxu1 %vm416_vm2, %v2123_v16  ;;  %v2351_v17 = vld [vmem:[%s3812_s26] ss:$0 sm:$0xff] }
0x10d6   :  { %v1551_v18 = vpop.f32.mrf.mxu1 }
0x10d7   :  { %v1558_v37 = vadd.f32 %v1551_v18, %v3660_v63 }
0x10d8   :  { %v2656_v19 = vpop.f32.mrf.mxu1 }
0x10da   :  { %v1554_v20 = vpop.f32.mrf.mxu1 }
0x10db   :  { %v1559_v40 = vadd.f32 %v1554_v20, %v3662_v4 }
0x10dc   :  { %v2657_v21 = vpop.f32.mrf.mxu1 }
0x10de   :  { %v1653_v22 = vpop.f32.mrf.mxu1 }
0x10df   :  { %v1660_v43 = vadd.f32 %v1653_v22, %v1558_v37 }
0x10e0   :  { %v2670_v23 = vpop.f32.mrf.mxu1 }
0x10e2   :  { %v1656_v24 = vpop.f32.mrf.mxu1 }
0x10e3   :  { %v1661_v42 = vadd.f32 %v1656_v24, %v1559_v40 }
0x10e4   :  { %v2671_v25 = vpop.f32.mrf.mxu1 }
0x10e6   :  { %v1755_v26 = vpop.f32.mrf.mxu1 }
0x10e7   :  { %v1762_v41 = vadd.f32 %v1755_v26, %v1660_v43 }
0x10e8   :  { %v2684_v27 = vpop.f32.mrf.mxu1 }
0x10ea   :  { %v1758_v28 = vpop.f32.mrf.mxu1 }
0x10eb   :  { %v1763_v46 = vadd.f32 %v1758_v28, %v1661_v42 }
0x10ec   :  { %v2685_v29 = vpop.f32.mrf.mxu1 }
0x10ee   :  { %v1857_v5 = vpop.f32.mrf.mxu1 }
0x10ef   :  { %v1864_v44 = vadd.f32 %v1857_v5, %v1762_v41 }
0x10f0   :  { %v2698_v30 = vpop.f32.mrf.mxu1 }
0x10f2   :  { %v1860_v31 = vpop.f32.mrf.mxu1 }
0x10f3   :  { %v1865_v50 = vadd.f32 %v1860_v31, %v1763_v46 }
0x10f4   :  { %v2699_v32 = vpop.f32.mrf.mxu1 }
0x10f6   :  { %v1959_v33 = vpop.f32.mrf.mxu1 }
0x10f7   :  { %v1966_v34 = vadd.f32 %v1959_v33, %v1864_v44 }
0x10f8   :  { %v2712_v35 = vpop.f32.mrf.mxu1 }
0x10fa   :  { %v1962_v36 = vpop.f32.mrf.mxu1 }
0x10fb   :  { %v1967_v52 = vadd.f32 %v1962_v36, %v1865_v50 }
0x10fc   :  { %v2713_v38 = vpop.f32.mrf.mxu1 }
0x10fe   :  { %v2061_v39 = vpop.f32.mrf.mxu1 }
0x10ff   :  { %v2068_v51 = vadd.f32 %v2061_v39, %v1966_v34 }
0x1100   :  { %v2726_v47 = vpop.f32.mrf.mxu1 }
0x1102   :  { %v2064_v45 = vpop.f32.mrf.mxu1 }
0x1103   :  { %v2069_v63 = vadd.f32 %v2064_v45, %v1967_v52 }
0x1104   :  { %v2727_v49 = vpop.f32.mrf.mxu1 }
0x1106   :  { %v2163_v48 = vpop.f32.mrf.mxu1 }
0x1107   :  { %v2170_v53 = vadd.f32 %v2163_v48, %v2068_v51 }
0x1108   :  { %v2740_v55 = vpop.f32.mrf.mxu1 }
0x1109   :  { %v2174_v56 = vsel %vm416_vm2, %v2170_v53, 0.0 }
0x110a   :  { %2175 = vadd.xlane.f32.xlu0 %v2174_v56  ;;  %v2166_v54 = vpop.f32.mrf.mxu1 }
0x110b   :  { %v2171_v4 = vadd.f32 %v2166_v54, %v2069_v63 }
0x110c   :  { %v2741_v57 = vpop.f32.mrf.mxu1 }
0x110d   :  { %v2177_v58 = vsel %vm416_vm2, %v2171_v4, 0.0 }
0x110e   :  { %2178 = vadd.xlane.f32.xlu1 %v2177_v58 }
0x1193   :  { %v2176_v59 = vpop.xlane.xlu0 %2175 }
0x1194   :  { %v2180_v60 = vmul.f32 0.03125, %v2176_v59 }
0x1196   :  { %v2182_v61 = vsub.f32 %v2170_v53, %v2180_v60 }
0x1197   :  { %v2179_v62 = vpop.xlane.xlu1 %2178 }
0x1198   :  { %v2181_v0 = vmul.f32 0.03125, %v2179_v62  ;;  %v2184_v1 = vmul.f32 %v2182_v61, %v2182_v61 }
0x119a   :  { %v2183_v2 = vsub.f32 %v2171_v4, %v2181_v0  ;;  %v2186_v3 = vsel %vm416_vm2, %v2184_v1, 0.0 }
0x119b   :  { %2187 = vadd.xlane.f32.xlu0 %v2186_v3 }
0x119c   :  { %v2185_v6 = vmul.f32 %v2183_v2, %v2183_v2 }
0x119e   :  { %v2189_v7 = vsel %vm416_vm2, %v2185_v6, 0.0 }
0x119f   :  { %2190 = vadd.xlane.f32.xlu1 %v2189_v7 }
0x1224   :  { %v2188_v8 = vpop.xlane.xlu0 %2187 }
0x1225   :  { %v2192_v9 = vmul.f32 0.03125, %v2188_v8 }
0x1227   :  { %v2194_v10 = vadd.f32 1e-06, %v2192_v9 }
0x1228   :  { %v2191_v11 = vpop.xlane.xlu1 %2190 }
0x1229   :  { %2777 = vrsqrt.f32 %v2194_v10  ;;  %v2193_v12 = vmul.f32 0.03125, %v2191_v11 }
0x122b   :  { %v2195_v13 = vadd.f32 1e-06, %v2193_v12 }
0x122d   :  { %2779 = vrsqrt.f32 %v2195_v13 }
0x1236   :  { %v2778_v14 = vpop.eup %2777 }
0x1237   :  { %v2198_v16 = vmul.f32 %v2778_v14, %v2182_v61 }
0x1239   :  { %v2206_v18 = vmul.f32 %v2350_v15, %v2198_v16 }
0x123a   :  { %v2780_v19 = vpop.eup %2779 }
0x123b   :  { %v2214_v20 = vadd.f32 %v2351_v17, %v2206_v18  ;;  %v2199_v21 = vmul.f32 %v2780_v19, %v2183_v2 }
0x123d   :  { %2216 = vst.msk [vmem:[%s3813_s27] sm:$0xff] %vm416_vm2, %v2214_v20  ;;  %v2207_v22 = vmul.f32 %v2350_v15, %v2199_v21 }
0x123f   :  { %v2215_v23 = vadd.f32 %v2351_v17, %v2207_v22 }
0x1241   :  { %2217 = vst.msk [vmem:[%s3813_s27 + $0x8] sm:$0xff] %vm416_vm2, %v2215_v23 }

// kernel: sam_forward.5
= control target key start
LH: loop header
LB: loop body
LE: loop exit
PB: predicated region body
PF: predicated region fallthrough
CT: control target
= control target key end

     0   :  { %s3617_s0 = inlined_call_operand.vmem [shape: f32[1,8,32], index: 0, kind: input, shape index: {}]   ;;  %s3618_s1 = inlined_call_operand.vmem [shape: f32[1,16,32], index: 1, kind: input, shape index: {}]   ;;  %s3619_s2 = inlined_call_operand.vmem [shape: f32[4,32,8], index: 2, kind: input, shape index: {}]   ;;  %s3620_s3 = inlined_call_operand.vmem [shape: f32[1,8], index: 3, kind: input, shape index: {}]   ;;  %s3621_s4 = inlined_call_operand.vmem [shape: f32[4,64,16], index: 4, kind: input, shape index: {}]   ;;  %s3622_s5 = inlined_call_operand.vmem [shape: f32[1,8], index: 5, kind: input, shape index: {}]   ;;  %s3623_s6 = inlined_call_operand.vmem [shape: f32[1,8], index: 6, kind: input, shape index: {}]   ;;  %s3624_s7 = inlined_call_operand.vmem [shape: f32[8,16], index: 7, kind: input, shape index: {}]   ;;  %s3625_s8 = inlined_call_operand.vmem [shape: f32[1,16], index: 8, kind: input, shape index: {}]   ;;  %s3626_s9 = inlined_call_operand.vmem [shape: f32[4,32,32], index: 9, kind: input, shape index: {}]   ;;  %s3627_s10 = inlined_call_operand.vmem [shape: f32[4,1,32], index: 10, kind: input, shape index: {}]   ;;  %s3628_s11 = inlined_call_operand.vmem [shape: f32[4,32,32], index: 11, kind: input, shape index: {}]   ;;  %s3629_s12 = inlined_call_operand.vmem [shape: f32[4,1,32], index: 12, kind: input, shape index: {}]   ;;  %s3630_s13 = inlined_call_operand.vmem [shape: f32[4,32,4], index: 13, kind: input, shape index: {}]   ;;  %s3631_s14 = inlined_call_operand.vmem [shape: f32[4,1,4], index: 14, kind: input, shape index: {}]   ;;  %s3632_s15 = inlined_call_operand.vmem [shape: f32[4,4,1], index: 15, kind: input, shape index: {}]   ;;  %s3633_s16 = inlined_call_operand.vmem [shape: f32[16,4], index: 16, kind: input, shape index: {}]   ;;  %s3634_s17 = inlined_call_operand.vmem [shape: f32[4,16], index: 17, kind: input, shape index: {}]   ;;  %s3635_s18 = inlined_call_operand.vmem [shape: f32[16,16], index: 18, kind: input, shape index: {}]   ;;  %s3636_s19 = inlined_call_operand.vmem [shape: f32[32,32], index: 19, kind: input, shape index: {}]   ;;  %s3637_s20 = inlined_call_operand.vmem [shape: f32[1,32], index: 20, kind: input, shape index: {}]   ;;  %s3638_s21 = inlined_call_operand.vmem [shape: f32[32,32], index: 21, kind: input, shape index: {}]   ;;  %s3639_s22 = inlined_call_operand.vmem [shape: f32[1,32], index: 22, kind: input, shape index: {}]   ;;  %s3640_s23 = inlined_call_operand.vmem [shape: f32[32,4], index: 23, kind: input, shape index: {}]   ;;  %s3641_s24 = inlined_call_operand.vmem [shape: f32[1,4], index: 24, kind: input, shape index: {}]   ;;  %s3642_s25 = inlined_call_operand.vmem [shape: f32[1,64,16], index: 25, kind: output, shape index: {0}]   ;;  %s3643_s26 = inlined_call_operand.hbm [shape: f32[1,1,4], index: 26, kind: output, shape index: {1}]  }
   0x1   :  { %3649 = sst [smem:[#allocation5_spill]] %s3617_s0 }
   0x2   :  { %3650 = sst [smem:[#allocation6_spill]] %s3618_s1 }
   0x3   :  { %3651 = sst [smem:[#allocation7_spill]] %s3619_s2 }
   0x4   :  { %3652 = sst [smem:[#allocation8_spill]] %s3620_s3 }
   0x5   :  { %3653 = sst [smem:[#allocation9_spill]] %s3621_s4 }
   0x6   :  { %3654 = sst [smem:[#allocation10_spill]] %s3622_s5 }
   0x7   :  { %3655 = sst [smem:[#allocation11_spill]] %s3623_s6 }
   0x8   :  { %3656 = sst [smem:[#allocation12_spill]] %s3624_s7 }
   0x9   :  { %3657 = sst [smem:[#allocation13_spill]] %s3625_s8 }
   0xa   :  { %3658 = sst [smem:[#allocation14_spill]] %s3626_s9 }
   0xb   :  { %3659 = sst [smem:[#allocation15_spill]] %s3627_s10 }
   0xc   :  { %s3660_s7 = sld [smem:[#allocation7_spill]]  ;;  %v2640_v3 = vmov 0.0   ;;  %vm2641_vm0 = vmmov 0  }
   0xd   :  { %2339 = vmatprep.subr.bf16.mxu0 %v2640_v3  ;;  %2347 = vmatprep.subr.bf16.mxu1 %v2640_v3  ;;  %s3661_s4 = sld [smem:[#allocation6_spill]] }
   0xe   :  { %2343 = vmatprep.mubr.msk.bf16.mxu0 %vm2641_vm0, %v2640_v3  ;;  %2351 = vmatprep.mubr.msk.bf16.mxu1 %vm2641_vm0, %v2640_v3 }
  0x12   :  { %v97_v0 = vld [vmem:[%s3660_s7 + $0x10] sm:$0xff]  ;;  %v98_v1 = vld [vmem:[%s3660_s7 + $0x18] sm:$0xff]  ;;  %v95_v6 = vld [vmem:[%s3660_s7] sm:$0xff] }
  0x13   :  { %v2126_v2 = vld [vmem:[%s3660_s7 + $0x30] sm:$0xff]  ;;  %v101_v4 = vpack.c.bf16 %v98_v1, %v97_v0  ;;  %v2127_v5 = vld [vmem:[%s3660_s7 + $0x38] sm:$0xff]  ;;  %v96_v7 = vld [vmem:[%s3660_s7 + $0x8] sm:$0xff] }
  0x14   :  { %v167_v8 = vpack.c.bf16 %v2127_v5, %v2126_v2  ;;  %v2124_v9 = vld [vmem:[%s3660_s7 + $0x20] sm:$0xff]  ;;  %v2125_v10 = vld [vmem:[%s3660_s7 + $0x28] sm:$0xff]  ;;  %v100_v11 = vpack.c.bf16 %v96_v7, %v95_v6 }
  0x15   :  { %2340 = vmatpush3.bf16.msra.mxu0 %v101_v4  ;;  %v85_v12 = vld [vmem:[%s3661_s4] sm:$0xff]  ;;  %v86_v13 = vld [vmem:[%s3661_s4 + $0x8] sm:$0xff] }
  0x16   :  { %32 = vsyncpa [#allocation3], 0  ;;  %2348 = vmatpush3.bf16.msra.mxu1 %v167_v8  ;;  %2341 = vmatprep.subr.bf16.mxu0 %v2640_v3  ;;  %v166_v14 = vpack.c.bf16 %v2125_v10, %v2124_v9  ;;  %v2817_v15 = vpack.c.bf16 %v86_v13, %v85_v12  ;;  %vm102_vm1 = vcmask 261120   ;;  %s3662_s2 = sld [smem:[#allocation9_spill]]  ;;  %vm214_vm2 = vcmask 130048   ;;  %v2147_v38 = vld [vmem:[%s3660_s7 + $0x50] sm:$0xff] }
  0x17   :  { %2349 = vmatprep.subr.bf16.mxu1 %v2640_v3  ;;  %v2148_v39 = vld [vmem:[%s3660_s7 + $0x58] sm:$0xff]  ;;  %v2145_v47 = vld [vmem:[%s3660_s7 + $0x40] sm:$0xff]  ;;  %v2146_v48 = vld [vmem:[%s3660_s7 + $0x48] sm:$0xff]  ;;  %s3663_s9 = sld [smem:[#allocation8_spill]]  ;;  %vm680_vm3 = vcmask 64512   ;;  %vm911_vm4 = vcmask 1043456  }
  0x18   :  { %v384_v46 = vpack.c.bf16 %v2148_v39, %v2147_v38  ;;  %v383_v53 = vpack.c.bf16 %v2146_v48, %v2145_v47  ;;  %v2164_v56 = vld [vmem:[%s3660_s7 + $0x70] sm:$0xff]  ;;  %v2165_v57 = vld [vmem:[%s3660_s7 + $0x78] sm:$0xff]  ;;  %v2162_v59 = vld [vmem:[%s3660_s7 + $0x60] sm:$0xff]  ;;  %s3664_s10 = sld [smem:[#allocation14_spill]]  ;;  %vm1749_vm5 = vcmask 31744   ;;  %vm1803_vm6 = vcmask 1041408  }
  0x19   :  { %2342 = vmatpush3.bf16.msra.mxu0 %v100_v11  ;;  %v531_v58 = vpack.c.bf16 %v2165_v57, %v2164_v56  ;;  %v2163_v60 = vld [vmem:[%s3660_s7 + $0x68] sm:$0xff]  ;;  %s3665_s7 = sld [smem:[#allocation5_spill]]  ;;  %vm2095_vm7 = vcmask 24576  }
  0x1a   :  { %2350 = vmatpush3.bf16.msra.mxu1 %v166_v14  ;;  %v530_v61 = vpack.c.bf16 %v2163_v60, %v2162_v59  ;;  %s3667_s6 = sld [smem:[#allocation10_spill]] }
  0x1b   :  { %s3668_s3 = sld [smem:[#allocation11_spill]] }
  0x1c   :  { %2344 = vmatmul.mubr.msk.bf16.vlgmr.msra.gmra.mxu0 %vm102_vm1, %v2817_v15  ;;  %v2116_v16 = vld [vmem:[%s3662_s2 + $0x40] sm:$0xff]  ;;  %v2117_v17 = vld [vmem:[%s3662_s2 + $0x48] sm:$0xff]  ;;  %v2118_v26 = vld [vmem:[%s3662_s2 + $0x50] sm:$0xff] }
  0x1d   :  { %2352 = vmatmul.mubr.msk.bf16.vlgmr.msra.gmra.mxu1 %vm102_vm1, %v2817_v15  ;;  %v87_v18 = vld [vmem:[%s3662_s2] sm:$0xff]  ;;  %v209_v19 = vpack.c.bf16 %v2117_v17, %v2116_v16  ;;  %v88_v20 = vld [vmem:[%s3662_s2 + $0x8] sm:$0xff]  ;;  %v2119_v28 = vld [vmem:[%s3662_s2 + $0x58] sm:$0xff] }
  0x1e   :  { %v147_v21 = vpack.c.bf16 %v88_v20, %v87_v18  ;;  %v89_v29 = vld [vmem:[%s3662_s2 + $0x10] sm:$0xff]  ;;  %v90_v30 = vld [vmem:[%s3662_s2 + $0x18] sm:$0xff]  ;;  %v2120_v33 = vld [vmem:[%s3662_s2 + $0x60] sm:$0xff]  ;;  %v210_v43 = vpack.c.bf16 %v2119_v28, %v2118_v26 }
  0x1f   :  { %2357 = vmatprep.mubr.msk.bf16.mxu0 %vm214_vm2, %v209_v19  ;;  %v91_v34 = vld [vmem:[%s3662_s2 + $0x20] sm:$0xff]  ;;  %v92_v35 = vld [vmem:[%s3662_s2 + $0x28] sm:$0xff]  ;;  %v148_v42 = vpack.c.bf16 %v90_v30, %v89_v29  ;;  %v93_v49 = vld [vmem:[%s3662_s2 + $0x30] sm:$0xff] }
  0x20   :  { %2367 = vmatprep.mubr.msk.bf16.mxu1 %vm214_vm2, %v147_v21  ;;  %v2121_v37 = vld [vmem:[%s3662_s2 + $0x68] sm:$0xff]  ;;  %v149_v44 = vpack.c.bf16 %v92_v35, %v91_v34  ;;  %v94_v50 = vld [vmem:[%s3662_s2 + $0x38] sm:$0xff]  ;;  %v2122_v51 = vld [vmem:[%s3662_s2 + $0x70] sm:$0xff] }
  0x21   :  { %v211_v45 = vpack.c.bf16 %v2121_v37, %v2120_v33  ;;  %v2123_v52 = vld [vmem:[%s3662_s2 + $0x78] sm:$0xff]  ;;  %v150_v54 = vpack.c.bf16 %v94_v50, %v93_v49  ;;  %v2137_v62 = vld [vmem:[%s3662_s2 + $0x80] sm:$0xff]  ;;  %v2138_v63 = vld [vmem:[%s3662_s2 + $0x88] sm:$0xff] }
  0x22   :  { %v212_v55 = vpack.c.bf16 %v2123_v52, %v2122_v51  ;;  %v426_v0 = vpack.c.bf16 %v2138_v63, %v2137_v62  ;;  %v2154_v1 = vld [vmem:[%s3662_s2 + $0xc0] sm:$0xff]  ;;  %v2155_v2 = vld [vmem:[%s3662_s2 + $0xc8] sm:$0xff]  ;;  %v2139_v16 = vld [vmem:[%s3662_s2 + $0x90] sm:$0xff] }
  0x23   :  { %v573_v4 = vpack.c.bf16 %v2155_v2, %v2154_v1  ;;  %v2140_v17 = vld [vmem:[%s3662_s2 + $0x98] sm:$0xff]  ;;  %v2141_v19 = vld [vmem:[%s3662_s2 + $0xa0] sm:$0xff]  ;;  %v2142_v20 = vld [vmem:[%s3662_s2 + $0xa8] sm:$0xff] }
  0x24   :  { %v2143_v26 = vld [vmem:[%s3662_s2 + $0xb0] sm:$0xff]  ;;  %v2144_v28 = vld [vmem:[%s3662_s2 + $0xb8] sm:$0xff]  ;;  %v2159_v33 = vld [vmem:[%s3662_s2 + $0xe8] sm:$0xff] }
  0x25   :  { %v2156_v29 = vld [vmem:[%s3662_s2 + $0xd0] sm:$0xff]  ;;  %v2157_v30 = vld [vmem:[%s3662_s2 + $0xd8] sm:$0xff]  ;;  %v429_v35 = vpack.c.bf16 %v2144_v28, %v2143_v26 }
  0x26   :  { %v2160_v38 = vld [vmem:[%s3662_s2 + $0xf0] sm:$0xff]  ;;  %v2161_v39 = vld [vmem:[%s3662_s2 + $0xf8] sm:$0xff] }
  0xdc   :  { %v140_v22 = vpop.f32.mrf.mxu0 }
  0xdd   :  { %v202_v23 = vpop.f32.mrf.mxu1 }
  0xde   :  { %v2345_v24 = vpop.f32.mrf.mxu0 }
  0xdf   :  { %v2353_v25 = vpop.f32.mrf.mxu1  ;;  %v428_v24 = vpack.c.bf16 %v2142_v20, %v2141_v19 }
  0xe0   :  { %v143_v27 = vpop.f32.mrf.mxu0 }
  0xe1   :  { %v151_v31 = vpack.c.bf16 %v143_v27, %v140_v22  ;;  %v205_v32 = vpop.f32.mrf.mxu1  ;;  %v427_v22 = vpack.c.bf16 %v2140_v17, %v2139_v16 }
  0xe2   :  { %v213_v36 = vpack.c.bf16 %v205_v32, %v202_v23  ;;  %v2346_v40 = vpop.f32.mrf.mxu0  ;;  %v2158_v32 = vld [vmem:[%s3662_s2 + $0xe0] sm:$0xff] }
  0xe3   :  { %v2354_v41 = vpop.f32.mrf.mxu1  ;;  %2365 = vmatprep.subr.bf16.mxu1 %v151_v31  ;;  %v575_v37 = vpack.c.bf16 %v2159_v33, %v2158_v32  ;;  %v576_v40 = vpack.c.bf16 %v2161_v39, %v2160_v38 }
  0xe4   :  { %2355 = vmatprep.subr.bf16.mxu0 %v213_v36  ;;  %2366 = vmatpush3.bf16.msra.mxu1 %v151_v31 }
  0xe5   :  { %2356 = vmatpush3.bf16.msra.mxu0 %v213_v36  ;;  %v574_v36 = vpack.c.bf16 %v2157_v30, %v2156_v29 }
  0xe6   :  { %2375 = vmatprep.subr.bf16.mxu0 %v2640_v3 }
  0xe7   :  { %2368 = vmatmul.mubr.msk.bf16.vlgmr.msra.gmra.mxu1 %vm214_vm2, %v148_v42 }
  0xe8   :  { %2358 = vmatmul.mubr.msk.bf16.vlgmr.msra.gmra.mxu0 %vm214_vm2, %v210_v43  ;;  %2371 = vmatprep.mubr.msk.bf16.mxu1 %vm214_vm2, %v149_v44 }
  0xe9   :  { %2361 = vmatprep.mubr.msk.bf16.mxu0 %vm214_vm2, %v211_v45  ;;  %2376 = vmatpush3.bf16.msra.mxu0 %v384_v46 }
  0xea   :  { %2377 = vmatprep.subr.bf16.mxu0 %v2640_v3 }
  0xed   :  { %2378 = vmatpush3.bf16.msra.mxu0 %v383_v53 }
  0xee   :  { %2393 = vmatprep.subr.bf16.mxu0 %v2640_v3 }
  0xef   :  { %2372 = vmatmul.mubr.msk.bf16.gmra.mxu1 %vm214_vm2, %v150_v54 }
  0xf0   :  { %2362 = vmatmul.mubr.msk.bf16.gmra.mxu0 %vm214_vm2, %v212_v55  ;;  %2385 = vmatprep.mubr.msk.bf16.mxu1 %vm214_vm2, %v426_v0 }
  0xf1   :  { %2379 = vmatprep.mubr.msk.bf16.mxu0 %vm2641_vm0, %v2640_v3 }
  0xf8   :  { %2380 = vmatmul.mubr.msk.bf16.vlgmr.msra.gmra.mxu0 %vm102_vm1, %v2817_v15 }
  0xf9   :  { %2394 = vmatpush3.bf16.msra.mxu0 %v531_v58  ;;  %2397 = vmatprep.mubr.msk.bf16.mxu0 %vm2641_vm0, %v2640_v3  ;;  %v2171_v58 = vld [vmem:[%s3663_s9] ss:$0 sm:$0xff]  ;;  %s3666_s9 = sld [smem:[#allocation12_spill]] }
  0xfa   :  { %2395 = vmatprep.subr.bf16.mxu0 %v2640_v3 }
  0xfd   :  { %2396 = vmatpush3.bf16.msra.mxu0 %v530_v61 }
 0x100   :  { %2398 = vmatmul.mubr.msk.bf16.vlgmr.msra.gmra.mxu0 %vm102_vm1, %v2817_v15 }
 0x101   :  { %2403 = vmatprep.mubr.msk.bf16.mxu0 %vm214_vm2, %v573_v4 }
 0x1a7   :  { %v2369_v41 = vpop.f32.mrf.mxu1 }
 0x1a8   :  { %v2359_v5 = vpop.f32.mrf.mxu0 }
 0x1a9   :  { %v338_v42 = vpop.f32.mrf.mxu1  ;;  %v347_v52 = vadd.f32 %v2369_v41, %v2359_v5 }
 0x1aa   :  { %v261_v6 = vpop.f32.mrf.mxu0 }
 0x1ab   :  { %v2370_v43 = vpop.f32.mrf.mxu1  ;;  %v339_v54 = vadd.f32 %v338_v42, %v261_v6 }
 0x1ac   :  { %v2929_v7 = vpop.f32.mrf.mxu0 }
 0x1ad   :  { %v341_v44 = vpop.f32.mrf.mxu1  ;;  %v350_v59 = vadd.f32 %v2370_v43, %v2929_v7  ;;  %v1054_v43 = vld [vmem:[%s3664_s10 + $0x10] sm:$0xff] }
 0x1ae   :  { %v2931_v8 = vpop.f32.mrf.mxu0 }
 0x1af   :  { %v2373_v45 = vpop.f32.mrf.mxu1  ;;  %v342_v0 = vadd.f32 %v341_v44, %v2931_v8  ;;  %v1055_v44 = vld [vmem:[%s3664_s10 + $0x18] sm:$0xff] }
 0x1b0   :  { %v2933_v9 = vpop.f32.mrf.mxu0 }
 0x1b1   :  { %v354_v46 = vpop.f32.mrf.mxu1  ;;  %v363_v7 = vadd.f32 %v2373_v45, %v2933_v9  ;;  %v1058_v45 = vpack.c.bf16 %v1055_v44, %v1054_v43 }
 0x1b2   :  { %v2935_v10 = vpop.f32.mrf.mxu0 }
 0x1b3   :  { %v2374_v47 = vpop.f32.mrf.mxu1 }
 0x1b4   :  { %v2937_v11 = vpop.f32.mrf.mxu0 }
 0x1b5   :  { %v357_v48 = vpop.f32.mrf.mxu1  ;;  %v366_v26 = vadd.f32 %v2374_v47, %v2937_v11  ;;  %v1053_v47 = vld [vmem:[%s3664_s10 + $0x8] sm:$0xff] }
 0x1b6   :  { %v2939_v12 = vpop.f32.mrf.mxu0 }
 0x1b7   :  { %v358_v28 = vadd.f32 %v357_v48, %v2939_v12 }
 0x1b8   :  { %v419_v13 = vpop.f32.mrf.mxu0 }
 0x1ba   :  { %v2381_v14 = vpop.f32.mrf.mxu0 }
 0x1bc   :  { %v422_v15 = vpop.f32.mrf.mxu0 }
 0x1bd   :  { %v430_v18 = vpack.c.bf16 %v422_v15, %v419_v13 }
 0x1be   :  { %v2382_v21 = vpop.f32.mrf.mxu0 }
 0x1bf   :  { %2383 = vmatprep.subr.bf16.mxu1 %v430_v18 }
 0x1c0   :  { %2384 = vmatpush3.bf16.msra.mxu1 %v430_v18  ;;  %v566_v23 = vpop.f32.mrf.mxu0  ;;  %v355_v18 = vadd.f32 %v354_v46, %v2935_v10  ;;  %v1052_v46 = vld [vmem:[%s3664_s10] sm:$0xff] }
 0x1c1   :  { %v1057_v48 = vpack.c.bf16 %v1053_v47, %v1052_v46 }
 0x1c2   :  { %v2399_v25 = vpop.f32.mrf.mxu0 }
 0x1c3   :  { %2386 = vmatmul.mubr.msk.bf16.vlgmr.msra.gmra.mxu1 %vm214_vm2, %v427_v22 }
 0x1c4   :  { %v569_v27 = vpop.f32.mrf.mxu0  ;;  %2389 = vmatprep.mubr.msk.bf16.mxu1 %vm214_vm2, %v428_v24 }
 0x1c5   :  { %v577_v31 = vpack.c.bf16 %v569_v27, %v566_v23 }
 0x1c6   :  { %v2400_v34 = vpop.f32.mrf.mxu0 }
 0x1c7   :  { %2401 = vmatprep.subr.bf16.mxu0 %v577_v31 }
 0x1c8   :  { %2402 = vmatpush3.bf16.msra.mxu0 %v577_v31 }
 0x1c9   :  { %2421 = vmatprep.subr.bf16.mxu0 %v2640_v3 }
 0x1cb   :  { %2390 = vmatmul.mubr.msk.bf16.gmra.mxu1 %vm214_vm2, %v429_v35  ;;  %2404 = vmatmul.mubr.msk.bf16.vlgmr.msra.gmra.mxu0 %vm214_vm2, %v574_v36 }
 0x1cc   :  { %2407 = vmatprep.mubr.msk.bf16.mxu0 %vm214_vm2, %v575_v37  ;;  %2422 = vmatpush3.bf16.msra.mxu0 %v1058_v45 }
 0x1cd   :  { %2423 = vmatprep.subr.bf16.mxu0 %v2640_v3 }
 0x1d0   :  { %2424 = vmatpush3.bf16.msra.mxu0 %v1057_v48 }
 0x1d1   :  { %2437 = vmatprep.subr.bf16.mxu0 %v2640_v3 }
 0x1d3   :  { %2408 = vmatmul.mubr.msk.bf16.gmra.mxu0 %vm214_vm2, %v576_v40 }
 0x1d4   :  { %2425 = vmatprep.mubr.msk.bf16.mxu0 %vm2641_vm0, %v2640_v3 }
 0x283   :  { %v2387_v49 = vpop.f32.mrf.mxu1 }
 0x284   :  { %v510_v55 = vadd.f32 %v2387_v49, %v347_v52  ;;  %v84_v49 = vld [vmem:[%s3665_s7] sm:$0xff]  ;;  %s3670_s7 = sld [smem:[#allocation13_spill]] }
 0x285   :  { %v477_v50 = vpop.f32.mrf.mxu1 }
 0x286   :  { %v508_v60 = vadd.f32 %v477_v50, %v339_v54  ;;  %v3025_v50 = vpack.c.bf16 %v84_v49, %v84_v49 }
 0x287   :  { %v2388_v51 = vpop.f32.mrf.mxu1 }
 0x288   :  { %v511_v1 = vadd.f32 %v2388_v51, %v350_v59  ;;  %v1061_v51 = vshrl.u32 %v3025_v50, 16 }
 0x289   :  { %v480_v53 = vpop.f32.mrf.mxu1 }
 0x28a   :  { %v509_v6 = vadd.f32 %v480_v53, %v342_v0  ;;  %2426 = vmatmul.mubr.msk.bf16.vlgmr.msra.gmra.mxu0 %vm102_vm1, %v1061_v51 }
 0x28b   :  { %v2391_v56 = vpop.f32.mrf.mxu1  ;;  %v2405_v57 = vpop.f32.mrf.mxu0  ;;  %2441 = vmatprep.mubr.msk.bf16.mxu0 %vm2641_vm0, %v2640_v3 }
 0x28c   :  { %v657_v61 = vadd.f32 %v2405_v57, %v510_v55  ;;  %v514_v22 = vadd.f32 %v2391_v56, %v363_v7 }
 0x28d   :  { %v493_v62 = vpop.f32.mrf.mxu1  ;;  %v624_v63 = vpop.f32.mrf.mxu0 }
 0x28e   :  { %v655_v2 = vadd.f32 %v624_v63, %v508_v60  ;;  %v2991_v4 = vadd.f32 %v2171_v58, %v657_v61  ;;  %v512_v23 = vadd.f32 %v493_v62, %v355_v18 }
 0x28f   :  { %v2406_v5 = vpop.f32.mrf.mxu0  ;;  %v2392_v16 = vpop.f32.mrf.mxu1 }
 0x290   :  { %v658_v13 = vadd.f32 %v2406_v5, %v511_v1  ;;  %v687_v14 = vsel %vm680_vm3, %v2991_v4, 0.0  ;;  %v2995_v15 = vadd.f32 %v2171_v58, %v655_v2  ;;  %v515_v32 = vadd.f32 %v2392_v16, %v366_v26 }
 0x291   :  { %688 = vadd.xlane.f32.xlu1 %v687_v14  ;;  %v627_v17 = vpop.f32.mrf.mxu0  ;;  %v496_v9 = vpop.f32.mrf.mxu1 }
 0x292   :  { %v656_v8 = vadd.f32 %v627_v17, %v509_v6  ;;  %v681_v19 = vsel %vm680_vm3, %v2995_v15, 0.0  ;;  %v673_v20 = vadd.f32 %v2171_v58, %v658_v13  ;;  %v513_v33 = vadd.f32 %v496_v9, %v358_v28 }
 0x293   :  { %682 = vadd.xlane.f32.xlu0 %v681_v19  ;;  %v2409_v21 = vpop.f32.mrf.mxu0 }
 0x294   :  { %v690_v24 = vsel %vm680_vm3, %v673_v20, 0.0  ;;  %v671_v25 = vadd.f32 %v2171_v58, %v656_v8  ;;  %v661_v10 = vadd.f32 %v2409_v21, %v514_v22 }
 0x295   :  { %691 = vadd.xlane.f32.xlu1 %v690_v24  ;;  %v640_v27 = vpop.f32.mrf.mxu0 }
 0x296   :  { %v659_v29 = vadd.f32 %v640_v27, %v512_v23  ;;  %v684_v30 = vsel %vm680_vm3, %v671_v25, 0.0  ;;  %v676_v11 = vadd.f32 %v2171_v58, %v661_v10 }
 0x297   :  { %685 = vadd.xlane.f32.xlu0 %v684_v30  ;;  %v2410_v31 = vpop.f32.mrf.mxu0 }
 0x298   :  { %v674_v34 = vadd.f32 %v2171_v58, %v659_v29  ;;  %v662_v36 = vadd.f32 %v2410_v31, %v515_v32  ;;  %v699_v40 = vsel %vm680_vm3, %v676_v11, 0.0  ;;  %v886_v31 = vld [vmem:[%s3666_s9] sm:$0xff] }
 0x299   :  { %v643_v35 = vpop.f32.mrf.mxu0  ;;  %v891_v32 = vpack.c.bf16 %v886_v31, %v886_v31 }
 0x29a   :  { %v660_v37 = vadd.f32 %v643_v35, %v513_v33  ;;  %v693_v38 = vsel %vm680_vm3, %v674_v34, 0.0  ;;  %v677_v41 = vadd.f32 %v2171_v58, %v662_v36 }
 0x29b   :  { %694 = vadd.xlane.f32.xlu0 %v693_v38  ;;  %2563 = vmatprep.subr.msk.bf16.mxu1 %vm911_vm4, %v891_v32  ;;  %v913_v33 = vsel %vm911_vm4, %v891_v32, 0 }
 0x29c   :  { %v675_v39 = vadd.f32 %v2171_v58, %v660_v37  ;;  %v702_v42 = vsel %vm680_vm3, %v677_v41, 0.0  ;;  %2412 = vmatpush3.bf16.msra.mxu1 %v913_v33 }
 0x29d   :  { %2429 = vmatprep.subr.bf16.mxu1 %v2640_v3 }
 0x29e   :  { %v696_v12 = vsel %vm680_vm3, %v675_v39, 0.0 }
 0x29f   :  { %700 = vadd.xlane.f32.xlu0 %v699_v40  ;;  %697 = vadd.xlane.f32.xlu1 %v696_v12 }
 0x2a3   :  { %703 = vadd.xlane.f32.xlu1 %v702_v42 }
 0x31a   :  { %v689_v52 = vpop.xlane.xlu1 %688 }
 0x31b   :  { %v708_v53 = vmul.f32 0.125, %v689_v52 }
 0x31c   :  { %v683_v54 = vpop.xlane.xlu0 %682 }
 0x31d   :  { %v706_v55 = vmul.f32 0.125, %v683_v54  ;;  %v3035_v57 = vsub.f32 %v2991_v4, %v708_v53 }
 0x31e   :  { %v692_v56 = vpop.xlane.xlu1 %691 }
 0x31f   :  { %v3038_v58 = vsub.f32 %v2995_v15, %v706_v55  ;;  %v709_v59 = vmul.f32 0.125, %v692_v56  ;;  %v724_v2 = vmul.f32 %v3035_v57, %v3035_v57 }
 0x320   :  { %v686_v60 = vpop.xlane.xlu0 %685 }
 0x321   :  { %v707_v61 = vmul.f32 0.125, %v686_v60  ;;  %v722_v62 = vmul.f32 %v3038_v58, %v3038_v58  ;;  %v3042_v63 = vsub.f32 %v673_v20, %v709_v59  ;;  %v736_v14 = vsel %vm680_vm3, %v724_v2, 0.0  ;;  %v2172_v2 = vld [vmem:[%s3667_s6] ss:$0 sm:$0xff]  ;;  %s3669_s6 = sld [smem:[#allocation15_spill]] }
 0x323   :  { %v3044_v0 = vsub.f32 %v671_v25, %v707_v61  ;;  %v730_v1 = vsel %vm680_vm3, %v722_v62, 0.0  ;;  %v725_v7 = vmul.f32 %v3042_v63, %v3042_v63 }
 0x324   :  { %731 = vadd.xlane.f32.xlu0 %v730_v1  ;;  %v695_v4 = vpop.xlane.xlu0 %694 }
 0x325   :  { %v710_v5 = vmul.f32 0.125, %v695_v4  ;;  %v723_v6 = vmul.f32 %v3044_v0, %v3044_v0  ;;  %v739_v23 = vsel %vm680_vm3, %v725_v7, 0.0 }
 0x327   :  { %v3051_v13 = vsub.f32 %v674_v34, %v710_v5  ;;  %v733_v15 = vsel %vm680_vm3, %v723_v6, 0.0  ;;  %v2173_v6 = vld [vmem:[%s3668_s3] ss:$0 sm:$0xff] }
 0x328   :  { %737 = vadd.xlane.f32.xlu0 %v736_v14  ;;  %v701_v16 = vpop.xlane.xlu0 %700  ;;  %734 = vadd.xlane.f32.xlu1 %v733_v15  ;;  %v698_v17 = vpop.xlane.xlu1 %697 }
 0x329   :  { %v712_v18 = vmul.f32 0.125, %v701_v16  ;;  %v711_v8 = vmul.f32 0.125, %v698_v17  ;;  %v726_v19 = vmul.f32 %v3051_v13, %v3051_v13 }
 0x32b   :  { %v3059_v20 = vsub.f32 %v676_v11, %v712_v18  ;;  %v3061_v21 = vsub.f32 %v675_v39, %v711_v8  ;;  %v742_v22 = vsel %vm680_vm3, %v726_v19, 0.0 }
 0x32c   :  { %743 = vadd.xlane.f32.xlu0 %v742_v22  ;;  %740 = vadd.xlane.f32.xlu1 %v739_v23  ;;  %v704_v24 = vpop.xlane.xlu1 %703 }
 0x32d   :  { %v713_v25 = vmul.f32 0.125, %v704_v24  ;;  %v728_v26 = vmul.f32 %v3059_v20, %v3059_v20  ;;  %v727_v9 = vmul.f32 %v3061_v21, %v3061_v21 }
 0x32f   :  { %v3069_v27 = vsub.f32 %v677_v41, %v713_v25  ;;  %v748_v28 = vsel %vm680_vm3, %v728_v26, 0.0  ;;  %v745_v10 = vsel %vm680_vm3, %v727_v9, 0.0 }
 0x330   :  { %749 = vadd.xlane.f32.xlu0 %v748_v28  ;;  %746 = vadd.xlane.f32.xlu1 %v745_v10 }
 0x331   :  { %v729_v29 = vmul.f32 %v3069_v27, %v3069_v27 }
 0x333   :  { %v751_v30 = vsel %vm680_vm3, %v729_v29, 0.0 }
 0x334   :  { %752 = vadd.xlane.f32.xlu1 %v751_v30 }
 0x34a   :  { %v3080_v34 = vpop.f32.mrf.mxu0 }
 0x34c   :  { %v2427_v35 = vpop.f32.mrf.mxu0 }
 0x34e   :  { %v1103_v36 = vpop.f32.mrf.mxu0 }
 0x350   :  { %v2428_v37 = vpop.f32.mrf.mxu0 }
 0x3ad   :  { %v732_v38 = vpop.xlane.xlu0 %731 }
 0x3ae   :  { %v754_v11 = vmul.f32 0.125, %v732_v38 }
 0x3b0   :  { %v762_v39 = vadd.f32 1e-06, %v754_v11 }
 0x3b1   :  { %v738_v40 = vpop.xlane.xlu0 %737  ;;  %v735_v12 = vpop.xlane.xlu1 %734 }
 0x3b2   :  { %2570 = vrsqrt.f32 %v762_v39  ;;  %v756_v41 = vmul.f32 0.125, %v738_v40  ;;  %v755_v42 = vmul.f32 0.125, %v735_v12 }
 0x3b4   :  { %v764_v43 = vadd.f32 1e-06, %v756_v41  ;;  %v763_v44 = vadd.f32 1e-06, %v755_v42 }
 0x3b5   :  { %v744_v45 = vpop.xlane.xlu0 %743  ;;  %v741_v46 = vpop.xlane.xlu1 %740 }
 0x3b6   :  { %2572 = vrsqrt.f32 %v764_v43  ;;  %v758_v47 = vmul.f32 0.125, %v744_v45  ;;  %v757_v48 = vmul.f32 0.125, %v741_v46 }
 0x3b7   :  { %2574 = vrsqrt.f32 %v763_v44 }
 0x3b8   :  { %v766_v49 = vadd.f32 1e-06, %v758_v47  ;;  %v765_v52 = vadd.f32 1e-06, %v757_v48 }
 0x3b9   :  { %v750_v53 = vpop.xlane.xlu0 %749  ;;  %v747_v54 = vpop.xlane.xlu1 %746 }
 0x3ba   :  { %2576 = vrsqrt.f32 %v766_v49  ;;  %v760_v55 = vmul.f32 0.125, %v750_v53  ;;  %v759_v56 = vmul.f32 0.125, %v747_v54 }
 0x3bb   :  { %2578 = vrsqrt.f32 %v765_v52 }
 0x3bc   :  { %v768_v59 = vadd.f32 1e-06, %v760_v55  ;;  %v767_v60 = vadd.f32 1e-06, %v759_v56 }
 0x3bd   :  { %v753_v61 = vpop.xlane.xlu1 %752 }
 0x3be   :  { %2580 = vrsqrt.f32 %v768_v59  ;;  %v761_v62 = vmul.f32 0.125, %v753_v61 }
 0x3bf   :  { %v2571_v1 = vpop.eup %2570  ;;  %2582 = vrsqrt.f32 %v767_v60 }
 0x3c0   :  { %v778_v4 = vmul.f32 %v2571_v1, %v3038_v58  ;;  %v769_v5 = vadd.f32 1e-06, %v761_v62 }
 0x3c2   :  { %v792_v14 = vmul.f32 %v2172_v2, %v778_v4  ;;  %2584 = vrsqrt.f32 %v769_v5 }
 0x3c3   :  { %v2573_v15 = vpop.eup %2572 }
 0x3c4   :  { %v2575_v7 = vpop.eup %2574  ;;  %v780_v16 = vmul.f32 %v2573_v15, %v3035_v57  ;;  %v3090_v17 = vadd.f32 %v2173_v6, %v792_v14 }
 0x3c5   :  { %v779_v18 = vmul.f32 %v2575_v7, %v3044_v0 }
 0x3c6   :  { %v794_v8 = vmul.f32 %v2172_v2, %v780_v16  ;;  %v814_v19 = vmul.f32 %v3090_v17, %v3090_v17 }
 0x3c7   :  { %v2577_v58 = vpop.eup %2576  ;;  %v793_v22 = vmul.f32 %v2172_v2, %v779_v18 }
 0x3c8   :  { %v2579_v23 = vpop.eup %2578  ;;  %v3095_v24 = vadd.f32 %v2173_v6, %v794_v8  ;;  %v782_v25 = vmul.f32 %v2577_v58, %v3051_v13  ;;  %v822_v26 = vmul.f32 %v814_v19, %v3090_v17 }
 0x3c9   :  { %v781_v9 = vmul.f32 %v2579_v23, %v3042_v63  ;;  %v3100_v57 = vadd.f32 %v2173_v6, %v793_v22 }
 0x3ca   :  { %v816_v0 = vmul.f32 %v3095_v24, %v3095_v24  ;;  %v796_v28 = vmul.f32 %v2172_v2, %v782_v25  ;;  %v830_v10 = vmul.f32 0.044715, %v822_v26 }
 0x3cb   :  { %v2581_v29 = vpop.eup %2580  ;;  %v795_v30 = vmul.f32 %v2172_v2, %v781_v9  ;;  %v815_v31 = vmul.f32 %v3100_v57, %v3100_v57 }
 0x3cc   :  { %v2583_v32 = vpop.eup %2582  ;;  %v824_v33 = vmul.f32 %v816_v0, %v3095_v24  ;;  %v784_v13 = vmul.f32 %v2581_v29, %v3059_v20  ;;  %v838_v35 = vadd.f32 %v830_v10, %v3090_v17  ;;  %v3109_v63 = vadd.f32 %v2173_v6, %v796_v28 }
 0x3cd   :  { %v3111_v36 = vadd.f32 %v2173_v6, %v795_v30  ;;  %v783_v37 = vmul.f32 %v2583_v32, %v3061_v21  ;;  %v823_v38 = vmul.f32 %v815_v31, %v3100_v57 }
 0x3ce   :  { %v832_v11 = vmul.f32 0.044715, %v824_v33  ;;  %v798_v39 = vmul.f32 %v2172_v2, %v784_v13  ;;  %v846_v40 = vmul.f32 0.7978846, %v838_v35  ;;  %v818_v12 = vmul.f32 %v3109_v63, %v3109_v63 }
 0x3cf   :  { %v2585_v41 = vpop.eup %2584  ;;  %v817_v20 = vmul.f32 %v3111_v36, %v3111_v36  ;;  %v797_v42 = vmul.f32 %v2172_v2, %v783_v37  ;;  %v831_v43 = vmul.f32 0.044715, %v823_v38 }
 0x3d0   :  { %v785_v44 = vmul.f32 %v2585_v41, %v3069_v27  ;;  %2586 = vtanh.f32 %v846_v40  ;;  %v840_v45 = vadd.f32 %v832_v11, %v3095_v24  ;;  %v826_v21 = vmul.f32 %v818_v12, %v3109_v63  ;;  %v1109_v40 = vld [vmem:[%s3628_s11 + $0x10] sm:$0xff]  ;;  %v1110_v12 = vld [vmem:[%s3628_s11 + $0x18] sm:$0xff] }
 0x3d1   :  { %v825_v46 = vmul.f32 %v817_v20, %v3111_v36  ;;  %v839_v47 = vadd.f32 %v831_v43, %v3100_v57  ;;  %v3124_v48 = vadd.f32 %v2173_v6, %v797_v42  ;;  %v3126_v49 = vadd.f32 %v2173_v6, %v798_v39 }
 0x3d2   :  { %v799_v52 = vmul.f32 %v2172_v2, %v785_v44  ;;  %v848_v53 = vmul.f32 0.7978846, %v840_v45  ;;  %v834_v54 = vmul.f32 0.044715, %v826_v21  ;;  %v1113_v44 = vpack.c.bf16 %v1110_v12, %v1109_v40 }
 0x3d3   :  { %v833_v55 = vmul.f32 0.044715, %v825_v46  ;;  %v847_v56 = vmul.f32 0.7978846, %v839_v47  ;;  %v819_v27 = vmul.f32 %v3124_v48, %v3124_v48  ;;  %v820_v59 = vmul.f32 %v3126_v49, %v3126_v49 }
 0x3d4   :  { %2588 = vtanh.f32 %v848_v53  ;;  %v842_v60 = vadd.f32 %v834_v54, %v3109_v63  ;;  %v3133_v61 = vadd.f32 %v2173_v6, %v799_v52  ;;  %v1107_v52 = vld [vmem:[%s3628_s11] sm:$0xff]  ;;  %v1108_v53 = vld [vmem:[%s3628_s11 + $0x8] sm:$0xff] }
 0x3d5   :  { %2590 = vtanh.f32 %v847_v56  ;;  %v841_v62 = vadd.f32 %v833_v55, %v3111_v36  ;;  %v827_v1 = vmul.f32 %v819_v27, %v3124_v48  ;;  %v828_v2 = vmul.f32 %v820_v59, %v3126_v49  ;;  %v1059_v27 = vld [vmem:[%s3669_s6] sm:$0x1] }
 0x3d6   :  { %v850_v4 = vmul.f32 0.7978846, %v842_v60  ;;  %v821_v5 = vmul.f32 %v3133_v61, %v3133_v61  ;;  %v1112_v59 = vpack.c.bf16 %v1108_v53, %v1107_v52 }
 0x3d7   :  { %v849_v14 = vmul.f32 0.7978846, %v841_v62  ;;  %v835_v15 = vmul.f32 0.044715, %v827_v1  ;;  %v836_v7 = vmul.f32 0.044715, %v828_v2 }
 0x3d8   :  { %2592 = vtanh.f32 %v850_v4  ;;  %v829_v16 = vmul.f32 %v821_v5, %v3133_v61  ;;  %v2182_v5 = vld [vmem:[%s3664_s10 + $0x20] sm:$0xff] }
 0x3d9   :  { %2594 = vtanh.f32 %v849_v14  ;;  %v843_v6 = vadd.f32 %v835_v15, %v3124_v48  ;;  %v844_v18 = vadd.f32 %v836_v7, %v3126_v49  ;;  %v2183_v14 = vld [vmem:[%s3664_s10 + $0x28] sm:$0xff]  ;;  %v1232_v7 = vrot.slane %v3025_v50, 1 }
 0x3da   :  { %v837_v8 = vmul.f32 0.044715, %v829_v16  ;;  %v1227_v15 = vpack.c.bf16 %v2183_v14, %v2182_v5  ;;  %v1161_v16 = vld [vmem:[%s3630_s13 + $0x10] sm:$0xff] }
 0x3db   :  { %v851_v19 = vmul.f32 0.7978846, %v843_v6  ;;  %v852_v58 = vmul.f32 0.7978846, %v844_v18  ;;  %v1162_v6 = vld [vmem:[%s3630_s13 + $0x18] sm:$0xff] }
 0x3dc   :  { %v845_v22 = vadd.f32 %v837_v8, %v3133_v61  ;;  %v1165_v18 = vpack.c.bf16 %v1162_v6, %v1161_v16  ;;  %v1159_v8 = vld [vmem:[%s3630_s13] sm:$0xff] }
 0x3dd   :  { %v2587_v23 = vpop.eup %2586  ;;  %2596 = vtanh.f32 %v851_v19  ;;  %v1160_v19 = vld [vmem:[%s3630_s13 + $0x8] sm:$0xff] }
 0x3de   :  { %v862_v25 = vadd.f32 1.0, %v2587_v23  ;;  %v853_v26 = vmul.f32 0.7978846, %v845_v22  ;;  %2598 = vtanh.f32 %v852_v58  ;;  %2438 = vmatpush3.bf16.msra.mxu0 %v1165_v18  ;;  %v1164_v58 = vpack.c.bf16 %v1160_v19, %v1159_v8  ;;  %v1210_v22 = vld [vmem:[%s3632_s15] sm:$0xf] }
 0x3df   :  { %2439 = vmatprep.subr.bf16.mxu0 %v2640_v3  ;;  %v2642_v23 = vmov 0  }
 0x3e0   :  { %2600 = vtanh.f32 %v853_v26  ;;  %v870_v28 = vmul.f32 0.5, %v862_v25  ;;  %2568 = vset.pattern.permute.xlu0 %v2642_v23  ;;  %2569 = vset.pattern.permute.xlu1 %v2642_v23  ;;  %v2174_v25 = vld [vmem:[%s3670_s7] ss:$0 sm:$0xff] }
 0x3e1   :  { %v2589_v9 = vpop.eup %2588  ;;  %1213 = vperm.xlu0 %2568, %v1210_v22  }
 0x3e2   :  { %v2591_v0 = vpop.eup %2590  ;;  %v864_v29 = vadd.f32 1.0, %v2589_v9  ;;  %v878_v33 = vmul.f32 %v870_v28, %v3090_v17  ;;  %2440 = vmatpush3.bf16.msra.mxu0 %v1164_v58 }
 0x3e3   :  { %v863_v10 = vadd.f32 1.0, %v2591_v0  ;;  %2453 = vmatprep.subr.bf16.mxu0 %v2640_v3 }
 0x3e4   :  { %v872_v37 = vmul.f32 0.5, %v864_v29 }
 0x3e5   :  { %v2593_v30 = vpop.eup %2592  ;;  %v871_v31 = vmul.f32 0.5, %v863_v10 }
 0x3e6   :  { %v2595_v32 = vpop.eup %2594  ;;  %v866_v38 = vadd.f32 1.0, %v2593_v30  ;;  %v880_v17 = vmul.f32 %v872_v37, %v3095_v24 }
 0x3e7   :  { %v879_v13 = vmul.f32 %v871_v31, %v3100_v57  ;;  %v865_v35 = vadd.f32 1.0, %v2595_v32 }
 0x3e8   :  { %v874_v43 = vmul.f32 0.5, %v866_v38 }
 0x3e9   :  { %v887_v11 = vpack.c.bf16 %v879_v13, %v878_v33  ;;  %v873_v39 = vmul.f32 0.5, %v865_v35 }
 0x3ea   :  { %v2597_v41 = vpop.eup %2596  ;;  %v882_v24 = vmul.f32 %v874_v43, %v3109_v63  ;;  %v1101_v63 = vadd.f32 %v3080_v34, %v1059_v27 }
 0x3eb   :  { %v2599_v20 = vpop.eup %2598  ;;  %2413 = vmatprep.mubr.msk.bf16.mxu1 %vm680_vm3, %v887_v11  ;;  %v881_v57 = vmul.f32 %v873_v39, %v3111_v36  ;;  %v867_v42 = vadd.f32 1.0, %v2597_v41 }
 0x3ec   :  { %v868_v45 = vadd.f32 1.0, %v2599_v20 }
 0x3ed   :  { %v2601_v21 = vpop.eup %2600  ;;  %v888_v46 = vpack.c.bf16 %v881_v57, %v880_v17  ;;  %v875_v47 = vmul.f32 0.5, %v867_v42 }
 0x3ee   :  { %v869_v54 = vadd.f32 1.0, %v2601_v21  ;;  %v876_v55 = vmul.f32 0.5, %v868_v45 }
 0x3ef   :  { %2414 = vmatmul.mubr.msk.bf16.vlgmr.msra.gmra.mxu1 %vm680_vm3, %v888_v46  ;;  %v883_v36 = vmul.f32 %v875_v47, %v3124_v48  ;;  %v1106_v48 = vmax.f32 %v1101_v63, 0.0 }
 0x3f0   :  { %2430 = vmatpush3.bf16.msra.mxu1 %v1113_v44  ;;  %v877_v56 = vmul.f32 0.5, %v869_v54  ;;  %v884_v62 = vmul.f32 %v876_v55, %v3126_v49  ;;  %v2184_v49 = vld [vmem:[%s3664_s10 + $0x30] sm:$0xff] }
 0x3f1   :  { %v889_v60 = vpack.c.bf16 %v883_v36, %v882_v24  ;;  %2431 = vmatprep.subr.bf16.mxu1 %v2640_v3  ;;  %v1111_v4 = vpack.c.bf16 %v1106_v48, %v1106_v48 }
 0x3f2   :  { %v885_v1 = vmul.f32 %v877_v56, %v3133_v61  ;;  %v2185_v61 = vld [vmem:[%s3664_s10 + $0x38] sm:$0xff]  ;;  %v1114_v56 = vld [vmem:[%s3629_s12] sm:$0x1] }
 0x3f3   :  { %2417 = vmatprep.mubr.msk.bf16.mxu1 %vm680_vm3, %v889_v60  ;;  %v1228_v34 = vpack.c.bf16 %v2185_v61, %v2184_v49 }
 0x3f4   :  { %v890_v2 = vpack.c.bf16 %v885_v1, %v884_v62  ;;  %2432 = vmatpush3.bf16.msra.mxu1 %v1112_v59 }
 0x3f5   :  { %2445 = vmatprep.subr.bf16.mxu1 %v2640_v3 }
 0x3f7   :  { %2418 = vmatmul.mubr.msk.bf16.gmra.mxu1 %vm680_vm3, %v890_v2 }
 0x3f8   :  { %2433 = vmatprep.mubr.msk.bf16.mxu1 %vm2641_vm0, %v2640_v3 }
 0x3ff   :  { %2434 = vmatmul.mubr.msk.bf16.vlgmr.msra.gmra.mxu1 %vm102_vm1, %v1111_v4  ;;  %v2190_v4 = vld [vmem:[%s3628_s11 + $0x30] sm:$0xff] }
 0x400   :  { %2446 = vmatpush3.bf16.msra.mxu1 %v1228_v34  ;;  %2449 = vmatprep.mubr.msk.bf16.mxu1 %vm2641_vm0, %v2640_v3  ;;  %v2191_v34 = vld [vmem:[%s3628_s11 + $0x38] sm:$0xff] }
 0x401   :  { %2447 = vmatprep.subr.bf16.mxu1 %v2640_v3  ;;  %v1284_v22 = vpack.c.bf16 %v2191_v34, %v2190_v4  ;;  %v1406_v4 = vrot.slane %v1061_v51, 1 }
 0x404   :  { %2448 = vmatpush3.bf16.msra.mxu1 %v1227_v15 }
 0x405   :  { %2461 = vmatprep.subr.bf16.mxu1 %v2640_v3 }
 0x407   :  { %2450 = vmatmul.mubr.msk.bf16.vlgmr.msra.gmra.mxu1 %vm102_vm1, %v1232_v7 }
 0x408   :  { %2465 = vmatprep.mubr.msk.bf16.mxu1 %vm2641_vm0, %v2640_v3 }
 0x4af   :  { %v2415_v26 = vpop.f32.mrf.mxu1 }
 0x4b0   :  { %v3217_v9 = vadd.f32 %v2415_v26, %v2174_v25  ;;  %v2188_v26 = vld [vmem:[%s3628_s11 + $0x20] sm:$0xff] }
 0x4b1   :  { %v949_v0 = vpop.f32.mrf.mxu1 }
 0x4b2   :  { %v982_v28 = vmul.f32 %v3217_v9, %v3217_v9  ;;  %v3221_v10 = vadd.f32 %v2174_v25, %v949_v0  ;;  %v2189_v0 = vld [vmem:[%s3628_s11 + $0x28] sm:$0xff] }
 0x4b3   :  { %v2416_v29 = vpop.f32.mrf.mxu1 }
 0x4b4   :  { %v990_v30 = vmul.f32 %v982_v28, %v3217_v9  ;;  %v980_v31 = vmul.f32 %v3221_v10, %v3221_v10  ;;  %v3226_v32 = vadd.f32 %v2416_v29, %v2174_v25 }
 0x4b5   :  { %v952_v33 = vpop.f32.mrf.mxu1 }
 0x4b6   :  { %v998_v13 = vmul.f32 0.044715, %v990_v30  ;;  %v988_v35 = vmul.f32 %v980_v31, %v3221_v10  ;;  %v983_v37 = vmul.f32 %v3226_v32, %v3226_v32  ;;  %v3231_v38 = vadd.f32 %v2174_v25, %v952_v33  ;;  %v2186_v31 = vld [vmem:[%s3669_s6 + $0x1] sm:$0x1] }
 0x4b7   :  { %v2419_v11 = vpop.f32.mrf.mxu1 }
 0x4b8   :  { %v1006_v39 = vadd.f32 %v998_v13, %v3217_v9  ;;  %v996_v40 = vmul.f32 0.044715, %v988_v35  ;;  %v991_v12 = vmul.f32 %v983_v37, %v3226_v32  ;;  %v981_v41 = vmul.f32 %v3231_v38, %v3231_v38 }
 0x4b9   :  { %v3237_v20 = vadd.f32 %v2419_v11, %v2174_v25  ;;  %v965_v17 = vpop.f32.mrf.mxu1  ;;  %v1283_v37 = vpack.c.bf16 %v2189_v0, %v2188_v26 }
 0x4ba   :  { %v1014_v57 = vmul.f32 0.7978846, %v1006_v39  ;;  %v1004_v42 = vadd.f32 %v996_v40, %v3221_v10  ;;  %v999_v43 = vmul.f32 0.044715, %v991_v12  ;;  %v989_v44 = vmul.f32 %v981_v41, %v3231_v38  ;;  %v2203_v40 = vld [vmem:[%s3664_s10 + $0x50] sm:$0xff]  ;;  %v2204_v12 = vld [vmem:[%s3664_s10 + $0x58] sm:$0xff] }
 0x4bb   :  { %v986_v45 = vmul.f32 %v3237_v20, %v3237_v20  ;;  %v3243_v21 = vadd.f32 %v2174_v25, %v965_v17  ;;  %v2420_v46 = vpop.f32.mrf.mxu1 }
 0x4bc   :  { %2602 = vtanh.f32 %v1014_v57  ;;  %v1012_v47 = vmul.f32 0.7978846, %v1004_v42  ;;  %v1007_v52 = vadd.f32 %v999_v43, %v3226_v32  ;;  %v997_v53 = vmul.f32 0.044715, %v989_v44 }
 0x4bd   :  { %v994_v54 = vmul.f32 %v986_v45, %v3237_v20  ;;  %v984_v55 = vmul.f32 %v3243_v21, %v3243_v21  ;;  %v3249_v24 = vadd.f32 %v2420_v46, %v2174_v25  ;;  %v968_v36 = vpop.f32.mrf.mxu1  ;;  %v1403_v45 = vpack.c.bf16 %v2204_v12, %v2203_v40  ;;  %v2209_v40 = vld [vmem:[%s3628_s11 + $0x50] sm:$0xff]  ;;  %v2210_v12 = vld [vmem:[%s3628_s11 + $0x58] sm:$0xff] }
 0x4be   :  { %2604 = vtanh.f32 %v1012_v47  ;;  %v1015_v27 = vmul.f32 0.7978846, %v1007_v52  ;;  %v1005_v59 = vadd.f32 %v997_v53, %v3231_v38  ;;  %v3255_v60 = vadd.f32 %v2174_v25, %v968_v36  ;;  %v2201_v52 = vld [vmem:[%s3664_s10 + $0x40] sm:$0xff]  ;;  %v2202_v53 = vld [vmem:[%s3664_s10 + $0x48] sm:$0xff] }
 0x4bf   :  { %v1002_v62 = vmul.f32 0.044715, %v994_v54  ;;  %v992_v1 = vmul.f32 %v984_v55, %v3243_v21  ;;  %v987_v63 = vmul.f32 %v3249_v24, %v3249_v24  ;;  %v1152_v2 = vpop.f32.mrf.mxu1 }
 0x4c0   :  { %2606 = vtanh.f32 %v1015_v27  ;;  %v1013_v48 = vmul.f32 0.7978846, %v1005_v59  ;;  %v985_v49 = vmul.f32 %v3255_v60, %v3255_v60  ;;  %v1153_v61 = vadd.f32 %v1152_v2, %v1114_v56 }
 0x4c1   :  { %v1010_v5 = vadd.f32 %v1002_v62, %v3237_v20  ;;  %v1000_v14 = vmul.f32 0.044715, %v992_v1  ;;  %v995_v15 = vmul.f32 %v987_v63, %v3249_v24  ;;  %v2435_v7 = vpop.f32.mrf.mxu1  ;;  %v1402_v59 = vpack.c.bf16 %v2202_v53, %v2201_v52 }
 0x4c2   :  { %2608 = vtanh.f32 %v1013_v48  ;;  %v993_v16 = vmul.f32 %v985_v49, %v3255_v60  ;;  %v1158_v6 = vmax.f32 %v1153_v61, 0.0 }
 0x4c3   :  { %v1018_v18 = vmul.f32 0.7978846, %v1010_v5  ;;  %v1008_v8 = vadd.f32 %v1000_v14, %v3243_v21  ;;  %v1003_v19 = vmul.f32 0.044715, %v995_v15  ;;  %v1155_v58 = vpop.f32.mrf.mxu1 }
 0x4c4   :  { %v1001_v23 = vmul.f32 0.044715, %v993_v16  ;;  %v1163_v25 = vpack.c.bf16 %v1158_v6, %v1158_v6 }
 0x4c5   :  { %2610 = vtanh.f32 %v1018_v18  ;;  %v1016_v28 = vmul.f32 0.7978846, %v1008_v8  ;;  %v1011_v29 = vadd.f32 %v1003_v19, %v3249_v24  ;;  %v2436_v30 = vpop.f32.mrf.mxu1 }
 0x4c6   :  { %v1009_v33 = vadd.f32 %v1001_v23, %v3255_v60  ;;  %2442 = vmatmul.mubr.msk.bf16.vlgmr.msra.gmra.mxu0 %vm102_vm1, %v1163_v25  ;;  %v2200_v30 = vld [vmem:[%s3632_s15 + $0x4] sm:$0xf] }
 0x4c7   :  { %2612 = vtanh.f32 %v1016_v28  ;;  %v1019_v13 = vmul.f32 0.7978846, %v1011_v29  ;;  %v1270_v35 = vpop.f32.mrf.mxu1  ;;  %2454 = vmatpush3.bf16.msra.mxu0 %v1284_v22  ;;  %2457 = vmatprep.mubr.msk.bf16.mxu0 %vm2641_vm0, %v2640_v3 }
 0x4c8   :  { %v1017_v11 = vmul.f32 0.7978846, %v1009_v33  ;;  %v1271_v39 = vadd.f32 %v2186_v31, %v1270_v35  ;;  %2455 = vmatprep.subr.bf16.mxu0 %v2640_v3  ;;  %1388 = vperm.xlu1 %2569, %v2200_v30  }
 0x4c9   :  { %v2603_v41 = vpop.eup %2602  ;;  %2614 = vtanh.f32 %v1019_v13  ;;  %v2451_v17 = vpop.f32.mrf.mxu1 }
 0x4ca   :  { %v1030_v57 = vadd.f32 1.0, %v2603_v41  ;;  %2616 = vtanh.f32 %v1017_v11  ;;  %v1276_v42 = vmax.f32 %v1271_v39, 0.0 }
 0x4cb   :  { %v2605_v43 = vpop.eup %2604  ;;  %v1273_v44 = vpop.f32.mrf.mxu1  ;;  %2456 = vmatpush3.bf16.msra.mxu0 %v1283_v37  ;;  %v2192_v37 = vld [vmem:[%s3629_s12 + $0x1] sm:$0x1] }
 0x4cc   :  { %v1028_v46 = vadd.f32 1.0, %v2605_v43  ;;  %v1282_v47 = vpack.c.bf16 %v1276_v42, %v1276_v42  ;;  %2469 = vmatprep.subr.bf16.mxu0 %v2640_v3  ;;  %v1038_v36 = vmul.f32 0.5, %v1030_v57  ;;  %v1458_v42 = vpack.c.bf16 %v2210_v12, %v2209_v40  ;;  %v2207_v44 = vld [vmem:[%s3628_s11 + $0x40] sm:$0xff] }
 0x4cd   :  { %v2607_v54 = vpop.eup %2606  ;;  %v2452_v55 = vpop.f32.mrf.mxu1 }
 0x4ce   :  { %v1031_v56 = vadd.f32 1.0, %v2607_v54  ;;  %2458 = vmatmul.mubr.msk.bf16.vlgmr.msra.gmra.mxu0 %vm102_vm1, %v1282_v47  ;;  %v1036_v62 = vmul.f32 0.5, %v1028_v46  ;;  %v3305_v48 = vmul.f32 %v1038_v36, %v3217_v9  ;;  %v2205_v47 = vld [vmem:[%s3669_s6 + $0x2] sm:$0x1]  ;;  %v2222_v55 = vld [vmem:[%s3664_s10 + $0x70] sm:$0xff]  ;;  %v2223_v36 = vld [vmem:[%s3664_s10 + $0x78] sm:$0xff] }
 0x4cf   :  { %v2609_v27 = vpop.eup %2608  ;;  %2470 = vmatpush3.bf16.msra.mxu0 %v1403_v45  ;;  %2473 = vmatprep.mubr.msk.bf16.mxu0 %vm2641_vm0, %v2640_v3  ;;  %v2208_v45 = vld [vmem:[%s3628_s11 + $0x48] sm:$0xff] }
 0x4d0   :  { %v1039_v1 = vmul.f32 0.5, %v1031_v56  ;;  %v1029_v63 = vadd.f32 1.0, %v2609_v27  ;;  %2471 = vmatprep.subr.bf16.mxu0 %v2640_v3  ;;  %v3313_v14 = vmul.f32 %v1036_v62, %v3221_v10  ;;  %v1457_v53 = vpack.c.bf16 %v2208_v45, %v2207_v44 }
 0x4d1   :  { %v1577_v62 = vpack.c.bf16 %v2223_v36, %v2222_v55  ;;  %v2224_v55 = vld [vmem:[%s3669_s6 + $0x3] sm:$0x1] }
 0x4d2   :  { %v2611_v2 = vpop.eup %2610  ;;  %v3308_v49 = vmul.f32 %v1039_v1, %v3226_v32  ;;  %v1037_v61 = vmul.f32 0.5, %v1029_v63  ;;  %v2220_v63 = vld [vmem:[%s3664_s10 + $0x60] sm:$0xff] }
 0x4d3   :  { %v1034_v34 = vadd.f32 1.0, %v2611_v2  ;;  %2472 = vmatpush3.bf16.msra.mxu0 %v1402_v59  ;;  %v2221_v2 = vld [vmem:[%s3664_s10 + $0x68] sm:$0xff] }
 0x4d4   :  { %v2613_v5 = vpop.eup %2612  ;;  %v1853_v15 = vpack.c.bf16 %v3308_v49, %v3305_v48  ;;  %v3318_v7 = vmul.f32 %v1037_v61, %v3231_v38  ;;  %2485 = vmatprep.subr.bf16.mxu0 %v2640_v3  ;;  %v2046_v48 = vld [vmem:[%s3640_s23 + $0x10] sm:$0xff]  ;;  %v2047_v49 = vld [vmem:[%s3640_s23 + $0x18] sm:$0xff] }
 0x4d5   :  { %v1032_v9 = vadd.f32 1.0, %v2613_v5  ;;  %v1042_v6 = vmul.f32 0.5, %v1034_v34  ;;  %v1580_v34 = vrot.slane %v3025_v50, 2  ;;  %v2215_v5 = vld [vmem:[%s3630_s13 + $0x50] sm:$0xff] }
 0x4d6   :  { %v2615_v32 = vpop.eup %2614  ;;  %2474 = vmatmul.mubr.msk.bf16.vlgmr.msra.gmra.mxu0 %vm102_vm1, %v1406_v4  ;;  %v1852_v51 = vpack.c.bf16 %v3318_v7, %v3313_v14  ;;  %v1576_v4 = vpack.c.bf16 %v2221_v2, %v2220_v63  ;;  %v1945_v14 = vld [vmem:[%s3636_s19 + $0x18] sm:$0xff] }
 0x4d7   :  { %v2617_v16 = vpop.eup %2616  ;;  %v1035_v18 = vadd.f32 1.0, %v2615_v32  ;;  %2489 = vmatprep.mubr.msk.bf16.mxu0 %vm2641_vm0, %v2640_v3  ;;  %v1040_v10 = vmul.f32 0.5, %v1032_v9  ;;  %v3327_v58 = vmul.f32 %v1042_v6, %v3237_v20  ;;  %v2196_v20 = vld [vmem:[%s3630_s13 + $0x30] sm:$0xff]  ;;  %v2216_v9 = vld [vmem:[%s3630_s13 + $0x58] sm:$0xff]  ;;  %v2214_v6 = vld [vmem:[%s3630_s13 + $0x48] sm:$0xff] }
 0x4d8   :  { %v1033_v8 = vadd.f32 1.0, %v2617_v16  ;;  %v1512_v32 = vpack.c.bf16 %v2216_v9, %v2215_v5  ;;  %v2213_v16 = vld [vmem:[%s3630_s13 + $0x40] sm:$0xff]  ;;  %v2233_v9 = vld [vmem:[%s3630_s13 + $0x68] sm:$0xff] }
 0x4d9   :  { %v1043_v19 = vmul.f32 0.5, %v1035_v18  ;;  %v3333_v23 = vmul.f32 %v1040_v10, %v3243_v21  ;;  %v2194_v21 = vld [vmem:[%s3630_s13 + $0x20] sm:$0xff]  ;;  %v1511_v18 = vpack.c.bf16 %v2214_v6, %v2213_v16  ;;  %v2219_v10 = vld [vmem:[%s3632_s15 + $0x8] sm:$0xf]  ;;  %v2238_v16 = vld [vmem:[%s3632_s15 + $0xc] sm:$0xf] }
 0x4da   :  { %v1041_v38 = vmul.f32 0.5, %v1033_v8  ;;  %2486 = vmatpush3.bf16.msra.mxu0 %v1512_v32  ;;  %1562 = vperm.xlu1 %2569, %v2219_v10   ;;  %v1216_v8 = vlaneseq  ;;  %v2232_v5 = vld [vmem:[%s3630_s13 + $0x60] sm:$0xff] }
 0x4db   :  { %v3330_v22 = vmul.f32 %v1043_v19, %v3249_v24  ;;  %v2197_v24 = vld [vmem:[%s3630_s13 + $0x38] sm:$0xff]  ;;  %2487 = vmatprep.subr.bf16.mxu0 %v2640_v3  ;;  %v1685_v32 = vpack.c.bf16 %v2233_v9, %v2232_v5  ;;  %v2217_v6 = vld [vmem:[%s3631_s14 + $0x2] sm:$0x1] }
 0x4dc   :  { %v3336_v25 = vmul.f32 %v1041_v38, %v3255_v60  ;;  %v1338_v28 = vpack.c.bf16 %v2197_v24, %v2196_v20  ;;  %v2195_v60 = vld [vmem:[%s3630_s13 + $0x28] sm:$0xff]  ;;  %v1217_v19 = vshrl.u32 %v1216_v8, 7  ;;  %v1166_v38 = vld [vmem:[%s3631_s14] sm:$0x1] }
 0x4dd   :  { %v1855_v26 = vpack.c.bf16 %v3330_v22, %v3327_v58  ;;  %v1337_v29 = vpack.c.bf16 %v2195_v60, %v2194_v21  ;;  %v1214_v60 = vpop.permute.xlu0 %1213  ;;  %v1992_v9 = vld [vmem:[%s3638_s21] sm:$0xff]  ;;  %v2045_v22 = vld [vmem:[%s3640_s23 + $0x8] sm:$0xff] }
 0x4de   :  { %v1854_v0 = vpack.c.bf16 %v3336_v25, %v3333_v23  ;;  %2462 = vmatpush3.bf16.msra.mxu1 %v1338_v28  ;;  %2488 = vmatpush3.bf16.msra.mxu0 %v1511_v18  ;;  %v3423_v24 = vsub.s32 0, %v1217_v19  ;;  %v2198_v28 = vld [vmem:[%s3631_s14 + $0x1] sm:$0x1] }
 0x4df   :  { %2463 = vmatprep.subr.bf16.mxu1 %v2640_v3  ;;  %2501 = vmatprep.subr.bf16.mxu0 %v2640_v3  ;;  %v2044_v58 = vld [vmem:[%s3640_s23] sm:$0xff] }
 0x4e0   :  { %1736 = vperm.xlu1 %2569, %v2238_v16   ;;  %v2049_v23 = vpack.c.bf16 %v2045_v22, %v2044_v58 }
 0x4e2   :  { %2464 = vmatpush3.bf16.msra.mxu1 %v1337_v29 }
 0x4e3   :  { %2477 = vmatprep.subr.bf16.mxu1 %v2640_v3 }
 0x586   :  { %v1204_v31 = vpop.f32.mrf.mxu0 }
 0x587   :  { %v1205_v20 = vadd.f32 %v1204_v31, %v1166_v38  ;;  %v2211_v31 = vld [vmem:[%s3629_s12 + $0x2] sm:$0x1] }
 0x588   :  { %v2443_v33 = vpop.f32.mrf.mxu0 }
 0x589   :  { %v1219_v29 = vrot.slane %v1205_v20, %v3423_v24 }
 0x58a   :  { %v1207_v13 = vpop.f32.mrf.mxu0 }
 0x58b   :  { %v1389_v13 = vpop.permute.xlu1 %1388 }
 0x58c   :  { %v2444_v35 = vpop.f32.mrf.mxu0 }
 0x58e   :  { %v1324_v11 = vpop.f32.mrf.mxu0 }
 0x58f   :  { %v1325_v39 = vadd.f32 %v2192_v37, %v1324_v11  ;;  %v1220_v11 = vmul.f32 %v1219_v29, %v1214_v60  ;;  %v1563_v19 = vpop.permute.xlu1 %1562  ;;  %v2230_v60 = vld [vmem:[%s3629_s12 + $0x3] sm:$0x1] }
 0x590   :  { %v2459_v41 = vpop.f32.mrf.mxu0 }
 0x591   :  { %v1330_v17 = vmax.f32 %v1325_v39, 0.0 }
 0x592   :  { %v1327_v57 = vpop.f32.mrf.mxu0 }
 0x593   :  { %v1336_v43 = vpack.c.bf16 %v1330_v17, %v1330_v17  ;;  %v2228_v57 = vld [vmem:[%s3628_s11 + $0x70] sm:$0xff] }
 0x594   :  { %v2460_v46 = vpop.f32.mrf.mxu0 }
 0x595   :  { %2466 = vmatmul.mubr.msk.bf16.vlgmr.msra.gmra.mxu1 %vm102_vm1, %v1336_v43 }
 0x596   :  { %v1444_v52 = vpop.f32.mrf.mxu0  ;;  %2478 = vmatpush3.bf16.msra.mxu1 %v1458_v42  ;;  %2481 = vmatprep.mubr.msk.bf16.mxu1 %vm2641_vm0, %v2640_v3  ;;  %v2229_v42 = vld [vmem:[%s3628_s11 + $0x78] sm:$0xff] }
 0x597   :  { %v1445_v54 = vadd.f32 %v2205_v47, %v1444_v52  ;;  %2479 = vmatprep.subr.bf16.mxu1 %v2640_v3  ;;  %v1632_v46 = vpack.c.bf16 %v2229_v42, %v2228_v57  ;;  %v2226_v52 = vld [vmem:[%s3628_s11 + $0x60] sm:$0xff]  ;;  %v1737_v57 = vpop.permute.xlu1 %1736 }
 0x598   :  { %v2475_v56 = vpop.f32.mrf.mxu0 }
 0x599   :  { %v1450_v27 = vmax.f32 %v1445_v54, 0.0 }
 0x59a   :  { %v1447_v59 = vpop.f32.mrf.mxu0  ;;  %2480 = vmatpush3.bf16.msra.mxu1 %v1457_v53  ;;  %v2227_v53 = vld [vmem:[%s3628_s11 + $0x68] sm:$0xff] }
 0x59b   :  { %v1456_v1 = vpack.c.bf16 %v1450_v27, %v1450_v27  ;;  %2493 = vmatprep.subr.bf16.mxu1 %v2640_v3  ;;  %v1631_v56 = vpack.c.bf16 %v2227_v53, %v2226_v52  ;;  %v1745_v52 = vld [vmem:[%s3633_s16] sm:$0xff]  ;;  %v1746_v53 = vld [vmem:[%s3633_s16 + $0x8] sm:$0xff] }
 0x59c   :  { %v2476_v61 = vpop.f32.mrf.mxu0 }
 0x59d   :  { %2482 = vmatmul.mubr.msk.bf16.vlgmr.msra.gmra.mxu1 %vm102_vm1, %v1456_v1  ;;  %v2234_v61 = vld [vmem:[%s3630_s13 + $0x70] sm:$0xff] }
 0x59e   :  { %2494 = vmatpush3.bf16.msra.mxu1 %v1577_v62  ;;  %2497 = vmatprep.mubr.msk.bf16.mxu1 %vm2641_vm0, %v2640_v3 }
 0x59f   :  { %2495 = vmatprep.subr.bf16.mxu1 %v2640_v3 }
 0x5a2   :  { %2496 = vmatpush3.bf16.msra.mxu1 %v1576_v4  ;;  %v2235_v4 = vld [vmem:[%s3630_s13 + $0x78] sm:$0xff] }
 0x5a3   :  { %2509 = vmatprep.subr.bf16.mxu1 %v2640_v3 }
 0x5a5   :  { %2498 = vmatmul.mubr.msk.bf16.vlgmr.msra.gmra.mxu1 %vm102_vm1, %v1580_v34  ;;  %v1686_v34 = vpack.c.bf16 %v2235_v4, %v2234_v61  ;;  %v1994_v4 = vld [vmem:[%s3638_s21 + $0x10] sm:$0xff] }
 0x5a6   :  { %2513 = vmatprep.mubr.msk.bf16.mxu1 %vm2641_vm0, %v2640_v3 }
 0x5a7   :  { %2510 = vmatpush3.bf16.msra.mxu1 %v1686_v34  ;;  %v1995_v34 = vld [vmem:[%s3638_s21 + $0x18] sm:$0xff] }
 0x5a8   :  { %2511 = vmatprep.subr.bf16.mxu1 %v2640_v3  ;;  %v1998_v5 = vpack.c.bf16 %v1995_v34, %v1994_v4 }
 0x5ab   :  { %2512 = vmatpush3.bf16.msra.mxu1 %v1685_v32 }
 0x5ac   :  { %2523 = vmatprep.subr.bf16.mxu1 %v2640_v3 }
 0x655   :  { %v1378_v21 = vpop.f32.mrf.mxu1 }
 0x656   :  { %v1379_v30 = vadd.f32 %v2198_v28, %v1378_v21 }
 0x657   :  { %v2467_v33 = vpop.f32.mrf.mxu1 }
 0x658   :  { %v1394_v35 = vrot.slane %v1379_v30, %v3423_v24 }
 0x659   :  { %v1381_v37 = vpop.f32.mrf.mxu1 }
 0x65a   :  { %v1395_v39 = vmul.f32 %v1394_v35, %v1389_v13 }
 0x65b   :  { %v2468_v40 = vpop.f32.mrf.mxu1 }
 0x65c   :  { %v1396_v12 = vadd.f32 %v1395_v39, %v1220_v11  ;;  %v2236_v40 = vld [vmem:[%s3631_s14 + $0x3] sm:$0x1] }
 0x65d   :  { %v1498_v41 = vpop.f32.mrf.mxu1 }
 0x65e   :  { %v1499_v17 = vadd.f32 %v2211_v31, %v1498_v41 }
 0x65f   :  { %v2483_v43 = vpop.f32.mrf.mxu1 }
 0x660   :  { %v1504_v44 = vmax.f32 %v1499_v17, 0.0 }
 0x661   :  { %v1501_v45 = vpop.f32.mrf.mxu1 }
 0x662   :  { %v1510_v47 = vpack.c.bf16 %v1504_v44, %v1504_v44 }
 0x663   :  { %v2484_v54 = vpop.f32.mrf.mxu1 }
 0x664   :  { %2490 = vmatmul.mubr.msk.bf16.vlgmr.msra.gmra.mxu0 %vm102_vm1, %v1510_v47  ;;  %v1747_v54 = vpack.c.bf16 %v1746_v53, %v1745_v52 }
 0x665   :  { %v1618_v36 = vpop.f32.mrf.mxu1  ;;  %2502 = vmatpush3.bf16.msra.mxu0 %v1632_v46  ;;  %2505 = vmatprep.mubr.msk.bf16.mxu0 %vm2641_vm0, %v2640_v3 }
 0x666   :  { %v1619_v27 = vadd.f32 %v2224_v55, %v1618_v36  ;;  %2503 = vmatprep.subr.bf16.mxu0 %v2640_v3 }
 0x667   :  { %v2499_v59 = vpop.f32.mrf.mxu1 }
 0x668   :  { %v1624_v62 = vmax.f32 %v1619_v27, 0.0  ;;  %v1944_v27 = vld [vmem:[%s3636_s19 + $0x10] sm:$0xff] }
 0x669   :  { %v1621_v1 = vpop.f32.mrf.mxu1  ;;  %2504 = vmatpush3.bf16.msra.mxu0 %v1631_v56  ;;  %v1947_v59 = vpack.c.bf16 %v1945_v14, %v1944_v27 }
 0x66a   :  { %v1630_v63 = vpack.c.bf16 %v1624_v62, %v1624_v62  ;;  %2517 = vmatprep.subr.bf16.mxu0 %v2640_v3  ;;  %v1942_v1 = vld [vmem:[%s3636_s19] sm:$0xff] }
 0x66b   :  { %v2500_v2 = vpop.f32.mrf.mxu1 }
 0x66c   :  { %2506 = vmatmul.mubr.msk.bf16.vlgmr.msra.gmra.mxu0 %vm102_vm1, %v1630_v63  ;;  %v1943_v63 = vld [vmem:[%s3636_s19 + $0x8] sm:$0xff] }
 0x66d   :  { %2519 = vmatprep.mubr.msk.bf16.mxu0 %vm2641_vm0, %v2640_v3  ;;  %v1946_v61 = vpack.c.bf16 %v1943_v63, %v1942_v1 }
 0x724   :  { %v1552_v18 = vpop.f32.mrf.mxu0 }
 0x725   :  { %v1553_v10 = vadd.f32 %v2217_v6, %v1552_v18  ;;  %v1848_v6 = vld [vmem:[%s3635_s18] sm:$0xff] }
 0x726   :  { %v2491_v8 = vpop.f32.mrf.mxu0 }
 0x727   :  { %v1568_v38 = vrot.slane %v1553_v10, %v3423_v24  ;;  %v1849_v10 = vld [vmem:[%s3635_s18 + $0x8] sm:$0xff]  ;;  %s2643_s18 = smov [#allocation2]  }
 0x728   :  { %v1555_v20 = vpop.f32.mrf.mxu0 }
 0x729   :  { %v1569_v28 = vmul.f32 %v1568_v38, %v1563_v19 }
 0x72a   :  { %v2492_v21 = vpop.f32.mrf.mxu0 }
 0x72b   :  { %v1570_v29 = vadd.f32 %v1569_v28, %v1396_v12  ;;  %v1948_v28 = vld [vmem:[%s3637_s20] sm:$0x1]  ;;  %s2105_s20 = sshll.u32 %s2643_s18, 4  ;;  %s2106_s20 = int_to_ptr.vmem [resolvable:$true] %s2105_s20 }
 0x72c   :  { %v1672_v30 = vpop.f32.mrf.mxu0  ;;  %s2622_s6 = scalar_lea.vmem %s2106_s20, 32  ;;  %p2623_p1 = scmp.lt.s32.totalorder %s2106_s20, %s2106_s20 }
 0x72d   :  { %v1673_v33 = vadd.f32 %v2230_v60, %v1672_v30 }
 0x72e   :  { %v2507_v13 = vpop.f32.mrf.mxu0 }
 0x72f   :  { %v1678_v35 = vmax.f32 %v1673_v33, 0.0 }
 0x730   :  { %v1675_v37 = vpop.f32.mrf.mxu0 }
 0x731   :  { %v1684_v11 = vpack.c.bf16 %v1678_v35, %v1678_v35 }
 0x732   :  { %v2508_v39 = vpop.f32.mrf.mxu0 }
 0x733   :  { %2514 = vmatmul.mubr.msk.bf16.vlgmr.msra.gmra.mxu1 %vm102_vm1, %v1684_v11 }
 0x734   :  { %2525 = vmatprep.mubr.msk.bf16.mxu1 %vm2641_vm0, %v2640_v3 }
 0x7f3   :  { %v1726_v31 = vpop.f32.mrf.mxu1 }
 0x7f4   :  { %v1727_v41 = vadd.f32 %v2236_v40, %v1726_v31 }
 0x7f5   :  { %v2515_v17 = vpop.f32.mrf.mxu1 }
 0x7f6   :  { %v1742_v12 = vrot.slane %v1727_v41, %v3423_v24  ;;  %v1797_v24 = vld [vmem:[%s3634_s17] sm:$0xf] }
 0x7f7   :  { %v1729_v42 = vpop.f32.mrf.mxu1  ;;  %v1799_v55 = vpack.c.bf16 %v1797_v24, %v1797_v24 }
 0x7f8   :  { %v1743_v43 = vmul.f32 %v1742_v12, %v1737_v57 }
 0x7f9   :  { %v2516_v44 = vpop.f32.mrf.mxu1  ;;  %v1805_v36 = vsel %vm1803_vm6, %v1799_v55, 0 }
 0x7fa   :  { %v1744_v45 = vadd.f32 %v1743_v43, %v1570_v29  ;;  %2524 = vmatpush3.bf16.msra.mxu1 %v1805_v36 }
 0x7fb   :  { %2539 = vmatprep.subr.bf16.mxu1 %v2640_v3 }
 0x7fc   :  { %v1748_v46 = vpack.c.bf16 %v1744_v45, %v1744_v45 }
 0x7fe   :  { %v1754_v47 = vsel %vm1749_vm5, %v1748_v46, 0  ;;  %v2051_v46 = vld [vmem:[%s3641_s24] sm:$0x1] }
 0x7ff   :  { %2518 = vmatpush3.bf16.xpose.msra.mxu0 %v1754_v47 }
 0x806   :  { %2520 = vmatmul.mubr.msk.bf16.vlgmr.msra.gmra.mxu0 %vm1749_vm5, %v1747_v54 }
 0x807   :  { %2531 = vmatprep.mubr.msk.bf16.mxu0 %vm214_vm2, %v1852_v51 }
 0x8c6   :  { %v1790_v56 = vpop.f32.mrf.mxu0 }
 0x8c8   :  { %v2521_v7 = vpop.f32.mrf.mxu0 }
 0x8ca   :  { %v1793_v51 = vpop.f32.mrf.mxu0 }
 0x8cb   :  { %v1798_v62 = vpack.c.bf16 %v1793_v51, %v1790_v56 }
 0x8cc   :  { %v2522_v2 = vpop.f32.mrf.mxu0 }
 0x8cd   :  { %2526 = vmatmul.mubr.msk.bf16.vlgmr.msra.gmra.mxu1 %vm1749_vm5, %v1798_v62 }
 0x8ce   :  { %2540 = vmatpush3.bf16.msra.mxu1 %v1947_v59  ;;  %2543 = vmatprep.mubr.msk.bf16.mxu1 %vm2641_vm0, %v2640_v3 }
 0x8cf   :  { %2541 = vmatprep.subr.bf16.mxu1 %v2640_v3 }
 0x8d2   :  { %2542 = vmatpush3.bf16.msra.mxu1 %v1946_v61 }
 0x8d3   :  { %2547 = vmatprep.subr.bf16.mxu1 %v2640_v3 }
 0x8d5   :  { %2544 = vmatmul.mubr.msk.bf16.vlgmr.msra.gmra.mxu1 %vm102_vm1, %v3025_v50  ;;  %v1993_v50 = vld [vmem:[%s3638_s21 + $0x8] sm:$0xff]  ;;  %s2618_s21 = scalar_lea.vmem %s2106_s20, 16 }
 0x8d6   :  { %2551 = vmatprep.mubr.msk.bf16.mxu1 %vm2641_vm0, %v2640_v3  ;;  %2548 = vmatpush3.bf16.msra.mxu1 %v1998_v5  ;;  %v1997_v32 = vpack.c.bf16 %v1993_v50, %v1992_v9  ;;  %p2619_p0 = scmp.ne.s32.totalorder %s2106_s20, %s2618_s21  ;;  %p2624_p2 = scmp.lt.s32.totalorder %s2622_s6, %s2618_s21 }
 0x8d7   :  { %2549 = vmatprep.subr.bf16.mxu1 %v2640_v3 }
 0x8d8   :  { %p2625_p3 = por %p2624_p2, %p2623_p1 }
 0x8da   :  { %2550 = vmatpush3.bf16.msra.mxu1 %v1997_v32  ;;  %p2626_p4 = pnand %p2625_p3, %p2619_p0 }
 0x98d   :  { %v1841_v16 = vpop.f32.mrf.mxu1 }
 0x98e   :  { %v1850_v19 = vmul.f32 %v1848_v6, %v1841_v16 }
 0x98f   :  { %v2527_v18 = vpop.f32.mrf.mxu1 }
 0x991   :  { %v1844_v8 = vpop.f32.mrf.mxu1 }
 0x992   :  { %v1851_v38 = vmul.f32 %v1849_v10, %v1844_v8 }
 0x993   :  { %v2528_v20 = vpop.f32.mrf.mxu1 }
 0x994   :  { %v1856_v21 = vpack.c.bf16 %v1851_v38, %v1850_v19 }
 0x995   :  { %v1985_v60 = vpop.f32.mrf.mxu1 }
 0x996   :  { %2529 = vmatprep.subr.bf16.mxu0 %v1856_v21  ;;  %v1986_v29 = vadd.f32 %v1985_v60, %v1948_v28 }
 0x997   :  { %2530 = vmatpush3.bf16.msra.mxu0 %v1856_v21  ;;  %v2545_v30 = vpop.f32.mrf.mxu1 }
 0x998   :  { %v1991_v33 = vmax.f32 %v1986_v29, 0.0  ;;  %2555 = vmatprep.subr.bf16.mxu0 %v2640_v3 }
 0x999   :  { %v1988_v13 = vpop.f32.mrf.mxu1 }
 0x99a   :  { %v1996_v35 = vpack.c.bf16 %v1991_v33, %v1991_v33  ;;  %2532 = vmatmul.mubr.msk.bf16.vlgmr.msra.gmra.mxu0 %vm214_vm2, %v1853_v15  ;;  %v2050_v15 = vpack.c.bf16 %v2047_v49, %v2046_v48 }
 0x99b   :  { %2535 = vmatprep.mubr.msk.bf16.mxu0 %vm214_vm2, %v1854_v0  ;;  %v2546_v37 = vpop.f32.mrf.mxu1 }
 0x99c   :  { %2552 = vmatmul.mubr.msk.bf16.vlgmr.msra.gmra.mxu1 %vm102_vm1, %v1996_v35  ;;  %2556 = vmatpush3.bf16.msra.mxu0 %v2050_v15 }
 0x99d   :  { %2557 = vmatprep.subr.bf16.mxu0 %v2640_v3 }
 0x9a0   :  { %2558 = vmatpush3.bf16.msra.mxu0 %v2049_v23 }
 0x9a2   :  { %2536 = vmatmul.mubr.msk.bf16.gmra.mxu0 %vm214_vm2, %v1855_v26  ;;  %v1999_v26 = vld [vmem:[%s3639_s22] sm:$0x1] }
 0x9a3   :  { %2559 = vmatprep.mubr.msk.bf16.mxu0 %vm2641_vm0, %v2640_v3 }
 0xa5a   :  { %v2533_v25 = vpop.f32.mrf.mxu0 }
 0xa5b   :  { %1936 = vst.msk [vmem:[%s3642_s25 + $0x10] sm:$0xff] %vm214_vm2, %v2533_v25 }
 0xa5c   :  { %v1903_v3 = vpop.f32.mrf.mxu0  ;;  %v2037_v0 = vpop.f32.mrf.mxu1 }
 0xa5d   :  { %1934 = vst.msk [vmem:[%s3642_s25] sm:$0xff] %vm214_vm2, %v1903_v3  ;;  %v2038_v11 = vadd.f32 %v2037_v0, %v1999_v26 }
 0xa5e   :  { %v2534_v39 = vpop.f32.mrf.mxu0  ;;  %v2553_v40 = vpop.f32.mrf.mxu1 }
 0xa5f   :  { %v2043_v31 = vmax.f32 %v2038_v11, 0.0  ;;  %1937 = vst.msk [vmem:[%s3642_s25 + $0x18] sm:$0xff] %vm214_vm2, %v2534_v39 }
 0xa60   :  { %v1906_v41 = vpop.f32.mrf.mxu0  ;;  %v2040_v17 = vpop.f32.mrf.mxu1 }
 0xa61   :  { %v2048_v12 = vpack.c.bf16 %v2043_v31, %v2043_v31  ;;  %1935 = vst.msk [vmem:[%s3642_s25 + $0x8] sm:$0xff] %vm214_vm2, %v1906_v41 }
 0xa62   :  { %v2537_v57 = vpop.f32.mrf.mxu0  ;;  %v2554_v42 = vpop.f32.mrf.mxu1 }
 0xa63   :  { %1940 = vst.msk [vmem:[%s3642_s25 + $0x30] sm:$0xff] %vm214_vm2, %v2537_v57  ;;  %2560 = vmatmul.mubr.msk.bf16.vlgmr.msra.gmra.mxu0 %vm102_vm1, %v2048_v12 }
 0xa64   :  { %v1919_v43 = vpop.f32.mrf.mxu0 }
 0xa65   :  { %1938 = vst.msk [vmem:[%s3642_s25 + $0x20] sm:$0xff] %vm214_vm2, %v1919_v43 }
 0xa66   :  { %v2538_v44 = vpop.f32.mrf.mxu0 }
 0xa67   :  { %1941 = vst.msk [vmem:[%s3642_s25 + $0x38] sm:$0xff] %vm214_vm2, %v2538_v44 }
 0xa68   :  { %v1922_v45 = vpop.f32.mrf.mxu0 }
 0xa69   :  { %1939 = vst.msk [vmem:[%s3642_s25 + $0x28] sm:$0xff] %vm214_vm2, %v1922_v45 }
 0xb23   :  { %v2089_v47 = vpop.f32.mrf.mxu0 }
 0xb24   :  { %v2090_v52 = vadd.f32 %v2089_v47, %v2051_v46 }
 0xb25   :  { %v2561_v53 = vpop.f32.mrf.mxu0 }
 0xb26   :  { %2096 = vst.msk [vmem:[#allocation2] sm:$0x1] %vm2095_vm7, %v2090_v52 }
 0xb27   :  { %v2092_v54 = vpop.f32.mrf.mxu0 }
 0xb28   :  { %2629 = shalt.err (!%p2626_p4)
}
 0xb29   :  { %2108 = dma.vmem_to_hbm [thread:$0]  %s2106_s20, 16, %s3643_s26, [#allocation3]   ;;  %v2562_v24 = vpop.f32.mrf.mxu0 }
 0xb2a   :  { %2638 = dma.done.wait [#allocation3], 16  }
 0xb2b   :  { %2639 = vsyncadd [#allocation3], 4294967280 }
 0xb2c   :  { %2114 = vsyncpa [#allocation3], 1 }

// kernel: sam_forward.4
= control target key start
LH: loop header
LB: loop body
LE: loop exit
PB: predicated region body
PF: predicated region fallthrough
CT: control target
= control target key end

     0   :  { %v3812_v0 = vmov 0.0   ;;  %vm3813_vm0 = vmmov 0   ;;  %vm90_vm1 = vcmask 261120   ;;  %vm242_vm2 = vcmask 130048   ;;  %s4786_s5 = inlined_call_operand.vmem [shape: f32[8,32,16], index: 5, kind: input, shape index: {}]   ;;  %s4787_s4 = inlined_call_operand.vmem [shape: f32[8,32,16], index: 4, kind: input, shape index: {}]   ;;  %s4788_s0 = inlined_call_operand.vmem [shape: f32[1,8,32], index: 0, kind: input, shape index: {}]   ;;  %s4789_s8 = inlined_call_operand.vmem [shape: f32[8,1,16], index: 8, kind: input, shape index: {}]   ;;  %s4790_s7 = inlined_call_operand.vmem [shape: f32[8,1,16], index: 7, kind: input, shape index: {}]   ;;  %s4791_s6 = inlined_call_operand.vmem [shape: f32[8,32,16], index: 6, kind: input, shape index: {}]   ;;  %s4792_s9 = inlined_call_operand.vmem [shape: f32[8,1,16], index: 9, kind: input, shape index: {}]   ;;  %s4793_s10 = inlined_call_operand.vmem [shape: f32[8,16,32], index: 10, kind: input, shape index: {}]   ;;  %s4794_s11 = inlined_call_operand.vmem [shape: f32[4,1,32], index: 11, kind: input, shape index: {}]   ;;  %s4795_s1 = inlined_call_operand.vmem [shape: f32[1,16,32], index: 1, kind: input, shape index: {}]   ;;  %s4796_s2 = inlined_call_operand.vmem [shape: f32[1,32], index: 2, kind: input, shape index: {}]   ;;  %s4797_s3 = inlined_call_operand.vmem [shape: f32[16,32], index: 3, kind: input, shape index: {}]   ;;  %s4798_s12 = inlined_call_operand.vmem [shape: f32[5,1,32], index: 12, kind: input, shape index: {}]   ;;  %s4799_s13 = inlined_call_operand.vmem [shape: f32[5,1,32], index: 13, kind: input, shape index: {}]   ;;  %s4800_s14 = inlined_call_operand.vmem [shape: f32[32,64], index: 14, kind: input, shape index: {}]   ;;  %s4801_s16 = inlined_call_operand.vmem [shape: f32[64,32], index: 16, kind: input, shape index: {}]   ;;  %s4802_s15 = inlined_call_operand.vmem [shape: f32[1,64], index: 15, kind: input, shape index: {}]   ;;  %s4803_s17 = inlined_call_operand.vmem [shape: f32[1,32], index: 17, kind: input, shape index: {}]   ;;  %s4804_s19 = inlined_call_operand.vmem [shape: f32[1,16,32], index: 19, kind: output, shape index: {1}]   ;;  %s4805_s18 = inlined_call_operand.vmem [shape: f32[1,8,32], index: 18, kind: output, shape index: {0}]  }
   0x1   :  { %4810 = sst [smem:[#allocation2_spill]] %s4786_s5  ;;  %3407 = vmatprep.subr.bf16.mxu1 %v3812_v0  ;;  %3399 = vmatprep.subr.bf16.mxu0 %v3812_v0  ;;  %v3051_v19 = vld [vmem:[%s4790_s7] ss:$0 sm:$0xff]  ;;  %v189_v30 = vld [vmem:[%s4791_s6 + $0x10] sm:$0xff]  ;;  %v190_v31 = vld [vmem:[%s4791_s6 + $0x18] sm:$0xff]  ;;  %vm290_vm3 = vcmask 64512  }
   0x2   :  { %4811 = sst [smem:[#allocation3_spill]] %s4787_s4  ;;  %3411 = vmatprep.mubr.msk.bf16.mxu1 %vm3813_vm0, %v3812_v0  ;;  %3403 = vmatprep.mubr.msk.bf16.mxu0 %vm3813_vm0, %v3812_v0  ;;  %v187_v32 = vld [vmem:[%s4791_s6] sm:$0xff]  ;;  %v192_v33 = vpack.c.bf16 %v190_v31, %v189_v30  ;;  %v188_v34 = vld [vmem:[%s4791_s6 + $0x8] sm:$0xff]  ;;  %vm307_vm4 = vcmask 1043456   ;;  %v3076_v30 = vld [vmem:[%s4791_s6 + $0x38] sm:$0xff]  ;;  %vm1531_vm5 = vcmask 523264  }
   0x3   :  { %4812 = sst [smem:[#allocation4_spill]] %s4788_s0  ;;  %v191_v35 = vpack.c.bf16 %v188_v34, %v187_v32  ;;  %v3055_v48 = vld [vmem:[%s4792_s9] ss:$0 sm:$0xff] }
   0x4   :  { %4813 = sst [smem:[#allocation5_spill]] %s4789_s8  ;;  %v3073_v31 = vld [vmem:[%s4791_s6 + $0x20] sm:$0xff] }
   0x5   :  { %s4814_s20 = sld [smem:[#allocation2_spill]] }
   0x6   :  { %s4815_s23 = sld [smem:[#allocation3_spill]] }
   0x7   :  { %s4816_s0 = sld [smem:[#allocation4_spill]] }
   0x8   :  { %s4817_s8 = sld [smem:[#allocation5_spill]] }
   0xb   :  { %v136_v1 = vld [vmem:[%s4814_s20 + $0x10] sm:$0xff]  ;;  %v137_v2 = vld [vmem:[%s4814_s20 + $0x18] sm:$0xff]  ;;  %v134_v6 = vld [vmem:[%s4814_s20] sm:$0xff] }
   0xc   :  { %v78_v3 = vld [vmem:[%s4815_s23 + $0x10] sm:$0xff]  ;;  %v139_v4 = vpack.c.bf16 %v137_v2, %v136_v1  ;;  %v79_v5 = vld [vmem:[%s4815_s23 + $0x18] sm:$0xff]  ;;  %v135_v7 = vld [vmem:[%s4814_s20 + $0x8] sm:$0xff] }
   0xd   :  { %v82_v8 = vpack.c.bf16 %v79_v5, %v78_v3  ;;  %v76_v9 = vld [vmem:[%s4815_s23] sm:$0xff]  ;;  %v77_v10 = vld [vmem:[%s4815_s23 + $0x8] sm:$0xff]  ;;  %v138_v11 = vpack.c.bf16 %v135_v7, %v134_v6  ;;  %v3061_v55 = vld [vmem:[%s4815_s23 + $0x30] sm:$0xff] }
   0xe   :  { %3408 = vmatpush3.bf16.msra.mxu1 %v139_v4  ;;  %v3947_v12 = vld [vmem:[%s4816_s0] sm:$0xff]  ;;  %v81_v13 = vpack.c.bf16 %v77_v10, %v76_v9  ;;  %v3062_v56 = vld [vmem:[%s4815_s23 + $0x38] sm:$0xff]  ;;  %v3060_v59 = vld [vmem:[%s4815_s23 + $0x28] sm:$0xff] }
   0xf   :  { %3400 = vmatpush3.bf16.msra.mxu0 %v82_v8  ;;  %3409 = vmatprep.subr.bf16.mxu1 %v3812_v0  ;;  %v3953_v14 = vpack.c.bf16 %v3947_v12, %v3947_v12  ;;  %v3053_v15 = vld [vmem:[%s4817_s8] ss:$0 sm:$0xff]  ;;  %v361_v57 = vpack.c.bf16 %v3062_v56, %v3061_v55  ;;  %v3068_v62 = vld [vmem:[%s4814_s20 + $0x30] sm:$0xff]  ;;  %v3069_v63 = vld [vmem:[%s4814_s20 + $0x38] sm:$0xff] }
  0x10   :  { %3401 = vmatprep.subr.bf16.mxu0 %v3812_v0  ;;  %v3059_v58 = vld [vmem:[%s4815_s23 + $0x20] sm:$0xff]  ;;  %v416_v3 = vpack.c.bf16 %v3069_v63, %v3068_v62  ;;  %v3067_v6 = vld [vmem:[%s4814_s20 + $0x28] sm:$0xff] }
  0x11   :  { %v360_v60 = vpack.c.bf16 %v3060_v59, %v3059_v58  ;;  %v3066_v5 = vld [vmem:[%s4814_s20 + $0x20] sm:$0xff]  ;;  %v352_v58 = vld [vmem:[%s4793_s10 + $0x8] sm:$0xff] }
  0x12   :  { %3410 = vmatpush3.bf16.msra.mxu1 %v138_v11  ;;  %v415_v7 = vpack.c.bf16 %v3067_v6, %v3066_v5 }
  0x13   :  { %3402 = vmatpush3.bf16.msra.mxu0 %v81_v13  ;;  %3423 = vmatprep.subr.bf16.mxu1 %v3812_v0 }
  0x14   :  { %3415 = vmatprep.subr.bf16.mxu0 %v3812_v0 }
  0x15   :  { %3412 = vmatmul.mubr.msk.bf16.vlgmr.msra.gmra.mxu1 %vm90_vm1, %v3953_v14 }
  0x16   :  { %3404 = vmatmul.mubr.msk.bf16.vlgmr.msra.gmra.mxu0 %vm90_vm1, %v3953_v14  ;;  %3425 = vmatprep.mubr.msk.bf16.mxu1 %vm3813_vm0, %v3812_v0 }
  0x17   :  { %3419 = vmatprep.mubr.msk.bf16.mxu0 %vm3813_vm0, %v3812_v0  ;;  %3416 = vmatpush3.bf16.msra.mxu0 %v192_v33  ;;  %v3074_v33 = vld [vmem:[%s4791_s6 + $0x28] sm:$0xff] }
  0x18   :  { %3417 = vmatprep.subr.bf16.mxu0 %v3812_v0  ;;  %v470_v34 = vpack.c.bf16 %v3074_v33, %v3073_v31  ;;  %v3096_v31 = vld [vmem:[%s4814_s20 + $0x40] sm:$0xff] }
  0x1b   :  { %3418 = vmatpush3.bf16.msra.mxu0 %v191_v35 }
  0x1c   :  { %3429 = vmatprep.subr.bf16.mxu0 %v3812_v0 }
  0x1e   :  { %3420 = vmatmul.mubr.msk.bf16.vlgmr.msra.gmra.mxu0 %vm90_vm1, %v3953_v14 }
  0x1f   :  { %3431 = vmatprep.mubr.msk.bf16.mxu0 %vm3813_vm0, %v3812_v0 }
  0xd5   :  { %v181_v16 = vpop.f32.mrf.mxu1 }
  0xd6   :  { %v182_v17 = vadd.f32 %v3053_v15, %v181_v16  ;;  %v128_v18 = vpop.f32.mrf.mxu0 }
  0xd7   :  { %v3413_v20 = vpop.f32.mrf.mxu1  ;;  %v129_v25 = vadd.f32 %v3051_v19, %v128_v18  ;;  %v3071_v18 = vld [vmem:[%s4817_s8 + $0x1] ss:$0 sm:$0xff] }
  0xd8   :  { %v241_v21 = vpack.c.bf16 %v182_v17, %v182_v17  ;;  %v3405_v22 = vpop.f32.mrf.mxu0 }
  0xd9   :  { %v184_v23 = vpop.f32.mrf.mxu1  ;;  %v240_v29 = vpack.c.bf16 %v129_v25, %v129_v25 }
  0xda   :  { %v247_v24 = vsel %vm242_vm2, %v241_v21, 0  ;;  %v131_v26 = vpop.f32.mrf.mxu0  ;;  %v3064_v21 = vld [vmem:[%s4790_s7 + $0x1] ss:$0 sm:$0xff] }
  0xdb   :  { %v3414_v27 = vpop.f32.mrf.mxu1  ;;  %3424 = vmatpush3.bf16.xpose.msra.mxu1 %v247_v24 }
  0xdc   :  { %v3406_v28 = vpop.f32.mrf.mxu0  ;;  %3435 = vmatprep.subr.bf16.mxu1 %v3812_v0 }
  0xde   :  { %v234_v47 = vpop.f32.mrf.mxu0 }
  0xdf   :  { %v235_v49 = vadd.f32 %v3055_v48, %v234_v47 }
  0xe0   :  { %v3421_v50 = vpop.f32.mrf.mxu0 }
  0xe1   :  { %v303_v51 = vpack.c.bf16 %v235_v49, %v235_v49 }
  0xe2   :  { %3426 = vmatmul.mubr.msk.bf16.vlgmr.msra.gmra.mxu1 %vm242_vm2, %v240_v29  ;;  %v237_v52 = vpop.f32.mrf.mxu0  ;;  %v3075_v29 = vld [vmem:[%s4791_s6 + $0x30] sm:$0xff] }
  0xe3   :  { %3439 = vmatprep.mubr.msk.bf16.mxu1 %vm3813_vm0, %v3812_v0  ;;  %v309_v53 = vsel %vm307_vm4, %v303_v51, 0  ;;  %3436 = vmatpush3.bf16.msra.mxu1 %v361_v57  ;;  %v471_v32 = vpack.c.bf16 %v3076_v30, %v3075_v29  ;;  %v351_v57 = vld [vmem:[%s4793_s10] sm:$0xff]  ;;  %v64_v29 = vld [vmem:[%s4795_s1 + $0x8] sm:$0xff] }
  0xe4   :  { %v3422_v54 = vpop.f32.mrf.mxu0  ;;  %3430 = vmatpush3.bf16.msra.mxu0 %v309_v53  ;;  %3437 = vmatprep.subr.bf16.mxu1 %v3812_v0  ;;  %v3082_v53 = vld [vmem:[%s4793_s10 + $0x10] sm:$0xff]  ;;  %v3050_v30 = vld [vmem:[%s4796_s2] ss:$0 sm:$0xff] }
  0xe5   :  { %3443 = vmatprep.subr.bf16.mxu0 %v3812_v0  ;;  %v3083_v54 = vld [vmem:[%s4793_s10 + $0x18] sm:$0xff] }
  0xe6   :  { %v632_v55 = vpack.c.bf16 %v3083_v54, %v3082_v53 }
  0xe7   :  { %3438 = vmatpush3.bf16.msra.mxu1 %v360_v60 }
  0xe8   :  { %3451 = vmatprep.subr.bf16.mxu1 %v3812_v0 }
  0xea   :  { %3440 = vmatmul.mubr.msk.bf16.vlgmr.msra.gmra.mxu1 %vm90_vm1, %v3953_v14 }
  0xeb   :  { %3455 = vmatprep.mubr.msk.bf16.mxu1 %vm3813_vm0, %v3812_v0  ;;  %3452 = vmatpush3.bf16.msra.mxu1 %v471_v32  ;;  %v3097_v32 = vld [vmem:[%s4814_s20 + $0x48] sm:$0xff] }
  0xec   :  { %3453 = vmatprep.subr.bf16.mxu1 %v3812_v0 }
  0xef   :  { %3454 = vmatpush3.bf16.msra.mxu1 %v470_v34  ;;  %v4132_v34 = vadd.f32 %v3050_v30, %v64_v29 }
  0xf0   :  { %3465 = vmatprep.subr.bf16.mxu1 %v3812_v0 }
  0xf2   :  { %3456 = vmatmul.mubr.msk.bf16.vlgmr.msra.gmra.mxu1 %vm90_vm1, %v3953_v14 }
  0xf3   :  { %3467 = vmatprep.mubr.msk.bf16.mxu1 %vm3813_vm0, %v3812_v0 }
 0x1a2   :  { %v283_v36 = vpop.f32.mrf.mxu1 }
 0x1a3   :  { %v289_v37 = vmul.f32 0.25, %v283_v36 }
 0x1a4   :  { %v3427_v38 = vpop.f32.mrf.mxu1 }
 0x1a5   :  { %v291_v39 = vsel %vm290_vm3, %v289_v37, -inf }
 0x1a6   :  { %292 = vmax.xlane.f32.xlu0 %v291_v39  ;;  %v286_v40 = vpop.f32.mrf.mxu1 }
 0x1a8   :  { %v3428_v41 = vpop.f32.mrf.mxu1 }
 0x1a9   :  { %v3078_v41 = vld [vmem:[%s4792_s9 + $0x1] ss:$0 sm:$0xff] }
 0x1aa   :  { %v404_v8 = vpop.f32.mrf.mxu1 }
 0x1ab   :  { %v405_v26 = vadd.f32 %v3064_v21, %v404_v8 }
 0x1ac   :  { %v3441_v9 = vpop.f32.mrf.mxu1 }
 0x1ad   :  { %v520_v28 = vpack.c.bf16 %v405_v26, %v405_v26  ;;  %v3099_v26 = vld [vmem:[%s4814_s20 + $0x58] sm:$0xff] }
 0x1ae   :  { %v407_v10 = vpop.f32.mrf.mxu1 }
 0x1b0   :  { %v3442_v11 = vpop.f32.mrf.mxu1 }
 0x1b1   :  { %v3086_v11 = vld [vmem:[%s4794_s11] ss:$0 sm:$0xff] }
 0x22f   :  { %v293_v42 = vpop.xlane.xlu0 %292 }
 0x230   :  { %v294_v43 = vsub.f32 %v289_v37, %v293_v42  ;;  %v514_v42 = vpop.f32.mrf.mxu1 }
 0x232   :  { %v295_v44 = vmul.f32 1.442695, %v294_v43  ;;  %v515_v43 = vadd.f32 %v3078_v41, %v514_v42  ;;  %v3091_v41 = vld [vmem:[%s4815_s23 + $0x50] sm:$0xff]  ;;  %v3092_v42 = vld [vmem:[%s4815_s23 + $0x58] sm:$0xff] }
 0x234   :  { %3757 = vpow2.f32 %v295_v44  ;;  %v3457_v44 = vpop.f32.mrf.mxu1 }
 0x235   :  { %v767_v44 = vpack.c.bf16 %v3092_v42, %v3091_v41 }
 0x241   :  { %v3758_v45 = vpop.eup %3757 }
 0x242   :  { %v297_v46 = vsel %vm290_vm3, %v3758_v45, 0.0 }
 0x243   :  { %298 = vadd.xlane.f32.xlu0 %v297_v46 }
 0x2cc   :  { %v299_v61 = vpop.xlane.xlu0 %298 }
 0x2cd   :  { %3759 = vrcp.f32 %v299_v61  ;;  %v354_v61 = vpack.c.bf16 %v352_v58, %v351_v57  ;;  %v3101_v57 = vld [vmem:[%s4817_s8 + $0x2] ss:$0 sm:$0xff] }
 0x2da   :  { %v3760_v1 = vpop.eup %3759 }
 0x2db   :  { %v301_v2 = vmul.f32 %v3760_v1, %v3758_v45  ;;  %v581_v45 = vpack.c.bf16 %v515_v43, %v515_v43  ;;  %v3089_v43 = vld [vmem:[%s4815_s23 + $0x40] sm:$0xff] }
 0x2dd   :  { %v302_v4 = vpack.c.bf16 %v301_v2, %v301_v2  ;;  %v586_v46 = vsel %vm307_vm4, %v581_v45, 0  ;;  %v3090_v45 = vld [vmem:[%s4815_s23 + $0x48] sm:$0xff] }
 0x2de   :  { %3466 = vmatpush3.bf16.msra.mxu1 %v586_v46 }
 0x2df   :  { %3432 = vmatmul.mubr.msk.bf16.vlgmr.msra.gmra.mxu0 %vm290_vm3, %v302_v4  ;;  %3477 = vmatprep.subr.bf16.mxu1 %v3812_v0 }
 0x2e0   :  { %3444 = vmatpush3.bf16.msra.mxu0 %v416_v3  ;;  %3447 = vmatprep.mubr.msk.bf16.mxu0 %vm3813_vm0, %v3812_v0 }
 0x2e1   :  { %3445 = vmatprep.subr.bf16.mxu0 %v3812_v0 }
 0x2e4   :  { %3446 = vmatpush3.bf16.msra.mxu0 %v415_v7 }
 0x2e5   :  { %3459 = vmatprep.subr.bf16.mxu0 %v3812_v0 }
 0x2e7   :  { %3448 = vmatmul.mubr.msk.bf16.vlgmr.msra.gmra.mxu0 %vm90_vm1, %v3953_v14  ;;  %v517_v14 = vpop.f32.mrf.mxu1 }
 0x2e8   :  { %3461 = vmatprep.mubr.msk.bf16.mxu0 %vm3813_vm0, %v3812_v0  ;;  %v766_v14 = vpack.c.bf16 %v3090_v45, %v3089_v43 }
 0x2e9   :  { %v3458_v47 = vpop.f32.mrf.mxu1 }
 0x39f   :  { %v4040_v13 = vpop.f32.mrf.mxu0 }
 0x3a0   :  { %v353_v63 = vpack.c.bf16 %v4040_v13, %v4040_v13 }
 0x3a1   :  { %v3433_v15 = vpop.f32.mrf.mxu0 }
 0x3a3   :  { %v348_v16 = vpop.f32.mrf.mxu0 }
 0x3a5   :  { %v3434_v17 = vpop.f32.mrf.mxu0 }
 0x3a7   :  { %v459_v19 = vpop.f32.mrf.mxu0 }
 0x3a8   :  { %v460_v20 = vadd.f32 %v3071_v18, %v459_v19 }
 0x3a9   :  { %v3449_v22 = vpop.f32.mrf.mxu0 }
 0x3aa   :  { %v521_v23 = vpack.c.bf16 %v460_v20, %v460_v20 }
 0x3ab   :  { %v462_v24 = vpop.f32.mrf.mxu0 }
 0x3ac   :  { %v526_v25 = vsel %vm242_vm2, %v521_v23, 0 }
 0x3ad   :  { %v3450_v27 = vpop.f32.mrf.mxu0  ;;  %3460 = vmatpush3.bf16.xpose.msra.mxu0 %v526_v25  ;;  %v3098_v25 = vld [vmem:[%s4814_s20 + $0x50] sm:$0xff] }
 0x3ae   :  { %3471 = vmatprep.subr.bf16.mxu0 %v3812_v0  ;;  %v826_v27 = vpack.c.bf16 %v3099_v26, %v3098_v25 }
 0x3b4   :  { %3462 = vmatmul.mubr.msk.bf16.vlgmr.msra.gmra.mxu0 %vm242_vm2, %v520_v28  ;;  %v63_v28 = vld [vmem:[%s4795_s1] sm:$0xff] }
 0x3b5   :  { %3473 = vmatprep.mubr.msk.bf16.mxu0 %vm3813_vm0, %v3812_v0  ;;  %3472 = vmatpush3.bf16.msra.mxu0 %v632_v55  ;;  %v4130_v33 = vadd.f32 %v3050_v30, %v63_v28 }
 0x3b6   :  { %3483 = vmatprep.subr.bf16.mxu0 %v3812_v0 }
 0x474   :  { %v562_v35 = vpop.f32.mrf.mxu0 }
 0x475   :  { %v568_v36 = vmul.f32 0.25, %v562_v35  ;;  %v825_v35 = vpack.c.bf16 %v3097_v32, %v3096_v31 }
 0x476   :  { %v3463_v37 = vpop.f32.mrf.mxu0 }
 0x477   :  { %v569_v38 = vsel %vm290_vm3, %v568_v36, -inf  ;;  %v75_v37 = vld [vmem:[%s4797_s3 + $0x8] sm:$0xff] }
 0x478   :  { %570 = vmax.xlane.f32.xlu1 %v569_v38  ;;  %v565_v39 = vpop.f32.mrf.mxu0 }
 0x479   :  { %v759_v39 = vadd.f32 %v75_v37, %v4132_v34 }
 0x47a   :  { %v3464_v40 = vpop.f32.mrf.mxu0 }
 0x501   :  { %v571_v48 = vpop.xlane.xlu1 %570 }
 0x502   :  { %v572_v49 = vsub.f32 %v568_v36, %v571_v48  ;;  %v74_v36 = vld [vmem:[%s4797_s3] sm:$0xff] }
 0x503   :  { %v758_v38 = vadd.f32 %v74_v36, %v4130_v33 }
 0x504   :  { %v573_v50 = vmul.f32 1.442695, %v572_v49 }
 0x505   :  { %v4142_v40 = vpack.c.bf16 %v759_v39, %v758_v38 }
 0x506   :  { %3761 = vpow2.f32 %v573_v50  ;;  %v3087_v50 = vld [vmem:[%s4798_s12] ss:$0 sm:$0xff] }
 0x513   :  { %v3762_v51 = vpop.eup %3761 }
 0x514   :  { %v575_v52 = vsel %vm290_vm3, %v3762_v51, 0.0 }
 0x515   :  { %576 = vadd.xlane.f32.xlu1 %v575_v52  ;;  %v3088_v52 = vld [vmem:[%s4799_s13] ss:$0 sm:$0xff] }
 0x59e   :  { %v577_v56 = vpop.xlane.xlu1 %576 }
 0x59f   :  { %3763 = vrcp.f32 %v577_v56 }
 0x5ac   :  { %v3764_v59 = vpop.eup %3763 }
 0x5ad   :  { %v579_v60 = vmul.f32 %v3764_v59, %v3762_v51 }
 0x5af   :  { %v580_v62 = vpack.c.bf16 %v579_v60, %v579_v60 }
 0x5b1   :  { %3468 = vmatmul.mubr.msk.bf16.vlgmr.msra.gmra.mxu1 %vm290_vm3, %v580_v62 }
 0x5b2   :  { %3478 = vmatpush3.bf16.msra.mxu1 %v354_v61  ;;  %3479 = vmatprep.mubr.msk.bf16.mxu1 %vm3813_vm0, %v3812_v0 }
 0x5b3   :  { %3491 = vmatprep.subr.bf16.mxu1 %v3812_v0 }
 0x5b9   :  { %3480 = vmatmul.mubr.msk.bf16.vlgmr.msra.gmra.mxu1 %vm242_vm2, %v353_v63 }
 0x5ba   :  { %3495 = vmatprep.mubr.msk.bf16.mxu1 %vm3813_vm0, %v3812_v0  ;;  %3492 = vmatpush3.bf16.msra.mxu1 %v826_v27 }
 0x5bb   :  { %3493 = vmatprep.subr.bf16.mxu1 %v3812_v0 }
 0x5be   :  { %3494 = vmatpush3.bf16.msra.mxu1 %v825_v35 }
 0x5bf   :  { %3507 = vmatprep.subr.bf16.mxu1 %v3812_v0 }
 0x5c1   :  { %3496 = vmatmul.mubr.msk.bf16.vlgmr.msra.gmra.mxu1 %vm90_vm1, %v4142_v40 }
 0x5c2   :  { %3509 = vmatprep.mubr.msk.bf16.mxu1 %vm3813_vm0, %v3812_v0 }
 0x671   :  { %v622_v1 = vpop.f32.mrf.mxu1 }
 0x672   :  { %v631_v2 = vpack.c.bf16 %v622_v1, %v622_v1 }
 0x673   :  { %v3469_v3 = vpop.f32.mrf.mxu1 }
 0x674   :  { %3474 = vmatmul.mubr.msk.bf16.vlgmr.msra.gmra.mxu0 %vm242_vm2, %v631_v2  ;;  %v3116_v3 = vld [vmem:[%s4815_s23 + $0x70] sm:$0xff] }
 0x675   :  { %v625_v4 = vpop.f32.mrf.mxu1  ;;  %3487 = vmatprep.mubr.msk.bf16.mxu0 %vm3813_vm0, %v3812_v0  ;;  %3484 = vmatpush3.bf16.msra.mxu0 %v767_v44  ;;  %v3108_v44 = vld [vmem:[%s4792_s9 + $0x2] ss:$0 sm:$0xff] }
 0x676   :  { %3485 = vmatprep.subr.bf16.mxu0 %v3812_v0  ;;  %v3117_v4 = vld [vmem:[%s4815_s23 + $0x78] sm:$0xff] }
 0x677   :  { %v3470_v5 = vpop.f32.mrf.mxu1 }
 0x679   :  { %v713_v6 = vpop.f32.mrf.mxu1  ;;  %3486 = vmatpush3.bf16.msra.mxu0 %v766_v14 }
 0x67a   :  { %3499 = vmatprep.subr.bf16.mxu0 %v3812_v0 }
 0x67b   :  { %v3481_v7 = vpop.f32.mrf.mxu1 }
 0x67d   :  { %v716_v8 = vpop.f32.mrf.mxu1 }
 0x67e   :  { %v1055_v8 = vpack.c.bf16 %v3117_v4, %v3116_v3 }
 0x67f   :  { %v3482_v9 = vpop.f32.mrf.mxu1 }
 0x681   :  { %v872_v58 = vpop.f32.mrf.mxu1 }
 0x682   :  { %v873_v60 = vadd.f32 %v3101_v57, %v872_v58  ;;  %v3122_v58 = vld [vmem:[%s4814_s20 + $0x68] sm:$0xff] }
 0x683   :  { %v3497_v59 = vpop.f32.mrf.mxu1 }
 0x685   :  { %v875_v61 = vpop.f32.mrf.mxu1 }
 0x686   :  { %v876_v62 = vadd.f32 %v3101_v57, %v875_v61  ;;  %v3121_v57 = vld [vmem:[%s4814_s20 + $0x60] sm:$0xff] }
 0x687   :  { %v3498_v63 = vpop.f32.mrf.mxu1  ;;  %v1109_v59 = vpack.c.bf16 %v3122_v58, %v3121_v57 }
 0x688   :  { %v940_v1 = vpack.c.bf16 %v876_v62, %v873_v60 }
 0x68a   :  { %v945_v2 = vsel %vm242_vm2, %v940_v1, 0 }
 0x68b   :  { %3508 = vmatpush3.bf16.xpose.msra.mxu1 %v945_v2  ;;  %v3126_v2 = vld [vmem:[%s4817_s8 + $0x3] ss:$0 sm:$0xff] }
 0x68c   :  { %3519 = vmatprep.subr.bf16.mxu1 %v3812_v0 }
 0x734   :  { %v670_v10 = vpop.f32.mrf.mxu0 }
 0x735   :  { %v714_v13 = vadd.f32 %v713_v6, %v670_v10  ;;  %v3114_v10 = vld [vmem:[%s4815_s23 + $0x60] sm:$0xff] }
 0x736   :  { %v3475_v15 = vpop.f32.mrf.mxu0 }
 0x737   :  { %v726_v16 = vadd.f32 %v3086_v11, %v714_v13  ;;  %v3115_v11 = vld [vmem:[%s4815_s23 + $0x68] sm:$0xff] }
 0x738   :  { %v673_v17 = vpop.f32.mrf.mxu0 }
 0x739   :  { %v729_v18 = vsel %vm90_vm1, %v726_v16, 0.0  ;;  %v3105_v17 = vld [vmem:[%s4791_s6 + $0x50] sm:$0xff] }
 0x73a   :  { %730 = vadd.xlane.f32.xlu0 %v729_v18  ;;  %v3476_v19 = vpop.f32.mrf.mxu0  ;;  %v3106_v18 = vld [vmem:[%s4791_s6 + $0x58] sm:$0xff] }
 0x73b   :  { %v3103_v19 = vld [vmem:[%s4791_s6 + $0x40] sm:$0xff] }
 0x7c3   :  { %v731_v20 = vpop.xlane.xlu0 %730 }
 0x7c4   :  { %v733_v21 = vmul.f32 0.03125, %v731_v20  ;;  %v886_v20 = vpack.c.bf16 %v3106_v18, %v3105_v17  ;;  %v3129_v18 = vld [vmem:[%s4791_s6 + $0x68] sm:$0xff] }
 0x7c6   :  { %v734_v22 = vsub.f32 %v726_v16, %v733_v21  ;;  %v1054_v16 = vpack.c.bf16 %v3115_v11, %v3114_v10  ;;  %v3104_v21 = vld [vmem:[%s4791_s6 + $0x48] sm:$0xff] }
 0x7c8   :  { %v735_v23 = vmul.f32 %v734_v22, %v734_v22 }
 0x7ca   :  { %v736_v24 = vsel %vm90_vm1, %v735_v23, 0.0  ;;  %v4219_v23 = vpack.c.bf16 %v4132_v34, %v4130_v33 }
 0x7cb   :  { %737 = vadd.xlane.f32.xlu1 %v736_v24 }
 0x854   :  { %v738_v46 = vpop.xlane.xlu1 %737 }
 0x855   :  { %v739_v47 = vmul.f32 0.03125, %v738_v46 }
 0x857   :  { %v740_v48 = vadd.f32 1e-05, %v739_v47 }
 0x859   :  { %3765 = vrsqrt.f32 %v740_v48 }
 0x866   :  { %v3766_v49 = vpop.eup %3765 }
 0x867   :  { %v742_v51 = vmul.f32 %v3766_v49, %v734_v22  ;;  %v885_v22 = vpack.c.bf16 %v3104_v21, %v3103_v19 }
 0x869   :  { %v749_v53 = vmul.f32 %v3087_v50, %v742_v51  ;;  %v3123_v50 = vld [vmem:[%s4814_s20 + $0x70] sm:$0xff]  ;;  %v3124_v51 = vld [vmem:[%s4814_s20 + $0x78] sm:$0xff] }
 0x86b   :  { %v4169_v54 = vadd.f32 %v3088_v52, %v749_v53 }
 0x86d   :  { %v757_v55 = vadd.f32 %v4169_v54, %v3947_v12  ;;  %v3094_v12 = vld [vmem:[%s4790_s7 + $0x2] ss:$0 sm:$0xff] }
 0x86f   :  { %v765_v56 = vpack.c.bf16 %v757_v55, %v757_v55  ;;  %v1110_v55 = vpack.c.bf16 %v3124_v51, %v3123_v50 }
 0x871   :  { %3488 = vmatmul.mubr.msk.bf16.vlgmr.msra.gmra.mxu0 %vm90_vm1, %v765_v56 }
 0x872   :  { %3503 = vmatprep.mubr.msk.bf16.mxu0 %vm3813_vm0, %v3812_v0  ;;  %3500 = vmatpush3.bf16.msra.mxu0 %v886_v20 }
 0x873   :  { %3501 = vmatprep.subr.bf16.mxu0 %v3812_v0 }
 0x876   :  { %3502 = vmatpush3.bf16.msra.mxu0 %v885_v22 }
 0x877   :  { %3513 = vmatprep.subr.bf16.mxu0 %v3812_v0 }
 0x879   :  { %3504 = vmatmul.mubr.msk.bf16.vlgmr.msra.gmra.mxu0 %vm90_vm1, %v4219_v23 }
 0x87a   :  { %3515 = vmatprep.mubr.msk.bf16.mxu0 %vm3813_vm0, %v3812_v0 }
 0x931   :  { %v813_v5 = vpop.f32.mrf.mxu0 }
 0x932   :  { %v814_v6 = vadd.f32 %v3094_v12, %v813_v5 }
 0x933   :  { %v3489_v7 = vpop.f32.mrf.mxu0 }
 0x934   :  { %v939_v9 = vpack.c.bf16 %v814_v6, %v814_v6 }
 0x935   :  { %v816_v13 = vpop.f32.mrf.mxu0 }
 0x936   :  { %3510 = vmatmul.mubr.msk.bf16.vlgmr.msra.gmra.mxu1 %vm242_vm2, %v939_v9  ;;  %v3130_v13 = vld [vmem:[%s4791_s6 + $0x70] sm:$0xff] }
 0x937   :  { %v3490_v15 = vpop.f32.mrf.mxu0  ;;  %3520 = vmatpush3.bf16.msra.mxu1 %v1055_v8  ;;  %3523 = vmatprep.mubr.msk.bf16.mxu1 %vm3813_vm0, %v3812_v0  ;;  %v3119_v8 = vld [vmem:[%s4790_s7 + $0x3] ss:$0 sm:$0xff] }
 0x938   :  { %3521 = vmatprep.subr.bf16.mxu1 %v3812_v0  ;;  %v3131_v15 = vld [vmem:[%s4791_s6 + $0x78] sm:$0xff] }
 0x939   :  { %v932_v36 = vpop.f32.mrf.mxu0  ;;  %v1166_v17 = vpack.c.bf16 %v3131_v15, %v3130_v13  ;;  %v1455_v13 = vld [vmem:[%s4800_s14 + $0x10] sm:$0xff]  ;;  %v1456_v15 = vld [vmem:[%s4800_s14 + $0x18] sm:$0xff] }
 0x93a   :  { %v933_v45 = vadd.f32 %v3108_v44, %v932_v36 }
 0x93b   :  { %3522 = vmatpush3.bf16.msra.mxu1 %v1054_v16  ;;  %v3505_v37 = vpop.f32.mrf.mxu0  ;;  %v3128_v16 = vld [vmem:[%s4791_s6 + $0x60] sm:$0xff] }
 0x93c   :  { %3535 = vmatprep.subr.bf16.mxu1 %v3812_v0  ;;  %v1165_v19 = vpack.c.bf16 %v3129_v18, %v3128_v16  ;;  %v1453_v16 = vld [vmem:[%s4800_s14] sm:$0xff] }
 0x93d   :  { %v935_v14 = vpop.f32.mrf.mxu0 }
 0x93e   :  { %3524 = vmatmul.mubr.msk.bf16.vlgmr.msra.gmra.mxu1 %vm90_vm1, %v765_v56  ;;  %v936_v46 = vadd.f32 %v3108_v44, %v935_v14  ;;  %v3112_v14 = vld [vmem:[%s4793_s10 + $0x20] sm:$0xff] }
 0x93f   :  { %3539 = vmatprep.mubr.msk.bf16.mxu1 %vm3813_vm0, %v3812_v0  ;;  %v3506_v47 = vpop.f32.mrf.mxu0  ;;  %3536 = vmatpush3.bf16.msra.mxu1 %v1166_v17  ;;  %v1454_v17 = vld [vmem:[%s4800_s14 + $0x8] sm:$0xff] }
 0x940   :  { %v1000_v48 = vpack.c.bf16 %v936_v46, %v933_v45  ;;  %3537 = vmatprep.subr.bf16.mxu1 %v3812_v0  ;;  %v3113_v46 = vld [vmem:[%s4793_s10 + $0x28] sm:$0xff]  ;;  %v1458_v18 = vpack.c.bf16 %v1454_v17, %v1453_v16  ;;  %v3162_v16 = vld [vmem:[%s4814_s20 + $0x80] sm:$0xff] }
 0x942   :  { %3514 = vmatpush3.bf16.msra.mxu0 %v1000_v48 }
 0x943   :  { %3527 = vmatprep.subr.bf16.mxu0 %v3812_v0  ;;  %3538 = vmatpush3.bf16.msra.mxu1 %v1165_v19  ;;  %v1517_v19 = vld [vmem:[%s4801_s16 + $0x30] sm:$0xff] }
 0x944   :  { %3549 = vmatprep.subr.bf16.mxu1 %v3812_v0 }
 0x946   :  { %3540 = vmatmul.mubr.msk.bf16.vlgmr.msra.gmra.mxu1 %vm90_vm1, %v4219_v23 }
 0x947   :  { %3551 = vmatprep.mubr.msk.bf16.mxu1 %vm3813_vm0, %v3812_v0 }
 0x9f6   :  { %v981_v24 = vpop.f32.mrf.mxu1 }
 0x9f7   :  { %v987_v25 = vmul.f32 0.25, %v981_v24 }
 0x9f8   :  { %v3511_v26 = vpop.f32.mrf.mxu1 }
 0x9f9   :  { %v988_v27 = vsel %vm242_vm2, %v987_v25, -inf }
 0x9fa   :  { %989 = vmax.xlane.f32.xlu0 %v988_v27  ;;  %v984_v28 = vpop.f32.mrf.mxu1 }
 0x9fc   :  { %v3512_v29 = vpop.f32.mrf.mxu1 }
 0x9fe   :  { %v1098_v30 = vpop.f32.mrf.mxu1 }
 0x9ff   :  { %v1099_v10 = vadd.f32 %v3119_v8, %v1098_v30 }
 0xa00   :  { %v3525_v31 = vpop.f32.mrf.mxu1 }
 0xa01   :  { %v1216_v11 = vpack.c.bf16 %v1099_v10, %v1099_v10 }
 0xa02   :  { %v1101_v32 = vpop.f32.mrf.mxu1 }
 0xa04   :  { %v3526_v35 = vpop.f32.mrf.mxu1 }
 0xa05   :  { %v3133_v35 = vld [vmem:[%s4792_s9 + $0x3] ss:$0 sm:$0xff] }
 0xa06   :  { %v1209_v27 = vpop.f32.mrf.mxu1 }
 0xa07   :  { %v1210_v36 = vadd.f32 %v3133_v35, %v1209_v27 }
 0xa08   :  { %v3541_v28 = vpop.f32.mrf.mxu1 }
 0xa0a   :  { %v1212_v37 = vpop.f32.mrf.mxu1 }
 0xa83   :  { %v990_v38 = vpop.xlane.xlu0 %989 }
 0xa84   :  { %v991_v39 = vsub.f32 %v987_v25, %v990_v38  ;;  %v1213_v38 = vadd.f32 %v3133_v35, %v1212_v37  ;;  %v1513_v37 = vld [vmem:[%s4801_s16 + $0x10] sm:$0xff] }
 0xa86   :  { %v992_v41 = vmul.f32 1.442695, %v991_v39  ;;  %v3542_v39 = vpop.f32.mrf.mxu1 }
 0xa88   :  { %3767 = vpow2.f32 %v992_v41  ;;  %v1277_v41 = vpack.c.bf16 %v1213_v38, %v1210_v36  ;;  %v1514_v38 = vld [vmem:[%s4801_s16 + $0x18] sm:$0xff] }
 0xa89   :  { %v1521_v39 = vpack.c.bf16 %v1514_v38, %v1513_v37 }
 0xa8a   :  { %3550 = vmatpush3.bf16.msra.mxu1 %v1277_v41  ;;  %v1511_v41 = vld [vmem:[%s4801_s16] sm:$0xff] }
 0xa8b   :  { %3561 = vmatprep.subr.bf16.mxu1 %v3812_v0 }
 0xa95   :  { %v3768_v42 = vpop.eup %3767 }
 0xa96   :  { %v994_v43 = vsel %vm242_vm2, %v3768_v42, 0.0 }
 0xa97   :  { %995 = vadd.xlane.f32.xlu1 %v994_v43  ;;  %v3138_v43 = vld [vmem:[%s4793_s10 + $0x38] sm:$0xff] }
 0xb20   :  { %v996_v49 = vpop.xlane.xlu1 %995 }
 0xb21   :  { %3769 = vrcp.f32 %v996_v49  ;;  %v1048_v49 = vpack.c.bf16 %v3113_v46, %v3112_v14 }
 0xb2e   :  { %v3770_v52 = vpop.eup %3769 }
 0xb2f   :  { %v998_v53 = vmul.f32 %v3770_v52, %v3768_v42  ;;  %v3137_v42 = vld [vmem:[%s4793_s10 + $0x30] sm:$0xff] }
 0xb30   :  { %v1325_v44 = vpack.c.bf16 %v3138_v43, %v3137_v42  ;;  %v1512_v42 = vld [vmem:[%s4801_s16 + $0x8] sm:$0xff] }
 0xb31   :  { %v999_v56 = vpack.c.bf16 %v998_v53, %v998_v53  ;;  %v1520_v43 = vpack.c.bf16 %v1512_v42, %v1511_v41 }
 0xb33   :  { %3516 = vmatmul.mubr.msk.bf16.vlgmr.msra.gmra.mxu0 %vm242_vm2, %v999_v56 }
 0xb34   :  { %3528 = vmatpush3.bf16.msra.mxu0 %v1110_v55  ;;  %3531 = vmatprep.mubr.msk.bf16.mxu0 %vm3813_vm0, %v3812_v0 }
 0xb35   :  { %3529 = vmatprep.subr.bf16.mxu0 %v3812_v0 }
 0xb38   :  { %3530 = vmatpush3.bf16.msra.mxu0 %v1109_v59 }
 0xb39   :  { %3543 = vmatprep.subr.bf16.mxu0 %v3812_v0 }
 0xb3b   :  { %3532 = vmatmul.mubr.msk.bf16.vlgmr.msra.gmra.mxu0 %vm90_vm1, %v4142_v40 }
 0xb3c   :  { %3545 = vmatprep.mubr.msk.bf16.mxu0 %vm3813_vm0, %v3812_v0 }
 0xbf3   :  { %v4253_v60 = vpop.f32.mrf.mxu0 }
 0xbf4   :  { %v1047_v51 = vpack.c.bf16 %v4253_v60, %v4253_v60 }
 0xbf5   :  { %v3517_v61 = vpop.f32.mrf.mxu0 }
 0xbf7   :  { %v1041_v62 = vpop.f32.mrf.mxu0 }
 0xbf9   :  { %v3518_v63 = vpop.f32.mrf.mxu0 }
 0xbfa   :  { %v3142_v63 = vld [vmem:[%s4794_s11 + $0x1] ss:$0 sm:$0xff] }
 0xbfb   :  { %v1153_v1 = vpop.f32.mrf.mxu0 }
 0xbfc   :  { %v1154_v4 = vadd.f32 %v3126_v2, %v1153_v1 }
 0xbfd   :  { %v3533_v12 = vpop.f32.mrf.mxu0 }
 0xbff   :  { %v1156_v3 = vpop.f32.mrf.mxu0 }
 0xc00   :  { %v1157_v5 = vadd.f32 %v3126_v2, %v1156_v3 }
 0xc01   :  { %v3534_v6 = vpop.f32.mrf.mxu0 }
 0xc02   :  { %v1217_v7 = vpack.c.bf16 %v1157_v5, %v1154_v4 }
 0xc04   :  { %v1222_v9 = vsel %vm242_vm2, %v1217_v7, 0 }
 0xc05   :  { %3544 = vmatpush3.bf16.xpose.msra.mxu0 %v1222_v9 }
 0xc06   :  { %3555 = vmatprep.subr.bf16.mxu0 %v3812_v0 }
 0xc0c   :  { %3546 = vmatmul.mubr.msk.bf16.vlgmr.msra.gmra.mxu0 %vm242_vm2, %v1216_v11 }
 0xc0d   :  { %3557 = vmatprep.mubr.msk.bf16.mxu0 %vm3813_vm0, %v3812_v0  ;;  %3556 = vmatpush3.bf16.msra.mxu0 %v1325_v44  ;;  %v3147_v44 = vld [vmem:[%s4802_s15] ss:$0 sm:$0xff] }
 0xc0e   :  { %3567 = vmatprep.subr.bf16.mxu0 %v3812_v0 }
 0xccc   :  { %v1258_v20 = vpop.f32.mrf.mxu0 }
 0xccd   :  { %v1264_v21 = vmul.f32 0.25, %v1258_v20  ;;  %v1518_v20 = vld [vmem:[%s4801_s16 + $0x38] sm:$0xff] }
 0xcce   :  { %v3547_v22 = vpop.f32.mrf.mxu0 }
 0xccf   :  { %v1265_v24 = vsel %vm242_vm2, %v1264_v21, -inf  ;;  %v1523_v22 = vpack.c.bf16 %v1518_v20, %v1517_v19 }
 0xcd0   :  { %1266 = vmax.xlane.f32.xlu0 %v1265_v24  ;;  %v1261_v25 = vpop.f32.mrf.mxu0  ;;  %v1516_v24 = vld [vmem:[%s4801_s16 + $0x28] sm:$0xff] }
 0xcd2   :  { %v3548_v26 = vpop.f32.mrf.mxu0 }
 0xd59   :  { %v1267_v29 = vpop.xlane.xlu0 %1266 }
 0xd5a   :  { %v1268_v30 = vsub.f32 %v1264_v21, %v1267_v29  ;;  %v1515_v21 = vld [vmem:[%s4801_s16 + $0x20] sm:$0xff] }
 0xd5b   :  { %v1522_v25 = vpack.c.bf16 %v1516_v24, %v1515_v21 }
 0xd5c   :  { %v1269_v31 = vmul.f32 1.442695, %v1268_v30  ;;  %v3145_v30 = vld [vmem:[%s4798_s12 + $0x1] ss:$0 sm:$0xff] }
 0xd5e   :  { %3771 = vpow2.f32 %v1269_v31 }
 0xd6b   :  { %v3772_v32 = vpop.eup %3771 }
 0xd6c   :  { %v1271_v23 = vsel %vm242_vm2, %v3772_v32, 0.0 }
 0xd6d   :  { %1272 = vadd.xlane.f32.xlu1 %v1271_v23 }
 0xdf6   :  { %v1273_v45 = vpop.xlane.xlu1 %1272 }
 0xdf7   :  { %3773 = vrcp.f32 %v1273_v45 }
 0xe04   :  { %v3774_v47 = vpop.eup %3773 }
 0xe05   :  { %v1275_v48 = vmul.f32 %v3774_v47, %v3772_v32  ;;  %v3146_v32 = vld [vmem:[%s4799_s13 + $0x1] ss:$0 sm:$0xff] }
 0xe07   :  { %v1276_v50 = vpack.c.bf16 %v1275_v48, %v1275_v48 }
 0xe09   :  { %3552 = vmatmul.mubr.msk.bf16.vlgmr.msra.gmra.mxu1 %vm242_vm2, %v1276_v50 }
 0xe0a   :  { %3562 = vmatpush3.bf16.msra.mxu1 %v1048_v49  ;;  %3563 = vmatprep.mubr.msk.bf16.mxu1 %vm3813_vm0, %v3812_v0 }
 0xe0b   :  { %3575 = vmatprep.subr.bf16.mxu1 %v3812_v0 }
 0xe11   :  { %3564 = vmatmul.mubr.msk.bf16.vlgmr.msra.gmra.mxu1 %vm242_vm2, %v1047_v51  ;;  %v3149_v51 = vld [vmem:[%s4803_s17] ss:$0 sm:$0xff] }
 0xe12   :  { %3583 = vmatprep.mubr.msk.bf16.mxu1 %vm3813_vm0, %v3812_v0  ;;  %3576 = vmatpush3.bf16.msra.mxu1 %v1523_v22 }
 0xe13   :  { %3577 = vmatprep.subr.bf16.mxu1 %v3812_v0 }
 0xe16   :  { %3578 = vmatpush3.bf16.msra.mxu1 %v1522_v25  ;;  %v3153_v25 = vld [vmem:[%s4798_s12 + $0x2] ss:$0 sm:$0xff] }
 0xe17   :  { %3579 = vmatprep.subr.bf16.mxu1 %v3812_v0 }
 0xe1a   :  { %3580 = vmatpush3.bf16.msra.mxu1 %v1521_v39 }
 0xe1b   :  { %3581 = vmatprep.subr.bf16.mxu1 %v3812_v0 }
 0xe1e   :  { %3582 = vmatpush3.bf16.msra.mxu1 %v1520_v43 }
 0xe1f   :  { %3603 = vmatprep.subr.bf16.mxu1 %v3812_v0 }
 0xec9   :  { %v1315_v52 = vpop.f32.mrf.mxu1 }
 0xeca   :  { %v1324_v53 = vpack.c.bf16 %v1315_v52, %v1315_v52 }
 0xecb   :  { %v3553_v55 = vpop.f32.mrf.mxu1 }
 0xecc   :  { %3558 = vmatmul.mubr.msk.bf16.vlgmr.msra.gmra.mxu0 %vm242_vm2, %v1324_v53 }
 0xecd   :  { %v1318_v56 = vpop.f32.mrf.mxu1  ;;  %3571 = vmatprep.mubr.msk.bf16.mxu0 %vm3813_vm0, %v3812_v0 }
 0xecf   :  { %v3554_v57 = vpop.f32.mrf.mxu1 }
 0xed1   :  { %v1406_v58 = vpop.f32.mrf.mxu1 }
 0xed3   :  { %v3565_v59 = vpop.f32.mrf.mxu1 }
 0xed5   :  { %v1409_v61 = vpop.f32.mrf.mxu1 }
 0xed7   :  { %v3566_v62 = vpop.f32.mrf.mxu1 }
 0xf8c   :  { %v1363_v60 = vpop.f32.mrf.mxu0 }
 0xf8d   :  { %v1407_v1 = vadd.f32 %v1406_v58, %v1363_v60 }
 0xf8e   :  { %v3559_v2 = vpop.f32.mrf.mxu0 }
 0xf8f   :  { %v1420_v12 = vadd.f32 %v3142_v63, %v1407_v1  ;;  %v3157_v2 = vld [vmem:[%s4815_s23 + $0x90] sm:$0xff] }
 0xf90   :  { %v1366_v3 = vpop.f32.mrf.mxu0 }
 0xf91   :  { %v1421_v4 = vadd.f32 %v1420_v12, %v4169_v54  ;;  %v1459_v54 = vpack.c.bf16 %v1456_v15, %v1455_v13  ;;  %v3158_v12 = vld [vmem:[%s4815_s23 + $0x98] sm:$0xff]  ;;  %v3169_v15 = vld [vmem:[%s4791_s6 + $0x80] sm:$0xff] }
 0xf92   :  { %v3560_v5 = vpop.f32.mrf.mxu0  ;;  %v1614_v3 = vpack.c.bf16 %v3158_v12, %v3157_v2  ;;  %v3196_v12 = vld [vmem:[%s4791_s6 + $0xb0] sm:$0xff] }
 0xf93   :  { %v1426_v6 = vsel %vm90_vm1, %v1421_v4, 0.0  ;;  %3568 = vmatpush3.bf16.msra.mxu0 %v1459_v54  ;;  %v3156_v5 = vld [vmem:[%s4815_s23 + $0x88] sm:$0xff] }
 0xf94   :  { %1427 = vadd.xlane.f32.xlu0 %v1426_v6  ;;  %3569 = vmatprep.subr.bf16.mxu0 %v3812_v0  ;;  %v3170_v54 = vld [vmem:[%s4791_s6 + $0x88] sm:$0xff] }
 0xf95   :  { %v1729_v17 = vpack.c.bf16 %v3170_v54, %v3169_v15 }
 0xf97   :  { %3570 = vmatpush3.bf16.msra.mxu0 %v1458_v18  ;;  %v3163_v18 = vld [vmem:[%s4814_s20 + $0x88] sm:$0xff] }
 0xf98   :  { %3587 = vmatprep.subr.bf16.mxu0 %v3812_v0  ;;  %v1670_v19 = vpack.c.bf16 %v3163_v18, %v3162_v16  ;;  %v3185_v16 = vld [vmem:[%s4790_s7 + $0x5] ss:$0 sm:$0xff] }
0x101d   :  { %v1428_v7 = vpop.xlane.xlu0 %1427 }
0x101e   :  { %v1429_v8 = vmul.f32 0.03125, %v1428_v7  ;;  %v3171_v7 = vld [vmem:[%s4791_s6 + $0x90] sm:$0xff] }
0x1020   :  { %v1430_v9 = vsub.f32 %v1421_v4, %v1429_v8  ;;  %v3155_v4 = vld [vmem:[%s4815_s23 + $0x80] sm:$0xff]  ;;  %v3172_v8 = vld [vmem:[%s4791_s6 + $0x98] sm:$0xff] }
0x1021   :  { %v1613_v6 = vpack.c.bf16 %v3156_v5, %v3155_v4  ;;  %v3194_v5 = vld [vmem:[%s4791_s6 + $0xa0] sm:$0xff] }
0x1022   :  { %v1431_v10 = vmul.f32 %v1430_v9, %v1430_v9 }
0x1024   :  { %v1432_v11 = vsel %vm90_vm1, %v1431_v10, 0.0  ;;  %v3164_v10 = vld [vmem:[%s4814_s20 + $0x90] sm:$0xff] }
0x1025   :  { %1433 = vadd.xlane.f32.xlu1 %v1432_v11  ;;  %v3165_v11 = vld [vmem:[%s4814_s20 + $0x98] sm:$0xff] }
0x1026   :  { %v1671_v13 = vpack.c.bf16 %v3165_v11, %v3164_v10 }
0x10ae   :  { %v1434_v26 = vpop.xlane.xlu1 %1433 }
0x10af   :  { %v1435_v27 = vmul.f32 0.03125, %v1434_v26 }
0x10b1   :  { %v1436_v28 = vadd.f32 1e-05, %v1435_v27  ;;  %v3154_v27 = vld [vmem:[%s4799_s13 + $0x2] ss:$0 sm:$0xff] }
0x10b3   :  { %3775 = vrsqrt.f32 %v1436_v28 }
0x10c0   :  { %v3776_v29 = vpop.eup %3775 }
0x10c1   :  { %v1438_v31 = vmul.f32 %v3776_v29, %v1430_v9  ;;  %v1730_v9 = vpack.c.bf16 %v3172_v8, %v3171_v7 }
0x10c3   :  { %v1445_v23 = vmul.f32 %v3145_v30, %v1438_v31  ;;  %v3809_v31 = vld [vmem:[%s4816_s0] sm:$0xff] }
0x10c5   :  { %v1452_v35 = vadd.f32 %v3146_v32, %v1445_v23 }
0x10c7   :  { %v1457_v36 = vpack.c.bf16 %v1452_v35, %v1452_v35 }
0x10c9   :  { %3572 = vmatmul.mubr.msk.bf16.vlgmr.msra.gmra.mxu0 %vm90_vm1, %v1457_v36 }
0x10ca   :  { %3591 = vmatprep.mubr.msk.bf16.mxu0 %vm3813_vm0, %v3812_v0  ;;  %3588 = vmatpush3.bf16.msra.mxu0 %v1614_v3  ;;  %v3197_v3 = vld [vmem:[%s4791_s6 + $0xb8] sm:$0xff] }
0x10cb   :  { %3589 = vmatprep.subr.bf16.mxu0 %v3812_v0  ;;  %v2026_v4 = vpack.c.bf16 %v3197_v3, %v3196_v12 }
0x10ce   :  { %3590 = vmatpush3.bf16.msra.mxu0 %v1613_v6  ;;  %v3195_v6 = vld [vmem:[%s4791_s6 + $0xa8] sm:$0xff] }
0x10cf   :  { %3595 = vmatprep.subr.bf16.mxu0 %v3812_v0  ;;  %v2025_v7 = vpack.c.bf16 %v3195_v6, %v3194_v5 }
0x10d1   :  { %3592 = vmatmul.mubr.msk.bf16.vlgmr.msra.gmra.mxu0 %vm90_vm1, %v4142_v40 }
0x10d2   :  { %3599 = vmatprep.mubr.msk.bf16.mxu0 %vm3813_vm0, %v3812_v0  ;;  %3596 = vmatpush3.bf16.msra.mxu0 %v1671_v13 }
0x10d3   :  { %3597 = vmatprep.subr.bf16.mxu0 %v3812_v0 }
0x10d6   :  { %3598 = vmatpush3.bf16.msra.mxu0 %v1670_v19 }
0x10d7   :  { %3611 = vmatprep.subr.bf16.mxu0 %v3812_v0 }
0x1189   :  { %v1504_v45 = vpop.f32.mrf.mxu0 }
0x118a   :  { %v1505_v14 = vadd.f32 %v3147_v44, %v1504_v45  ;;  %v3174_v44 = vld [vmem:[%s4792_s9 + $0x4] ss:$0 sm:$0xff] }
0x118b   :  { %v3573_v46 = vpop.f32.mrf.mxu0 }
0x118c   :  { %v1510_v47 = vmax.f32 %v1505_v14, 0.0  ;;  %v3167_v14 = vld [vmem:[%s4817_s8 + $0x4] ss:$0 sm:$0xff] }
0x118d   :  { %v1507_v48 = vpop.f32.mrf.mxu0 }
0x118e   :  { %v1519_v49 = vpack.c.bf16 %v1510_v47, %v1510_v47 }
0x118f   :  { %v3574_v50 = vpop.f32.mrf.mxu0 }
0x1190   :  { %3584 = vmatmul.mubr.msk.bf16.vlgmr.msra.gmra.mxu1 %vm1531_vm5, %v1519_v49 }
0x1191   :  { %3607 = vmatprep.mubr.msk.bf16.mxu1 %vm3813_vm0, %v3812_v0  ;;  %3604 = vmatpush3.bf16.msra.mxu1 %v1730_v9  ;;  %v1657_v36 = vpop.f32.mrf.mxu0 }
0x1192   :  { %3605 = vmatprep.subr.bf16.mxu1 %v3812_v0 }
0x1193   :  { %v3593_v37 = vpop.f32.mrf.mxu0 }
0x1195   :  { %3606 = vmatpush3.bf16.msra.mxu1 %v1729_v17  ;;  %v1660_v39 = vpop.f32.mrf.mxu0 }
0x1196   :  { %3617 = vmatprep.subr.bf16.mxu1 %v3812_v0 }
0x1197   :  { %v3594_v42 = vpop.f32.mrf.mxu0 }
0x1250   :  { %v1569_v52 = vpop.f32.mrf.mxu1 }
0x1251   :  { %v1570_v53 = vadd.f32 %v3149_v51, %v1569_v52 }
0x1252   :  { %v3585_v55 = vpop.f32.mrf.mxu1 }
0x1253   :  { %v1575_v56 = vadd.f32 %v1570_v53, %v1452_v35  ;;  %v3160_v35 = vld [vmem:[%s4790_s7 + $0x4] ss:$0 sm:$0xff] }
0x1254   :  { %v1572_v57 = vpop.f32.mrf.mxu1  ;;  %v1658_v38 = vadd.f32 %v3160_v35, %v1657_v36  ;;  %v1661_v41 = vadd.f32 %v3160_v35, %v1660_v39 }
0x1255   :  { %v1580_v58 = vsel %vm90_vm1, %v1575_v56, 0.0 }
0x1256   :  { %1581 = vadd.xlane.f32.xlu0 %v1580_v58  ;;  %v3586_v59 = vpop.f32.mrf.mxu1  ;;  %v1782_v43 = vpack.c.bf16 %v1661_v41, %v1658_v38 }
0x12df   :  { %v1582_v61 = vpop.xlane.xlu0 %1581 }
0x12e0   :  { %v1583_v62 = vmul.f32 0.03125, %v1582_v61  ;;  %v3182_v61 = vld [vmem:[%s4815_s23 + $0xb0] sm:$0xff] }
0x12e2   :  { %v1584_v60 = vsub.f32 %v1575_v56, %v1583_v62  ;;  %v3183_v62 = vld [vmem:[%s4815_s23 + $0xb8] sm:$0xff] }
0x12e4   :  { %v1585_v63 = vmul.f32 %v1584_v60, %v1584_v60 }
0x12e6   :  { %v1586_v1 = vsel %vm90_vm1, %v1585_v63, 0.0  ;;  %v3180_v63 = vld [vmem:[%s4815_s23 + $0xa0] sm:$0xff] }
0x12e7   :  { %1587 = vadd.xlane.f32.xlu1 %v1586_v1  ;;  %v3181_v1 = vld [vmem:[%s4815_s23 + $0xa8] sm:$0xff] }
0x12e8   :  { %v1914_v2 = vpack.c.bf16 %v3181_v1, %v3180_v63 }
0x1370   :  { %v1588_v20 = vpop.xlane.xlu1 %1587 }
0x1371   :  { %v1589_v21 = vmul.f32 0.03125, %v1588_v20 }
0x1373   :  { %v1590_v22 = vadd.f32 1e-05, %v1589_v21 }
0x1375   :  { %3777 = vrsqrt.f32 %v1590_v22 }
0x1382   :  { %v3778_v24 = vpop.eup %3777 }
0x1383   :  { %v1592_v26 = vmul.f32 %v3778_v24, %v1584_v60  ;;  %v1915_v60 = vpack.c.bf16 %v3183_v62, %v3182_v61  ;;  %v3199_v24 = vld [vmem:[%s4792_s9 + $0x5] ss:$0 sm:$0xff] }
0x1385   :  { %v1599_v28 = vmul.f32 %v3153_v25, %v1592_v26 }
0x1387   :  { %v4434_v29 = vadd.f32 %v3154_v27, %v1599_v28 }
0x1389   :  { %v1728_v30 = vpack.c.bf16 %v4434_v29, %v4434_v29  ;;  %v1607_v32 = vadd.f32 %v3809_v31, %v4434_v29 }
0x138b   :  { %3608 = vmatmul.mubr.msk.bf16.vlgmr.msra.gmra.mxu1 %vm90_vm1, %v1728_v30  ;;  %v4443_v23 = vpack.c.bf16 %v1607_v32, %v1607_v32 }
0x138c   :  { %3619 = vmatprep.mubr.msk.bf16.mxu1 %vm3813_vm0, %v3812_v0 }
0x138d   :  { %3600 = vmatmul.mubr.msk.bf16.vlgmr.msra.gmra.mxu0 %vm90_vm1, %v4443_v23 }
0x138e   :  { %3613 = vmatprep.mubr.msk.bf16.mxu0 %vm3813_vm0, %v3812_v0 }
0x144b   :  { %v1776_v45 = vpop.f32.mrf.mxu1 }
0x144c   :  { %v1777_v46 = vadd.f32 %v3174_v44, %v1776_v45 }
0x144d   :  { %v1717_v47 = vpop.f32.mrf.mxu0  ;;  %v3609_v48 = vpop.f32.mrf.mxu1 }
0x144e   :  { %v1856_v49 = vpack.c.bf16 %v1777_v46, %v1777_v46  ;;  %v1718_v50 = vadd.f32 %v3167_v14, %v1717_v47 }
0x144f   :  { %v3601_v51 = vpop.f32.mrf.mxu0  ;;  %v1779_v52 = vpop.f32.mrf.mxu1 }
0x1450   :  { %v1861_v53 = vsel %vm307_vm4, %v1856_v49, 0  ;;  %v1783_v55 = vpack.c.bf16 %v1718_v50, %v1718_v50  ;;  %v3189_v49 = vld [vmem:[%s4814_s20 + $0xb0] sm:$0xff]  ;;  %v3190_v50 = vld [vmem:[%s4814_s20 + $0xb8] sm:$0xff] }
0x1451   :  { %v1720_v56 = vpop.f32.mrf.mxu0  ;;  %v3610_v57 = vpop.f32.mrf.mxu1  ;;  %3618 = vmatpush3.bf16.msra.mxu1 %v1861_v53 }
0x1452   :  { %v1788_v58 = vsel %vm242_vm2, %v1783_v55, 0  ;;  %3631 = vmatprep.subr.bf16.mxu1 %v3812_v0  ;;  %v1971_v55 = vpack.c.bf16 %v3190_v50, %v3189_v49  ;;  %v3187_v57 = vld [vmem:[%s4814_s20 + $0xa0] sm:$0xff] }
0x1453   :  { %v3602_v59 = vpop.f32.mrf.mxu0  ;;  %3612 = vmatpush3.bf16.xpose.msra.mxu0 %v1788_v58  ;;  %v3188_v58 = vld [vmem:[%s4814_s20 + $0xa8] sm:$0xff] }
0x1454   :  { %3623 = vmatprep.subr.bf16.mxu0 %v3812_v0  ;;  %v1970_v59 = vpack.c.bf16 %v3188_v58, %v3187_v57 }
0x145a   :  { %3614 = vmatmul.mubr.msk.bf16.vlgmr.msra.gmra.mxu0 %vm242_vm2, %v1782_v43 }
0x145b   :  { %3624 = vmatpush3.bf16.msra.mxu0 %v1915_v60  ;;  %3627 = vmatprep.mubr.msk.bf16.mxu0 %vm3813_vm0, %v3812_v0 }
0x145c   :  { %3625 = vmatprep.subr.bf16.mxu0 %v3812_v0 }
0x145f   :  { %3626 = vmatpush3.bf16.msra.mxu0 %v1914_v2  ;;  %v3192_v2 = vld [vmem:[%s4817_s8 + $0x5] ss:$0 sm:$0xff] }
0x1460   :  { %3639 = vmatprep.subr.bf16.mxu0 %v3812_v0 }
0x1462   :  { %3628 = vmatmul.mubr.msk.bf16.vlgmr.msra.gmra.mxu0 %vm90_vm1, %v4142_v40 }
0x1463   :  { %3640 = vmatpush3.bf16.msra.mxu0 %v2026_v4  ;;  %3643 = vmatprep.mubr.msk.bf16.mxu0 %vm3813_vm0, %v3812_v0 }
0x1464   :  { %3641 = vmatprep.subr.bf16.mxu0 %v3812_v0 }
0x1467   :  { %3642 = vmatpush3.bf16.msra.mxu0 %v2025_v7 }
0x1468   :  { %3653 = vmatprep.subr.bf16.mxu0 %v3812_v0 }
0x146a   :  { %3644 = vmatmul.mubr.msk.bf16.vlgmr.msra.gmra.mxu0 %vm90_vm1, %v1728_v30 }
0x146b   :  { %3655 = vmatprep.mubr.msk.bf16.mxu0 %vm3813_vm0, %v3812_v0 }
0x151a   :  { %v1824_v8 = vpop.f32.mrf.mxu0 }
0x151b   :  { %v1831_v9 = vmul.f32 0.25, %v1824_v8 }
0x151c   :  { %v3615_v10 = vpop.f32.mrf.mxu0 }
0x151d   :  { %v1833_v40 = vsel %vm290_vm3, %v1831_v9, -inf }
0x151e   :  { %1834 = vmax.xlane.f32.xlu0 %v1833_v40  ;;  %v1827_v11 = vpop.f32.mrf.mxu0 }
0x151f   :  { %v1832_v13 = vmul.f32 0.25, %v1827_v11 }
0x1520   :  { %v3616_v15 = vpop.f32.mrf.mxu0 }
0x1521   :  { %v1836_v54 = vsel %vm290_vm3, %v1832_v13, -inf }
0x1522   :  { %1837 = vmax.xlane.f32.xlu1 %v1836_v54  ;;  %v1958_v17 = vpop.f32.mrf.mxu0 }
0x1523   :  { %v4507_v19 = vadd.f32 %v3185_v16, %v1958_v17 }
0x1524   :  { %v3629_v18 = vpop.f32.mrf.mxu0 }
0x1526   :  { %v1961_v20 = vpop.f32.mrf.mxu0 }
0x1527   :  { %v4509_v21 = vadd.f32 %v3185_v16, %v1961_v20 }
0x1528   :  { %v3630_v22 = vpop.f32.mrf.mxu0 }
0x1529   :  { %v2075_v25 = vpack.c.bf16 %v4509_v21, %v4507_v19 }
0x152a   :  { %v2069_v26 = vpop.f32.mrf.mxu0 }
0x152b   :  { %v2070_v27 = vadd.f32 %v3199_v24, %v2069_v26 }
0x152c   :  { %v3645_v28 = vpop.f32.mrf.mxu0 }
0x152d   :  { %v2149_v30 = vpack.c.bf16 %v2070_v27, %v2070_v27 }
0x152e   :  { %v2072_v31 = vpop.f32.mrf.mxu0 }
0x152f   :  { %v2154_v32 = vsel %vm307_vm4, %v2149_v30, 0 }
0x1530   :  { %v3646_v35 = vpop.f32.mrf.mxu0  ;;  %3654 = vmatpush3.bf16.msra.mxu0 %v2154_v32  ;;  %v3178_v32 = vld [vmem:[%s4793_s10 + $0x40] sm:$0xff] }
0x1531   :  { %3665 = vmatprep.subr.bf16.mxu0 %v3812_v0  ;;  %v3179_v35 = vld [vmem:[%s4793_s10 + $0x48] sm:$0xff] }
0x15a7   :  { %v1835_v36 = vpop.xlane.xlu0 %1834 }
0x15a8   :  { %v1839_v37 = vsub.f32 %v1831_v9, %v1835_v36 }
0x15aa   :  { %v1841_v38 = vmul.f32 1.442695, %v1839_v37 }
0x15ab   :  { %v1838_v39 = vpop.xlane.xlu1 %1837 }
0x15ac   :  { %3779 = vpow2.f32 %v1841_v38  ;;  %v1840_v41 = vsub.f32 %v1832_v13, %v1838_v39  ;;  %v1908_v39 = vpack.c.bf16 %v3179_v35, %v3178_v32  ;;  %v3221_v35 = vld [vmem:[%s4814_s20 + $0xc8] sm:$0xff] }
0x15ae   :  { %v1843_v42 = vmul.f32 1.442695, %v1840_v41 }
0x15b0   :  { %3781 = vpow2.f32 %v1843_v42  ;;  %v3203_v42 = vld [vmem:[%s4793_s10 + $0x50] sm:$0xff] }
0x15b9   :  { %v3780_v43 = vpop.eup %3779 }
0x15ba   :  { %v1845_v44 = vsel %vm290_vm3, %v3780_v43, 0.0 }
0x15bb   :  { %1846 = vadd.xlane.f32.xlu0 %v1845_v44 }
0x15bd   :  { %v3782_v45 = vpop.eup %3781 }
0x15be   :  { %v1848_v14 = vsel %vm290_vm3, %v3782_v45, 0.0 }
0x15bf   :  { %1849 = vadd.xlane.f32.xlu1 %v1848_v14  ;;  %v3215_v14 = vld [vmem:[%s4815_s23 + $0xd0] sm:$0xff] }
0x1644   :  { %v1847_v46 = vpop.xlane.xlu0 %1846 }
0x1645   :  { %3783 = vrcp.f32 %v1847_v46  ;;  %v3216_v46 = vld [vmem:[%s4815_s23 + $0xd8] sm:$0xff] }
0x1646   :  { %v2356_v49 = vpack.c.bf16 %v3216_v46, %v3215_v14  ;;  %v3212_v46 = vld [vmem:[%s4799_s13 + $0x3] ss:$0 sm:$0xff] }
0x1648   :  { %v1850_v47 = vpop.xlane.xlu1 %1849 }
0x1649   :  { %3785 = vrcp.f32 %v1850_v47 }
0x1652   :  { %v3784_v48 = vpop.eup %3783 }
0x1653   :  { %v1853_v52 = vmul.f32 %v3784_v48, %v3780_v43  ;;  %v3204_v43 = vld [vmem:[%s4793_s10 + $0x58] sm:$0xff] }
0x1654   :  { %v2201_v44 = vpack.c.bf16 %v3204_v43, %v3203_v42 }
0x1656   :  { %v3786_v51 = vpop.eup %3785 }
0x1657   :  { %v1854_v53 = vmul.f32 %v3786_v51, %v3782_v45  ;;  %v3213_v51 = vld [vmem:[%s4815_s23 + $0xc0] sm:$0xff] }
0x1659   :  { %v1855_v56 = vpack.c.bf16 %v1854_v53, %v1853_v52  ;;  %v3214_v52 = vld [vmem:[%s4815_s23 + $0xc8] sm:$0xff] }
0x165b   :  { %3620 = vmatmul.mubr.msk.bf16.vlgmr.msra.gmra.mxu1 %vm290_vm3, %v1855_v56  ;;  %v2355_v56 = vpack.c.bf16 %v3214_v52, %v3213_v51 }
0x165c   :  { %3632 = vmatpush3.bf16.msra.mxu1 %v1971_v55  ;;  %3635 = vmatprep.mubr.msk.bf16.mxu1 %vm3813_vm0, %v3812_v0 }
0x165d   :  { %3633 = vmatprep.subr.bf16.mxu1 %v3812_v0 }
0x1660   :  { %3634 = vmatpush3.bf16.msra.mxu1 %v1970_v59 }
0x1661   :  { %3647 = vmatprep.subr.bf16.mxu1 %v3812_v0 }
0x1663   :  { %3636 = vmatmul.mubr.msk.bf16.vlgmr.msra.gmra.mxu1 %vm90_vm1, %v4443_v23 }
0x1664   :  { %3649 = vmatprep.mubr.msk.bf16.mxu1 %vm3813_vm0, %v3812_v0 }
0x171b   :  { %v1897_v61 = vpop.f32.mrf.mxu1 }
0x171d   :  { %v3621_v62 = vpop.f32.mrf.mxu1 }
0x171e   :  { %v3208_v62 = vld [vmem:[%s4794_s11 + $0x2] ss:$0 sm:$0xff] }
0x171f   :  { %v1900_v60 = vpop.f32.mrf.mxu1 }
0x1720   :  { %v1907_v63 = vpack.c.bf16 %v1900_v60, %v1897_v61 }
0x1721   :  { %v3622_v1 = vpop.f32.mrf.mxu1 }
0x1723   :  { %v2014_v12 = vpop.f32.mrf.mxu1 }
0x1724   :  { %v2015_v3 = vadd.f32 %v3192_v2, %v2014_v12 }
0x1725   :  { %v3637_v4 = vpop.f32.mrf.mxu1 }
0x1726   :  { %v2076_v5 = vpack.c.bf16 %v2015_v3, %v2015_v3 }
0x1727   :  { %v2017_v6 = vpop.f32.mrf.mxu1 }
0x1728   :  { %v2081_v7 = vsel %vm242_vm2, %v2076_v5, 0 }
0x1729   :  { %v3638_v8 = vpop.f32.mrf.mxu1  ;;  %3648 = vmatpush3.bf16.xpose.msra.mxu1 %v2081_v7 }
0x172a   :  { %3659 = vmatprep.subr.bf16.mxu1 %v3812_v0 }
0x1730   :  { %3650 = vmatmul.mubr.msk.bf16.vlgmr.msra.gmra.mxu1 %vm242_vm2, %v2075_v25 }
0x1731   :  { %3661 = vmatprep.mubr.msk.bf16.mxu1 %vm3813_vm0, %v3812_v0  ;;  %3660 = vmatpush3.bf16.msra.mxu1 %v2201_v44 }
0x1732   :  { %3671 = vmatprep.subr.bf16.mxu1 %v3812_v0 }
0x17f0   :  { %v2117_v9 = vpop.f32.mrf.mxu1 }
0x17f1   :  { %v2124_v10 = vmul.f32 0.25, %v2117_v9 }
0x17f2   :  { %v3651_v40 = vpop.f32.mrf.mxu1 }
0x17f3   :  { %v2126_v11 = vsel %vm290_vm3, %v2124_v10, -inf }
0x17f4   :  { %2127 = vmax.xlane.f32.xlu0 %v2126_v11  ;;  %v2120_v13 = vpop.f32.mrf.mxu1 }
0x17f5   :  { %v2125_v15 = vmul.f32 0.25, %v2120_v13 }
0x17f6   :  { %v3652_v54 = vpop.f32.mrf.mxu1 }
0x17f7   :  { %v2129_v16 = vsel %vm290_vm3, %v2125_v15, -inf }
0x17f8   :  { %2130 = vmax.xlane.f32.xlu1 %v2129_v16 }
0x187d   :  { %v2128_v17 = vpop.xlane.xlu0 %2127 }
0x187e   :  { %v2132_v18 = vsub.f32 %v2124_v10, %v2128_v17 }
0x1880   :  { %v2134_v19 = vmul.f32 1.442695, %v2132_v18 }
0x1881   :  { %v2131_v20 = vpop.xlane.xlu1 %2130 }
0x1882   :  { %3787 = vpow2.f32 %v2134_v19  ;;  %v2133_v21 = vsub.f32 %v2125_v15, %v2131_v20 }
0x1884   :  { %v2136_v22 = vmul.f32 1.442695, %v2133_v21 }
0x1886   :  { %3789 = vpow2.f32 %v2136_v22  ;;  %v3230_v22 = vld [vmem:[%s4791_s6 + $0xd8] sm:$0xff] }
0x188f   :  { %v3788_v24 = vpop.eup %3787 }
0x1890   :  { %v2138_v25 = vsel %vm290_vm3, %v3788_v24, 0.0 }
0x1891   :  { %2139 = vadd.xlane.f32.xlu0 %v2138_v25  ;;  %v3222_v25 = vld [vmem:[%s4814_s20 + $0xd0] sm:$0xff] }
0x1893   :  { %v3790_v26 = vpop.eup %3789 }
0x1894   :  { %v2141_v27 = vsel %vm290_vm3, %v3790_v26, 0.0 }
0x1895   :  { %2142 = vadd.xlane.f32.xlu1 %v2141_v27 }
0x191a   :  { %v2140_v28 = vpop.xlane.xlu0 %2139 }
0x191b   :  { %3791 = vrcp.f32 %v2140_v28  ;;  %v3227_v28 = vld [vmem:[%s4791_s6 + $0xc0] sm:$0xff] }
0x191e   :  { %v2143_v30 = vpop.xlane.xlu1 %2142 }
0x191f   :  { %3793 = vrcp.f32 %v2143_v30  ;;  %v3228_v30 = vld [vmem:[%s4791_s6 + $0xc8] sm:$0xff] }
0x1920   :  { %v2471_v32 = vpack.c.bf16 %v3228_v30, %v3227_v28 }
0x1928   :  { %v3792_v31 = vpop.eup %3791 }
0x1929   :  { %v2146_v37 = vmul.f32 %v3792_v31, %v3788_v24  ;;  %v3220_v31 = vld [vmem:[%s4814_s20 + $0xc0] sm:$0xff] }
0x192c   :  { %v3794_v36 = vpop.eup %3793 }
0x192d   :  { %v2147_v38 = vmul.f32 %v3794_v36, %v3790_v26  ;;  %v3223_v26 = vld [vmem:[%s4814_s20 + $0xd8] sm:$0xff]  ;;  %v2411_v36 = vpack.c.bf16 %v3221_v35, %v3220_v31 }
0x192e   :  { %v2412_v27 = vpack.c.bf16 %v3223_v26, %v3222_v25  ;;  %v3253_v25 = vld [vmem:[%s4791_s6 + $0xe8] sm:$0xff] }
0x192f   :  { %v2148_v41 = vpack.c.bf16 %v2147_v38, %v2146_v37 }
0x1931   :  { %3656 = vmatmul.mubr.msk.bf16.vlgmr.msra.gmra.mxu0 %vm290_vm3, %v2148_v41 }
0x1932   :  { %3666 = vmatpush3.bf16.msra.mxu0 %v1908_v39  ;;  %3667 = vmatprep.mubr.msk.bf16.mxu0 %vm3813_vm0, %v3812_v0 }
0x1933   :  { %3679 = vmatprep.subr.bf16.mxu0 %v3812_v0 }
0x1939   :  { %3668 = vmatmul.mubr.msk.bf16.vlgmr.msra.gmra.mxu0 %vm242_vm2, %v1907_v63 }
0x193a   :  { %3683 = vmatprep.mubr.msk.bf16.mxu0 %vm3813_vm0, %v3812_v0  ;;  %3680 = vmatpush3.bf16.msra.mxu0 %v2412_v27 }
0x193b   :  { %3681 = vmatprep.subr.bf16.mxu0 %v3812_v0 }
0x193e   :  { %3682 = vmatpush3.bf16.msra.mxu0 %v2411_v36 }
0x193f   :  { %3695 = vmatprep.subr.bf16.mxu0 %v3812_v0 }
0x19f1   :  { %v2190_v45 = vpop.f32.mrf.mxu0 }
0x19f3   :  { %v3657_v47 = vpop.f32.mrf.mxu0 }
0x19f5   :  { %v2193_v48 = vpop.f32.mrf.mxu0 }
0x19f6   :  { %v2200_v50 = vpack.c.bf16 %v2193_v48, %v2190_v45  ;;  %v3211_v45 = vld [vmem:[%s4798_s12 + $0x3] ss:$0 sm:$0xff] }
0x19f7   :  { %v3658_v53 = vpop.f32.mrf.mxu0 }
0x19f8   :  { %3662 = vmatmul.mubr.msk.bf16.vlgmr.msra.gmra.mxu1 %vm242_vm2, %v2200_v50 }
0x19f9   :  { %v2283_v55 = vpop.f32.mrf.mxu0  ;;  %3672 = vmatpush3.bf16.msra.mxu1 %v2356_v49  ;;  %3675 = vmatprep.mubr.msk.bf16.mxu1 %vm3813_vm0, %v3812_v0 }
0x19fa   :  { %3673 = vmatprep.subr.bf16.mxu1 %v3812_v0 }
0x19fb   :  { %v3669_v57 = vpop.f32.mrf.mxu0 }
0x19fc   :  { %v3811_v57 = vld [vmem:[%s4797_s3 + $0x8] sm:$0xff] }
0x19fd   :  { %v2286_v58 = vpop.f32.mrf.mxu0  ;;  %3674 = vmatpush3.bf16.msra.mxu1 %v2355_v56 }
0x19fe   :  { %3687 = vmatprep.subr.bf16.mxu1 %v3812_v0 }
0x19ff   :  { %v3670_v59 = vpop.f32.mrf.mxu0 }
0x1a00   :  { %3676 = vmatmul.mubr.msk.bf16.vlgmr.msra.gmra.mxu1 %vm90_vm1, %v4443_v23 }
0x1a01   :  { %3691 = vmatprep.mubr.msk.bf16.mxu1 %vm3813_vm0, %v3812_v0 }
0x1ab8   :  { %v2239_v61 = vpop.f32.mrf.mxu1 }
0x1ab9   :  { %v2284_v60 = vadd.f32 %v2283_v55, %v2239_v61  ;;  %v3810_v55 = vld [vmem:[%s4797_s3] sm:$0xff] }
0x1aba   :  { %v3663_v63 = vpop.f32.mrf.mxu1 }
0x1abb   :  { %v2298_v1 = vadd.f32 %v3208_v62, %v2284_v60 }
0x1abc   :  { %v2242_v2 = vpop.f32.mrf.mxu1 }
0x1abd   :  { %v2287_v12 = vadd.f32 %v2286_v58, %v2242_v2  ;;  %v2300_v3 = vadd.f32 %v2298_v1, %v4130_v33  ;;  %v3225_v1 = vld [vmem:[%s4817_s8 + $0x6] ss:$0 sm:$0xff] }
0x1abe   :  { %v3664_v4 = vpop.f32.mrf.mxu1 }
0x1abf   :  { %v2299_v5 = vadd.f32 %v3208_v62, %v2287_v12  ;;  %v2306_v6 = vsel %vm90_vm1, %v2300_v3, 0.0  ;;  %v3232_v62 = vld [vmem:[%s4792_s9 + $0x6] ss:$0 sm:$0xff] }
0x1ac0   :  { %v4599_v7 = vpop.f32.mrf.mxu1  ;;  %2307 = vadd.xlane.f32.xlu0 %v2306_v6 }
0x1ac1   :  { %v2301_v8 = vadd.f32 %v2299_v5, %v4132_v34  ;;  %v3229_v34 = vld [vmem:[%s4791_s6 + $0xd0] sm:$0xff] }
0x1ac2   :  { %v3677_v9 = vpop.f32.mrf.mxu1  ;;  %v2472_v24 = vpack.c.bf16 %v3230_v22, %v3229_v34  ;;  %v3255_v34 = vld [vmem:[%s4791_s6 + $0xf8] sm:$0xff] }
0x1ac3   :  { %v2309_v10 = vsel %vm90_vm1, %v2301_v8, 0.0 }
0x1ac4   :  { %v2402_v40 = vpop.f32.mrf.mxu1  ;;  %2310 = vadd.xlane.f32.xlu1 %v2309_v10  ;;  %3688 = vmatpush3.bf16.msra.mxu1 %v2472_v24  ;;  %v3252_v24 = vld [vmem:[%s4791_s6 + $0xe0] sm:$0xff] }
0x1ac5   :  { %3689 = vmatprep.subr.bf16.mxu1 %v3812_v0  ;;  %v2751_v26 = vpack.c.bf16 %v3253_v25, %v3252_v24  ;;  %v3261_v25 = vld [vmem:[%s4793_s10 + $0x70] sm:$0xff] }
0x1ac6   :  { %v3678_v11 = vpop.f32.mrf.mxu1 }
0x1ac8   :  { %3690 = vmatpush3.bf16.msra.mxu1 %v2471_v32 }
0x1ac9   :  { %3701 = vmatprep.subr.bf16.mxu1 %v3812_v0 }
0x1b49   :  { %v2308_v13 = vpop.xlane.xlu0 %2307 }
0x1b4a   :  { %v2312_v15 = vmul.f32 0.03125, %v2308_v13  ;;  %v3218_v13 = vld [vmem:[%s4790_s7 + $0x6] ss:$0 sm:$0xff] }
0x1b4c   :  { %v2314_v54 = vsub.f32 %v2300_v3, %v2312_v15 }
0x1b4d   :  { %v2311_v16 = vpop.xlane.xlu1 %2310 }
0x1b4e   :  { %v2313_v33 = vmul.f32 0.03125, %v2311_v16  ;;  %v2316_v17 = vmul.f32 %v2314_v54, %v2314_v54  ;;  %v3240_v16 = vld [vmem:[%s4815_s23 + $0xf0] sm:$0xff] }
0x1b50   :  { %v2315_v18 = vsub.f32 %v2301_v8, %v2313_v33  ;;  %v2318_v19 = vsel %vm90_vm1, %v2316_v17, 0.0  ;;  %v3241_v33 = vld [vmem:[%s4815_s23 + $0xf8] sm:$0xff] }
0x1b51   :  { %2319 = vadd.xlane.f32.xlu0 %v2318_v19  ;;  %v2641_v17 = vpack.c.bf16 %v3241_v33, %v3240_v16  ;;  %v3238_v19 = vld [vmem:[%s4815_s23 + $0xe0] sm:$0xff] }
0x1b52   :  { %v2317_v20 = vmul.f32 %v2315_v18, %v2315_v18 }
0x1b54   :  { %v2321_v21 = vsel %vm90_vm1, %v2317_v20, 0.0 }
0x1b55   :  { %2322 = vadd.xlane.f32.xlu1 %v2321_v21  ;;  %v3254_v21 = vld [vmem:[%s4791_s6 + $0xf0] sm:$0xff] }
0x1b56   :  { %v2752_v22 = vpack.c.bf16 %v3255_v34, %v3254_v21 }
0x1bda   :  { %v2320_v37 = vpop.xlane.xlu0 %2319 }
0x1bdb   :  { %v2324_v38 = vmul.f32 0.03125, %v2320_v37 }
0x1bdd   :  { %v2326_v39 = vadd.f32 1e-05, %v2324_v38 }
0x1bde   :  { %v2323_v41 = vpop.xlane.xlu1 %2322 }
0x1bdf   :  { %3795 = vrsqrt.f32 %v2326_v39  ;;  %v2325_v42 = vmul.f32 0.03125, %v2323_v41  ;;  %v3257_v41 = vld [vmem:[%s4792_s9 + $0x7] ss:$0 sm:$0xff] }
0x1be1   :  { %v2327_v43 = vadd.f32 1e-05, %v2325_v42 }
0x1be3   :  { %3797 = vrsqrt.f32 %v2327_v43 }
0x1bec   :  { %v3796_v44 = vpop.eup %3795 }
0x1bed   :  { %v2330_v14 = vmul.f32 %v3796_v44, %v2314_v54  ;;  %v2400_v54 = vadd.f32 %v3218_v13, %v4599_v7  ;;  %v3239_v7 = vld [vmem:[%s4815_s23 + $0xe8] sm:$0xff] }
0x1bee   :  { %v2640_v20 = vpack.c.bf16 %v3239_v7, %v3238_v19 }
0x1bef   :  { %v2338_v47 = vmul.f32 %v3211_v45, %v2330_v14 }
0x1bf0   :  { %v3798_v48 = vpop.eup %3797 }
0x1bf1   :  { %v2331_v49 = vmul.f32 %v3798_v48, %v2315_v18  ;;  %v2346_v50 = vadd.f32 %v3212_v46, %v2338_v47  ;;  %v2525_v18 = vpack.c.bf16 %v2400_v54, %v2400_v54 }
0x1bf3   :  { %v2339_v51 = vmul.f32 %v3211_v45, %v2331_v49  ;;  %3040 = vst.msk [vmem:[%s4804_s19] sm:$0xff] %vm90_vm1, %v2346_v50  ;;  %v2348_v56 = vadd.f32 %v3810_v55, %v2346_v50  ;;  %v3248_v55 = vld [vmem:[%s4814_s20 + $0xf8] sm:$0xff] }
0x1bf5   :  { %v2347_v52 = vadd.f32 %v3212_v46, %v2339_v51 }
0x1bf7   :  { %v2470_v53 = vpack.c.bf16 %v2347_v52, %v2346_v50  ;;  %3041 = vst.msk [vmem:[%s4804_s19 + $0x8] sm:$0xff] %vm90_vm1, %v2347_v52  ;;  %v2349_v58 = vadd.f32 %v3811_v57, %v2347_v52 }
0x1bf9   :  { %3692 = vmatmul.mubr.msk.bf16.vlgmr.msra.gmra.mxu1 %vm90_vm1, %v2470_v53  ;;  %v4654_v59 = vpack.c.bf16 %v2349_v58, %v2348_v56 }
0x1bfa   :  { %3703 = vmatprep.mubr.msk.bf16.mxu1 %vm3813_vm0, %v3812_v0 }
0x1bfb   :  { %3684 = vmatmul.mubr.msk.bf16.vlgmr.msra.gmra.mxu0 %vm90_vm1, %v4654_v59 }
0x1bfc   :  { %3697 = vmatprep.mubr.msk.bf16.mxu0 %vm3813_vm0, %v3812_v0 }
0x1cb9   :  { %v2518_v61 = vpop.f32.mrf.mxu1 }
0x1cba   :  { %v2519_v3 = vadd.f32 %v3232_v62, %v2518_v61 }
0x1cbb   :  { %v2458_v60 = vpop.f32.mrf.mxu0  ;;  %v3693_v63 = vpop.f32.mrf.mxu1 }
0x1cbc   :  { %v2459_v8 = vadd.f32 %v3225_v1, %v2458_v60  ;;  %v3246_v60 = vld [vmem:[%s4814_s20 + $0xe8] sm:$0xff] }
0x1cbd   :  { %v3685_v2 = vpop.f32.mrf.mxu0  ;;  %v2521_v12 = vpop.f32.mrf.mxu1 }
0x1cbe   :  { %v2522_v4 = vadd.f32 %v3232_v62, %v2521_v12  ;;  %v3245_v62 = vld [vmem:[%s4814_s20 + $0xe0] sm:$0xff] }
0x1cbf   :  { %v2461_v5 = vpop.f32.mrf.mxu0  ;;  %v3694_v6 = vpop.f32.mrf.mxu1  ;;  %v2695_v63 = vpack.c.bf16 %v3246_v60, %v3245_v62 }
0x1cc0   :  { %v2586_v9 = vpack.c.bf16 %v2522_v4, %v2519_v3  ;;  %v2462_v10 = vadd.f32 %v3225_v1, %v2461_v5  ;;  %v3250_v5 = vld [vmem:[%s4817_s8 + $0x7] ss:$0 sm:$0xff] }
0x1cc1   :  { %v3686_v40 = vpop.f32.mrf.mxu0 }
0x1cc2   :  { %v2526_v11 = vpack.c.bf16 %v2462_v10, %v2459_v8  ;;  %3702 = vmatpush3.bf16.msra.mxu1 %v2586_v9 }
0x1cc3   :  { %3715 = vmatprep.subr.bf16.mxu1 %v3812_v0 }
0x1cc4   :  { %v2531_v15 = vsel %vm242_vm2, %v2526_v11, 0 }
0x1cc5   :  { %3696 = vmatpush3.bf16.xpose.msra.mxu0 %v2531_v15 }
0x1cc6   :  { %3707 = vmatprep.subr.bf16.mxu0 %v3812_v0 }
0x1ccc   :  { %3698 = vmatmul.mubr.msk.bf16.vlgmr.msra.gmra.mxu0 %vm242_vm2, %v2525_v18 }
0x1ccd   :  { %3708 = vmatpush3.bf16.msra.mxu0 %v2641_v17  ;;  %3711 = vmatprep.mubr.msk.bf16.mxu0 %vm3813_vm0, %v3812_v0 }
0x1cce   :  { %3709 = vmatprep.subr.bf16.mxu0 %v3812_v0 }
0x1cd1   :  { %3710 = vmatpush3.bf16.msra.mxu0 %v2640_v20 }
0x1cd2   :  { %3723 = vmatprep.subr.bf16.mxu0 %v3812_v0 }
0x1cd4   :  { %3712 = vmatmul.mubr.msk.bf16.vlgmr.msra.gmra.mxu0 %vm90_vm1, %v4443_v23 }
0x1cd5   :  { %3724 = vmatpush3.bf16.msra.mxu0 %v2752_v22  ;;  %3727 = vmatprep.mubr.msk.bf16.mxu0 %vm3813_vm0, %v3812_v0 }
0x1cd6   :  { %3725 = vmatprep.subr.bf16.mxu0 %v3812_v0 }
0x1cd9   :  { %3726 = vmatpush3.bf16.msra.mxu0 %v2751_v26  ;;  %v3262_v26 = vld [vmem:[%s4793_s10 + $0x78] sm:$0xff] }
0x1cda   :  { %3737 = vmatprep.subr.bf16.mxu0 %v3812_v0 }
0x1cdc   :  { %3728 = vmatmul.mubr.msk.bf16.vlgmr.msra.gmra.mxu0 %vm90_vm1, %v2470_v53  ;;  %v3247_v53 = vld [vmem:[%s4814_s20 + $0xf0] sm:$0xff] }
0x1cdd   :  { %3739 = vmatprep.mubr.msk.bf16.mxu0 %vm3813_vm0, %v3812_v0  ;;  %v2696_v58 = vpack.c.bf16 %v3248_v55, %v3247_v53 }
0x1d8c   :  { %v2567_v27 = vpop.f32.mrf.mxu0 }
0x1d8d   :  { %v2573_v28 = vmul.f32 0.25, %v2567_v27  ;;  %v2911_v27 = vpack.c.bf16 %v3262_v26, %v3261_v25 }
0x1d8e   :  { %v3699_v30 = vpop.f32.mrf.mxu0 }
0x1d8f   :  { %v2574_v23 = vsel %vm242_vm2, %v2573_v28, -inf  ;;  %v3236_v30 = vld [vmem:[%s4793_s10 + $0x60] sm:$0xff] }
0x1d90   :  { %2575 = vmax.xlane.f32.xlu0 %v2574_v23  ;;  %v2570_v31 = vpop.f32.mrf.mxu0  ;;  %v3237_v23 = vld [vmem:[%s4793_s10 + $0x68] sm:$0xff] }
0x1d92   :  { %v3700_v32 = vpop.f32.mrf.mxu0 }
0x1d94   :  { %v2684_v35 = vpop.f32.mrf.mxu0 }
0x1d96   :  { %v3713_v36 = vpop.f32.mrf.mxu0 }
0x1d98   :  { %v2687_v37 = vpop.f32.mrf.mxu0 }
0x1d9a   :  { %v3714_v38 = vpop.f32.mrf.mxu0 }
0x1d9c   :  { %v2795_v39 = vpop.f32.mrf.mxu0 }
0x1d9d   :  { %v2796_v44 = vadd.f32 %v3257_v41, %v2795_v39 }
0x1d9e   :  { %v3729_v42 = vpop.f32.mrf.mxu0 }
0x1da0   :  { %v2798_v43 = vpop.f32.mrf.mxu0 }
0x1da1   :  { %v2799_v45 = vadd.f32 %v3257_v41, %v2798_v43 }
0x1da2   :  { %v3730_v14 = vpop.f32.mrf.mxu0 }
0x1da3   :  { %v2863_v46 = vpack.c.bf16 %v2799_v45, %v2796_v44 }
0x1da5   :  { %3738 = vmatpush3.bf16.msra.mxu0 %v2863_v46 }
0x1da6   :  { %3749 = vmatprep.subr.bf16.mxu0 %v3812_v0 }
0x1e19   :  { %v2576_v47 = vpop.xlane.xlu0 %2575 }
0x1e1a   :  { %v2577_v48 = vsub.f32 %v2573_v28, %v2576_v47 }
0x1e1c   :  { %v2578_v49 = vmul.f32 1.442695, %v2577_v48  ;;  %v3266_v48 = vld [vmem:[%s4794_s11 + $0x3] ss:$0 sm:$0xff] }
0x1e1e   :  { %3799 = vpow2.f32 %v2578_v49 }
0x1e2b   :  { %v3800_v50 = vpop.eup %3799 }
0x1e2c   :  { %v2580_v51 = vsel %vm242_vm2, %v3800_v50, 0.0 }
0x1e2d   :  { %2581 = vadd.xlane.f32.xlu1 %v2580_v51 }
0x1eb6   :  { %v2582_v52 = vpop.xlane.xlu1 %2581 }
0x1eb7   :  { %3801 = vrcp.f32 %v2582_v52 }
0x1ec4   :  { %v3802_v56 = vpop.eup %3801 }
0x1ec5   :  { %v2584_v57 = vmul.f32 %v3802_v56, %v3800_v50 }
0x1ec7   :  { %v2585_v61 = vpack.c.bf16 %v2584_v57, %v2584_v57 }
0x1ec9   :  { %3704 = vmatmul.mubr.msk.bf16.vlgmr.msra.gmra.mxu1 %vm242_vm2, %v2585_v61 }
0x1eca   :  { %3716 = vmatpush3.bf16.msra.mxu1 %v2696_v58  ;;  %3719 = vmatprep.mubr.msk.bf16.mxu1 %vm3813_vm0, %v3812_v0 }
0x1ecb   :  { %3717 = vmatprep.subr.bf16.mxu1 %v3812_v0 }
0x1ece   :  { %3718 = vmatpush3.bf16.msra.mxu1 %v2695_v63 }
0x1ecf   :  { %3731 = vmatprep.subr.bf16.mxu1 %v3812_v0 }
0x1ed1   :  { %3720 = vmatmul.mubr.msk.bf16.vlgmr.msra.gmra.mxu1 %vm90_vm1, %v4654_v59  ;;  %v3243_v59 = vld [vmem:[%s4790_s7 + $0x7] ss:$0 sm:$0xff] }
0x1ed2   :  { %3733 = vmatprep.mubr.msk.bf16.mxu1 %vm3813_vm0, %v3812_v0  ;;  %v2685_v15 = vadd.f32 %v3243_v59, %v2684_v35  ;;  %v2634_v35 = vpack.c.bf16 %v3237_v23, %v3236_v30 }
0x1ed4   :  { %v2802_v54 = vpack.c.bf16 %v2685_v15, %v2685_v15 }
0x1f89   :  { %v2624_v1 = vpop.f32.mrf.mxu1 }
0x1f8a   :  { %v2633_v37 = vpack.c.bf16 %v2624_v1, %v2624_v1 }
0x1f8b   :  { %v3705_v2 = vpop.f32.mrf.mxu1 }
0x1f8d   :  { %v2627_v12 = vpop.f32.mrf.mxu1 }
0x1f8f   :  { %v3706_v3 = vpop.f32.mrf.mxu1 }
0x1f90   :  { %v3270_v3 = vld [vmem:[%s4799_s13 + $0x4] ss:$0 sm:$0xff] }
0x1f91   :  { %v2739_v4 = vpop.f32.mrf.mxu1 }
0x1f92   :  { %v2740_v9 = vadd.f32 %v3250_v5, %v2739_v4 }
0x1f93   :  { %v3721_v6 = vpop.f32.mrf.mxu1 }
0x1f95   :  { %v2742_v8 = vpop.f32.mrf.mxu1 }
0x1f96   :  { %v2743_v10 = vadd.f32 %v3250_v5, %v2742_v8 }
0x1f97   :  { %v3722_v40 = vpop.f32.mrf.mxu1 }
0x1f98   :  { %v2803_v11 = vpack.c.bf16 %v2743_v10, %v2740_v9 }
0x1f9a   :  { %v2808_v13 = vsel %vm242_vm2, %v2803_v11, 0 }
0x1f9b   :  { %3732 = vmatpush3.bf16.xpose.msra.mxu1 %v2808_v13 }
0x1f9c   :  { %3743 = vmatprep.subr.bf16.mxu1 %v3812_v0 }
0x1fa2   :  { %3734 = vmatmul.mubr.msk.bf16.vlgmr.msra.gmra.mxu1 %vm242_vm2, %v2802_v54 }
0x1fa3   :  { %3745 = vmatprep.mubr.msk.bf16.mxu1 %vm3813_vm0, %v3812_v0  ;;  %3744 = vmatpush3.bf16.msra.mxu1 %v2911_v27 }
0x2062   :  { %v2844_v16 = vpop.f32.mrf.mxu1 }
0x2063   :  { %v2850_v33 = vmul.f32 0.25, %v2844_v16 }
0x2064   :  { %v3735_v17 = vpop.f32.mrf.mxu1 }
0x2065   :  { %v2851_v18 = vsel %vm242_vm2, %v2850_v33, -inf }
0x2066   :  { %2852 = vmax.xlane.f32.xlu0 %v2851_v18  ;;  %v2847_v19 = vpop.f32.mrf.mxu1 }
0x2068   :  { %v3736_v7 = vpop.f32.mrf.mxu1 }
0x20ef   :  { %v2853_v20 = vpop.xlane.xlu0 %2852 }
0x20f0   :  { %v2854_v21 = vsub.f32 %v2850_v33, %v2853_v20 }
0x20f2   :  { %v2855_v34 = vmul.f32 1.442695, %v2854_v21 }
0x20f4   :  { %3803 = vpow2.f32 %v2855_v34 }
0x2101   :  { %v3804_v22 = vpop.eup %3803 }
0x2102   :  { %v2857_v24 = vsel %vm242_vm2, %v3804_v22, 0.0 }
0x2103   :  { %2858 = vadd.xlane.f32.xlu1 %v2857_v24 }
0x218c   :  { %v2859_v28 = vpop.xlane.xlu1 %2858 }
0x218d   :  { %3805 = vrcp.f32 %v2859_v28 }
0x219a   :  { %v3806_v31 = vpop.eup %3805 }
0x219b   :  { %v2861_v32 = vmul.f32 %v3806_v31, %v3804_v22 }
0x219d   :  { %v2862_v36 = vpack.c.bf16 %v2861_v32, %v2861_v32 }
0x219f   :  { %3740 = vmatmul.mubr.msk.bf16.vlgmr.msra.gmra.mxu0 %vm242_vm2, %v2862_v36 }
0x21a0   :  { %3750 = vmatpush3.bf16.msra.mxu0 %v2634_v35  ;;  %3751 = vmatprep.mubr.msk.bf16.mxu0 %vm3813_vm0, %v3812_v0 }
0x21a7   :  { %3752 = vmatmul.mubr.msk.bf16.vlgmr.msra.gmra.mxu0 %vm242_vm2, %v2633_v37 }
0x225f   :  { %v2901_v38 = vpop.f32.mrf.mxu0 }
0x2260   :  { %v2910_v39 = vpack.c.bf16 %v2901_v38, %v2901_v38 }
0x2261   :  { %v3741_v41 = vpop.f32.mrf.mxu0 }
0x2262   :  { %3746 = vmatmul.mubr.msk.bf16.vlgmr.msra.gmra.mxu1 %vm242_vm2, %v2910_v39 }
0x2263   :  { %v2904_v42 = vpop.f32.mrf.mxu0 }
0x2265   :  { %v3742_v43 = vpop.f32.mrf.mxu0 }
0x2267   :  { %v2992_v44 = vpop.f32.mrf.mxu0 }
0x2269   :  { %v3753_v45 = vpop.f32.mrf.mxu0 }
0x226b   :  { %v2995_v14 = vpop.f32.mrf.mxu0 }
0x226d   :  { %v3754_v46 = vpop.f32.mrf.mxu0 }
0x2322   :  { %v2949_v47 = vpop.f32.mrf.mxu1 }
0x2323   :  { %v2993_v0 = vadd.f32 %v2992_v44, %v2949_v47 }
0x2324   :  { %v3747_v49 = vpop.f32.mrf.mxu1 }
0x2325   :  { %v3006_v50 = vadd.f32 %v3266_v48, %v2993_v0 }
0x2326   :  { %v2952_v51 = vpop.f32.mrf.mxu1 }
0x2327   :  { %v3007_v52 = vadd.f32 %v3006_v50, %v4434_v29  ;;  %v3269_v29 = vld [vmem:[%s4798_s12 + $0x4] ss:$0 sm:$0xff] }
0x2328   :  { %v3748_v53 = vpop.f32.mrf.mxu1 }
0x2329   :  { %v3012_v55 = vsel %vm90_vm1, %v3007_v52, 0.0 }
0x232a   :  { %3013 = vadd.xlane.f32.xlu0 %v3012_v55 }
0x23b3   :  { %v3014_v56 = vpop.xlane.xlu0 %3013 }
0x23b4   :  { %v3015_v57 = vmul.f32 0.03125, %v3014_v56 }
0x23b6   :  { %v3016_v58 = vsub.f32 %v3007_v52, %v3015_v57 }
0x23b8   :  { %v3017_v61 = vmul.f32 %v3016_v58, %v3016_v58 }
0x23ba   :  { %v3018_v62 = vsel %vm90_vm1, %v3017_v61, 0.0 }
0x23bb   :  { %3019 = vadd.xlane.f32.xlu1 %v3018_v62 }
0x2444   :  { %v3020_v60 = vpop.xlane.xlu1 %3019 }
0x2445   :  { %v3021_v63 = vmul.f32 0.03125, %v3020_v60 }
0x2447   :  { %v3022_v1 = vadd.f32 1e-05, %v3021_v63 }
0x2449   :  { %3807 = vrsqrt.f32 %v3022_v1 }
0x2456   :  { %v3808_v2 = vpop.eup %3807 }
0x2457   :  { %v3024_v12 = vmul.f32 %v3808_v2, %v3016_v58 }
0x2459   :  { %v3031_v4 = vmul.f32 %v3269_v29, %v3024_v12 }
0x245b   :  { %v3038_v5 = vadd.f32 %v3270_v3, %v3031_v4 }
0x245d   :  { %3039 = vst.msk [vmem:[%s4805_s18] sm:$0xff] %vm90_vm1, %v3038_v5 }

</bundles_post_ra>
